<compile_context>
chip_gen: v5e
topology: v5e:2x2
jax: 0.10.0
libtpu: 0.0.40
codegen_flags: <defaults>
</compile_context>

<pallas_src>
import functools

import numpy as np
import jax
import jax.numpy as jnp
from jax import lax
from jax.experimental import pallas as pl
from jax.experimental.pallas import tpu as pltpu

_VMEM = pl.BlockSpec(memory_space=pltpu.MemorySpace.VMEM)
_BN_EPS = 1e-5


# --------------------------------------------------------------------------------------
# Host-side parameter preparation (done once): lower every conv / conv-transpose into a
# dense matrix acting on NCHW-flattened activations, and pack everything into a few slabs.
# --------------------------------------------------------------------------------------

def _enc_conv_matrix(w, h_in, w_in):
    """ReplicationPad2d(K//2) + Conv2d(K, stride=2, bias=False) as one dense matrix."""
    w = np.asarray(w, np.float32)                    # (C_out, C_in, K, K) torch layout
    c_out, c_in, k, _ = w.shape
    pad = k // 2
    h_out, w_out = h_in // 2, w_in // 2
    th = np.zeros((k, h_out, h_in), np.float32)      # th[ki, ho, h] = [h == clamp(2*ho+ki-pad)]
    tw = np.zeros((k, w_out, w_in), np.float32)
    for ki in range(k):
        for ho in range(h_out):
            th[ki, ho, min(max(2 * ho + ki - pad, 0), h_in - 1)] = 1.0
        for wo in range(w_out):
            tw[ki, wo, min(max(2 * wo + ki - pad, 0), w_in - 1)] = 1.0
    m = np.einsum("ocij,iyh,jxw->chwoyx", w, th, tw)
    return m.reshape(c_in * h_in * w_in, c_out * h_out * w_out)


def _dec_convt_matrix(w, h_in, w_in):
    """ConvTranspose2d(K=3, stride=2, padding=1, output_padding=1) as one dense matrix."""
    w = np.asarray(w, np.float32)                    # (C_in, C_out, K, K) torch layout
    c_in, c_out, k, _ = w.shape
    h_out, w_out = 2 * h_in, 2 * w_in
    th = np.zeros((k, h_out, h_in), np.float32)      # output row a receives x row h iff a == 2h+ki-1
    tw = np.zeros((k, w_out, w_in), np.float32)
    for ki in range(k):
        for h in range(h_in):
            a = 2 * h + ki - 1
            if 0 <= a < h_out:
                th[ki, a, h] = 1.0
        for x in range(w_in):
            b = 2 * x + ki - 1
            if 0 <= b < w_out:
                tw[ki, b, x] = 1.0
    m = np.einsum("coij,iah,jbw->chwoab", w, th, tw)
    return m.reshape(c_in * h_in * w_in, c_out * h_out * w_out)


def _e_mat(c, p):
    """Per-channel broadcast matrix E (C -> C*P lanes); R = E.T reduces lanes -> channels."""
    return np.kron(np.eye(c, dtype=np.float32), np.ones((1, p), np.float32))


def prepare_params(params, width):
    """Pre-lower torch-layout parameters into a few packed, lane-dense bf16 slabs."""
    assert width == 16, "slab row offsets in the kernel are specialised to width=16"
    w = width

    m_enc1 = _enc_conv_matrix(params["enc1_w"], w, w)            # (768, 512)
    m_enc2 = _enc_conv_matrix(params["enc2_w"], w // 2, w // 2)  # (512, 256)
    m_enc3 = _enc_conv_matrix(params["enc3_w"], w // 4, w // 4)  # (256, 128)
    m_enc4 = _enc_conv_matrix(params["enc4_w"], w // 8, w // 8)  # (128, 64)
    m_dec1 = _dec_convt_matrix(params["dec1_w"], 1, 1)           # (16, 128)
    m_dec2 = _dec_convt_matrix(params["dec2_w"], 2, 2)           # (128, 256)
    m_dec3 = _dec_convt_matrix(params["dec3_w"], 4, 4)           # (256, 512)
    m_dec4 = _dec_convt_matrix(params["dec4_w"], 8, 8)           # (512, 768)

    # BN broadcast/reduce matrices (shared by encoder & decoder blocks with equal C).
    e8, e16, e32 = _e_mat(8, 64), _e_mat(16, 16), _e_mat(32, 4)  # (8,512) (16,256) (32,128)

    # ---- lane-width-grouped bf16 slabs: a few big DMAs instead of ~40 small ones ----
    w512 = np.concatenate([m_enc1, m_dec3, e8], axis=0)              # (1032, 512)
    w256 = np.concatenate([m_enc2, m_dec2, e16], axis=0)             # (656, 256)
    m_dec1_stacked = np.concatenate([m_dec1, m_dec1], axis=0)        # (32, 128): [mu|sigma*eps] path
    w128 = np.concatenate([m_enc3, m_dec1_stacked, e32], axis=0)     # (320, 128)
    bias_row = np.repeat(np.asarray(params["dec4_bias"], np.float32), w * w)[None, :]
    w768 = np.concatenate([m_dec4, bias_row,
                           np.zeros((7, 3 * w * w), np.float32)], axis=0)   # (520, 768)

    # Channel-reduction matrices R = E.T, packed into one narrow slab.
    rslab = np.zeros((896, 32), np.float32)
    rslab[0:512, 0:8] = e8.T
    rslab[512:768, 0:16] = e16.T
    rslab[768:896, 0:32] = e32.T

    # Fused head: torch Linear y = x @ W^T, chunk(dim=1) -> [mu | raw-sigma] columns.
    whd = np.ascontiguousarray(np.asarray(params["comp_w"], np.float32).T)  # (4w, 2w)

    # Small per-channel vectors (gamma/beta per BN block), one padded 128-lane row each (f32).
    vecs = np.zeros((16, 128), np.float32)
    for i, (name, c) in enumerate([("enc1", 8), ("enc2", 16), ("enc3", 32), ("enc4", 4 * w),
                                   ("dec1", 32), ("dec2", 16), ("dec3", 8)]):
        vecs[2 * i, :c] = np.asarray(params[name + "_g"], np.float32)
        vecs[2 * i + 1, :c] = np.asarray(params[name + "_b"], np.float32)

    bf = lambda a: jnp.asarray(a, jnp.bfloat16)
    return {
        "w512": bf(w512), "w256": bf(w256), "w128": bf(w128), "w768": bf(w768),
        "we4": bf(m_enc4), "whd": bf(whd), "rslab": bf(rslab),
        "vecs": jnp.asarray(vecs, jnp.float32),
    }


# --------------------------------------------------------------------------------------
# Fused forward kernel (single launch, everything VMEM-resident)
# --------------------------------------------------------------------------------------

def _bn2d_relu(y, e, r, gamma, beta):
    """Training-mode BatchNorm2d + ReLU with exactly two tiny matmuls.

    y:     (N, L) f32 NCHW-flat activations, L = C*P
    e:     (C, L) f32 0/1 broadcast matrix
    r:     (L, C) f32 0/1 reduce matrix (= e.T)
    gamma, beta: (1, C) f32 affine parameters
    """
    n, l = y.shape
    c = e.shape[0]
    inv_count = 1.0 / (n * (l // c))
    s1 = jnp.sum(y, axis=0, keepdims=True)                       # (1, L)
    s2 = jnp.sum(y * y, axis=0, keepdims=True)                   # (1, L)
    stats = jnp.concatenate([s1, s2], axis=0)                    # (2, L)
    st_c = jnp.dot(stats, r, preferred_element_type=jnp.float32) * inv_count   # (2, C)
    mean_c = st_c[0:1, :]
    var_c = jnp.maximum(st_c[1:2, :] - mean_c * mean_c, 0.0)     # biased variance (guarded)
    a_c = gamma * lax.rsqrt(var_c + _BN_EPS)
    b_c = beta - a_c * mean_c
    ab_l = jnp.dot(jnp.concatenate([a_c, b_c], axis=0), e,
                   preferred_element_type=jnp.float32)           # (2, L): scale | shift
    return jnp.maximum(y * ab_l[0:1, :] + ab_l[1:2, :], 0.0)


def _conv_bn_relu(h, m_bf16, e_bf16, r_bf16, gamma, beta):
    """One encoder/decoder block: dense (bf16) conv matmul + train-mode BN2d + ReLU."""
    y = jnp.dot(h.astype(jnp.bfloat16), m_bf16, preferred_element_type=jnp.float32)
    return _bn2d_relu(y, e_bf16.astype(jnp.float32), r_bf16.astype(jnp.float32), gamma, beta)


def _vae_fwd_kernel(x_ref, eps2_ref, w512_ref, w256_ref, w128_ref, we4_ref,
                    whd_ref, r_ref, vecs_ref, w768_hbm, ms_ref, recon_ref,
                    w768_vmem, dma_sem):
    # Start the decoder-output weight DMA (largest single weight) immediately so it
    # overlaps the whole encoder + decoder-body compute; wait just before it is needed.
    dec4_copy = pltpu.make_async_copy(w768_hbm, w768_vmem, dma_sem.at[0])
    dec4_copy.start()

    f32, bf16 = jnp.float32, jnp.bfloat16
    width = whd_ref.shape[1] // 2

    # ---------------------------------- encoder ----------------------------------
    h = x_ref[...]                                                     # (N, 3*16*16) = (N, 768)
    h = _conv_bn_relu(h, w512_ref[0:768, :],                           # enc1 conv matrix
                      w512_ref[1024:1032, :], r_ref[0:512, 0:8],       # E8 / R8
                      vecs_ref[0:1, 0:8], vecs_ref[1:2, 0:8])          # -> (N, 512)
    h = _conv_bn_relu(h, w256_ref[0:512, :],
                      w256_ref[640:656, :], r_ref[512:768, 0:16],
                      vecs_ref[2:3, 0:16], vecs_ref[3:4, 0:16])        # -> (N, 256)
    h = _conv_bn_relu(h, w128_ref[0:256, :],
                      w128_ref[288:320, :], r_ref[768:896, 0:32],
                      vecs_ref[4:5, 0:32], vecs_ref[5:6, 0:32])        # -> (N, 128)
    # encoder output block: 1x1 conv (stride 2) -> squeeze -> BatchNorm1d -> ReLU
    y = jnp.dot(h.astype(bf16), we4_ref[...], preferred_element_type=f32)   # (N, 4*width)
    mean = jnp.mean(y, axis=0, keepdims=True)
    var = jnp.mean(jnp.square(y - mean), axis=0, keepdims=True)
    h = (y - mean) * lax.rsqrt(var + _BN_EPS) * vecs_ref[6:7, 0:4 * width] \
        + vecs_ref[7:8, 0:4 * width]
    h = jnp.maximum(h, 0.0)
    # fused VAE head: single matmul -> [mu | s];  sigma = exp(softplus(s)) = 1 + exp(s)
    ho = jnp.dot(h.astype(bf16), whd_ref[...], preferred_element_type=f32)  # (N, 2*width)
    col = lax.broadcasted_iota(jnp.int32, ho.shape, 1)
    ms = jnp.where(col < width, ho, 1.0 + jnp.exp(ho))                 # [mu | sigma]
    ms_ref[...] = ms
    # ------------------------------ reparameterise --------------------------------
    # eps2 = [1 | eps]  =>  t = [mu | sigma*eps];  t @ [M_dec1; M_dec1] == (mu+sigma*eps) @ M_dec1
    t = ms * eps2_ref[...]

    # ---------------------------------- decoder -----------------------------------
    d = _conv_bn_relu(t, w128_ref[256:288, :],                         # stacked dec1 matrix
                      w128_ref[288:320, :], r_ref[768:896, 0:32],
                      vecs_ref[8:9, 0:32], vecs_ref[9:10, 0:32])       # -> (N, 128)
    d = _conv_bn_relu(d, w256_ref[512:640, :],
                      w256_ref[640:656, :], r_ref[512:768, 0:16],
                      vecs_ref[10:11, 0:16], vecs_ref[11:12, 0:16])    # -> (N, 256)
    d = _conv_bn_relu(d, w512_ref[768:1024, :],
                      w512_ref[1024:1032, :], r_ref[0:512, 0:8],
                      vecs_ref[12:13, 0:8], vecs_ref[13:14, 0:8])      # -> (N, 512)
    # decoder output block: ConvTranspose + bias + sigmoid (weights arrive via manual DMA)
    dec4_copy.wait()
    yo = jnp.dot(d.astype(bf16), w768_vmem[0:512, :], preferred_element_type=f32)
    yo = yo + w768_vmem[512:513, :].astype(f32)
    recon_ref[...] = 1.0 / (1.0 + jnp.exp(-yo))                        # (N, 768), NCHW-flat


def vae_forward(x_nchw, eps, ops, *, width):
    n = x_nchw.shape[0]
    x_flat = x_nchw.reshape(n, -1).astype(jnp.float32)        # NCHW-flat, pixel-fastest lanes
    eps2 = jnp.concatenate([jnp.ones_like(eps), eps], axis=1).astype(jnp.float32)  # (N, 2w)
    ms, recon_flat = pl.pallas_call(
        _vae_fwd_kernel,
        out_shape=(jax.ShapeDtypeStruct((n, 2 * width), jnp.float32),         # [mu | sigma]
                   jax.ShapeDtypeStruct((n, x_flat.shape[1]), jnp.float32)),  # reconstruction
        in_specs=[_VMEM] * 9 + [pl.BlockSpec(memory_space=pl.ANY)],
        out_specs=(_VMEM, _VMEM),
        scratch_shapes=[pltpu.VMEM((520, 3 * width * width), jnp.bfloat16),   # dec4 weight buffer
                        pltpu.SemaphoreType.DMA((1,))],
    )(x_flat, eps2, ops["w512"], ops["w256"], ops["w128"], ops["we4"],
      ops["whd"], ops["rslab"], ops["vecs"], ops["w768"])
    mu, sigma = ms[:, :width], ms[:, width:]
    recon = recon_flat.reshape(x_nchw.shape)                  # already NCHW order -> free reshape
    return mu, sigma, recon


# --------------------------------------------------------------------------------------
# Deterministic example parameters / inputs
# --------------------------------------------------------------------------------------

def init_params(key, width=16):
    ks = jax.random.split(key, 10)

    def w(k, shape, scale=0.1):
        return scale * jax.random.normal(k, shape, dtype=jnp.float32)

    p = {}
    # Encoder conv weights (torch Conv2d layout: C_out, C_in, K, K), bias=False
    p["enc1_w"] = w(ks[0], (8, 3, 3, 3))
    p["enc2_w"] = w(ks[1], (16, 8, 3, 3))
    p["enc3_w"] = w(ks[2], (32, 16, 3, 3))
    p["enc4_w"] = w(ks[3], (4 * width, 32, 1, 1))
    # Compressor Linear(4*width -> 2*width), torch layout (out, in), bias=False
    p["comp_w"] = w(ks[4], (2 * width, 4 * width))
    # Decoder ConvTranspose2d weights (torch layout: C_in, C_out, K, K)
    p["dec1_w"] = w(ks[5], (width, 32, 3, 3))
    p["dec2_w"] = w(ks[6], (32, 16, 3, 3))
    p["dec3_w"] = w(ks[7], (16, 8, 3, 3))
    p["dec4_w"] = w(ks[8], (8, 3, 3, 3))
    p["dec4_bias"] = w(ks[9], (3,))
    # BatchNorm affine params at torch defaults (weight=1, bias=0)
    for name, c in [("enc1", 8), ("enc2", 16), ("enc3", 32), ("enc4", 4 * width),
                    ("dec1", 32), ("dec2", 16), ("dec3", 8)]:
        p[name + "_g"] = jnp.ones((c,), jnp.float32)
        p[name + "_b"] = jnp.zeros((c,), jnp.float32)
    return p


if __name__ == "__main__":
    width = 16
    key = jax.random.PRNGKey(0)
    k_param, k_input, k_noise = jax.random.split(key, 3)

    params = init_params(k_param, width)
    ops = prepare_params(params, width)      # host-side pre-lowering / packing, done once
    x = jax.random.uniform(k_input, (2, 3, width, width), dtype=jnp.float32)
    eps = jax.random.normal(k_noise, (2, width), dtype=jnp.float32)

    fwd = jax.jit(functools.partial(vae_forward, width=width))
    mu, sigma, recon = fwd(x, eps, ops)
    jax.block_until_ready((mu, sigma, recon))

    assert mu.shape == (2, width)
    assert sigma.shape == (2, width)
    assert recon.shape == (2, 3, width, width)
    assert bool(jnp.all(jnp.isfinite(mu)))
    assert bool(jnp.all(sigma > 0))
    assert bool(jnp.all((recon >= 0) & (recon <= 1)))
    print("KERNEL_OK")
</pallas_src>

<mosaic_0001>
module attributes {stable_mosaic.version = 11 : i64} {
  func.func @_vae_fwd_kernel(%arg0: memref<2x768xf32, #tpu.memory_space<vmem>>, %arg1: memref<2x32xf32, #tpu.memory_space<vmem>>, %arg2: memref<1032x512xbf16, #tpu.memory_space<vmem>>, %arg3: memref<656x256xbf16, #tpu.memory_space<vmem>>, %arg4: memref<320x128xbf16, #tpu.memory_space<vmem>>, %arg5: memref<128x64xbf16, #tpu.memory_space<vmem>>, %arg6: memref<64x32xbf16, #tpu.memory_space<vmem>>, %arg7: memref<896x32xbf16, #tpu.memory_space<vmem>>, %arg8: memref<16x128xf32, #tpu.memory_space<vmem>>, %arg9: memref<520x768xbf16, #tpu.memory_space<any>>, %arg10: memref<2x32xf32, #tpu.memory_space<vmem>>, %arg11: memref<2x768xf32, #tpu.memory_space<vmem>>, %arg12: memref<520x768xbf16, #tpu.memory_space<vmem>>, %arg13: memref<1x!tpu.dma_semaphore, #tpu.memory_space<semaphore_mem>>) attributes {dimension_semantics = [], scalar_prefetch = 0 : i64, scratch_operands = 2 : i64, tpu.core_type = #tpu.core_type<tc>} {
    %c0_i32 = arith.constant 0 : i32
    %0 = tpu.memref_slice %arg13[%c0_i32] : memref<1x!tpu.dma_semaphore, #tpu.memory_space<semaphore_mem>> -> memref<1x!tpu.dma_semaphore, #tpu.memory_space<semaphore_mem>>
    %1 = tpu.memref_squeeze %0 : memref<1x!tpu.dma_semaphore, #tpu.memory_space<semaphore_mem>> -> memref<!tpu.dma_semaphore, #tpu.memory_space<semaphore_mem>>
    tpu.enqueue_dma source(%arg9 : memref<520x768xbf16, #tpu.memory_space<any>>) target(%arg12 : memref<520x768xbf16, #tpu.memory_space<vmem>>) target_semaphore(%1 : memref<!tpu.dma_semaphore, #tpu.memory_space<semaphore_mem>>)
    %c0 = arith.constant 0 : index
    %c0_0 = arith.constant 0 : index
    %2 = vector.load %arg0[%c0, %c0_0] : memref<2x768xf32, #tpu.memory_space<vmem>>, vector<2x768xf32>
    %c0_1 = arith.constant 0 : index
    %c0_2 = arith.constant 0 : index
    %3 = vector.load %arg2[%c0_1, %c0_2] : memref<1032x512xbf16, #tpu.memory_space<vmem>>, vector<768x512xbf16>
    %c1024 = arith.constant 1024 : index
    %c0_3 = arith.constant 0 : index
    %4 = vector.load %arg2[%c1024, %c0_3] : memref<1032x512xbf16, #tpu.memory_space<vmem>>, vector<8x512xbf16>
    %c0_4 = arith.constant 0 : index
    %c0_5 = arith.constant 0 : index
    %5 = vector.load %arg7[%c0_4, %c0_5] : memref<896x32xbf16, #tpu.memory_space<vmem>>, vector<512x8xbf16>
    %c0_6 = arith.constant 0 : index
    %c0_7 = arith.constant 0 : index
    %6 = vector.load %arg8[%c0_6, %c0_7] : memref<16x128xf32, #tpu.memory_space<vmem>>, vector<1x8xf32>
    %c1 = arith.constant 1 : index
    %c0_8 = arith.constant 0 : index
    %7 = vector.load %arg8[%c1, %c0_8] : memref<16x128xf32, #tpu.memory_space<vmem>>, vector<1x8xf32>
    %8 = arith.truncf %2 : vector<2x768xf32> to vector<2x768xbf16>
    %cst = arith.constant dense<0.000000e+00> : vector<2x512xf32>
    %9 = tpu.matmul %8, %3, %cst {dimension_numbers = #tpu.dot_dimension_numbers<[1], [0], [0], [1], [0, 0, 1, 1], [], []>} : vector<2x768xbf16>, vector<768x512xbf16>, vector<2x512xf32> -> vector<2x512xf32>
    %10 = arith.extf %4 : vector<8x512xbf16> to vector<8x512xf32>
    %11 = arith.extf %5 : vector<512x8xbf16> to vector<512x8xf32>
    %cst_9 = arith.constant dense<0.000000e+00> : vector<512xf32>
    %12 = vector.multi_reduction <add>, %9, %cst_9 [0] : vector<2x512xf32> to vector<512xf32>
    %13 = vector.shape_cast %12 : vector<512xf32> to vector<1x512xf32>
    %14 = arith.mulf %9, %9 : vector<2x512xf32>
    %cst_10 = arith.constant dense<0.000000e+00> : vector<512xf32>
    %15 = vector.multi_reduction <add>, %14, %cst_10 [0] : vector<2x512xf32> to vector<512xf32>
    %16 = vector.shape_cast %15 : vector<512xf32> to vector<1x512xf32>
    %17 = tpu.concatenate %13, %16 in 0 : vector<1x512xf32>, vector<1x512xf32> -> vector<2x512xf32>
    %cst_11 = arith.constant dense<0.000000e+00> : vector<2x8xf32>
    %18 = tpu.matmul %17, %11, %cst_11 {dimension_numbers = #tpu.dot_dimension_numbers<[1], [0], [0], [1], [0, 0, 1, 1], [], []>} : vector<2x512xf32>, vector<512x8xf32>, vector<2x8xf32> -> vector<2x8xf32>
    %cst_12 = arith.constant 7.812500e-03 : f32
    %19 = vector.broadcast %cst_12 : f32 to vector<2x8xf32>
    %20 = arith.mulf %18, %19 : vector<2x8xf32>
    %21 = vector.extract_strided_slice %20 {offsets = [0, 0], sizes = [1, 8], strides = [1, 1]} : vector<2x8xf32> to vector<1x8xf32>
    %22 = vector.extract_strided_slice %20 {offsets = [1, 0], sizes = [1, 8], strides = [1, 1]} : vector<2x8xf32> to vector<1x8xf32>
    %23 = arith.mulf %21, %21 : vector<1x8xf32>
    %24 = arith.subf %22, %23 : vector<1x8xf32>
    %cst_13 = arith.constant 0.000000e+00 : f32
    %25 = vector.broadcast %cst_13 : f32 to vector<1x8xf32>
    %26 = arith.maximumf %24, %25 : vector<1x8xf32>
    %cst_14 = arith.constant 9.99999974E-6 : f32
    %27 = vector.broadcast %cst_14 : f32 to vector<1x8xf32>
    %28 = arith.addf %26, %27 : vector<1x8xf32>
    %29 = math.rsqrt %28 : vector<1x8xf32>
    %30 = arith.mulf %6, %29 : vector<1x8xf32>
    %31 = arith.mulf %30, %21 : vector<1x8xf32>
    %32 = arith.subf %7, %31 : vector<1x8xf32>
    %33 = tpu.concatenate %30, %32 in 0 : vector<1x8xf32>, vector<1x8xf32> -> vector<2x8xf32>
    %cst_15 = arith.constant dense<0.000000e+00> : vector<2x512xf32>
    %34 = tpu.matmul %33, %10, %cst_15 {dimension_numbers = #tpu.dot_dimension_numbers<[1], [0], [0], [1], [0, 0, 1, 1], [], []>} : vector<2x8xf32>, vector<8x512xf32>, vector<2x512xf32> -> vector<2x512xf32>
    %35 = vector.extract_strided_slice %34 {offsets = [0, 0], sizes = [1, 512], strides = [1, 1]} : vector<2x512xf32> to vector<1x512xf32>
    %36 = vector.broadcast %35 : vector<1x512xf32> to vector<2x512xf32>
    %37 = arith.mulf %9, %36 : vector<2x512xf32>
    %38 = vector.extract_strided_slice %34 {offsets = [1, 0], sizes = [1, 512], strides = [1, 1]} : vector<2x512xf32> to vector<1x512xf32>
    %39 = vector.broadcast %38 : vector<1x512xf32> to vector<2x512xf32>
    %40 = arith.addf %37, %39 : vector<2x512xf32>
    %cst_16 = arith.constant 0.000000e+00 : f32
    %41 = vector.broadcast %cst_16 : f32 to vector<2x512xf32>
    %42 = arith.maximumf %40, %41 : vector<2x512xf32>
    %c0_17 = arith.constant 0 : index
    %c0_18 = arith.constant 0 : index
    %43 = vector.load %arg3[%c0_17, %c0_18] : memref<656x256xbf16, #tpu.memory_space<vmem>>, vector<512x256xbf16>
    %c640 = arith.constant 640 : index
    %c0_19 = arith.constant 0 : index
    %44 = vector.load %arg3[%c640, %c0_19] : memref<656x256xbf16, #tpu.memory_space<vmem>>, vector<16x256xbf16>
    %c512 = arith.constant 512 : index
    %c0_20 = arith.constant 0 : index
    %45 = vector.load %arg7[%c512, %c0_20] : memref<896x32xbf16, #tpu.memory_space<vmem>>, vector<256x16xbf16>
    %c2 = arith.constant 2 : index
    %c0_21 = arith.constant 0 : index
    %46 = vector.load %arg8[%c2, %c0_21] : memref<16x128xf32, #tpu.memory_space<vmem>>, vector<1x16xf32>
    %c3 = arith.constant 3 : index
    %c0_22 = arith.constant 0 : index
    %47 = vector.load %arg8[%c3, %c0_22] : memref<16x128xf32, #tpu.memory_space<vmem>>, vector<1x16xf32>
    %48 = arith.truncf %42 : vector<2x512xf32> to vector<2x512xbf16>
    %cst_23 = arith.constant dense<0.000000e+00> : vector<2x256xf32>
    %49 = tpu.matmul %48, %43, %cst_23 {dimension_numbers = #tpu.dot_dimension_numbers<[1], [0], [0], [1], [0, 0, 1, 1], [], []>} : vector<2x512xbf16>, vector<512x256xbf16>, vector<2x256xf32> -> vector<2x256xf32>
    %50 = arith.extf %44 : vector<16x256xbf16> to vector<16x256xf32>
    %51 = arith.extf %45 : vector<256x16xbf16> to vector<256x16xf32>
    %cst_24 = arith.constant dense<0.000000e+00> : vector<256xf32>
    %52 = vector.multi_reduction <add>, %49, %cst_24 [0] : vector<2x256xf32> to vector<256xf32>
    %53 = vector.shape_cast %52 : vector<256xf32> to vector<1x256xf32>
    %54 = arith.mulf %49, %49 : vector<2x256xf32>
    %cst_25 = arith.constant dense<0.000000e+00> : vector<256xf32>
    %55 = vector.multi_reduction <add>, %54, %cst_25 [0] : vector<2x256xf32> to vector<256xf32>
    %56 = vector.shape_cast %55 : vector<256xf32> to vector<1x256xf32>
    %57 = tpu.concatenate %53, %56 in 0 : vector<1x256xf32>, vector<1x256xf32> -> vector<2x256xf32>
    %cst_26 = arith.constant dense<0.000000e+00> : vector<2x16xf32>
    %58 = tpu.matmul %57, %51, %cst_26 {dimension_numbers = #tpu.dot_dimension_numbers<[1], [0], [0], [1], [0, 0, 1, 1], [], []>} : vector<2x256xf32>, vector<256x16xf32>, vector<2x16xf32> -> vector<2x16xf32>
    %cst_27 = arith.constant 3.125000e-02 : f32
    %59 = vector.broadcast %cst_27 : f32 to vector<2x16xf32>
    %60 = arith.mulf %58, %59 : vector<2x16xf32>
    %61 = vector.extract_strided_slice %60 {offsets = [0, 0], sizes = [1, 16], strides = [1, 1]} : vector<2x16xf32> to vector<1x16xf32>
    %62 = vector.extract_strided_slice %60 {offsets = [1, 0], sizes = [1, 16], strides = [1, 1]} : vector<2x16xf32> to vector<1x16xf32>
    %63 = arith.mulf %61, %61 : vector<1x16xf32>
    %64 = arith.subf %62, %63 : vector<1x16xf32>
    %cst_28 = arith.constant 0.000000e+00 : f32
    %65 = vector.broadcast %cst_28 : f32 to vector<1x16xf32>
    %66 = arith.maximumf %64, %65 : vector<1x16xf32>
    %cst_29 = arith.constant 9.99999974E-6 : f32
    %67 = vector.broadcast %cst_29 : f32 to vector<1x16xf32>
    %68 = arith.addf %66, %67 : vector<1x16xf32>
    %69 = math.rsqrt %68 : vector<1x16xf32>
    %70 = arith.mulf %46, %69 : vector<1x16xf32>
    %71 = arith.mulf %70, %61 : vector<1x16xf32>
    %72 = arith.subf %47, %71 : vector<1x16xf32>
    %73 = tpu.concatenate %70, %72 in 0 : vector<1x16xf32>, vector<1x16xf32> -> vector<2x16xf32>
    %cst_30 = arith.constant dense<0.000000e+00> : vector<2x256xf32>
    %74 = tpu.matmul %73, %50, %cst_30 {dimension_numbers = #tpu.dot_dimension_numbers<[1], [0], [0], [1], [0, 0, 1, 1], [], []>} : vector<2x16xf32>, vector<16x256xf32>, vector<2x256xf32> -> vector<2x256xf32>
    %75 = vector.extract_strided_slice %74 {offsets = [0, 0], sizes = [1, 256], strides = [1, 1]} : vector<2x256xf32> to vector<1x256xf32>
    %76 = vector.broadcast %75 : vector<1x256xf32> to vector<2x256xf32>
    %77 = arith.mulf %49, %76 : vector<2x256xf32>
    %78 = vector.extract_strided_slice %74 {offsets = [1, 0], sizes = [1, 256], strides = [1, 1]} : vector<2x256xf32> to vector<1x256xf32>
    %79 = vector.broadcast %78 : vector<1x256xf32> to vector<2x256xf32>
    %80 = arith.addf %77, %79 : vector<2x256xf32>
    %cst_31 = arith.constant 0.000000e+00 : f32
    %81 = vector.broadcast %cst_31 : f32 to vector<2x256xf32>
    %82 = arith.maximumf %80, %81 : vector<2x256xf32>
    %c0_32 = arith.constant 0 : index
    %c0_33 = arith.constant 0 : index
    %83 = vector.load %arg4[%c0_32, %c0_33] : memref<320x128xbf16, #tpu.memory_space<vmem>>, vector<256x128xbf16>
    %c288 = arith.constant 288 : index
    %c0_34 = arith.constant 0 : index
    %84 = vector.load %arg4[%c288, %c0_34] : memref<320x128xbf16, #tpu.memory_space<vmem>>, vector<32x128xbf16>
    %c768 = arith.constant 768 : index
    %c0_35 = arith.constant 0 : index
    %85 = vector.load %arg7[%c768, %c0_35] : memref<896x32xbf16, #tpu.memory_space<vmem>>, vector<128x32xbf16>
    %c4 = arith.constant 4 : index
    %c0_36 = arith.constant 0 : index
    %86 = vector.load %arg8[%c4, %c0_36] : memref<16x128xf32, #tpu.memory_space<vmem>>, vector<1x32xf32>
    %c5 = arith.constant 5 : index
    %c0_37 = arith.constant 0 : index
    %87 = vector.load %arg8[%c5, %c0_37] : memref<16x128xf32, #tpu.memory_space<vmem>>, vector<1x32xf32>
    %88 = arith.truncf %82 : vector<2x256xf32> to vector<2x256xbf16>
    %cst_38 = arith.constant dense<0.000000e+00> : vector<2x128xf32>
    %89 = tpu.matmul %88, %83, %cst_38 {dimension_numbers = #tpu.dot_dimension_numbers<[1], [0], [0], [1], [0, 0, 1, 1], [], []>} : vector<2x256xbf16>, vector<256x128xbf16>, vector<2x128xf32> -> vector<2x128xf32>
    %90 = arith.extf %84 : vector<32x128xbf16> to vector<32x128xf32>
    %91 = arith.extf %85 : vector<128x32xbf16> to vector<128x32xf32>
    %cst_39 = arith.constant dense<0.000000e+00> : vector<128xf32>
    %92 = vector.multi_reduction <add>, %89, %cst_39 [0] : vector<2x128xf32> to vector<128xf32>
    %93 = vector.shape_cast %92 : vector<128xf32> to vector<1x128xf32>
    %94 = arith.mulf %89, %89 : vector<2x128xf32>
    %cst_40 = arith.constant dense<0.000000e+00> : vector<128xf32>
    %95 = vector.multi_reduction <add>, %94, %cst_40 [0] : vector<2x128xf32> to vector<128xf32>
    %96 = vector.shape_cast %95 : vector<128xf32> to vector<1x128xf32>
    %97 = tpu.concatenate %93, %96 in 0 : vector<1x128xf32>, vector<1x128xf32> -> vector<2x128xf32>
    %cst_41 = arith.constant dense<0.000000e+00> : vector<2x32xf32>
    %98 = tpu.matmul %97, %91, %cst_41 {dimension_numbers = #tpu.dot_dimension_numbers<[1], [0], [0], [1], [0, 0, 1, 1], [], []>} : vector<2x128xf32>, vector<128x32xf32>, vector<2x32xf32> -> vector<2x32xf32>
    %cst_42 = arith.constant 1.250000e-01 : f32
    %99 = vector.broadcast %cst_42 : f32 to vector<2x32xf32>
    %100 = arith.mulf %98, %99 : vector<2x32xf32>
    %101 = vector.extract_strided_slice %100 {offsets = [0, 0], sizes = [1, 32], strides = [1, 1]} : vector<2x32xf32> to vector<1x32xf32>
    %102 = vector.extract_strided_slice %100 {offsets = [1, 0], sizes = [1, 32], strides = [1, 1]} : vector<2x32xf32> to vector<1x32xf32>
    %103 = arith.mulf %101, %101 : vector<1x32xf32>
    %104 = arith.subf %102, %103 : vector<1x32xf32>
    %cst_43 = arith.constant 0.000000e+00 : f32
    %105 = vector.broadcast %cst_43 : f32 to vector<1x32xf32>
    %106 = arith.maximumf %104, %105 : vector<1x32xf32>
    %cst_44 = arith.constant 9.99999974E-6 : f32
    %107 = vector.broadcast %cst_44 : f32 to vector<1x32xf32>
    %108 = arith.addf %106, %107 : vector<1x32xf32>
    %109 = math.rsqrt %108 : vector<1x32xf32>
    %110 = arith.mulf %86, %109 : vector<1x32xf32>
    %111 = arith.mulf %110, %101 : vector<1x32xf32>
    %112 = arith.subf %87, %111 : vector<1x32xf32>
    %113 = tpu.concatenate %110, %112 in 0 : vector<1x32xf32>, vector<1x32xf32> -> vector<2x32xf32>
    %cst_45 = arith.constant dense<0.000000e+00> : vector<2x128xf32>
    %114 = tpu.matmul %113, %90, %cst_45 {dimension_numbers = #tpu.dot_dimension_numbers<[1], [0], [0], [1], [0, 0, 1, 1], [], []>} : vector<2x32xf32>, vector<32x128xf32>, vector<2x128xf32> -> vector<2x128xf32>
    %115 = vector.extract_strided_slice %114 {offsets = [0, 0], sizes = [1, 128], strides = [1, 1]} : vector<2x128xf32> to vector<1x128xf32>
    %116 = vector.broadcast %115 : vector<1x128xf32> to vector<2x128xf32>
    %117 = arith.mulf %89, %116 : vector<2x128xf32>
    %118 = vector.extract_strided_slice %114 {offsets = [1, 0], sizes = [1, 128], strides = [1, 1]} : vector<2x128xf32> to vector<1x128xf32>
    %119 = vector.broadcast %118 : vector<1x128xf32> to vector<2x128xf32>
    %120 = arith.addf %117, %119 : vector<2x128xf32>
    %cst_46 = arith.constant 0.000000e+00 : f32
    %121 = vector.broadcast %cst_46 : f32 to vector<2x128xf32>
    %122 = arith.maximumf %120, %121 : vector<2x128xf32>
    %123 = arith.truncf %122 : vector<2x128xf32> to vector<2x128xbf16>
    %c0_47 = arith.constant 0 : index
    %c0_48 = arith.constant 0 : index
    %124 = vector.load %arg5[%c0_47, %c0_48] : memref<128x64xbf16, #tpu.memory_space<vmem>>, vector<128x64xbf16>
    %cst_49 = arith.constant dense<0.000000e+00> : vector<2x64xf32>
    %125 = tpu.matmul %123, %124, %cst_49 {dimension_numbers = #tpu.dot_dimension_numbers<[1], [0], [0], [1], [0, 0, 1, 1], [], []>} : vector<2x128xbf16>, vector<128x64xbf16>, vector<2x64xf32> -> vector<2x64xf32>
    %cst_50 = arith.constant dense<0.000000e+00> : vector<64xf32>
    %126 = vector.multi_reduction <add>, %125, %cst_50 [0] : vector<2x64xf32> to vector<64xf32>
    %127 = vector.shape_cast %126 : vector<64xf32> to vector<1x64xf32>
    %cst_51 = arith.constant 2.000000e+00 : f32
    %128 = vector.broadcast %cst_51 : f32 to vector<1x64xf32>
    %129 = arith.divf %127, %128 : vector<1x64xf32>
    %130 = vector.broadcast %129 : vector<1x64xf32> to vector<2x64xf32>
    %131 = arith.subf %125, %130 : vector<2x64xf32>
    %132 = arith.mulf %131, %131 : vector<2x64xf32>
    %cst_52 = arith.constant dense<0.000000e+00> : vector<64xf32>
    %133 = vector.multi_reduction <add>, %132, %cst_52 [0] : vector<2x64xf32> to vector<64xf32>
    %134 = vector.shape_cast %133 : vector<64xf32> to vector<1x64xf32>
    %cst_53 = arith.constant 2.000000e+00 : f32
    %135 = vector.broadcast %cst_53 : f32 to vector<1x64xf32>
    %136 = arith.divf %134, %135 : vector<1x64xf32>
    %137 = vector.broadcast %129 : vector<1x64xf32> to vector<2x64xf32>
    %138 = arith.subf %125, %137 : vector<2x64xf32>
    %cst_54 = arith.constant 9.99999974E-6 : f32
    %139 = vector.broadcast %cst_54 : f32 to vector<1x64xf32>
    %140 = arith.addf %136, %139 : vector<1x64xf32>
    %141 = math.rsqrt %140 : vector<1x64xf32>
    %142 = vector.broadcast %141 : vector<1x64xf32> to vector<2x64xf32>
    %143 = arith.mulf %138, %142 : vector<2x64xf32>
    %c6 = arith.constant 6 : index
    %c0_55 = arith.constant 0 : index
    %144 = vector.load %arg8[%c6, %c0_55] : memref<16x128xf32, #tpu.memory_space<vmem>>, vector<1x64xf32>
    %145 = vector.broadcast %144 : vector<1x64xf32> to vector<2x64xf32>
    %146 = arith.mulf %143, %145 : vector<2x64xf32>
    %c7 = arith.constant 7 : index
    %c0_56 = arith.constant 0 : index
    %147 = vector.load %arg8[%c7, %c0_56] : memref<16x128xf32, #tpu.memory_space<vmem>>, vector<1x64xf32>
    %148 = vector.broadcast %147 : vector<1x64xf32> to vector<2x64xf32>
    %149 = arith.addf %146, %148 : vector<2x64xf32>
    %cst_57 = arith.constant 0.000000e+00 : f32
    %150 = vector.broadcast %cst_57 : f32 to vector<2x64xf32>
    %151 = arith.maximumf %149, %150 : vector<2x64xf32>
    %152 = arith.truncf %151 : vector<2x64xf32> to vector<2x64xbf16>
    %c0_58 = arith.constant 0 : index
    %c0_59 = arith.constant 0 : index
    %153 = vector.load %arg6[%c0_58, %c0_59] : memref<64x32xbf16, #tpu.memory_space<vmem>>, vector<64x32xbf16>
    %cst_60 = arith.constant dense<0.000000e+00> : vector<2x32xf32>
    %154 = tpu.matmul %152, %153, %cst_60 {dimension_numbers = #tpu.dot_dimension_numbers<[1], [0], [0], [1], [0, 0, 1, 1], [], []>} : vector<2x64xbf16>, vector<64x32xbf16>, vector<2x32xf32> -> vector<2x32xf32>
    %155 = tpu.iota {dimensions = array<i32: 1>} : vector<2x32xi32>
    %c16_i32 = arith.constant 16 : i32
    %156 = vector.broadcast %c16_i32 : i32 to vector<2x32xi32>
    %157 = arith.cmpi slt, %155, %156 : vector<2x32xi32>
    %158 = math.exp %154 : vector<2x32xf32>
    %cst_61 = arith.constant 1.000000e+00 : f32
    %159 = vector.broadcast %cst_61 : f32 to vector<2x32xf32>
    %160 = arith.addf %159, %158 : vector<2x32xf32>
    %161 = arith.select %157, %154, %160 : vector<2x32xi1>, vector<2x32xf32>
    %c0_62 = arith.constant 0 : index
    %c0_63 = arith.constant 0 : index
    %162 = vector.load %arg10[%c0_62, %c0_63] : memref<2x32xf32, #tpu.memory_space<vmem>>, vector<2x32xf32>
    tpu.vector_store %arg10[%c0_62, %c0_63], %161 {strides = array<i32>} : memref<2x32xf32, #tpu.memory_space<vmem>>, vector<2x32xf32>,
    %c0_64 = arith.constant 0 : index
    %c0_65 = arith.constant 0 : index
    %163 = vector.load %arg1[%c0_64, %c0_65] : memref<2x32xf32, #tpu.memory_space<vmem>>, vector<2x32xf32>
    %164 = arith.mulf %161, %163 : vector<2x32xf32>
    %c256 = arith.constant 256 : index
    %c0_66 = arith.constant 0 : index
    %165 = vector.load %arg4[%c256, %c0_66] : memref<320x128xbf16, #tpu.memory_space<vmem>>, vector<32x128xbf16>
    %c288_67 = arith.constant 288 : index
    %c0_68 = arith.constant 0 : index
    %166 = vector.load %arg4[%c288_67, %c0_68] : memref<320x128xbf16, #tpu.memory_space<vmem>>, vector<32x128xbf16>
    %c768_69 = arith.constant 768 : index
    %c0_70 = arith.constant 0 : index
    %167 = vector.load %arg7[%c768_69, %c0_70] : memref<896x32xbf16, #tpu.memory_space<vmem>>, vector<128x32xbf16>
    %c8 = arith.constant 8 : index
    %c0_71 = arith.constant 0 : index
    %168 = vector.load %arg8[%c8, %c0_71] : memref<16x128xf32, #tpu.memory_space<vmem>>, vector<1x32xf32>
    %c9 = arith.constant 9 : index
    %c0_72 = arith.constant 0 : index
    %169 = vector.load %arg8[%c9, %c0_72] : memref<16x128xf32, #tpu.memory_space<vmem>>, vector<1x32xf32>
    %170 = arith.truncf %164 : vector<2x32xf32> to vector<2x32xbf16>
    %cst_73 = arith.constant dense<0.000000e+00> : vector<2x128xf32>
    %171 = tpu.matmul %170, %165, %cst_73 {dimension_numbers = #tpu.dot_dimension_numbers<[1], [0], [0], [1], [0, 0, 1, 1], [], []>} : vector<2x32xbf16>, vector<32x128xbf16>, vector<2x128xf32> -> vector<2x128xf32>
    %172 = arith.extf %166 : vector<32x128xbf16> to vector<32x128xf32>
    %173 = arith.extf %167 : vector<128x32xbf16> to vector<128x32xf32>
    %cst_74 = arith.constant dense<0.000000e+00> : vector<128xf32>
    %174 = vector.multi_reduction <add>, %171, %cst_74 [0] : vector<2x128xf32> to vector<128xf32>
    %175 = vector.shape_cast %174 : vector<128xf32> to vector<1x128xf32>
    %176 = arith.mulf %171, %171 : vector<2x128xf32>
    %cst_75 = arith.constant dense<0.000000e+00> : vector<128xf32>
    %177 = vector.multi_reduction <add>, %176, %cst_75 [0] : vector<2x128xf32> to vector<128xf32>
    %178 = vector.shape_cast %177 : vector<128xf32> to vector<1x128xf32>
    %179 = tpu.concatenate %175, %178 in 0 : vector<1x128xf32>, vector<1x128xf32> -> vector<2x128xf32>
    %cst_76 = arith.constant dense<0.000000e+00> : vector<2x32xf32>
    %180 = tpu.matmul %179, %173, %cst_76 {dimension_numbers = #tpu.dot_dimension_numbers<[1], [0], [0], [1], [0, 0, 1, 1], [], []>} : vector<2x128xf32>, vector<128x32xf32>, vector<2x32xf32> -> vector<2x32xf32>
    %cst_77 = arith.constant 1.250000e-01 : f32
    %181 = vector.broadcast %cst_77 : f32 to vector<2x32xf32>
    %182 = arith.mulf %180, %181 : vector<2x32xf32>
    %183 = vector.extract_strided_slice %182 {offsets = [0, 0], sizes = [1, 32], strides = [1, 1]} : vector<2x32xf32> to vector<1x32xf32>
    %184 = vector.extract_strided_slice %182 {offsets = [1, 0], sizes = [1, 32], strides = [1, 1]} : vector<2x32xf32> to vector<1x32xf32>
    %185 = arith.mulf %183, %183 : vector<1x32xf32>
    %186 = arith.subf %184, %185 : vector<1x32xf32>
    %cst_78 = arith.constant 0.000000e+00 : f32
    %187 = vector.broadcast %cst_78 : f32 to vector<1x32xf32>
    %188 = arith.maximumf %186, %187 : vector<1x32xf32>
    %cst_79 = arith.constant 9.99999974E-6 : f32
    %189 = vector.broadcast %cst_79 : f32 to vector<1x32xf32>
    %190 = arith.addf %188, %189 : vector<1x32xf32>
    %191 = math.rsqrt %190 : vector<1x32xf32>
    %192 = arith.mulf %168, %191 : vector<1x32xf32>
    %193 = arith.mulf %192, %183 : vector<1x32xf32>
    %194 = arith.subf %169, %193 : vector<1x32xf32>
    %195 = tpu.concatenate %192, %194 in 0 : vector<1x32xf32>, vector<1x32xf32> -> vector<2x32xf32>
    %cst_80 = arith.constant dense<0.000000e+00> : vector<2x128xf32>
    %196 = tpu.matmul %195, %172, %cst_80 {dimension_numbers = #tpu.dot_dimension_numbers<[1], [0], [0], [1], [0, 0, 1, 1], [], []>} : vector<2x32xf32>, vector<32x128xf32>, vector<2x128xf32> -> vector<2x128xf32>
    %197 = vector.extract_strided_slice %196 {offsets = [0, 0], sizes = [1, 128], strides = [1, 1]} : vector<2x128xf32> to vector<1x128xf32>
    %198 = vector.broadcast %197 : vector<1x128xf32> to vector<2x128xf32>
    %199 = arith.mulf %171, %198 : vector<2x128xf32>
    %200 = vector.extract_strided_slice %196 {offsets = [1, 0], sizes = [1, 128], strides = [1, 1]} : vector<2x128xf32> to vector<1x128xf32>
    %201 = vector.broadcast %200 : vector<1x128xf32> to vector<2x128xf32>
    %202 = arith.addf %199, %201 : vector<2x128xf32>
    %cst_81 = arith.constant 0.000000e+00 : f32
    %203 = vector.broadcast %cst_81 : f32 to vector<2x128xf32>
    %204 = arith.maximumf %202, %203 : vector<2x128xf32>
    %c512_82 = arith.constant 512 : index
    %c0_83 = arith.constant 0 : index
    %205 = vector.load %arg3[%c512_82, %c0_83] : memref<656x256xbf16, #tpu.memory_space<vmem>>, vector<128x256xbf16>
    %c640_84 = arith.constant 640 : index
    %c0_85 = arith.constant 0 : index
    %206 = vector.load %arg3[%c640_84, %c0_85] : memref<656x256xbf16, #tpu.memory_space<vmem>>, vector<16x256xbf16>
    %c512_86 = arith.constant 512 : index
    %c0_87 = arith.constant 0 : index
    %207 = vector.load %arg7[%c512_86, %c0_87] : memref<896x32xbf16, #tpu.memory_space<vmem>>, vector<256x16xbf16>
    %c10 = arith.constant 10 : index
    %c0_88 = arith.constant 0 : index
    %208 = vector.load %arg8[%c10, %c0_88] : memref<16x128xf32, #tpu.memory_space<vmem>>, vector<1x16xf32>
    %c11 = arith.constant 11 : index
    %c0_89 = arith.constant 0 : index
    %209 = vector.load %arg8[%c11, %c0_89] : memref<16x128xf32, #tpu.memory_space<vmem>>, vector<1x16xf32>
    %210 = arith.truncf %204 : vector<2x128xf32> to vector<2x128xbf16>
    %cst_90 = arith.constant dense<0.000000e+00> : vector<2x256xf32>
    %211 = tpu.matmul %210, %205, %cst_90 {dimension_numbers = #tpu.dot_dimension_numbers<[1], [0], [0], [1], [0, 0, 1, 1], [], []>} : vector<2x128xbf16>, vector<128x256xbf16>, vector<2x256xf32> -> vector<2x256xf32>
    %212 = arith.extf %206 : vector<16x256xbf16> to vector<16x256xf32>
    %213 = arith.extf %207 : vector<256x16xbf16> to vector<256x16xf32>
    %cst_91 = arith.constant dense<0.000000e+00> : vector<256xf32>
    %214 = vector.multi_reduction <add>, %211, %cst_91 [0] : vector<2x256xf32> to vector<256xf32>
    %215 = vector.shape_cast %214 : vector<256xf32> to vector<1x256xf32>
    %216 = arith.mulf %211, %211 : vector<2x256xf32>
    %cst_92 = arith.constant dense<0.000000e+00> : vector<256xf32>
    %217 = vector.multi_reduction <add>, %216, %cst_92 [0] : vector<2x256xf32> to vector<256xf32>
    %218 = vector.shape_cast %217 : vector<256xf32> to vector<1x256xf32>
    %219 = tpu.concatenate %215, %218 in 0 : vector<1x256xf32>, vector<1x256xf32> -> vector<2x256xf32>
    %cst_93 = arith.constant dense<0.000000e+00> : vector<2x16xf32>
    %220 = tpu.matmul %219, %213, %cst_93 {dimension_numbers = #tpu.dot_dimension_numbers<[1], [0], [0], [1], [0, 0, 1, 1], [], []>} : vector<2x256xf32>, vector<256x16xf32>, vector<2x16xf32> -> vector<2x16xf32>
    %cst_94 = arith.constant 3.125000e-02 : f32
    %221 = vector.broadcast %cst_94 : f32 to vector<2x16xf32>
    %222 = arith.mulf %220, %221 : vector<2x16xf32>
    %223 = vector.extract_strided_slice %222 {offsets = [0, 0], sizes = [1, 16], strides = [1, 1]} : vector<2x16xf32> to vector<1x16xf32>
    %224 = vector.extract_strided_slice %222 {offsets = [1, 0], sizes = [1, 16], strides = [1, 1]} : vector<2x16xf32> to vector<1x16xf32>
    %225 = arith.mulf %223, %223 : vector<1x16xf32>
    %226 = arith.subf %224, %225 : vector<1x16xf32>
    %cst_95 = arith.constant 0.000000e+00 : f32
    %227 = vector.broadcast %cst_95 : f32 to vector<1x16xf32>
    %228 = arith.maximumf %226, %227 : vector<1x16xf32>
    %cst_96 = arith.constant 9.99999974E-6 : f32
    %229 = vector.broadcast %cst_96 : f32 to vector<1x16xf32>
    %230 = arith.addf %228, %229 : vector<1x16xf32>
    %231 = math.rsqrt %230 : vector<1x16xf32>
    %232 = arith.mulf %208, %231 : vector<1x16xf32>
    %233 = arith.mulf %232, %223 : vector<1x16xf32>
    %234 = arith.subf %209, %233 : vector<1x16xf32>
    %235 = tpu.concatenate %232, %234 in 0 : vector<1x16xf32>, vector<1x16xf32> -> vector<2x16xf32>
    %cst_97 = arith.constant dense<0.000000e+00> : vector<2x256xf32>
    %236 = tpu.matmul %235, %212, %cst_97 {dimension_numbers = #tpu.dot_dimension_numbers<[1], [0], [0], [1], [0, 0, 1, 1], [], []>} : vector<2x16xf32>, vector<16x256xf32>, vector<2x256xf32> -> vector<2x256xf32>
    %237 = vector.extract_strided_slice %236 {offsets = [0, 0], sizes = [1, 256], strides = [1, 1]} : vector<2x256xf32> to vector<1x256xf32>
    %238 = vector.broadcast %237 : vector<1x256xf32> to vector<2x256xf32>
    %239 = arith.mulf %211, %238 : vector<2x256xf32>
    %240 = vector.extract_strided_slice %236 {offsets = [1, 0], sizes = [1, 256], strides = [1, 1]} : vector<2x256xf32> to vector<1x256xf32>
    %241 = vector.broadcast %240 : vector<1x256xf32> to vector<2x256xf32>
    %242 = arith.addf %239, %241 : vector<2x256xf32>
    %cst_98 = arith.constant 0.000000e+00 : f32
    %243 = vector.broadcast %cst_98 : f32 to vector<2x256xf32>
    %244 = arith.maximumf %242, %243 : vector<2x256xf32>
    %c768_99 = arith.constant 768 : index
    %c0_100 = arith.constant 0 : index
    %245 = vector.load %arg2[%c768_99, %c0_100] : memref<1032x512xbf16, #tpu.memory_space<vmem>>, vector<256x512xbf16>
    %c1024_101 = arith.constant 1024 : index
    %c0_102 = arith.constant 0 : index
    %246 = vector.load %arg2[%c1024_101, %c0_102] : memref<1032x512xbf16, #tpu.memory_space<vmem>>, vector<8x512xbf16>
    %c0_103 = arith.constant 0 : index
    %c0_104 = arith.constant 0 : index
    %247 = vector.load %arg7[%c0_103, %c0_104] : memref<896x32xbf16, #tpu.memory_space<vmem>>, vector<512x8xbf16>
    %c12 = arith.constant 12 : index
    %c0_105 = arith.constant 0 : index
    %248 = vector.load %arg8[%c12, %c0_105] : memref<16x128xf32, #tpu.memory_space<vmem>>, vector<1x8xf32>
    %c13 = arith.constant 13 : index
    %c0_106 = arith.constant 0 : index
    %249 = vector.load %arg8[%c13, %c0_106] : memref<16x128xf32, #tpu.memory_space<vmem>>, vector<1x8xf32>
    %250 = arith.truncf %244 : vector<2x256xf32> to vector<2x256xbf16>
    %cst_107 = arith.constant dense<0.000000e+00> : vector<2x512xf32>
    %251 = tpu.matmul %250, %245, %cst_107 {dimension_numbers = #tpu.dot_dimension_numbers<[1], [0], [0], [1], [0, 0, 1, 1], [], []>} : vector<2x256xbf16>, vector<256x512xbf16>, vector<2x512xf32> -> vector<2x512xf32>
    %252 = arith.extf %246 : vector<8x512xbf16> to vector<8x512xf32>
    %253 = arith.extf %247 : vector<512x8xbf16> to vector<512x8xf32>
    %cst_108 = arith.constant dense<0.000000e+00> : vector<512xf32>
    %254 = vector.multi_reduction <add>, %251, %cst_108 [0] : vector<2x512xf32> to vector<512xf32>
    %255 = vector.shape_cast %254 : vector<512xf32> to vector<1x512xf32>
    %256 = arith.mulf %251, %251 : vector<2x512xf32>
    %cst_109 = arith.constant dense<0.000000e+00> : vector<512xf32>
    %257 = vector.multi_reduction <add>, %256, %cst_109 [0] : vector<2x512xf32> to vector<512xf32>
    %258 = vector.shape_cast %257 : vector<512xf32> to vector<1x512xf32>
    %259 = tpu.concatenate %255, %258 in 0 : vector<1x512xf32>, vector<1x512xf32> -> vector<2x512xf32>
    %cst_110 = arith.constant dense<0.000000e+00> : vector<2x8xf32>
    %260 = tpu.matmul %259, %253, %cst_110 {dimension_numbers = #tpu.dot_dimension_numbers<[1], [0], [0], [1], [0, 0, 1, 1], [], []>} : vector<2x512xf32>, vector<512x8xf32>, vector<2x8xf32> -> vector<2x8xf32>
    %cst_111 = arith.constant 7.812500e-03 : f32
    %261 = vector.broadcast %cst_111 : f32 to vector<2x8xf32>
    %262 = arith.mulf %260, %261 : vector<2x8xf32>
    %263 = vector.extract_strided_slice %262 {offsets = [0, 0], sizes = [1, 8], strides = [1, 1]} : vector<2x8xf32> to vector<1x8xf32>
    %264 = vector.extract_strided_slice %262 {offsets = [1, 0], sizes = [1, 8], strides = [1, 1]} : vector<2x8xf32> to vector<1x8xf32>
    %265 = arith.mulf %263, %263 : vector<1x8xf32>
    %266 = arith.subf %264, %265 : vector<1x8xf32>
    %cst_112 = arith.constant 0.000000e+00 : f32
    %267 = vector.broadcast %cst_112 : f32 to vector<1x8xf32>
    %268 = arith.maximumf %266, %267 : vector<1x8xf32>
    %cst_113 = arith.constant 9.99999974E-6 : f32
    %269 = vector.broadcast %cst_113 : f32 to vector<1x8xf32>
    %270 = arith.addf %268, %269 : vector<1x8xf32>
    %271 = math.rsqrt %270 : vector<1x8xf32>
    %272 = arith.mulf %248, %271 : vector<1x8xf32>
    %273 = arith.mulf %272, %263 : vector<1x8xf32>
    %274 = arith.subf %249, %273 : vector<1x8xf32>
    %275 = tpu.concatenate %272, %274 in 0 : vector<1x8xf32>, vector<1x8xf32> -> vector<2x8xf32>
    %cst_114 = arith.constant dense<0.000000e+00> : vector<2x512xf32>
    %276 = tpu.matmul %275, %252, %cst_114 {dimension_numbers = #tpu.dot_dimension_numbers<[1], [0], [0], [1], [0, 0, 1, 1], [], []>} : vector<2x8xf32>, vector<8x512xf32>, vector<2x512xf32> -> vector<2x512xf32>
    %277 = vector.extract_strided_slice %276 {offsets = [0, 0], sizes = [1, 512], strides = [1, 1]} : vector<2x512xf32> to vector<1x512xf32>
    %278 = vector.broadcast %277 : vector<1x512xf32> to vector<2x512xf32>
    %279 = arith.mulf %251, %278 : vector<2x512xf32>
    %280 = vector.extract_strided_slice %276 {offsets = [1, 0], sizes = [1, 512], strides = [1, 1]} : vector<2x512xf32> to vector<1x512xf32>
    %281 = vector.broadcast %280 : vector<1x512xf32> to vector<2x512xf32>
    %282 = arith.addf %279, %281 : vector<2x512xf32>
    %cst_115 = arith.constant 0.000000e+00 : f32
    %283 = vector.broadcast %cst_115 : f32 to vector<2x512xf32>
    %284 = arith.maximumf %282, %283 : vector<2x512xf32>
    %c0_i32_116 = arith.constant 0 : i32
    %285 = tpu.memref_slice %arg13[%c0_i32_116] : memref<1x!tpu.dma_semaphore, #tpu.memory_space<semaphore_mem>> -> memref<1x!tpu.dma_semaphore, #tpu.memory_space<semaphore_mem>>
    %286 = tpu.memref_squeeze %285 : memref<1x!tpu.dma_semaphore, #tpu.memory_space<semaphore_mem>> -> memref<!tpu.dma_semaphore, #tpu.memory_space<semaphore_mem>>
    tpu.wait_dma2 semaphore(%286 : memref<!tpu.dma_semaphore, #tpu.memory_space<semaphore_mem>>) src(%arg9 : memref<520x768xbf16, #tpu.memory_space<any>>) dst(%arg12 : memref<520x768xbf16, #tpu.memory_space<vmem>>)
    %287 = arith.truncf %284 : vector<2x512xf32> to vector<2x512xbf16>
    %c0_117 = arith.constant 0 : index
    %c0_118 = arith.constant 0 : index
    %288 = vector.load %arg12[%c0_117, %c0_118] : memref<520x768xbf16, #tpu.memory_space<vmem>>, vector<512x768xbf16>
    %cst_119 = arith.constant dense<0.000000e+00> : vector<2x768xf32>
    %289 = tpu.matmul %287, %288, %cst_119 {dimension_numbers = #tpu.dot_dimension_numbers<[1], [0], [0], [1], [0, 0, 1, 1], [], []>} : vector<2x512xbf16>, vector<512x768xbf16>, vector<2x768xf32> -> vector<2x768xf32>
    %c512_120 = arith.constant 512 : index
    %c0_121 = arith.constant 0 : index
    %290 = vector.load %arg12[%c512_120, %c0_121] : memref<520x768xbf16, #tpu.memory_space<vmem>>, vector<1x768xbf16>
    %291 = arith.extf %290 : vector<1x768xbf16> to vector<1x768xf32>
    %292 = vector.broadcast %291 : vector<1x768xf32> to vector<2x768xf32>
    %293 = arith.addf %289, %292 : vector<2x768xf32>
    %cst_122 = arith.constant 0.000000e+00 : f32
    %294 = vector.broadcast %cst_122 : f32 to vector<2x768xf32>
    %295 = arith.subf %294, %293 : vector<2x768xf32>
    %296 = math.exp %295 : vector<2x768xf32>
    %cst_123 = arith.constant 1.000000e+00 : f32
    %297 = vector.broadcast %cst_123 : f32 to vector<2x768xf32>
    %298 = arith.addf %297, %296 : vector<2x768xf32>
    %cst_124 = arith.constant 1.000000e+00 : f32
    %299 = vector.broadcast %cst_124 : f32 to vector<2x768xf32>
    %300 = arith.divf %299, %298 : vector<2x768xf32>
    %c0_125 = arith.constant 0 : index
    %c0_126 = arith.constant 0 : index
    %301 = vector.load %arg11[%c0_125, %c0_126] : memref<2x768xf32, #tpu.memory_space<vmem>>, vector<2x768xf32>
    tpu.vector_store %arg11[%c0_125, %c0_126], %300 {strides = array<i32>} : memref<2x768xf32, #tpu.memory_space<vmem>>, vector<2x768xf32>,
    return
  }
}

</mosaic_0001>

<bundles_post_ra>
// kernel: vae_forward.1
= control target key start
LH: loop header
LB: loop body
LE: loop exit
PB: predicated region body
PF: predicated region fallthrough
CT: control target
= control target key end

     0   :  { %17 = vsyncpa [#allocation5], 0  ;;  %s10603_s0 = inlined_call_operand.vmem [shape: f32[2,768], index: 0, kind: input, shape index: {}]   ;;  %s10604_s1 = inlined_call_operand.vmem [shape: f32[2,32], index: 1, kind: input, shape index: {}]   ;;  %s10605_s2 = inlined_call_operand.hbm [shape: bf16[1032,512], index: 2, kind: input, shape index: {}]   ;;  %s10606_s3 = inlined_call_operand.hbm [shape: bf16[656,256], index: 3, kind: input, shape index: {}]   ;;  %s10607_s4 = inlined_call_operand.hbm [shape: bf16[320,128], index: 4, kind: input, shape index: {}]   ;;  %s10608_s5 = inlined_call_operand.vmem [shape: bf16[128,64], index: 5, kind: input, shape index: {}]   ;;  %s10609_s6 = inlined_call_operand.vmem [shape: bf16[64,32], index: 6, kind: input, shape index: {}]   ;;  %s10610_s7 = inlined_call_operand.vmem [shape: bf16[896,32], index: 7, kind: input, shape index: {}]   ;;  %s10611_s8 = inlined_call_operand.hbm [shape: f32[16,128], index: 8, kind: input, shape index: {}]   ;;  %s10612_s9 = inlined_call_operand.hbm [shape: bf16[520,768], index: 9, kind: input, shape index: {}]   ;;  %s10613_s10 = inlined_call_operand.vmem [shape: f32[2,32], index: 10, kind: output, shape index: {0}]   ;;  %s10614_s11 = inlined_call_operand.vmem [shape: f32[2,768], index: 11, kind: output, shape index: {1}]  }
   0x1   :  { %18 = vsyncpa [#allocation7], 0  ;;  %s41_s19 = sshll.u32 %s10606_s3, 4  ;;  %s42_s19 = int_to_ptr.hbm [resolvable:$true] %s41_s19 }
   0x2   :  { %19 = vsyncpa [#allocation10], 0  ;;  %s9831_s20 = smov [#allocation6]   ;;  %s28_s24 = sshll.u32 %s10605_s2, 4  ;;  %s29_s24 = int_to_ptr.hbm [resolvable:$true] %s28_s24 }
   0x3   :  { %s43_s21 = sshll.u32 %s9831_s20, 4  ;;  %s9832_s25 = smov 128   ;;  %s44_s21 = int_to_ptr.vmem [resolvable:$true] %s43_s21 }
   0x4   :  { %s9833_s26 = smov 8   ;;  %s9834_s27 = smov [#allocation4]  }
   0x5   :  { %49 = dma.hbm_to_vmem [thread:$0]  %s42_s19, 10496, %s44_s21, [#allocation7], %s9832_s25, %s9832_s25, %s9833_s26  }
   0x6   :  { %s30_s28 = sshll.u32 %s9834_s27, 4  ;;  %s9835_s29 = smov 256   ;;  %s31_s28 = int_to_ptr.vmem [resolvable:$true] %s30_s28 }
   0x7   :  { %s9836_s30 = smov 16   ;;  %s54_s13 = sshll.u32 %s10607_s4, 4  ;;  %s55_s13 = int_to_ptr.hbm [resolvable:$true] %s54_s13 }
   0x8   :  { %36 = dma.hbm_to_vmem [thread:$0]  %s29_s24, 33024, %s31_s28, [#allocation5], %s9835_s29, %s9835_s29, %s9836_s30  }
   0x9   :  { %s9837_s14 = smov [#allocation8]   ;;  %s73_s17 = sshll.u32 %s10611_s8, 4  ;;  %s74_s17 = int_to_ptr.hbm [resolvable:$true] %s73_s17 }
   0xa   :  { %s56_s15 = sshll.u32 %s9837_s14, 4  ;;  %s9838_s18 = smov 64   ;;  %s57_s15 = int_to_ptr.vmem [resolvable:$true] %s56_s15 }
   0xb   :  { %s9839_s19 = smov 4   ;;  %s9840_s20 = smov [#allocation9]  }
   0xc   :  { %62 = dma.hbm_to_vmem [thread:$0]  %s55_s13, 2560, %s57_s15, [#allocation7], %s9838_s18, %s9838_s18, %s9839_s19  }
   0xd   :  { %s75_s21 = sshll.u32 %s9840_s20, 4  ;;  %s76_s21 = int_to_ptr.vmem [resolvable:$true] %s75_s21 }
   0xe   :  { %81 = dma.hbm_to_vmem [thread:$0]  %s74_s17, 256, %s76_s21, [#allocation10], %s9832_s25, %s9832_s25, %s9833_s26  }
   0xf   :  { %9823 = dma.done.wait [#allocation5], 33024  }
  0x10   :  { %9824 = vsyncadd [#allocation5], 4294934272 }
  0x11   :  { %9825 = dma.done.wait [#allocation7], 13056  }
  0x12   :  { %9826 = vsyncadd [#allocation7], 4294954240 }
  0x13   :  { %9827 = dma.done.wait [#allocation10], 256  }
  0x14   :  { %9828 = vsyncadd [#allocation10], 4294967040  ;;  %v6376_v0 = vld [vmem:[#allocation4 + $0xe0] sm:$0xf]  ;;  %v8541_v1 = vld [vmem:[#allocation4 + $0xec] sm:$0xf0] }
  0x15   :  { %v6504_v2 = vld [vmem:[#allocation4 + $0x1e0] sm:$0xf]  ;;  %v6377_v3 = vor.u32 %v8541_v1, %v6376_v0  ;;  %v8573_v4 = vld [vmem:[#allocation4 + $0x1ec] sm:$0xf0]  ;;  %vm1737_vm0 = vcmask 1041408   ;;  %vm1798_vm1 = vcmask 1040384  }
  0x16   :  { %v6632_v5 = vld [vmem:[#allocation4 + $0x2e0] sm:$0xf]  ;;  %v8605_v6 = vld [vmem:[#allocation4 + $0x2ec] sm:$0xf0]  ;;  %v6505_v7 = vor.u32 %v8573_v4, %v6504_v2  ;;  %vm1911_vm5 = vcmask 64512   ;;  %vm2679_vm9 = vcmask 130048  }
  0x17   :  { %v6633_v8 = vor.u32 %v8605_v6, %v6632_v5  ;;  %v6760_v9 = vld [vmem:[#allocation4 + $0x3e0] sm:$0xf]  ;;  %v8637_v10 = vld [vmem:[#allocation4 + $0x3ec] sm:$0xf0]  ;;  %1357 = vmatpush.bf16.msra.mxu0 %v6377_v3  ;;  %vm2995_vm13 = vcmask 261120   ;;  %vm3102_vm14 = vcmask 517120  }
  0x18   :  { %v6360_v11 = vld [vmem:[#allocation4 + $0xc0] sm:$0xf]  ;;  %v6761_v12 = vor.u32 %v8637_v10, %v6760_v9  ;;  %v8537_v13 = vld [vmem:[#allocation4 + $0xcc] sm:$0xf0]  ;;  %1370 = vmatpush.bf16.msra.mxu1 %v6505_v7  ;;  %s106_s28 = sshll.u32 %s10612_s9, 4  ;;  %s9842_s29 = smov [#allocation2]   ;;  %s107_s28 = int_to_ptr.hbm [resolvable:$true] %s106_s28 }
  0x19   :  { %v6488_v14 = vld [vmem:[#allocation4 + $0x1c0] sm:$0xf]  ;;  %v8569_v15 = vld [vmem:[#allocation4 + $0x1cc] sm:$0xf0]  ;;  %1383 = vmatpush.bf16.msra.mxu2 %v6633_v8  ;;  %v6361_v16 = vor.u32 %v8537_v13, %v6360_v11  ;;  %s108_s30 = sshll.u32 %s9842_s29, 4  ;;  %s109_s30 = int_to_ptr.vmem [resolvable:$true] %s108_s30 }
  0x1a   :  { %v6489_v17 = vor.u32 %v8569_v15, %v6488_v14  ;;  %v6616_v18 = vld [vmem:[#allocation4 + $0x2c0] sm:$0xf]  ;;  %v8601_v19 = vld [vmem:[#allocation4 + $0x2cc] sm:$0xf0]  ;;  %1396 = vmatpush.bf16.msra.mxu3 %v6761_v12  ;;  %111 = dma.hbm_to_vmem [thread:$0]  %s107_s28, 24960, %s109_s30, [#allocation3] }
  0x1b   :  { %v6744_v20 = vld [vmem:[#allocation4 + $0x3c0] sm:$0xf]  ;;  %v6617_v21 = vor.u32 %v8601_v19, %v6616_v18  ;;  %v8633_v22 = vld [vmem:[#allocation4 + $0x3cc] sm:$0xf0]  ;;  %1358 = vmatpush.bf16.msra.mxu0 %v6361_v16 }
  0x1c   :  { %v6344_v23 = vld [vmem:[#allocation4 + $0xa0] sm:$0xf]  ;;  %v8533_v24 = vld [vmem:[#allocation4 + $0xac] sm:$0xf0]  ;;  %v6745_v25 = vor.u32 %v8633_v22, %v6744_v20  ;;  %1371 = vmatpush.bf16.msra.mxu1 %v6489_v17 }
  0x1d   :  { %v6472_v26 = vld [vmem:[#allocation4 + $0x1a0] sm:$0xf]  ;;  %v8565_v27 = vld [vmem:[#allocation4 + $0x1ac] sm:$0xf0]  ;;  %v6345_v29 = vor.u32 %v8533_v24, %v6344_v23  ;;  %1384 = vmatpush.bf16.msra.mxu2 %v6617_v21 }
  0x1e   :  { %v6600_v28 = vld [vmem:[#allocation4 + $0x2a0] sm:$0xf]  ;;  %v8597_v30 = vld [vmem:[#allocation4 + $0x2ac] sm:$0xf0]  ;;  %v6473_v33 = vor.u32 %v8565_v27, %v6472_v26  ;;  %1397 = vmatpush.bf16.msra.mxu3 %v6745_v25 }
  0x1f   :  { %v6728_v31 = vld [vmem:[#allocation4 + $0x3a0] sm:$0xf]  ;;  %v8629_v32 = vld [vmem:[#allocation4 + $0x3ac] sm:$0xf0]  ;;  %v6601_v34 = vor.u32 %v8597_v30, %v6600_v28  ;;  %1359 = vmatpush.bf16.msra.mxu0 %v6345_v29 }
  0x20   :  { %v6328_v35 = vld [vmem:[#allocation4 + $0x80] sm:$0xf]  ;;  %v8529_v36 = vld [vmem:[#allocation4 + $0x8c] sm:$0xf0]  ;;  %v6729_v38 = vor.u32 %v8629_v32, %v6728_v31  ;;  %1372 = vmatpush.bf16.msra.mxu1 %v6473_v33  ;;  %v8539_v33 = vld [vmem:[#allocation4 + $0xe4] sm:$0xf] }
  0x21   :  { %v6456_v37 = vld [vmem:[#allocation4 + $0x180] sm:$0xf]  ;;  %v8561_v39 = vld [vmem:[#allocation4 + $0x18c] sm:$0xf0]  ;;  %v6329_v44 = vor.u32 %v8529_v36, %v6328_v35  ;;  %1385 = vmatpush.bf16.msra.mxu2 %v6601_v34  ;;  %v6378_v34 = vld [vmem:[#allocation4 + $0xf0] sm:$0xf0] }
  0x22   :  { %v6584_v40 = vld [vmem:[#allocation4 + $0x280] sm:$0xf]  ;;  %v8593_v41 = vld [vmem:[#allocation4 + $0x28c] sm:$0xf0]  ;;  %v6457_v45 = vor.u32 %v8561_v39, %v6456_v37  ;;  %1398 = vmatpush.bf16.msra.mxu3 %v6729_v38  ;;  %v8571_v37 = vld [vmem:[#allocation4 + $0x1e4] sm:$0xf] }
  0x23   :  { %v6712_v42 = vld [vmem:[#allocation4 + $0x380] sm:$0xf]  ;;  %v8625_v43 = vld [vmem:[#allocation4 + $0x38c] sm:$0xf0]  ;;  %v6585_v46 = vor.u32 %v8593_v41, %v6584_v40  ;;  %1360 = vmatpush.bf16.msra.mxu0 %v6329_v44  ;;  %v6506_v38 = vld [vmem:[#allocation4 + $0x1f0] sm:$0xf0] }
  0x24   :  { %v6312_v47 = vld [vmem:[#allocation4 + $0x60] sm:$0xf]  ;;  %v8525_v48 = vld [vmem:[#allocation4 + $0x6c] sm:$0xf0]  ;;  %v6713_v50 = vor.u32 %v8625_v43, %v6712_v42  ;;  %1373 = vmatpush.bf16.msra.mxu1 %v6457_v45  ;;  %v6381_v42 = vor.u32 %v8539_v33, %v6378_v34 }
  0x25   :  { %v6440_v49 = vld [vmem:[#allocation4 + $0x160] sm:$0xf]  ;;  %v8557_v51 = vld [vmem:[#allocation4 + $0x16c] sm:$0xf0]  ;;  %v6313_v56 = vor.u32 %v8525_v48, %v6312_v47  ;;  %1386 = vmatpush.bf16.msra.mxu2 %v6585_v46  ;;  %v6509_v46 = vor.u32 %v8571_v37, %v6506_v38  ;;  %v8535_v48 = vld [vmem:[#allocation4 + $0xc4] sm:$0xf] }
  0x26   :  { %v6568_v52 = vld [vmem:[#allocation4 + $0x260] sm:$0xf]  ;;  %v8589_v53 = vld [vmem:[#allocation4 + $0x26c] sm:$0xf0]  ;;  %v6441_v57 = vor.u32 %v8557_v51, %v6440_v49  ;;  %1399 = vmatpush.bf16.msra.mxu3 %v6713_v50  ;;  %v6362_v49 = vld [vmem:[#allocation4 + $0xd0] sm:$0xf0] }
  0x27   :  { %v6696_v54 = vld [vmem:[#allocation4 + $0x360] sm:$0xf]  ;;  %v8621_v55 = vld [vmem:[#allocation4 + $0x36c] sm:$0xf0]  ;;  %v6569_v58 = vor.u32 %v8589_v53, %v6568_v52  ;;  %1361 = vmatpush.bf16.msra.mxu0 %v6313_v56  ;;  %v8567_v50 = vld [vmem:[#allocation4 + $0x1c4] sm:$0xf] }
  0x28   :  { %v6296_v59 = vld [vmem:[#allocation4 + $0x40] sm:$0xf]  ;;  %v8521_v60 = vld [vmem:[#allocation4 + $0x4c] sm:$0xf0]  ;;  %v6697_v62 = vor.u32 %v8621_v55, %v6696_v54  ;;  %1374 = vmatpush.bf16.msra.mxu1 %v6441_v57  ;;  %v6490_v51 = vld [vmem:[#allocation4 + $0x1d0] sm:$0xf0]  ;;  %v6365_v55 = vor.u32 %v8535_v48, %v6362_v49 }
  0x29   :  { %v6424_v61 = vld [vmem:[#allocation4 + $0x140] sm:$0xf]  ;;  %v8553_v63 = vld [vmem:[#allocation4 + $0x14c] sm:$0xf0]  ;;  %v6297_v4 = vor.u32 %v8521_v60, %v6296_v59  ;;  %1387 = vmatpush.bf16.msra.mxu2 %v6569_v58  ;;  %v6493_v59 = vor.u32 %v8567_v50, %v6490_v51 }
  0x2a   :  { %v6552_v0 = vld [vmem:[#allocation4 + $0x240] sm:$0xf]  ;;  %v8585_v1 = vld [vmem:[#allocation4 + $0x24c] sm:$0xf0]  ;;  %v6425_v5 = vor.u32 %v8553_v63, %v6424_v61  ;;  %1400 = vmatpush.bf16.msra.mxu3 %v6697_v62  ;;  %v8531_v61 = vld [vmem:[#allocation4 + $0xa4] sm:$0xf] }
  0x2b   :  { %v6680_v2 = vld [vmem:[#allocation4 + $0x340] sm:$0xf]  ;;  %v8617_v3 = vld [vmem:[#allocation4 + $0x34c] sm:$0xf0]  ;;  %v6553_v6 = vor.u32 %v8585_v1, %v6552_v0  ;;  %1362 = vmatpush.bf16.msra.mxu0 %v6297_v4  ;;  %v6346_v62 = vld [vmem:[#allocation4 + $0xb0] sm:$0xf0] }
  0x2c   :  { %v6280_v7 = vld [vmem:[#allocation4 + $0x20] sm:$0xf]  ;;  %v8517_v8 = vld [vmem:[#allocation4 + $0x2c] sm:$0xf0]  ;;  %v6681_v10 = vor.u32 %v8617_v3, %v6680_v2  ;;  %1375 = vmatpush.bf16.msra.mxu1 %v6425_v5  ;;  %v8563_v63 = vld [vmem:[#allocation4 + $0x1a4] sm:$0xf]  ;;  %v6349_v5 = vor.u32 %v8531_v61, %v6346_v62 }
  0x2d   :  { %v6408_v9 = vld [vmem:[#allocation4 + $0x120] sm:$0xf]  ;;  %v8549_v11 = vld [vmem:[#allocation4 + $0x12c] sm:$0xf0]  ;;  %v6281_v16 = vor.u32 %v8517_v8, %v6280_v7  ;;  %1388 = vmatpush.bf16.msra.mxu2 %v6553_v6  ;;  %v6474_v0 = vld [vmem:[#allocation4 + $0x1b0] sm:$0xf0] }
  0x2e   :  { %v6536_v12 = vld [vmem:[#allocation4 + $0x220] sm:$0xf]  ;;  %v8581_v13 = vld [vmem:[#allocation4 + $0x22c] sm:$0xf0]  ;;  %v6409_v19 = vor.u32 %v8549_v11, %v6408_v9  ;;  %1401 = vmatpush.bf16.msra.mxu3 %v6681_v10  ;;  %v8527_v8 = vld [vmem:[#allocation4 + $0x84] sm:$0xf]  ;;  %v6477_v9 = vor.u32 %v8563_v63, %v6474_v0 }
  0x2f   :  { %v6664_v14 = vld [vmem:[#allocation4 + $0x320] sm:$0xf]  ;;  %v8613_v15 = vld [vmem:[#allocation4 + $0x32c] sm:$0xf0]  ;;  %v6537_v20 = vor.u32 %v8581_v13, %v6536_v12  ;;  %1363 = vmatpush.bf16.msra.mxu0 %v6281_v16  ;;  %v6330_v10 = vld [vmem:[#allocation4 + $0x90] sm:$0xf0] }
  0x30   :  { %v6264_v17 = vld [vmem:[#allocation4] sm:$0xf]  ;;  %v8513_v18 = vld [vmem:[#allocation4 + $0xc] sm:$0xf0]  ;;  %v6665_v24 = vor.u32 %v8613_v15, %v6664_v14  ;;  %1376 = vmatpush.bf16.msra.mxu1 %v6409_v19  ;;  %v8559_v11 = vld [vmem:[#allocation4 + $0x184] sm:$0xf] }
  0x31   :  { %v6392_v21 = vld [vmem:[#allocation4 + $0x100] sm:$0xf]  ;;  %v8545_v22 = vld [vmem:[#allocation4 + $0x10c] sm:$0xf0]  ;;  %v6265_v31 = vor.u32 %v8513_v18, %v6264_v17  ;;  %1389 = vmatpush.bf16.msra.mxu2 %v6537_v20  ;;  %v6458_v12 = vld [vmem:[#allocation4 + $0x190] sm:$0xf0] }
  0x32   :  { %v6520_v23 = vld [vmem:[#allocation4 + $0x200] sm:$0xf]  ;;  %v8577_v25 = vld [vmem:[#allocation4 + $0x20c] sm:$0xf0]  ;;  %v6393_v35 = vor.u32 %v8545_v22, %v6392_v21  ;;  %1402 = vmatpush.bf16.msra.mxu3 %v6665_v24  ;;  %v6333_v21 = vor.u32 %v8527_v8, %v6330_v10  ;;  %v8635_v8 = vld [vmem:[#allocation4 + $0x3e4] sm:$0xf] }
  0x33   :  { %v6648_v26 = vld [vmem:[#allocation4 + $0x300] sm:$0xf]  ;;  %v8609_v27 = vld [vmem:[#allocation4 + $0x30c] sm:$0xf0]  ;;  %v6521_v36 = vor.u32 %v8577_v25, %v6520_v23  ;;  %1364 = vmatpush.bf16.msra.mxu0 %v6265_v31  ;;  %v8555_v31 = vld [vmem:[#allocation4 + $0x164] sm:$0xf] }
  0x34   :  { %v6888_v28 = vld [vmem:[#allocation4 + $0x4e0] sm:$0xf]  ;;  %v8669_v29 = vld [vmem:[#allocation4 + $0x4ec] sm:$0xf0]  ;;  %v6649_v39 = vor.u32 %v8609_v27, %v6648_v26  ;;  %1377 = vmatpush.bf16.msra.mxu1 %v6393_v35  ;;  %v6461_v27 = vor.u32 %v8559_v11, %v6458_v12  ;;  %v8667_v11 = vld [vmem:[#allocation4 + $0x4e4] sm:$0xf] }
  0x35   :  { %v7016_v30 = vld [vmem:[#allocation4 + $0x5e0] sm:$0xf]  ;;  %v8701_v32 = vld [vmem:[#allocation4 + $0x5ec] sm:$0xf0]  ;;  %v6889_v40 = vor.u32 %v8669_v29, %v6888_v28  ;;  %1390 = vmatpush.bf16.msra.mxu2 %v6521_v36  ;;  %v8523_v29 = vld [vmem:[#allocation4 + $0x64] sm:$0xf] }
  0x36   :  { %v7017_v41 = vor.u32 %v8701_v32, %v7016_v30  ;;  %v6872_v43 = vld [vmem:[#allocation4 + $0x4c0] sm:$0xf]  ;;  %v8665_v44 = vld [vmem:[#allocation4 + $0x4cc] sm:$0xf0]  ;;  %1403 = vmatpush.bf16.msra.mxu3 %v6649_v39  ;;  %v6314_v30 = vld [vmem:[#allocation4 + $0x70] sm:$0xf0] }
  0x37   :  { %v7000_v45 = vld [vmem:[#allocation4 + $0x5c0] sm:$0xf]  ;;  %v8697_v47 = vld [vmem:[#allocation4 + $0x5cc] sm:$0xf0]  ;;  %1409 = vmatpush.bf16.msrb.mxu0 %v6889_v40  ;;  %v6873_v53 = vor.u32 %v8665_v44, %v6872_v43  ;;  %v6442_v32 = vld [vmem:[#allocation4 + $0x170] sm:$0xf0]  ;;  %v6317_v35 = vor.u32 %v8523_v29, %v6314_v30 }
  0x38   :  { %v112_v52 = vld [vmem:[%s10603_s0] sm:$0xff]  ;;  %1422 = vmatpush.bf16.msrb.mxu1 %v7017_v41  ;;  %v7001_v54 = vor.u32 %v8697_v47, %v7000_v45  ;;  %v8661_v57 = vld [vmem:[#allocation4 + $0x4ac] sm:$0xf0]  ;;  %v6445_v39 = vor.u32 %v8555_v31, %v6442_v32  ;;  %v6426_v44 = vld [vmem:[#allocation4 + $0x150] sm:$0xf0] }
  0x39   :  { %376 = vst [vmem:[#allocation1] ss:$4 sm:$0xff] %v112_v52  ;;  %1435 = vmatpush.bf16.msrb.mxu2 %v6381_v42  ;;  %v6856_v56 = vld [vmem:[#allocation4 + $0x4a0] sm:$0xf]  ;;  %v8693_v60 = vld [vmem:[#allocation4 + $0x5ac] sm:$0xf0] }
  0x3a   :  { %v6984_v58 = vld [vmem:[#allocation4 + $0x5a0] sm:$0xf]  ;;  %1448 = vmatpush.bf16.msrb.mxu3 %v6509_v46  ;;  %v6857_v1 = vor.u32 %v8661_v57, %v6856_v56  ;;  %v8657_v3 = vld [vmem:[#allocation4 + $0x48c] sm:$0xf0]  ;;  %v8519_v41 = vld [vmem:[#allocation4 + $0x44] sm:$0xf] }
  0x3b   :  { %1410 = vmatpush.bf16.msrb.mxu0 %v6873_v53  ;;  %v6840_v2 = vld [vmem:[#allocation4 + $0x480] sm:$0xf]  ;;  %v6985_v4 = vor.u32 %v8693_v60, %v6984_v58  ;;  %v8689_v7 = vld [vmem:[#allocation4 + $0x58c] sm:$0xf0]  ;;  %v6298_v42 = vld [vmem:[#allocation4 + $0x50] sm:$0xf0] }
  0x3c   :  { %1423 = vmatpush.bf16.msrb.mxu1 %v7001_v54  ;;  %v6968_v6 = vld [vmem:[#allocation4 + $0x580] sm:$0xf]  ;;  %v6841_v15 = vor.u32 %v8657_v3, %v6840_v2  ;;  %v8653_v23 = vld [vmem:[#allocation4 + $0x46c] sm:$0xf0]  ;;  %v8551_v43 = vld [vmem:[#allocation4 + $0x144] sm:$0xf]  ;;  %v6301_v48 = vor.u32 %v8519_v41, %v6298_v42 }
  0x3d   :  { %1436 = vmatpush.bf16.msrb.mxu2 %v6365_v55  ;;  %v6969_v16 = vor.u32 %v8689_v7, %v6968_v6  ;;  %v6824_v22 = vld [vmem:[#allocation4 + $0x460] sm:$0xf]  ;;  %v8685_v28 = vld [vmem:[#allocation4 + $0x56c] sm:$0xf0]  ;;  %v113_v45 = vld [vmem:[%s10603_s0 + $0x8] sm:$0xf]  ;;  %v6429_v52 = vor.u32 %v8551_v43, %v6426_v44 }
  0x3e   :  { %1449 = vmatpush.bf16.msrb.mxu3 %v6493_v59  ;;  %v6952_v24 = vld [vmem:[#allocation4 + $0x560] sm:$0xf]  ;;  %v6825_v33 = vor.u32 %v8653_v23, %v6824_v22  ;;  %v8649_v37 = vld [vmem:[#allocation4 + $0x44c] sm:$0xf0]  ;;  %378 = vst [vmem:[#allocation1 + $0x20] ss:$4 sm:$0xff] %v113_v45 }
  0x3f   :  { %1411 = vmatpush.bf16.msrb.mxu0 %v6857_v1  ;;  %v6953_v34 = vor.u32 %v8685_v28, %v6952_v24  ;;  %v6808_v36 = vld [vmem:[#allocation4 + $0x440] sm:$0xf]  ;;  %v8681_v40 = vld [vmem:[#allocation4 + $0x54c] sm:$0xf0]  ;;  %v8515_v54 = vld [vmem:[#allocation4 + $0x24] sm:$0xf] }
  0x40   :  { %v379_v13 = vld.sshfl [vmem:[#allocation1] sm:$0xff pattern:$0x73625140]  ;;  %v380_v14 = vld.sshfl [vmem:[#allocation1 + $0x8] sm:$0xff pattern:$0x73625140]  ;;  %1424 = vmatpush.bf16.msrb.mxu1 %v6985_v4  ;;  %v6809_v46 = vor.u32 %v8649_v37, %v6808_v36 }
  0x41   :  { %v9918_v17 = vpack.c.bf16 %v379_v13, %v379_v13  ;;  %v9920_v18 = vpack.c.bf16 %v380_v14, %v380_v14  ;;  %v381_v19 = vld.sshfl [vmem:[#allocation1 + $0x10] sm:$0xff pattern:$0x73625140]  ;;  %v382_v20 = vld.sshfl [vmem:[#allocation1 + $0x18] sm:$0xff pattern:$0x73625140]  ;;  %1437 = vmatpush.bf16.msrb.mxu2 %v6349_v5 }
  0x42   :  { %v9922_v25 = vpack.c.bf16 %v381_v19, %v381_v19  ;;  %v9924_v26 = vpack.c.bf16 %v382_v20, %v382_v20  ;;  %1450 = vmatpush.bf16.msrb.mxu3 %v6477_v9  ;;  %v6936_v38 = vld [vmem:[#allocation4 + $0x540] sm:$0xf]  ;;  %v8645_v50 = vld [vmem:[#allocation4 + $0x42c] sm:$0xf0]  ;;  %v6282_v55 = vld [vmem:[#allocation4 + $0x30] sm:$0xf0] }
  0x43   :  { %1365 = vmatmul.bf16.vlgmr.msra.gmra.mxu0 %v9918_v17  ;;  %1378 = vmatmul.bf16.vlgmr.msra.gmra.mxu1 %v9920_v18  ;;  %v6937_v47 = vor.u32 %v8681_v40, %v6936_v38  ;;  %v6792_v49 = vld [vmem:[#allocation4 + $0x420] sm:$0xf]  ;;  %v8677_v53 = vld [vmem:[#allocation4 + $0x52c] sm:$0xf0]  ;;  %v8547_v56 = vld [vmem:[#allocation4 + $0x124] sm:$0xf]  ;;  %v6285_v63 = vor.u32 %v8515_v54, %v6282_v55 }
  0x44   :  { %1391 = vmatmul.bf16.vlgmr.msra.gmra.mxu2 %v9922_v25  ;;  %1412 = vmatpush.bf16.msrb.mxu0 %v6841_v15  ;;  %v6920_v51 = vld [vmem:[#allocation4 + $0x520] sm:$0xf]  ;;  %v6410_v57 = vld [vmem:[#allocation4 + $0x130] sm:$0xf0]  ;;  %v6793_v58 = vor.u32 %v8645_v50, %v6792_v49  ;;  %v8641_v60 = vld [vmem:[#allocation4 + $0x40c] sm:$0xf0] }
  0x45   :  { %1404 = vmatmul.bf16.vlgmr.msra.gmra.mxu3 %v9924_v26  ;;  %1425 = vmatpush.bf16.msrb.mxu1 %v6969_v16  ;;  %v6776_v59 = vld [vmem:[#allocation4 + $0x400] sm:$0xf]  ;;  %v6921_v62 = vor.u32 %v8677_v53, %v6920_v51  ;;  %v8673_v0 = vld [vmem:[#allocation4 + $0x50c] sm:$0xf0]  ;;  %v8511_v1 = vld [vmem:[#allocation4 + $0x4] sm:$0xf]  ;;  %v6413_v3 = vor.u32 %v8547_v56, %v6410_v57 }
  0x46   :  { %1438 = vmatpush.bf16.msrb.mxu2 %v6333_v21  ;;  %1451 = vmatpush.bf16.msrb.mxu3 %v6461_v27  ;;  %v6904_v61 = vld [vmem:[#allocation4 + $0x500] sm:$0xf]  ;;  %v6266_v2 = vld [vmem:[#allocation4 + $0x10] sm:$0xf0]  ;;  %v8543_v4 = vld [vmem:[#allocation4 + $0x104] sm:$0xf]  ;;  %v6777_v10 = vor.u32 %v8641_v60, %v6776_v59 }
  0x47   :  { %v6394_v5 = vld [vmem:[#allocation4 + $0x110] sm:$0xf0]  ;;  %v8603_v6 = vld [vmem:[#allocation4 + $0x2e4] sm:$0xf]  ;;  %v6905_v14 = vor.u32 %v8673_v0, %v6904_v61  ;;  %v6269_v15 = vor.u32 %v8511_v1, %v6266_v2 }
  0x48   :  { %1413 = vmatpush.bf16.msrb.mxu0 %v6825_v33  ;;  %v6634_v7 = vld [vmem:[#allocation4 + $0x2f0] sm:$0xf0]  ;;  %v8699_v13 = vld [vmem:[#allocation4 + $0x5e4] sm:$0xf]  ;;  %v6397_v20 = vor.u32 %v8543_v4, %v6394_v5 }
  0x49   :  { %1426 = vmatpush.bf16.msrb.mxu1 %v6953_v34  ;;  %v6762_v9 = vld [vmem:[#allocation4 + $0x3f0] sm:$0xf0]  ;;  %v383_v19 = vld.sshfl [vmem:[#allocation1 + $0x20] sm:$0xff pattern:$0x73625140]  ;;  %v6637_v21 = vor.u32 %v8603_v6, %v6634_v7 }
  0x4a   :  { %1439 = vmatpush.bf16.msrb.mxu2 %v6317_v35  ;;  %1452 = vmatpush.bf16.msrb.mxu3 %v6445_v39  ;;  %v6890_v12 = vld [vmem:[#allocation4 + $0x4f0] sm:$0xf0]  ;;  %v384_v22 = vld.sshfl [vmem:[#allocation1 + $0x28] sm:$0xff pattern:$0x73625140]  ;;  %v6765_v23 = vor.u32 %v8635_v8, %v6762_v9  ;;  %v9933_v31 = vpack.c.bf16 %v383_v19, %v383_v19 }
  0x4b   :  { %v7018_v16 = vld [vmem:[#allocation4 + $0x5f0] sm:$0xf0]  ;;  %v6893_v24 = vor.u32 %v8667_v11, %v6890_v12  ;;  %v8599_v27 = vld [vmem:[#allocation4 + $0x2c4] sm:$0xf]  ;;  %v9935_v35 = vpack.c.bf16 %v384_v22, %v384_v22 }
  0x4c   :  { %1414 = vmatpush.bf16.msrb.mxu0 %v6809_v46  ;;  %v6618_v28 = vld [vmem:[#allocation4 + $0x2d0] sm:$0xf0]  ;;  %v8631_v29 = vld [vmem:[#allocation4 + $0x3c4] sm:$0xf]  ;;  %v7021_v30 = vor.u32 %v8699_v13, %v7018_v16 }
  0x4d   :  { %1427 = vmatpush.bf16.msrb.mxu1 %v6937_v47  ;;  %v6746_v32 = vld [vmem:[#allocation4 + $0x3d0] sm:$0xf0]  ;;  %v8663_v33 = vld [vmem:[#allocation4 + $0x4c4] sm:$0xf]  ;;  %v6621_v38 = vor.u32 %v8599_v27, %v6618_v28 }
  0x4e   :  { %1440 = vmatpush.bf16.msrb.mxu2 %v6301_v48  ;;  %1453 = vmatpush.bf16.msrb.mxu3 %v6429_v52  ;;  %v6874_v34 = vld [vmem:[#allocation4 + $0x4d0] sm:$0xf0]  ;;  %v8695_v36 = vld [vmem:[#allocation4 + $0x5c4] sm:$0xf]  ;;  %v6749_v39 = vor.u32 %v8631_v29, %v6746_v32 }
  0x4f   :  { %v7002_v37 = vld [vmem:[#allocation4 + $0x5d0] sm:$0xf0]  ;;  %v6877_v40 = vor.u32 %v8663_v33, %v6874_v34  ;;  %v8595_v41 = vld [vmem:[#allocation4 + $0x2a4] sm:$0xf] }
  0x50   :  { %1415 = vmatpush.bf16.msrb.mxu0 %v6793_v58  ;;  %v6602_v42 = vld [vmem:[#allocation4 + $0x2b0] sm:$0xf0]  ;;  %v8627_v43 = vld [vmem:[#allocation4 + $0x3a4] sm:$0xf]  ;;  %v7005_v44 = vor.u32 %v8695_v36, %v7002_v37 }
  0x51   :  { %1428 = vmatpush.bf16.msrb.mxu1 %v6921_v62  ;;  %v6730_v45 = vld [vmem:[#allocation4 + $0x3b0] sm:$0xf0]  ;;  %v8659_v46 = vld [vmem:[#allocation4 + $0x4a4] sm:$0xf]  ;;  %v6605_v50 = vor.u32 %v8595_v41, %v6602_v42 }
  0x52   :  { %1441 = vmatpush.bf16.msrb.mxu2 %v6285_v63  ;;  %1454 = vmatpush.bf16.msrb.mxu3 %v6413_v3  ;;  %v6858_v47 = vld [vmem:[#allocation4 + $0x4b0] sm:$0xf0]  ;;  %v8691_v48 = vld [vmem:[#allocation4 + $0x5a4] sm:$0xf]  ;;  %v6733_v51 = vor.u32 %v8627_v43, %v6730_v45 }
  0x53   :  { %v6986_v49 = vld [vmem:[#allocation4 + $0x5b0] sm:$0xf0]  ;;  %v6861_v52 = vor.u32 %v8659_v46, %v6858_v47  ;;  %v8591_v53 = vld [vmem:[#allocation4 + $0x284] sm:$0xf] }
  0x54   :  { %1416 = vmatpush.bf16.msrb.mxu0 %v6777_v10  ;;  %v6586_v54 = vld [vmem:[#allocation4 + $0x290] sm:$0xf0]  ;;  %v8623_v55 = vld [vmem:[#allocation4 + $0x384] sm:$0xf]  ;;  %v6989_v56 = vor.u32 %v8691_v48, %v6986_v49 }
  0x55   :  { %1429 = vmatpush.bf16.msrb.mxu1 %v6905_v14  ;;  %v6714_v57 = vld [vmem:[#allocation4 + $0x390] sm:$0xf0]  ;;  %v8655_v58 = vld [vmem:[#allocation4 + $0x484] sm:$0xf]  ;;  %v6589_v62 = vor.u32 %v8591_v53, %v6586_v54  ;;  %v8542_v53 = vld [vmem:[#allocation4 + $0xf4] sm:$0xf0] }
  0x56   :  { %1442 = vmatpush.bf16.msrb.mxu2 %v6269_v15  ;;  %1455 = vmatpush.bf16.msrb.mxu3 %v6397_v20  ;;  %v6842_v59 = vld [vmem:[#allocation4 + $0x490] sm:$0xf0]  ;;  %v8687_v60 = vld [vmem:[#allocation4 + $0x584] sm:$0xf]  ;;  %v6717_v63 = vor.u32 %v8623_v55, %v6714_v57  ;;  %v6512_v54 = vld [vmem:[#allocation4 + $0x1e8] sm:$0xf] }
  0x57   :  { %1417 = vmatmul.bf16.vlgmr.msrb.gmra.mxu0 %v9933_v31  ;;  %v6970_v61 = vld [vmem:[#allocation4 + $0x590] sm:$0xf0]  ;;  %v6845_v0 = vor.u32 %v8655_v58, %v6842_v59  ;;  %v8587_v1 = vld [vmem:[#allocation4 + $0x264] sm:$0xf]  ;;  %v8574_v55 = vld [vmem:[#allocation4 + $0x1f4] sm:$0xf0] }
  0x58   :  { %1461 = vmatpush.bf16.msra.mxu0 %v6637_v21  ;;  %1430 = vmatmul.bf16.vlgmr.msrb.gmra.mxu1 %v9935_v35  ;;  %v6570_v2 = vld [vmem:[#allocation4 + $0x270] sm:$0xf0]  ;;  %v8619_v3 = vld [vmem:[#allocation4 + $0x364] sm:$0xf]  ;;  %v6973_v4 = vor.u32 %v8687_v60, %v6970_v61  ;;  %v6640_v57 = vld [vmem:[#allocation4 + $0x2e8] sm:$0xf] }
  0x59   :  { %1474 = vmatpush.bf16.msra.mxu1 %v6765_v23  ;;  %1443 = vmatmul.bf16.vlgmr.msrb.gmra.mxu2 %v9918_v17  ;;  %v6698_v5 = vld [vmem:[#allocation4 + $0x370] sm:$0xf0]  ;;  %v8651_v6 = vld [vmem:[#allocation4 + $0x464] sm:$0xf]  ;;  %v6573_v10 = vor.u32 %v8587_v1, %v6570_v2  ;;  %v8606_v58 = vld [vmem:[#allocation4 + $0x2f4] sm:$0xf0]  ;;  %v6513_v1 = vor.u32 %v8574_v55, %v6512_v54 }
  0x5a   :  { %1487 = vmatpush.bf16.msra.mxu2 %v6893_v24  ;;  %1500 = vmatpush.bf16.msra.mxu3 %v7021_v30  ;;  %v6826_v7 = vld [vmem:[#allocation4 + $0x470] sm:$0xf0]  ;;  %v8683_v8 = vld [vmem:[#allocation4 + $0x564] sm:$0xf]  ;;  %v6701_v11 = vor.u32 %v8619_v3, %v6698_v5  ;;  %v6768_v61 = vld [vmem:[#allocation4 + $0x3e8] sm:$0xf]  ;;  %v6641_v2 = vor.u32 %v8606_v58, %v6640_v57 }
  0x5b   :  { %1456 = vmatmul.bf16.vlgmr.msrb.gmra.mxu3 %v9920_v18  ;;  %v6954_v9 = vld [vmem:[#allocation4 + $0x570] sm:$0xf0]  ;;  %v6829_v12 = vor.u32 %v8651_v6, %v6826_v7  ;;  %v8583_v13 = vld [vmem:[#allocation4 + $0x244] sm:$0xf]  ;;  %v6368_v3 = vld [vmem:[#allocation4 + $0xc8] sm:$0xf] }
  0x5c   :  { %1462 = vmatpush.bf16.msra.mxu0 %v6621_v38  ;;  %v6554_v14 = vld [vmem:[#allocation4 + $0x250] sm:$0xf0]  ;;  %v8615_v15 = vld [vmem:[#allocation4 + $0x344] sm:$0xf]  ;;  %v6957_v16 = vor.u32 %v8683_v8, %v6954_v9  ;;  %v6496_v5 = vld [vmem:[#allocation4 + $0x1c8] sm:$0xf] }
  0x5d   :  { %1475 = vmatpush.bf16.msra.mxu1 %v6749_v39  ;;  %v6682_v19 = vld [vmem:[#allocation4 + $0x350] sm:$0xf0]  ;;  %v8647_v20 = vld [vmem:[#allocation4 + $0x444] sm:$0xf]  ;;  %v6557_v24 = vor.u32 %v8583_v13, %v6554_v14  ;;  %v8570_v7 = vld [vmem:[#allocation4 + $0x1d4] sm:$0xf0] }
  0x5e   :  { %1488 = vmatpush.bf16.msra.mxu2 %v6877_v40  ;;  %1501 = vmatpush.bf16.msra.mxu3 %v7005_v44  ;;  %v6810_v21 = vld [vmem:[#allocation4 + $0x450] sm:$0xf0]  ;;  %v8679_v22 = vld [vmem:[#allocation4 + $0x544] sm:$0xf]  ;;  %v6685_v27 = vor.u32 %v8615_v15, %v6682_v19  ;;  %v6624_v8 = vld [vmem:[#allocation4 + $0x2c8] sm:$0xf]  ;;  %v6497_v13 = vor.u32 %v8570_v7, %v6496_v5 }
  0x5f   :  { %v6938_v23 = vld [vmem:[#allocation4 + $0x550] sm:$0xf0]  ;;  %v6813_v28 = vor.u32 %v8647_v20, %v6810_v21  ;;  %v8579_v29 = vld [vmem:[#allocation4 + $0x224] sm:$0xf]  ;;  %v8602_v9 = vld [vmem:[#allocation4 + $0x2d4] sm:$0xf0] }
  0x60   :  { %1463 = vmatpush.bf16.msra.mxu0 %v6605_v50  ;;  %v6538_v30 = vld [vmem:[#allocation4 + $0x230] sm:$0xf0]  ;;  %v8611_v32 = vld [vmem:[#allocation4 + $0x324] sm:$0xf]  ;;  %v6941_v33 = vor.u32 %v8679_v22, %v6938_v23  ;;  %v6625_v14 = vor.u32 %v8602_v9, %v6624_v8  ;;  %v6352_v15 = vld [vmem:[#allocation4 + $0xa8] sm:$0xf] }
  0x61   :  { %1476 = vmatpush.bf16.msra.mxu1 %v6733_v51  ;;  %v6666_v34 = vld [vmem:[#allocation4 + $0x330] sm:$0xf0]  ;;  %v8643_v36 = vld [vmem:[#allocation4 + $0x424] sm:$0xf]  ;;  %v6541_v40 = vor.u32 %v8579_v29, %v6538_v30  ;;  %v6480_v19 = vld [vmem:[#allocation4 + $0x1a8] sm:$0xf] }
  0x62   :  { %1489 = vmatpush.bf16.msra.mxu2 %v6861_v52  ;;  %1502 = vmatpush.bf16.msra.mxu3 %v6989_v56  ;;  %v6794_v37 = vld [vmem:[#allocation4 + $0x430] sm:$0xf0]  ;;  %v8675_v38 = vld [vmem:[#allocation4 + $0x524] sm:$0xf]  ;;  %v6669_v44 = vor.u32 %v8611_v32, %v6666_v34  ;;  %v6384_v52 = vld [vmem:[#allocation4 + $0xe8] sm:$0xf] }
  0x63   :  { %v6922_v39 = vld [vmem:[#allocation4 + $0x530] sm:$0xf0]  ;;  %v8575_v41 = vld [vmem:[#allocation4 + $0x204] sm:$0xf]  ;;  %v6797_v45 = vor.u32 %v8643_v36, %v6794_v37  ;;  %v8566_v21 = vld [vmem:[#allocation4 + $0x1b4] sm:$0xf0] }
  0x64   :  { %1464 = vmatpush.bf16.msra.mxu0 %v6589_v62  ;;  %v6522_v42 = vld [vmem:[#allocation4 + $0x210] sm:$0xf0]  ;;  %v8607_v43 = vld [vmem:[#allocation4 + $0x304] sm:$0xf]  ;;  %v6925_v49 = vor.u32 %v8675_v38, %v6922_v39  ;;  %v8638_v62 = vld [vmem:[#allocation4 + $0x3f4] sm:$0xf0]  ;;  %v6481_v29 = vor.u32 %v8566_v21, %v6480_v19 }
  0x65   :  { %1477 = vmatpush.bf16.msra.mxu1 %v6717_v63  ;;  %v6650_v46 = vld [vmem:[#allocation4 + $0x310] sm:$0xf0]  ;;  %v8639_v47 = vld [vmem:[#allocation4 + $0x404] sm:$0xf]  ;;  %v6525_v56 = vor.u32 %v8575_v41, %v6522_v42  ;;  %v6769_v6 = vor.u32 %v8638_v62, %v6768_v61  ;;  %v6608_v22 = vld [vmem:[#allocation4 + $0x2a8] sm:$0xf] }
  0x66   :  { %1490 = vmatpush.bf16.msra.mxu2 %v6845_v0  ;;  %1503 = vmatpush.bf16.msra.mxu3 %v6973_v4  ;;  %v6778_v48 = vld [vmem:[#allocation4 + $0x410] sm:$0xf0]  ;;  %v8671_v50 = vld [vmem:[#allocation4 + $0x504] sm:$0xf]  ;;  %v6653_v59 = vor.u32 %v8607_v43, %v6650_v46  ;;  %v6385_v0 = vor.u32 %v8542_v53, %v6384_v52  ;;  %v8538_v4 = vld [vmem:[#allocation4 + $0xd4] sm:$0xf0] }
  0x67   :  { %v6906_v51 = vld [vmem:[#allocation4 + $0x510] sm:$0xf0]  ;;  %v6781_v60 = vor.u32 %v8639_v47, %v6778_v48  ;;  %v8598_v23 = vld [vmem:[#allocation4 + $0x2b4] sm:$0xf0]  ;;  %v6336_v32 = vld [vmem:[#allocation4 + $0x88] sm:$0xf] }
  0x68   :  { %1465 = vmatpush.bf16.msra.mxu0 %v6573_v10  ;;  %v6909_v63 = vor.u32 %v8671_v50, %v6906_v51  ;;  %v6752_v10 = vld [vmem:[#allocation4 + $0x3c8] sm:$0xf]  ;;  %v6609_v30 = vor.u32 %v8598_v23, %v6608_v22  ;;  %v8562_v37 = vld [vmem:[#allocation4 + $0x194] sm:$0xf0] }
  0x69   :  { %1478 = vmatpush.bf16.msra.mxu1 %v6701_v11  ;;  %v8634_v11 = vld [vmem:[#allocation4 + $0x3d4] sm:$0xf0]  ;;  %v6464_v34 = vld [vmem:[#allocation4 + $0x188] sm:$0xf] }
  0x6a   :  { %1491 = vmatpush.bf16.msra.mxu2 %v6829_v12  ;;  %1504 = vmatpush.bf16.msra.mxu3 %v6957_v16  ;;  %v6369_v12 = vor.u32 %v8538_v4, %v6368_v3  ;;  %v8534_v16 = vld [vmem:[#allocation4 + $0xb4] sm:$0xf0]  ;;  %v6753_v20 = vor.u32 %v8634_v11, %v6752_v10  ;;  %v6592_v38 = vld [vmem:[#allocation4 + $0x288] sm:$0xf]  ;;  %v6465_v43 = vor.u32 %v8562_v37, %v6464_v34  ;;  %v8540_v37 = vld [vmem:[#allocation4 + $0xec] sm:$0xf] }
  0x6b   :  { %v8594_v39 = vld [vmem:[#allocation4 + $0x294] sm:$0xf0]  ;;  %v6448_v47 = vld [vmem:[#allocation4 + $0x168] sm:$0xf] }
  0x6c   :  { %1466 = vmatpush.bf16.msra.mxu0 %v6557_v24  ;;  %v6736_v24 = vld [vmem:[#allocation4 + $0x3a8] sm:$0xf]  ;;  %v8626_v41 = vld [vmem:[#allocation4 + $0x394] sm:$0xf0] }
  0x6d   :  { %1479 = vmatpush.bf16.msra.mxu1 %v6685_v27  ;;  %v8630_v27 = vld [vmem:[#allocation4 + $0x3b4] sm:$0xf0]  ;;  %v6576_v50 = vld [vmem:[#allocation4 + $0x268] sm:$0xf] }
  0x6e   :  { %1492 = vmatpush.bf16.msra.mxu2 %v6813_v28  ;;  %1505 = vmatpush.bf16.msra.mxu3 %v6941_v33  ;;  %v6353_v28 = vor.u32 %v8534_v16, %v6352_v15  ;;  %v8530_v33 = vld [vmem:[#allocation4 + $0x94] sm:$0xf0]  ;;  %v6737_v36 = vor.u32 %v8630_v27, %v6736_v24  ;;  %v6704_v52 = vld [vmem:[#allocation4 + $0x368] sm:$0xf] }
  0x6f   :  { %v6337_v42 = vor.u32 %v8530_v33, %v6336_v32  ;;  %v8526_v46 = vld [vmem:[#allocation4 + $0x74] sm:$0xf0]  ;;  %v6304_v57 = vld [vmem:[#allocation4 + $0x48] sm:$0xf] }
  0x70   :  { %1467 = vmatpush.bf16.msra.mxu0 %v6541_v40  ;;  %v6720_v40 = vld [vmem:[#allocation4 + $0x388] sm:$0xf]  ;;  %v8590_v51 = vld [vmem:[#allocation4 + $0x274] sm:$0xf0] }
  0x71   :  { %1480 = vmatpush.bf16.msra.mxu1 %v6669_v44  ;;  %v6593_v44 = vor.u32 %v8594_v39, %v6592_v38  ;;  %v6721_v48 = vor.u32 %v8626_v41, %v6720_v40  ;;  %v8622_v53 = vld [vmem:[#allocation4 + $0x374] sm:$0xf0]  ;;  %v6560_v62 = vld [vmem:[#allocation4 + $0x248] sm:$0xf]  ;;  %v6386_v38 = vld [vmem:[#allocation4 + $0xf8] sm:$0xf0] }
  0x72   :  { %1493 = vmatpush.bf16.msra.mxu2 %v6797_v45  ;;  %1506 = vmatpush.bf16.msra.mxu3 %v6925_v49  ;;  %v6320_v45 = vld [vmem:[#allocation4 + $0x68] sm:$0xf]  ;;  %v8558_v49 = vld [vmem:[#allocation4 + $0x174] sm:$0xf0]  ;;  %v8572_v41 = vld [vmem:[#allocation4 + $0x1ec] sm:$0xf] }
  0x73   :  { %v6321_v54 = vor.u32 %v8526_v46, %v6320_v45  ;;  %v6449_v55 = vor.u32 %v8558_v49, %v6448_v47  ;;  %v8522_v58 = vld [vmem:[#allocation4 + $0x54] sm:$0xf0]  ;;  %v6288_v5 = vld [vmem:[#allocation4 + $0x28] sm:$0xf]  ;;  %v6389_v46 = vor.u32 %v8540_v37, %v6386_v38 }
  0x74   :  { %1468 = vmatpush.bf16.msra.mxu0 %v6525_v56  ;;  %v6577_v56 = vor.u32 %v8590_v51, %v6576_v50  ;;  %v8554_v61 = vld [vmem:[#allocation4 + $0x154] sm:$0xf0]  ;;  %v6416_v7 = vld [vmem:[#allocation4 + $0x128] sm:$0xf] }
  0x75   :  { %1481 = vmatpush.bf16.msra.mxu1 %v6653_v59  ;;  %v6432_v59 = vld [vmem:[#allocation4 + $0x148] sm:$0xf]  ;;  %v8550_v9 = vld [vmem:[#allocation4 + $0x134] sm:$0xf0] }
  0x76   :  { %1494 = vmatpush.bf16.msra.mxu2 %v6781_v60  ;;  %1507 = vmatpush.bf16.msra.mxu3 %v6909_v63  ;;  %v6705_v60 = vor.u32 %v8622_v53, %v6704_v52  ;;  %v8586_v63 = vld [vmem:[#allocation4 + $0x254] sm:$0xf0]  ;;  %v6433_v3 = vor.u32 %v8554_v61, %v6432_v59  ;;  %v6544_v10 = vld [vmem:[#allocation4 + $0x228] sm:$0xf]  ;;  %v6417_v19 = vor.u32 %v8550_v9, %v6416_v7  ;;  %v8536_v52 = vld [vmem:[#allocation4 + $0xcc] sm:$0xf] }
  0x77   :  { %1469 = vmatmul.bf16.vlgmr.msra.gmra.mxu0 %v9922_v25  ;;  %v6561_v4 = vor.u32 %v8586_v63, %v6560_v62  ;;  %v8582_v11 = vld [vmem:[#allocation4 + $0x234] sm:$0xf0]  ;;  %v6272_v15 = vld [vmem:[#allocation4 + $0x8] sm:$0xf]  ;;  %v6370_v53 = vld [vmem:[#allocation4 + $0xd8] sm:$0xf0] }
  0x78   :  { %1513 = vmatpush.bf16.msrb.mxu0 %v6385_v0  ;;  %1482 = vmatmul.bf16.vlgmr.msra.gmra.mxu1 %v9924_v26  ;;  %v6688_v0 = vld [vmem:[#allocation4 + $0x348] sm:$0xf]  ;;  %v8514_v16 = vld [vmem:[#allocation4 + $0x14] sm:$0xf0] }
  0x79   :  { %1526 = vmatpush.bf16.msrb.mxu1 %v6513_v1  ;;  %1495 = vmatmul.bf16.vlgmr.msra.gmra.mxu2 %v9933_v31  ;;  %v8618_v1 = vld [vmem:[#allocation4 + $0x354] sm:$0xf0]  ;;  %v6400_v21 = vld [vmem:[#allocation4 + $0x108] sm:$0xf]  ;;  %v6273_v34 = vor.u32 %v8514_v16, %v6272_v15  ;;  %v6466_v15 = vld [vmem:[#allocation4 + $0x198] sm:$0xf0] }
  0x7a   :  { %1539 = vmatpush.bf16.msrb.mxu2 %v6641_v2  ;;  %1552 = vmatpush.bf16.msrb.mxu3 %v6769_v6  ;;  %v6305_v2 = vor.u32 %v8522_v58, %v6304_v57  ;;  %v8518_v6 = vld [vmem:[#allocation4 + $0x34] sm:$0xf0]  ;;  %v6689_v8 = vor.u32 %v8618_v1, %v6688_v0  ;;  %v6528_v23 = vld [vmem:[#allocation4 + $0x208] sm:$0xf]  ;;  %v6373_v58 = vor.u32 %v8536_v52, %v6370_v53  ;;  %v8532_v0 = vld [vmem:[#allocation4 + $0xac] sm:$0xf] }
  0x7b   :  { %1508 = vmatmul.bf16.vlgmr.msra.gmra.mxu3 %v9935_v35  ;;  %v8546_v22 = vld [vmem:[#allocation4 + $0x114] sm:$0xf0]  ;;  %v7024_v33 = vld [vmem:[#allocation4 + $0x5e8] sm:$0xf]  ;;  %v6354_v1 = vld [vmem:[#allocation4 + $0xb8] sm:$0xf0] }
  0x7c   :  { %1514 = vmatpush.bf16.msrb.mxu0 %v6369_v12  ;;  %v6672_v12 = vld [vmem:[#allocation4 + $0x328] sm:$0xf]  ;;  %v8578_v27 = vld [vmem:[#allocation4 + $0x214] sm:$0xf0]  ;;  %v6401_v39 = vor.u32 %v8546_v22, %v6400_v21 }
  0x7d   :  { %1527 = vmatpush.bf16.msrb.mxu1 %v6497_v13  ;;  %v8614_v13 = vld [vmem:[#allocation4 + $0x334] sm:$0xf0]  ;;  %v6529_v40 = vor.u32 %v8578_v27, %v6528_v23  ;;  %v6880_v47 = vld [vmem:[#allocation4 + $0x4c8] sm:$0xf] }
  0x7e   :  { %1540 = vmatpush.bf16.msrb.mxu2 %v6625_v14  ;;  %1553 = vmatpush.bf16.msrb.mxu3 %v6753_v20  ;;  %v6289_v14 = vor.u32 %v8518_v6, %v6288_v5  ;;  %v6545_v20 = vor.u32 %v8582_v11, %v6544_v10  ;;  %v6673_v24 = vor.u32 %v8614_v13, %v6672_v12  ;;  %v8670_v32 = vld [vmem:[#allocation4 + $0x4f4] sm:$0xf0]  ;;  %v7008_v49 = vld [vmem:[#allocation4 + $0x5c8] sm:$0xf]  ;;  %v8528_v12 = vld [vmem:[#allocation4 + $0x8c] sm:$0xf] }
  0x7f   :  { %v8698_v51 = vld [vmem:[#allocation4 + $0x5d4] sm:$0xf0]  ;;  %v6864_v59 = vld [vmem:[#allocation4 + $0x4a8] sm:$0xf]  ;;  %v6357_v6 = vor.u32 %v8532_v0, %v6354_v1  ;;  %v6338_v13 = vld [vmem:[#allocation4 + $0x98] sm:$0xf0] }
  0x80   :  { %1515 = vmatpush.bf16.msrb.mxu0 %v6353_v28  ;;  %v6656_v28 = vld [vmem:[#allocation4 + $0x308] sm:$0xf]  ;;  %v7009_v57 = vor.u32 %v8698_v51, %v7008_v49  ;;  %v8694_v63 = vld [vmem:[#allocation4 + $0x5b4] sm:$0xf0]  ;;  %v8512_v1 = vld [vmem:[#allocation4 + $0xc] sm:$0xf] }
  0x81   :  { %1528 = vmatpush.bf16.msrb.mxu1 %v6481_v29  ;;  %v8610_v29 = vld [vmem:[#allocation4 + $0x314] sm:$0xf0]  ;;  %v6992_v61 = vld [vmem:[#allocation4 + $0x5a8] sm:$0xf] }
  0x82   :  { %1541 = vmatpush.bf16.msrb.mxu2 %v6609_v30  ;;  %1554 = vmatpush.bf16.msrb.mxu3 %v6737_v36  ;;  %v6896_v30 = vld [vmem:[#allocation4 + $0x4e8] sm:$0xf]  ;;  %v8702_v36 = vld [vmem:[#allocation4 + $0x5f4] sm:$0xf0]  ;;  %v6993_v5 = vor.u32 %v8694_v63, %v6992_v61 }
  0x83   :  { %v7025_v45 = vor.u32 %v8702_v36, %v7024_v33  ;;  %v6848_v7 = vld [vmem:[#allocation4 + $0x488] sm:$0xf]  ;;  %v8690_v11 = vld [vmem:[#allocation4 + $0x594] sm:$0xf0] }
  0x84   :  { %1516 = vmatpush.bf16.msrb.mxu0 %v6337_v42  ;;  %v6514_v42 = vld [vmem:[#allocation4 + $0x1f8] sm:$0xf0]  ;;  %v6976_v9 = vld [vmem:[#allocation4 + $0x588] sm:$0xf]  ;;  %v8654_v22 = vld [vmem:[#allocation4 + $0x474] sm:$0xf0] }
  0x85   :  { %1529 = vmatpush.bf16.msrb.mxu1 %v6465_v43  ;;  %v6657_v43 = vor.u32 %v8610_v29, %v6656_v28  ;;  %v6517_v50 = vor.u32 %v8572_v41, %v6514_v42  ;;  %v6832_v21 = vld [vmem:[#allocation4 + $0x468] sm:$0xf]  ;;  %v8686_v27 = vld [vmem:[#allocation4 + $0x574] sm:$0xf0]  ;;  %v8524_v28 = vld [vmem:[#allocation4 + $0x6c] sm:$0xf] }
  0x86   :  { %1542 = vmatpush.bf16.msrb.mxu2 %v6593_v44  ;;  %1555 = vmatpush.bf16.msrb.mxu3 %v6721_v48  ;;  %v6897_v44 = vor.u32 %v8670_v32, %v6896_v30  ;;  %v8666_v48 = vld [vmem:[#allocation4 + $0x4d4] sm:$0xf0]  ;;  %v6960_v23 = vld [vmem:[#allocation4 + $0x568] sm:$0xf]  ;;  %v6322_v29 = vld [vmem:[#allocation4 + $0x78] sm:$0xf0]  ;;  %v6833_v33 = vor.u32 %v8654_v22, %v6832_v21 }
  0x87   :  { %v8556_v30 = vld [vmem:[#allocation4 + $0x16c] sm:$0xf]  ;;  %v6450_v32 = vld [vmem:[#allocation4 + $0x178] sm:$0xf0]  ;;  %v6325_v36 = vor.u32 %v8524_v28, %v6322_v29  ;;  %v6816_v37 = vld [vmem:[#allocation4 + $0x448] sm:$0xf] }
  0x88   :  { %1517 = vmatpush.bf16.msrb.mxu0 %v6321_v54  ;;  %v8568_v54 = vld [vmem:[#allocation4 + $0x1cc] sm:$0xf]  ;;  %v8650_v38 = vld [vmem:[#allocation4 + $0x454] sm:$0xf0]  ;;  %v6800_v49 = vld [vmem:[#allocation4 + $0x428] sm:$0xf] }
  0x89   :  { %1530 = vmatpush.bf16.msrb.mxu1 %v6449_v55  ;;  %v6498_v55 = vld [vmem:[#allocation4 + $0x1d8] sm:$0xf0]  ;;  %v8682_v41 = vld [vmem:[#allocation4 + $0x554] sm:$0xf0]  ;;  %v8520_v42 = vld [vmem:[#allocation4 + $0x4c] sm:$0xf] }
  0x8a   :  { %1543 = vmatpush.bf16.msrb.mxu2 %v6577_v56  ;;  %1556 = vmatpush.bf16.msrb.mxu3 %v6705_v60  ;;  %v6881_v56 = vor.u32 %v8666_v48, %v6880_v47  ;;  %v8662_v60 = vld [vmem:[#allocation4 + $0x4b4] sm:$0xf0]  ;;  %v6501_v62 = vor.u32 %v8568_v54, %v6498_v55  ;;  %v6928_v51 = vld [vmem:[#allocation4 + $0x528] sm:$0xf]  ;;  %v8516_v54 = vld [vmem:[#allocation4 + $0x2c] sm:$0xf] }
  0x8b   :  { %v8678_v53 = vld [vmem:[#allocation4 + $0x534] sm:$0xf0]  ;;  %v6290_v55 = vld [vmem:[#allocation4 + $0x38] sm:$0xf0]  ;;  %v6912_v63 = vld [vmem:[#allocation4 + $0x508] sm:$0xf] }
  0x8c   :  { %1518 = vmatpush.bf16.msrb.mxu0 %v6305_v2  ;;  %v8564_v2 = vld [vmem:[#allocation4 + $0x1ac] sm:$0xf]  ;;  %v6929_v61 = vor.u32 %v8678_v53, %v6928_v51  ;;  %v8674_v0 = vld [vmem:[#allocation4 + $0x514] sm:$0xf0]  ;;  %v6754_v29 = vld [vmem:[#allocation4 + $0x3d8] sm:$0xf0] }
  0x8d   :  { %1531 = vmatpush.bf16.msrb.mxu1 %v6433_v3  ;;  %v6482_v3 = vld [vmem:[#allocation4 + $0x1b8] sm:$0xf0]  ;;  %v8592_v51 = vld [vmem:[#allocation4 + $0x28c] sm:$0xf] }
  0x8e   :  { %1544 = vmatpush.bf16.msrb.mxu2 %v6561_v4  ;;  %1557 = vmatpush.bf16.msrb.mxu3 %v6689_v8  ;;  %v6865_v4 = vor.u32 %v8662_v60, %v6864_v59  ;;  %v8658_v8 = vld [vmem:[#allocation4 + $0x494] sm:$0xf0]  ;;  %v6485_v10 = vor.u32 %v8564_v2, %v6482_v3  ;;  %v6784_v59 = vld [vmem:[#allocation4 + $0x408] sm:$0xf]  ;;  %v6274_v3 = vld [vmem:[#allocation4 + $0x18] sm:$0xf0] }
  0x8f   :  { %v6849_v16 = vor.u32 %v8658_v8, %v6848_v7  ;;  %v8642_v60 = vld [vmem:[#allocation4 + $0x414] sm:$0xf0]  ;;  %v6642_v7 = vld [vmem:[#allocation4 + $0x2f8] sm:$0xf0]  ;;  %v8636_v8 = vld [vmem:[#allocation4 + $0x3ec] sm:$0xf] }
  0x90   :  { %1519 = vmatpush.bf16.msrb.mxu0 %v6289_v14  ;;  %v8560_v14 = vld [vmem:[#allocation4 + $0x18c] sm:$0xf] }
  0x91   :  { %1532 = vmatpush.bf16.msrb.mxu1 %v6417_v19  ;;  %v6977_v19 = vor.u32 %v8690_v11, %v6976_v9  ;;  %v6785_v9 = vor.u32 %v8642_v60, %v6784_v59  ;;  %v8668_v11 = vld [vmem:[#allocation4 + $0x4ec] sm:$0xf] }
  0x92   :  { %1545 = vmatpush.bf16.msrb.mxu2 %v6545_v20  ;;  %1558 = vmatpush.bf16.msrb.mxu3 %v6673_v24  ;;  %v6341_v20 = vor.u32 %v8528_v12, %v6338_v13  ;;  %v6469_v24 = vor.u32 %v8560_v14, %v6466_v15  ;;  %v6898_v12 = vld [vmem:[#allocation4 + $0x4f8] sm:$0xf0]  ;;  %v6913_v13 = vor.u32 %v8674_v0, %v6912_v63  ;;  %v8700_v15 = vld [vmem:[#allocation4 + $0x5ec] sm:$0xf] }
  0x93   :  { %v6277_v14 = vor.u32 %v8512_v1, %v6274_v3  ;;  %v6901_v22 = vor.u32 %v8668_v11, %v6898_v12  ;;  %v8624_v53 = vld [vmem:[#allocation4 + $0x38c] sm:$0xf]  ;;  %v6706_v1 = vld [vmem:[#allocation4 + $0x378] sm:$0xf0] }
  0x94   :  { %1520 = vmatpush.bf16.msrb.mxu0 %v6273_v34  ;;  %v6961_v34 = vor.u32 %v8686_v27, %v6960_v23  ;;  %v8600_v23 = vld [vmem:[#allocation4 + $0x2cc] sm:$0xf]  ;;  %v6834_v3 = vld [vmem:[#allocation4 + $0x478] sm:$0xf0] }
  0x95   :  { %1533 = vmatpush.bf16.msrb.mxu1 %v6401_v39  ;;  %v6944_v39 = vld [vmem:[#allocation4 + $0x548] sm:$0xf]  ;;  %v8632_v27 = vld [vmem:[#allocation4 + $0x3cc] sm:$0xf] }
  0x96   :  { %1546 = vmatpush.bf16.msrb.mxu2 %v6529_v40  ;;  %1559 = vmatpush.bf16.msrb.mxu3 %v6657_v43  ;;  %v6453_v40 = vor.u32 %v8556_v30, %v6450_v32  ;;  %v6306_v43 = vld [vmem:[#allocation4 + $0x58] sm:$0xf0]  ;;  %v6945_v47 = vor.u32 %v8682_v41, %v6944_v39  ;;  %v8664_v30 = vld [vmem:[#allocation4 + $0x4cc] sm:$0xf] }
  0x97   :  { %1521 = vmatmul.bf16.vlgmr.msrb.gmra.mxu0 %v9918_v17  ;;  %v6309_v48 = vor.u32 %v8520_v42, %v6306_v43  ;;  %v6882_v32 = vld [vmem:[#allocation4 + $0x4d8] sm:$0xf0]  ;;  %v8596_v39 = vld [vmem:[#allocation4 + $0x2ac] sm:$0xf] }
  0x98   :  { %1565 = vmatpush.bf16.msra.mxu0 %v6897_v44  ;;  %1534 = vmatmul.bf16.vlgmr.msrb.gmra.mxu1 %v9920_v18  ;;  %v8552_v44 = vld [vmem:[#allocation4 + $0x14c] sm:$0xf]  ;;  %v6738_v43 = vld [vmem:[#allocation4 + $0x3b8] sm:$0xf0] }
  0x99   :  { %1578 = vmatpush.bf16.msra.mxu1 %v7025_v45  ;;  %1547 = vmatmul.bf16.vlgmr.msrb.gmra.mxu2 %v9922_v25  ;;  %v6434_v45 = vld [vmem:[#allocation4 + $0x158] sm:$0xf0]  ;;  %v8628_v41 = vld [vmem:[#allocation4 + $0x3ac] sm:$0xf] }
  0x9a   :  { %1591 = vmatpush.bf16.msra.mxu2 %v6389_v46  ;;  %1604 = vmatpush.bf16.msra.mxu3 %v6517_v50  ;;  %v6817_v46 = vor.u32 %v8650_v38, %v6816_v37  ;;  %v8646_v50 = vld [vmem:[#allocation4 + $0x434] sm:$0xf0]  ;;  %v6437_v52 = vor.u32 %v8552_v44, %v6434_v45  ;;  %v6757_v37 = vor.u32 %v8632_v27, %v6754_v29  ;;  %v8660_v44 = vld [vmem:[#allocation4 + $0x4ac] sm:$0xf]  ;;  %v6866_v45 = vld [vmem:[#allocation4 + $0x4b8] sm:$0xf0] }
  0x9b   :  { %1560 = vmatmul.bf16.vlgmr.msrb.gmra.mxu3 %v9924_v26  ;;  %v6885_v38 = vor.u32 %v8664_v30, %v6882_v32  ;;  %v8620_v63 = vld [vmem:[#allocation4 + $0x36c] sm:$0xf]  ;;  %v6674_v32 = vld [vmem:[#allocation4 + $0x338] sm:$0xf0] }
  0x9c   :  { %1566 = vmatpush.bf16.msra.mxu0 %v6881_v56  ;;  %v8548_v56 = vld [vmem:[#allocation4 + $0x12c] sm:$0xf] }
  0x9d   :  { %1579 = vmatpush.bf16.msra.mxu1 %v7009_v57  ;;  %v6418_v57 = vld [vmem:[#allocation4 + $0x138] sm:$0xf0]  ;;  %v8616_v11 = vld [vmem:[#allocation4 + $0x34c] sm:$0xf] }
  0x9e   :  { %1592 = vmatpush.bf16.msra.mxu2 %v6373_v58  ;;  %1605 = vmatpush.bf16.msra.mxu3 %v6501_v62  ;;  %v6801_v58 = vor.u32 %v8646_v50, %v6800_v49  ;;  %v6293_v62 = vor.u32 %v8516_v54, %v6290_v55  ;;  %v6421_v2 = vor.u32 %v8548_v56, %v6418_v57  ;;  %v6722_v55 = vld [vmem:[#allocation4 + $0x398] sm:$0xf0]  ;;  %v8656_v56 = vld [vmem:[#allocation4 + $0x48c] sm:$0xf] }
  0x9f   :  { %v6741_v49 = vor.u32 %v8628_v41, %v6738_v43  ;;  %v6869_v50 = vor.u32 %v8660_v44, %v6866_v45  ;;  %v6850_v57 = vld [vmem:[#allocation4 + $0x498] sm:$0xf0]  ;;  %v6725_v60 = vor.u32 %v8624_v53, %v6722_v55  ;;  %v8580_v27 = vld [vmem:[#allocation4 + $0x22c] sm:$0xf] }
  0xa0   :  { %1567 = vmatpush.bf16.msra.mxu0 %v6865_v4  ;;  %v8544_v4 = vld [vmem:[#allocation4 + $0x10c] sm:$0xf]  ;;  %v6658_v45 = vld [vmem:[#allocation4 + $0x318] sm:$0xf0] }
  0xa1   :  { %1580 = vmatpush.bf16.msra.mxu1 %v6993_v5  ;;  %v6402_v5 = vld [vmem:[#allocation4 + $0x118] sm:$0xf0]  ;;  %v8612_v29 = vld [vmem:[#allocation4 + $0x32c] sm:$0xf] }
  0xa2   :  { %1593 = vmatpush.bf16.msra.mxu2 %v6357_v6  ;;  %1606 = vmatpush.bf16.msra.mxu3 %v6485_v10  ;;  %v8604_v6 = vld [vmem:[#allocation4 + $0x2ec] sm:$0xf]  ;;  %v6770_v10 = vld [vmem:[#allocation4 + $0x3f8] sm:$0xf0] }
  0xa3   :  { %v6773_v21 = vor.u32 %v8636_v8, %v6770_v10  ;;  %v6562_v10 = vld [vmem:[#allocation4 + $0x258] sm:$0xf0]  ;;  %v8576_v41 = vld [vmem:[#allocation4 + $0x20c] sm:$0xf] }
  0xa4   :  { %1568 = vmatpush.bf16.msra.mxu0 %v6849_v16  ;;  %v7026_v16 = vld [vmem:[#allocation4 + $0x5f8] sm:$0xf0]  ;;  %v8608_v43 = vld [vmem:[#allocation4 + $0x30c] sm:$0xf] }
  0xa5   :  { %1581 = vmatpush.bf16.msra.mxu1 %v6977_v19  ;;  %v6405_v19 = vor.u32 %v8544_v4, %v6402_v5  ;;  %v7029_v28 = vor.u32 %v8700_v15, %v7026_v16  ;;  %v8684_v4 = vld [vmem:[#allocation4 + $0x56c] sm:$0xf]  ;;  %v6962_v5 = vld [vmem:[#allocation4 + $0x578] sm:$0xf0] }
  0xa6   :  { %1594 = vmatpush.bf16.msra.mxu2 %v6341_v20  ;;  %1607 = vmatpush.bf16.msra.mxu3 %v6469_v24  ;;  %v6645_v20 = vor.u32 %v8604_v6, %v6642_v7  ;;  %v6626_v24 = vld [vmem:[#allocation4 + $0x2d8] sm:$0xf0]  ;;  %v6709_v7 = vor.u32 %v8620_v63, %v6706_v1  ;;  %v6965_v12 = vor.u32 %v8684_v4, %v6962_v5  ;;  %v8680_v16 = vld [vmem:[#allocation4 + $0x54c] sm:$0xf] }
  0xa7   :  { %v6818_v15 = vld [vmem:[#allocation4 + $0x458] sm:$0xf0]  ;;  %v9537_v4 = vld [vmem:[%s10610_s7 + $0x28] sm:$0xff]  }
  0xa8   :  { %1569 = vmatpush.bf16.msra.mxu0 %v6833_v33  ;;  %v8696_v33 = vld [vmem:[#allocation4 + $0x5cc] sm:$0xf]  ;;  %v9547_v63 = vld [vmem:[%s10610_s7 + $0x78] sm:$0xff]  }
  0xa9   :  { %1582 = vmatpush.bf16.msra.mxu1 %v6961_v34  ;;  %v7010_v34 = vld [vmem:[#allocation4 + $0x5d8] sm:$0xf0]  ;;  %v9131_v5 = vunpack.c.l.bf16 %v9547_v63 }
  0xaa   :  { %1595 = vmatpush.bf16.msra.mxu2 %v6325_v36  ;;  %1608 = vmatpush.bf16.msra.mxu3 %v6453_v40  ;;  %v6629_v36 = vor.u32 %v8600_v23, %v6626_v24  ;;  %v6610_v40 = vld [vmem:[#allocation4 + $0x2b8] sm:$0xf0]  ;;  %v7013_v42 = vor.u32 %v8696_v33, %v7010_v34  ;;  %v8644_v33 = vld [vmem:[#allocation4 + $0x42c] sm:$0xf] }
  0xab   :  { %v6802_v34 = vld [vmem:[#allocation4 + $0x438] sm:$0xf0] }
  0xac   :  { %1570 = vmatpush.bf16.msra.mxu0 %v6817_v46  ;;  %v8692_v46 = vld [vmem:[#allocation4 + $0x5ac] sm:$0xf] }
  0xad   :  { %1583 = vmatpush.bf16.msra.mxu1 %v6945_v47  ;;  %v6994_v47 = vld [vmem:[#allocation4 + $0x5b8] sm:$0xf0] }
  0xae   :  { %1596 = vmatpush.bf16.msra.mxu2 %v6309_v48  ;;  %1609 = vmatpush.bf16.msra.mxu3 %v6437_v52  ;;  %v6613_v48 = vor.u32 %v8596_v39, %v6610_v40  ;;  %v6594_v52 = vld [vmem:[#allocation4 + $0x298] sm:$0xf0]  ;;  %v6997_v54 = vor.u32 %v8692_v46, %v6994_v47  ;;  %v6677_v39 = vor.u32 %v8612_v29, %v6674_v32  ;;  %v8640_v46 = vld [vmem:[#allocation4 + $0x40c] sm:$0xf] }
  0xaf   :  { %v6597_v59 = vor.u32 %v8592_v51, %v6594_v52  ;;  %v6805_v40 = vor.u32 %v8644_v33, %v6802_v34  ;;  %v6786_v47 = vld [vmem:[#allocation4 + $0x418] sm:$0xf0] }
  0xb0   :  { %1571 = vmatpush.bf16.msra.mxu0 %v6801_v58  ;;  %v8688_v58 = vld [vmem:[#allocation4 + $0x58c] sm:$0xf]  ;;  %v9539_v51 = vld [vmem:[%s10610_s7 + $0x38] sm:$0xff]  }
  0xb1   :  { %1584 = vmatpush.bf16.msra.mxu1 %v6929_v61  ;;  %v8588_v61 = vld [vmem:[#allocation4 + $0x26c] sm:$0xf] }
  0xb2   :  { %1597 = vmatpush.bf16.msra.mxu2 %v6293_v62  ;;  %1610 = vmatpush.bf16.msra.mxu3 %v6421_v2  ;;  %v6578_v62 = vld [vmem:[#allocation4 + $0x278] sm:$0xf0]  ;;  %v8652_v2 = vld [vmem:[#allocation4 + $0x46c] sm:$0xf] }
  0xb3   :  { %v6581_v6 = vor.u32 %v8588_v61, %v6578_v62  ;;  %v6837_v8 = vor.u32 %v8652_v2, %v6834_v3  ;;  %v9132_v2 = vunpack.c.h.bf16 %v9547_v63  ;;  %v9546_v3 = vld [vmem:[%s10610_s7 + $0x70] sm:$0xff]  }
  0xb4   :  { %1572 = vmatpush.bf16.msra.mxu0 %v6785_v9  ;;  %v8584_v9 = vld [vmem:[#allocation4 + $0x24c] sm:$0xf] }
  0xb5   :  { %1585 = vmatpush.bf16.msra.mxu1 %v6913_v13  ;;  %v6690_v13 = vld [vmem:[#allocation4 + $0x358] sm:$0xf0] }
  0xb6   :  { %1598 = vmatpush.bf16.msra.mxu2 %v6277_v14  ;;  %1611 = vmatpush.bf16.msra.mxu3 %v6405_v19  ;;  %v8648_v14 = vld [vmem:[#allocation4 + $0x44c] sm:$0xf]  ;;  %v6946_v19 = vld [vmem:[#allocation4 + $0x558] sm:$0xf0]  ;;  %v6693_v23 = vor.u32 %v8616_v11, %v6690_v13 }
  0xb7   :  { %1573 = vmatmul.bf16.vlgmr.msra.gmra.mxu0 %v9933_v31  ;;  %v6821_v24 = vor.u32 %v8648_v14, %v6818_v15  ;;  %v6949_v30 = vor.u32 %v8680_v16, %v6946_v19  ;;  %v9545_v13 = vld [vmem:[%s10610_s7 + $0x68] sm:$0xff]   ;;  %v9535_v15 = vld [vmem:[%s10610_s7 + $0x18] sm:$0xff]  }
  0xb8   :  { %1617 = vmatpush.bf16.msrb.mxu0 %v6645_v20  ;;  %1586 = vmatmul.bf16.vlgmr.msra.gmra.mxu1 %v9935_v35  ;;  %v9124_v16 = vunpack.c.h.bf16 %v9545_v13  ;;  %v9083_v34 = vunpack.c.l.bf16 %v9535_v15 }
  0xb9   :  { %1630 = vmatpush.bf16.msrb.mxu1 %v6773_v21  ;;  %1599 = vmatmul.bf16.vlgmr.msra.gmra.mxu2 %v9918_v17  ;;  %v6978_v17 = vld [vmem:[#allocation4 + $0x598] sm:$0xf0]  ;;  %v6565_v21 = vor.u32 %v8584_v9, %v6562_v10  ;;  %v9091_v9 = vunpack.c.l.bf16 %v9537_v4  ;;  %v9127_v10 = vunpack.c.l.bf16 %v9546_v3 }
  0xba   :  { %1643 = vmatpush.bf16.msrb.mxu2 %v6901_v22  ;;  %1656 = vmatpush.bf16.msrb.mxu3 %v7029_v28  ;;  %v6981_v0 = vor.u32 %v8688_v58, %v6978_v17  ;;  %v6546_v28 = vld [vmem:[#allocation4 + $0x238] sm:$0xf0] }
  0xbb   :  { %1612 = vmatmul.bf16.vlgmr.msra.gmra.mxu3 %v9920_v18  ;;  %v6853_v18 = vor.u32 %v8656_v56, %v6850_v57  ;;  %v6661_v56 = vor.u32 %v8608_v43, %v6658_v45  ;;  %v6789_v57 = vor.u32 %v8640_v46, %v6786_v47  ;;  %v9543_v45 = vld [vmem:[%s10610_s7 + $0x58] sm:$0xff]  }
  0xbc   :  { %1618 = vmatpush.bf16.msrb.mxu0 %v6629_v36  ;;  %v8676_v36 = vld [vmem:[#allocation4 + $0x52c] sm:$0xf] }
  0xbd   :  { %1631 = vmatpush.bf16.msrb.mxu1 %v6757_v37  ;;  %v6930_v37 = vld [vmem:[#allocation4 + $0x538] sm:$0xf0] }
  0xbe   :  { %1644 = vmatpush.bf16.msrb.mxu2 %v6885_v38  ;;  %1657 = vmatpush.bf16.msrb.mxu3 %v7013_v42  ;;  %v6549_v38 = vor.u32 %v8580_v27, %v6546_v28  ;;  %v6530_v42 = vld [vmem:[#allocation4 + $0x218] sm:$0xf0]  ;;  %v6933_v44 = vor.u32 %v8676_v36, %v6930_v37  ;;  %v9534_v28 = vld [vmem:[%s10610_s7 + $0x10] sm:$0xff]  }
  0xc0   :  { %1619 = vmatpush.bf16.msrb.mxu0 %v6613_v48  ;;  %v1366_v20 = vpop.f32.mrf.mxu0  ;;  %v1379_v22 = vpop.f32.mrf.mxu1 }
  0xc1   :  { %1632 = vmatpush.bf16.msrb.mxu1 %v6741_v49  ;;  %v8672_v49 = vld [vmem:[#allocation4 + $0x50c] sm:$0xf]  ;;  %v1380_v58 = vadd.f32 %v1379_v22, %v1366_v20  ;;  %v9123_v22 = vunpack.c.l.bf16 %v9545_v13 }
  0xc2   :  { %1645 = vmatpush.bf16.msrb.mxu2 %v6869_v50  ;;  %1658 = vmatpush.bf16.msrb.mxu3 %v6997_v54  ;;  %v6914_v50 = vld [vmem:[#allocation4 + $0x518] sm:$0xf0]  ;;  %v6533_v54 = vor.u32 %v8576_v41, %v6530_v42  ;;  %v9080_v42 = vunpack.c.h.bf16 %v9534_v28 }
  0xc3   :  { %v6917_v17 = vor.u32 %v8672_v49, %v6914_v50  ;;  %v9116_v49 = vunpack.c.h.bf16 %v9543_v45 }
  0xc4   :  { %1620 = vmatpush.bf16.msrb.mxu0 %v6597_v59  ;;  %v9100_v59 = vunpack.c.h.bf16 %v9539_v51 }
  0xc5   :  { %1633 = vmatpush.bf16.msrb.mxu1 %v6725_v60  ;;  %v9538_v60 = vld [vmem:[%s10610_s7 + $0x30] sm:$0xff]  }
  0xc6   :  { %1646 = vmatpush.bf16.msrb.mxu2 %v6853_v18  ;;  %1659 = vmatpush.bf16.msrb.mxu3 %v6981_v0  ;;  %v9099_v18 = vunpack.c.l.bf16 %v9539_v51  ;;  %v9096_v0 = vunpack.c.h.bf16 %v9538_v60 }
  0xc7   :  { %v1392_v48 = vpop.f32.mrf.mxu2 }
  0xc8   :  { %1621 = vmatpush.bf16.msrb.mxu0 %v6581_v6  ;;  %v1368_v52 = vpop.f32.mrf.mxu0  ;;  %v1405_v53 = vpop.f32.mrf.mxu3  ;;  %v1393_v61 = vadd.f32 %v1392_v48, %v1380_v58  ;;  %v9079_v48 = vunpack.c.l.bf16 %v9534_v28 }
  0xc9   :  { %1634 = vmatpush.bf16.msrb.mxu1 %v6709_v7  ;;  %v1381_v55 = vpop.f32.mrf.mxu1  ;;  %v9128_v7 = vunpack.c.h.bf16 %v9546_v3  ;;  %v9115_v52 = vunpack.c.l.bf16 %v9543_v45 }
  0xca   :  { %1647 = vmatpush.bf16.msrb.mxu2 %v6837_v8  ;;  %1660 = vmatpush.bf16.msrb.mxu3 %v6965_v12  ;;  %v1406_v6 = vadd.f32 %v1405_v53, %v1393_v61  ;;  %v9092_v8 = vunpack.c.h.bf16 %v9537_v4 }
  0xcc   :  { %1622 = vmatpush.bf16.msrb.mxu0 %v6565_v21 }
  0xcd   :  { %1635 = vmatpush.bf16.msrb.mxu1 %v6693_v23 }
  0xce   :  { %1648 = vmatpush.bf16.msrb.mxu2 %v6821_v24  ;;  %1661 = vmatpush.bf16.msrb.mxu3 %v6949_v30  ;;  %v9084_v24 = vunpack.c.h.bf16 %v9535_v15  ;;  %v9544_v30 = vld [vmem:[%s10610_s7 + $0x60] sm:$0xff]   ;;  %v9554_v15 = vld [vmem:[%s10610_s7 + $0xb0] sm:$0xff]  }
  0xcf   :  { %v1394_v62 = vpop.f32.mrf.mxu2  ;;  %v9119_v43 = vunpack.c.l.bf16 %v9544_v30 }
  0xd0   :  { %1623 = vmatpush.bf16.msrb.mxu0 %v6549_v38  ;;  %v1407_v1 = vpop.f32.mrf.mxu3  ;;  %v9120_v38 = vunpack.c.h.bf16 %v9544_v30 }
  0xd1   :  { %1636 = vmatpush.bf16.msrb.mxu1 %v6677_v39 }
  0xd2   :  { %1649 = vmatpush.bf16.msrb.mxu2 %v6805_v40  ;;  %1662 = vmatpush.bf16.msrb.mxu3 %v6933_v44  ;;  %v9533_v44 = vld [vmem:[%s10610_s7 + $0x8] sm:$0xff]  }
  0xd3   :  { %v9076_v50 = vunpack.c.h.bf16 %v9533_v44  ;;  %v9075_v53 = vunpack.c.l.bf16 %v9533_v44 }
  0xd4   :  { %1624 = vmatpush.bf16.msrb.mxu0 %v6533_v54  ;;  %v9070_v54 = vld [vmem:[%s10610_s7] sm:$0xff]  }
  0xd5   :  { %1637 = vmatpush.bf16.msrb.mxu1 %v6661_v56  ;;  %v1431_v12 = vpop.f32.mrf.mxu1  ;;  %v9542_v56 = vld [vmem:[%s10610_s7 + $0x50] sm:$0xff]   ;;  %v9072_v61 = vunpack.c.h.bf16 %v9070_v54  ;;  %v9071_v1 = vunpack.c.l.bf16 %v9070_v54 }
  0xd6   :  { %1650 = vmatpush.bf16.msrb.mxu2 %v6789_v57  ;;  %1663 = vmatpush.bf16.msrb.mxu3 %v6917_v17 }
  0xd7   :  { %1625 = vmatmul.bf16.vlgmr.msrb.gmra.mxu0 %v9922_v25  ;;  %v9095_v25 = vunpack.c.l.bf16 %v9538_v60  ;;  %v9111_v60 = vunpack.c.l.bf16 %v9542_v56 }
  0xd8   :  { %1803 = vmatpush.msra.mxu0 %v9100_v59  ;;  %1638 = vmatmul.bf16.vlgmr.msrb.gmra.mxu1 %v9924_v26  ;;  %v9536_v26 = vld [vmem:[%s10610_s7 + $0x20] sm:$0xff]   ;;  %v9112_v59 = vunpack.c.h.bf16 %v9542_v56 }
  0xd9   :  { %1651 = vmatmul.bf16.vlgmr.msrb.gmra.mxu2 %v9933_v31  ;;  %1664 = vmatmul.bf16.vlgmr.msrb.gmra.mxu3 %v9935_v35  ;;  %v1418_v31 = vpop.f32.mrf.mxu0  ;;  %v9088_v35 = vunpack.c.h.bf16 %v9536_v26  ;;  %v9087_v19 = vunpack.c.l.bf16 %v9536_v26 }
  0xda   :  { %1804 = vmatpush.msra.mxu0 %v9099_v18  ;;  %1823 = vmatpush.msra.mxu1 %v9132_v2  ;;  %v1419_v11 = vadd.f32 %v1418_v31, %v1406_v6  ;;  %v9541_v18 = vld [vmem:[%s10610_s7 + $0x48] sm:$0xff]  }
  0xdb   :  { %v9108_v63 = vunpack.c.h.bf16 %v9541_v18  ;;  %v9107_v3 = vunpack.c.l.bf16 %v9541_v18 }
  0xdc   :  { %1805 = vmatpush.msra.mxu0 %v9096_v0  ;;  %1824 = vmatpush.msra.mxu1 %v9131_v5  ;;  %v9978_v14 = vadd.f32 %v1431_v12, %v1419_v11  ;;  %v9991_v29 = vpop.f32.mrf.mxu2  ;;  %v9540_v0 = vld [vmem:[%s10610_s7 + $0x40] sm:$0xff]  }
  0xdd   :  { %v1433_v39 = vpop.f32.mrf.mxu1  ;;  %v9104_v5 = vunpack.c.h.bf16 %v9540_v0 }
  0xde   :  { %1806 = vmatpush.msra.mxu0 %v9095_v25  ;;  %1825 = vmatpush.msra.mxu1 %v9128_v7  ;;  %v1738_v20 = vsel %vm1737_vm0, %v9978_v14, 0.0  ;;  %v1766_v21 = vmul.f32 %v9978_v14, %v9978_v14  ;;  %v1457_v36 = vpop.f32.mrf.mxu3  ;;  %v9103_v25 = vunpack.c.l.bf16 %v9540_v0  ;;  %v9555_v7 = vld [vmem:[%s10610_s7 + $0xb8] sm:$0xff]  }
  0xdf   :  { %v1739_v23 = vrot.slane %v1738_v20, 4  ;;  %v1458_v6 = vadd.f32 %v1457_v36, %v9991_v29  ;;  %v9164_v26 = vunpack.c.h.bf16 %v9555_v7  ;;  %v9163_v12 = vunpack.c.l.bf16 %v9555_v7 }
  0xe0   :  { %1807 = vmatpush.msra.mxu0 %v9092_v8  ;;  %1826 = vmatpush.msra.mxu1 %v9127_v10  ;;  %v1770_v27 = vsel %vm1737_vm0, %v1766_v21, 0.0 }
  0xe1   :  { %v1740_v32 = vadd.f32 %v1739_v23, %v1738_v20  ;;  %v1771_v33 = vrot.slane %v1770_v27, 4  ;;  %v1420_v37 = vpop.f32.mrf.mxu0  ;;  %1843 = vmatpush.msra.mxu2 %v9164_v26  ;;  %v9553_v20 = vld [vmem:[%s10610_s7 + $0xa8] sm:$0xff]   ;;  %v9562_v26 = vld [vmem:[%s10610_s7 + $0xf0] sm:$0xff]  }
  0xe2   :  { %1808 = vmatpush.msra.mxu0 %v9091_v9  ;;  %1827 = vmatpush.msra.mxu1 %v9124_v16  ;;  %v9160_v16 = vunpack.c.h.bf16 %v9554_v15 }
  0xe3   :  { %v1741_v40 = vrot.slane %v1740_v32, 2  ;;  %v1772_v41 = vadd.f32 %v1771_v33, %v1770_v27  ;;  %1844 = vmatpush.msra.mxu2 %v9163_v12  ;;  %v9561_v12 = vld [vmem:[%s10610_s7 + $0xe8] sm:$0xff]  }
  0xe4   :  { %1809 = vmatpush.msra.mxu0 %v9088_v35  ;;  %1828 = vmatpush.msra.mxu1 %v9123_v22  ;;  %v1446_v55 = vpop.f32.mrf.mxu2 }
  0xe5   :  { %v1742_v46 = vadd.f32 %v1741_v40, %v1740_v32  ;;  %v1773_v47 = vrot.slane %v1772_v41, 2  ;;  %1845 = vmatpush.msra.mxu2 %v9160_v16 }
  0xe6   :  { %1810 = vmatpush.msra.mxu0 %v9087_v19  ;;  %1829 = vmatpush.msra.mxu1 %v9120_v38  ;;  %v1459_v17 = vpop.f32.mrf.mxu3  ;;  %v9159_v19 = vunpack.c.l.bf16 %v9554_v15  ;;  %v9188_v15 = vunpack.c.h.bf16 %v9561_v12 }
  0xe7   :  { %v1774_v51 = vadd.f32 %v1773_v47, %v1772_v41  ;;  %v1743_v57 = vrot.slane %v1742_v46, 1  ;;  %v9155_v47 = vunpack.c.l.bf16 %v9553_v20 }
  0xe8   :  { %1811 = vmatpush.msra.mxu0 %v9084_v24  ;;  %1830 = vmatpush.msra.mxu1 %v9119_v43  ;;  %v9156_v24 = vunpack.c.h.bf16 %v9553_v20  ;;  %v9560_v20 = vld [vmem:[%s10610_s7 + $0xe0] sm:$0xff]  }
  0xe9   :  { %v1775_v58 = vrot.slane %v1774_v51, 1  ;;  %v1744_v2 = vadd.f32 %v1743_v57, %v1742_v46  ;;  %1846 = vmatpush.msra.mxu2 %v9159_v19  ;;  %v9550_v57 = vld [vmem:[%s10610_s7 + $0x90] sm:$0xff]   ;;  %v9187_v19 = vunpack.c.l.bf16 %v9561_v12 }
  0xea   :  { %1812 = vmatpush.msra.mxu0 %v9083_v34  ;;  %1831 = vmatpush.msra.mxu1 %v9116_v49  ;;  %v9143_v18 = vunpack.c.l.bf16 %v9550_v57 }
  0xeb   :  { %v1776_v62 = vadd.f32 %v1775_v58, %v1774_v51  ;;  %1847 = vmatpush.msra.mxu2 %v9156_v24  ;;  %v9184_v24 = vunpack.c.h.bf16 %v9560_v20 }
  0xec   :  { %1813 = vmatpush.msra.mxu0 %v9080_v42  ;;  %1832 = vmatpush.msra.mxu1 %v9115_v52 }
  0xed   :  { %v1799_v4 = vsel %vm1798_vm1, %v1744_v2, %v1776_v62  ;;  %1848 = vmatpush.msra.mxu2 %v9155_v47 }
  0xee   :  { %1814 = vmatpush.msra.mxu0 %v9079_v48  ;;  %1833 = vmatpush.msra.mxu1 %v9112_v59  ;;  %v9552_v48 = vld [vmem:[%s10610_s7 + $0xa0] sm:$0xff]   ;;  %v9144_v59 = vunpack.c.h.bf16 %v9550_v57 }
  0xef   :  { %v9151_v52 = vunpack.c.l.bf16 %v9552_v48 }
  0xf0   :  { %1815 = vmatpush.msra.mxu0 %v9076_v50  ;;  %1834 = vmatpush.msra.mxu1 %v9111_v60  ;;  %v9152_v50 = vunpack.c.h.bf16 %v9552_v48 }
  0xf2   :  { %1816 = vmatpush.msra.mxu0 %v9075_v53  ;;  %1835 = vmatpush.msra.mxu1 %v9108_v63  ;;  %v9551_v53 = vld [vmem:[%s10610_s7 + $0x98] sm:$0xff]   ;;  %v9548_v63 = vld [vmem:[%s10610_s7 + $0x80] sm:$0xff]  }
  0xf3   :  { %1849 = vmatpush.msra.mxu2 %v9152_v50  ;;  %v9148_v54 = vunpack.c.h.bf16 %v9551_v53  ;;  %v9147_v55 = vunpack.c.l.bf16 %v9551_v53  ;;  %v9557_v53 = vld [vmem:[%s10610_s7 + $0xc8] sm:$0xff]  }
  0xf4   :  { %1817 = vmatpush.msra.mxu0 %v9072_v61  ;;  %1836 = vmatpush.msra.mxu1 %v9107_v3  ;;  %v1470_v8 = vpop.f32.mrf.mxu0  ;;  %v9549_v61 = vld [vmem:[%s10610_s7 + $0x88] sm:$0xff]  }
  0xf5   :  { %v1471_v31 = vadd.f32 %v1470_v8, %v1458_v6  ;;  %v1483_v9 = vpop.f32.mrf.mxu1  ;;  %1850 = vmatpush.msra.mxu2 %v9151_v52  ;;  %v9140_v62 = vunpack.c.h.bf16 %v9549_v61  ;;  %v9139_v0 = vunpack.c.l.bf16 %v9549_v61 }
  0xf6   :  { %1818 = vmatpush.msra.mxu0 %v9071_v1  ;;  %1837 = vmatpush.msra.mxu1 %v9104_v5  ;;  %v9136_v1 = vunpack.c.h.bf16 %v9548_v63 }
  0xf7   :  { %1819 = vmatmul.f32.vlgmr.msra.gmra.mxu0 %v1799_v4  ;;  %v1484_v10 = vadd.f32 %v1483_v9, %v1471_v31  ;;  %1851 = vmatpush.msra.mxu2 %v9148_v54  ;;  %v9135_v4 = vunpack.c.l.bf16 %v9548_v63  ;;  %v9192_v9 = vunpack.c.h.bf16 %v9562_v26  ;;  %v9556_v54 = vld [vmem:[%s10610_s7 + $0xc0] sm:$0xff]  }
  0xf8   :  { %1838 = vmatpush.msra.mxu1 %v9103_v25  ;;  %v9563_v25 = vld [vmem:[%s10610_s7 + $0xf8] sm:$0xff]  }
  0xf9   :  { %1852 = vmatpush.msra.mxu2 %v9147_v55  ;;  %v9196_v6 = vunpack.c.h.bf16 %v9563_v25  ;;  %v9195_v7 = vunpack.c.l.bf16 %v9563_v25  ;;  %v9172_v55 = vunpack.c.h.bf16 %v9557_v53 }
  0xfb   :  { %1853 = vmatpush.msra.mxu2 %v9144_v59  ;;  %1863 = vmatpush.msra.mxu3 %v9196_v6 }
  0xfc   :  { %v1496_v11 = vpop.f32.mrf.mxu2  ;;  %v1472_v22 = vpop.f32.mrf.mxu0 }
  0xfd   :  { %v1497_v35 = vadd.f32 %v1496_v11, %v1484_v10  ;;  %v1485_v23 = vpop.f32.mrf.mxu1  ;;  %1854 = vmatpush.msra.mxu2 %v9143_v18  ;;  %1864 = vmatpush.msra.mxu3 %v9195_v7  ;;  %v9191_v10 = vunpack.c.l.bf16 %v9562_v26 }
  0xfe   :  { %v1509_v13 = vpop.f32.mrf.mxu3 }
  0xff   :  { %v10025_v21 = vadd.f32 %v1509_v13, %v1497_v35  ;;  %1855 = vmatpush.msra.mxu2 %v9140_v62  ;;  %1865 = vmatpush.msra.mxu3 %v9192_v9 }
 0x101   :  { %v1745_v27 = vsel %vm1737_vm0, %v10025_v21, 0.0  ;;  %v1767_v28 = vmul.f32 %v10025_v21, %v10025_v21  ;;  %1856 = vmatpush.msra.mxu2 %v9139_v0  ;;  %1866 = vmatpush.msra.mxu3 %v9191_v10 }
 0x102   :  { %v1746_v29 = vrot.slane %v1745_v27, 4 }
 0x103   :  { %v1777_v30 = vsel %vm1737_vm0, %v1767_v28, 0.0  ;;  %1857 = vmatpush.msra.mxu2 %v9136_v1  ;;  %1867 = vmatpush.msra.mxu3 %v9188_v15 }
 0x104   :  { %v1747_v32 = vadd.f32 %v1746_v29, %v1745_v27  ;;  %v1778_v33 = vrot.slane %v1777_v30, 4  ;;  %v1498_v34 = vpop.f32.mrf.mxu2 }
 0x105   :  { %1858 = vmatpush.msra.mxu2 %v9135_v4  ;;  %1868 = vmatpush.msra.mxu3 %v9187_v19 }
 0x106   :  { %v1511_v36 = vpop.f32.mrf.mxu3  ;;  %v1748_v37 = vrot.slane %v1747_v32, 2  ;;  %v1779_v38 = vadd.f32 %v1778_v33, %v1777_v30  ;;  %v9183_v30 = vunpack.c.l.bf16 %v9560_v20 }
 0x107   :  { %1869 = vmatpush.msra.mxu3 %v9184_v24 }
 0x108   :  { %v1749_v39 = vadd.f32 %v1748_v37, %v1747_v32  ;;  %v1780_v40 = vrot.slane %v1779_v38, 2  ;;  %v9559_v37 = vld [vmem:[%s10610_s7 + $0xd8] sm:$0xff]  }
 0x109   :  { %1870 = vmatpush.msra.mxu3 %v9183_v30 }
 0x10a   :  { %v1750_v41 = vrot.slane %v1749_v39, 1  ;;  %v1781_v42 = vadd.f32 %v1780_v40, %v1779_v38 }
 0x10c   :  { %v1782_v43 = vrot.slane %v1781_v42, 1  ;;  %v1751_v44 = vadd.f32 %v1750_v41, %v1749_v39  ;;  %v9180_v39 = vunpack.c.h.bf16 %v9559_v37 }
 0x10e   :  { %v1783_v45 = vadd.f32 %v1782_v43, %v1781_v42  ;;  %1871 = vmatpush.msra.mxu3 %v9180_v39  ;;  %v9179_v42 = vunpack.c.l.bf16 %v9559_v37 }
 0x110   :  { %v1800_v46 = vsel %vm1798_vm1, %v1751_v44, %v1783_v45  ;;  %v9558_v45 = vld [vmem:[%s10610_s7 + $0xd0] sm:$0xff]   ;;  %1872 = vmatpush.msra.mxu3 %v9179_v42  ;;  %v306_v42 = vld [vmem:[#allocation4 + $0x800] sm:$0xff] }
 0x111   :  { %1839 = vmatmul.f32.vlgmr.msra.gmra.mxu1 %v1800_v46  ;;  %v9176_v46 = vunpack.c.h.bf16 %v9558_v45  ;;  %v9175_v50 = vunpack.c.l.bf16 %v9558_v45  ;;  %v1669_v45 = vunpack.c.l.bf16 %v306_v42 }
 0x113   :  { %1873 = vmatpush.msra.mxu3 %v9176_v46  ;;  %v1670_v46 = vunpack.c.h.bf16 %v306_v42  ;;  %1930 = vmatpush.msrb.mxu0 %v1669_v45  ;;  %v7124_v42 = vld [vmem:[#allocation6 + $0xb0] sm:$0xf]  ;;  %v7052_v45 = vld [vmem:[#allocation6 + $0x20] sm:$0xf] }
 0x114   :  { %v1522_v49 = vpop.f32.mrf.mxu0 }
 0x115   :  { %v1535_v51 = vpop.f32.mrf.mxu1  ;;  %1874 = vmatpush.msra.mxu3 %v9175_v50  ;;  %1950 = vmatpush.msrb.mxu1 %v1670_v46  ;;  %v8718_v50 = vld [vmem:[#allocation6 + $0x74] sm:$0xf0] }
 0x116   :  { %v1536_v5 = vadd.f32 %v1535_v51, %v1522_v49 }
 0x117   :  { %1875 = vmatpush.msra.mxu3 %v9172_v55 }
 0x11c   :  { %v1548_v56 = vpop.f32.mrf.mxu2  ;;  %v1524_v58 = vpop.f32.mrf.mxu0 }
 0x11d   :  { %v1537_v60 = vpop.f32.mrf.mxu1  ;;  %v1549_v8 = vadd.f32 %v1548_v56, %v1536_v5  ;;  %v9171_v56 = vunpack.c.l.bf16 %v9557_v53  ;;  %v8734_v53 = vld [vmem:[#allocation6 + $0xf4] sm:$0xf0] }
 0x11e   :  { %v1561_v17 = vpop.f32.mrf.mxu3  ;;  %v9167_v60 = vunpack.c.l.bf16 %v9556_v54 }
 0x11f   :  { %v1562_v31 = vadd.f32 %v1561_v17, %v1549_v8  ;;  %v9168_v17 = vunpack.c.h.bf16 %v9556_v54  ;;  %1876 = vmatpush.msra.mxu3 %v9171_v56  ;;  %v7084_v54 = vld [vmem:[#allocation6 + $0x60] sm:$0xf]  ;;  %v8716_v56 = vld [vmem:[#allocation6 + $0x64] sm:$0xf0] }
 0x121   :  { %1877 = vmatpush.msra.mxu3 %v9168_v17  ;;  %v7085_v17 = vor.u32 %v8716_v56, %v7084_v54  ;;  %v7252_v54 = vld [vmem:[#allocation6 + $0x1b0] sm:$0xf] }
 0x123   :  { %1878 = vmatpush.msra.mxu3 %v9167_v60  ;;  %v8750_v60 = vld [vmem:[#allocation6 + $0x174] sm:$0xf0] }
 0x124   :  { %v1550_v2 = vpop.f32.mrf.mxu2 }
 0x126   :  { %v1563_v3 = vpop.f32.mrf.mxu3 }
 0x134   :  { %v1574_v11 = vpop.f32.mrf.mxu0 }
 0x135   :  { %v1575_v35 = vadd.f32 %v1574_v11, %v1562_v31  ;;  %v1587_v13 = vpop.f32.mrf.mxu1 }
 0x137   :  { %v10057_v16 = vadd.f32 %v1587_v13, %v1575_v35 }
 0x139   :  { %v1752_v22 = vsel %vm1737_vm0, %v10057_v16, 0.0  ;;  %v1768_v23 = vmul.f32 %v10057_v16, %v10057_v16 }
 0x13a   :  { %v1753_v27 = vrot.slane %v1752_v22, 4 }
 0x13b   :  { %v1784_v28 = vsel %vm1737_vm0, %v1768_v23, 0.0 }
 0x13c   :  { %v1600_v29 = vpop.f32.mrf.mxu2  ;;  %v1754_v32 = vadd.f32 %v1753_v27, %v1752_v22  ;;  %v1785_v33 = vrot.slane %v1784_v28, 4  ;;  %v1576_v36 = vpop.f32.mrf.mxu0 }
 0x13d   :  { %v1589_v38 = vpop.f32.mrf.mxu1 }
 0x13e   :  { %v1613_v34 = vpop.f32.mrf.mxu3  ;;  %v1755_v40 = vrot.slane %v1754_v32, 2  ;;  %v1786_v41 = vadd.f32 %v1785_v33, %v1784_v28 }
 0x13f   :  { %v1614_v18 = vadd.f32 %v1613_v34, %v1600_v29 }
 0x140   :  { %v1756_v43 = vadd.f32 %v1755_v40, %v1754_v32  ;;  %v1787_v44 = vrot.slane %v1786_v41, 2 }
 0x142   :  { %v1757_v47 = vrot.slane %v1756_v43, 1  ;;  %v1788_v48 = vadd.f32 %v1787_v44, %v1786_v41  ;;  %v307_v41 = vld [vmem:[#allocation4 + $0x808] sm:$0xff] }
 0x143   :  { %v1672_v44 = vunpack.c.h.bf16 %v307_v41 }
 0x144   :  { %v1602_v49 = vpop.f32.mrf.mxu2  ;;  %v1789_v52 = vrot.slane %v1788_v48, 1  ;;  %v1758_v57 = vadd.f32 %v1757_v47, %v1756_v43  ;;  %v1671_v43 = vunpack.c.l.bf16 %v307_v41 }
 0x145   :  { %1990 = vmatpush.msrb.mxu3 %v1672_v44  ;;  %v7092_v49 = vld [vmem:[#allocation6 + $0x70] sm:$0xf] }
 0x146   :  { %v1615_v51 = vpop.f32.mrf.mxu3  ;;  %v1790_v58 = vadd.f32 %v1789_v52, %v1788_v48  ;;  %1970 = vmatpush.msrb.mxu2 %v1671_v43  ;;  %v7156_v52 = vld [vmem:[#allocation6 + $0xf0] sm:$0xf]  ;;  %v8726_v43 = vld [vmem:[#allocation6 + $0xb4] sm:$0xf0] }
 0x147   :  { %v7093_v51 = vor.u32 %v8718_v50, %v7092_v49  ;;  %v7157_v55 = vor.u32 %v8734_v53, %v7156_v52  ;;  %v7188_v50 = vld [vmem:[#allocation6 + $0x130] sm:$0xf]  ;;  %v7125_v52 = vor.u32 %v8726_v43, %v7124_v42  ;;  %v8708_v53 = vld [vmem:[#allocation6 + $0x24] sm:$0xf0]  ;;  %v7086_v42 = vld [vmem:[#allocation6 + $0x68] sm:$0xf0] }
 0x148   :  { %v1801_v59 = vsel %vm1798_vm1, %v1758_v57, %v1790_v58  ;;  %v7148_v57 = vld [vmem:[#allocation6 + $0xe0] sm:$0xf]  ;;  %v8732_v58 = vld [vmem:[#allocation6 + $0xe4] sm:$0xf0]  ;;  %v8731_v43 = vld [vmem:[#allocation6 + $0xe4] sm:$0xf] }
 0x149   :  { %1859 = vmatmul.f32.vlgmr.msra.gmra.mxu2 %v1801_v59  ;;  %2439 = vmatpush.bf16.msra.mxu0 %v7093_v51  ;;  %v7220_v59 = vld [vmem:[#allocation6 + $0x170] sm:$0xf]  ;;  %v8742_v51 = vld [vmem:[#allocation6 + $0x134] sm:$0xf0] }
 0x14a   :  { %2452 = vmatpush.bf16.msra.mxu1 %v7157_v55  ;;  %v8758_v55 = vld [vmem:[#allocation6 + $0x1b4] sm:$0xf0] }
 0x14d   :  { %2440 = vmatpush.bf16.msra.mxu0 %v7085_v17  ;;  %v372_v17 = vld [vmem:[#allocation9] sm:$0x1] }
 0x154   :  { %v1626_v61 = vpop.f32.mrf.mxu0 }
 0x155   :  { %v1639_v62 = vpop.f32.mrf.mxu1  ;;  %v1627_v63 = vadd.f32 %v1626_v61, %v1614_v18  ;;  %v7284_v18 = vld [vmem:[#allocation6 + $0x1f0] sm:$0xf]  ;;  %v7149_v61 = vor.u32 %v8732_v58, %v7148_v57  ;;  %v7116_v57 = vld [vmem:[#allocation6 + $0xa0] sm:$0xf]  ;;  %v8724_v58 = vld [vmem:[#allocation6 + $0xa4] sm:$0xf0] }
 0x157   :  { %v1640_v0 = vadd.f32 %v1639_v62, %v1627_v63  ;;  %v7221_v62 = vor.u32 %v8750_v60, %v7220_v59  ;;  %v8766_v63 = vld [vmem:[#allocation6 + $0x1f4] sm:$0xf0]  ;;  %2453 = vmatpush.bf16.msra.mxu1 %v7149_v61  ;;  %v7189_v59 = vor.u32 %v8742_v51, %v7188_v50  ;;  %v7044_v60 = vld [vmem:[#allocation6 + $0x10] sm:$0xf]  ;;  %v7053_v61 = vor.u32 %v8708_v53, %v7052_v45  ;;  %v7150_v45 = vld [vmem:[#allocation6 + $0xe8] sm:$0xf0] }
 0x158   :  { %v7228_v51 = vld [vmem:[#allocation6 + $0x180] sm:$0xf]  ;;  %v8749_v53 = vld [vmem:[#allocation6 + $0x174] sm:$0xf] }
 0x159   :  { %2465 = vmatpush.bf16.msra.mxu2 %v7221_v62  ;;  %v7253_v62 = vor.u32 %v8758_v55, %v7252_v54  ;;  %v7222_v55 = vld [vmem:[#allocation6 + $0x178] sm:$0xf0] }
 0x15c   :  { %v1652_v1 = vpop.f32.mrf.mxu2  ;;  %v1665_v3 = vpop.f32.mrf.mxu3 }
 0x15d   :  { %v1653_v2 = vadd.f32 %v1652_v1, %v1640_v0  ;;  %v1628_v4 = vpop.f32.mrf.mxu0  ;;  %v1641_v5 = vpop.f32.mrf.mxu1  ;;  %v7076_v0 = vld [vmem:[#allocation6 + $0x50] sm:$0xf]  ;;  %v8714_v1 = vld [vmem:[#allocation6 + $0x54] sm:$0xf0] }
 0x15e   :  { %v8730_v4 = vld [vmem:[#allocation6 + $0xd4] sm:$0xf0]  ;;  %v7212_v5 = vld [vmem:[#allocation6 + $0x160] sm:$0xf] }
 0x15f   :  { %v10080_v25 = vadd.f32 %v1665_v3, %v1653_v2  ;;  %v7285_v2 = vor.u32 %v8766_v63, %v7284_v18  ;;  %v7140_v3 = vld [vmem:[#allocation6 + $0xd0] sm:$0xf]  ;;  %v8706_v63 = vld [vmem:[#allocation6 + $0x14] sm:$0xf0] }
 0x161   :  { %v1759_v6 = vsel %vm1737_vm0, %v10080_v25, 0.0  ;;  %v1769_v7 = vmul.f32 %v10080_v25, %v10080_v25 }
 0x162   :  { %v1760_v8 = vrot.slane %v1759_v6, 4 }
 0x163   :  { %v1791_v26 = vsel %vm1737_vm0, %v1769_v7, 0.0  ;;  %v7276_v7 = vld [vmem:[#allocation6 + $0x1e0] sm:$0xf] }
 0x164   :  { %v1761_v31 = vadd.f32 %v1760_v8, %v1759_v6  ;;  %v1792_v9 = vrot.slane %v1791_v26, 4  ;;  %v1654_v10 = vpop.f32.mrf.mxu2  ;;  %v1667_v11 = vpop.f32.mrf.mxu3  ;;  %v8748_v6 = vld [vmem:[#allocation6 + $0x164] sm:$0xf0] }
 0x165   :  { %v8764_v8 = vld [vmem:[#allocation6 + $0x1e4] sm:$0xf0]  ;;  %v7068_v10 = vld [vmem:[#allocation6 + $0x40] sm:$0xf] }
 0x166   :  { %v1762_v12 = vrot.slane %v1761_v31, 2  ;;  %v1793_v35 = vadd.f32 %v1792_v9, %v1791_v26  ;;  %v7077_v26 = vor.u32 %v8714_v1, %v7076_v0  ;;  %v7277_v9 = vor.u32 %v8764_v8, %v7276_v7  ;;  %v8712_v11 = vld [vmem:[#allocation6 + $0x44] sm:$0xf0]  ;;  %v7180_v0 = vld [vmem:[#allocation6 + $0x120] sm:$0xf] }
 0x167   :  { %v8740_v1 = vld [vmem:[#allocation6 + $0x124] sm:$0xf0] }
 0x168   :  { %v1763_v13 = vadd.f32 %v1762_v12, %v1761_v31  ;;  %v1794_v15 = vrot.slane %v1793_v35, 2  ;;  %v7213_v31 = vor.u32 %v8748_v6, %v7212_v5  ;;  %2441 = vmatpush.bf16.msra.mxu0 %v7077_v26  ;;  %v7108_v5 = vld [vmem:[#allocation6 + $0x90] sm:$0xf]  ;;  %v8722_v6 = vld [vmem:[#allocation6 + $0x94] sm:$0xf0]  ;;  %v7181_v8 = vor.u32 %v8740_v1, %v7180_v0 }
 0x169   :  { %v373_v26 = vld [vmem:[#allocation9 + $0x1] sm:$0x1]  ;;  %v8747_v0 = vld [vmem:[#allocation6 + $0x164] sm:$0xf]  ;;  %v7214_v1 = vld [vmem:[#allocation6 + $0x168] sm:$0xf0] }
 0x16a   :  { %v1764_v19 = vrot.slane %v1763_v13, 1  ;;  %v1795_v20 = vadd.f32 %v1794_v15, %v1793_v35  ;;  %v7141_v35 = vor.u32 %v8730_v4, %v7140_v3  ;;  %v7204_v15 = vld [vmem:[#allocation6 + $0x150] sm:$0xf]  ;;  %2466 = vmatpush.bf16.msra.mxu2 %v7213_v31  ;;  %v7117_v3 = vor.u32 %v8724_v58, %v7116_v57  ;;  %v8756_v4 = vld [vmem:[#allocation6 + $0x1a4] sm:$0xf0] }
 0x16b   :  { %v7045_v31 = vor.u32 %v8706_v63, %v7044_v60  ;;  %v7286_v57 = vld [vmem:[#allocation6 + $0x1f8] sm:$0xf0]  ;;  %v7225_v58 = vor.u32 %v8749_v53, %v7222_v55  ;;  %v8739_v53 = vld [vmem:[#allocation6 + $0x124] sm:$0xf] }
 0x16c   :  { %v1796_v22 = vrot.slane %v1795_v20, 1  ;;  %v1765_v23 = vadd.f32 %v1764_v19, %v1763_v13  ;;  %v7132_v13 = vld [vmem:[#allocation6 + $0xc0] sm:$0xf]  ;;  %v8746_v19 = vld [vmem:[#allocation6 + $0x154] sm:$0xf0]  ;;  %2454 = vmatpush.bf16.msra.mxu1 %v7141_v35  ;;  %v7109_v35 = vor.u32 %v8722_v6, %v7108_v5 }
 0x16d   :  { %v7078_v60 = vld [vmem:[#allocation6 + $0x58] sm:$0xf0]  ;;  %v8711_v5 = vld [vmem:[#allocation6 + $0x44] sm:$0xf]  ;;  %v7070_v6 = vld [vmem:[#allocation6 + $0x48] sm:$0xf0] }
 0x16e   :  { %v1797_v24 = vadd.f32 %v1796_v22, %v1795_v20  ;;  %v8728_v22 = vld [vmem:[#allocation6 + $0xc4] sm:$0xf0] }
 0x170   :  { %v1802_v27 = vsel %vm1798_vm1, %v1765_v23, %v1797_v24  ;;  %v7268_v23 = vld [vmem:[#allocation6 + $0x1d0] sm:$0xf]  ;;  %v8762_v24 = vld [vmem:[#allocation6 + $0x1d4] sm:$0xf0] }
 0x171   :  { %1879 = vmatmul.f32.vlgmr.msra.gmra.mxu3 %v1802_v27  ;;  %v7205_v27 = vor.u32 %v8746_v19, %v7204_v15  ;;  %v8704_v15 = vld [vmem:[#allocation6 + $0x4] sm:$0xf0] }
 0x172   :  { %2478 = vmatpush.bf16.msra.mxu3 %v7285_v2 }
 0x173   :  { %2467 = vmatpush.bf16.msra.mxu2 %v7205_v27  ;;  %v7094_v27 = vld [vmem:[#allocation6 + $0x78] sm:$0xf0] }
 0x174   :  { %v1820_v29 = vpop.f32.mrf.mxu0 }
 0x176   :  { %2479 = vmatpush.bf16.msra.mxu3 %v7277_v9 }
 0x18e   :  { %v1840_v28 = vpop.f32.mrf.mxu1 }
 0x18f   :  { %v1841_v32 = vadd.f32 %v1840_v28, %v1820_v29  ;;  %v7069_v29 = vor.u32 %v8712_v11, %v7068_v10  ;;  %v7172_v10 = vld [vmem:[#allocation6 + $0x110] sm:$0xf]  ;;  %v8738_v11 = vld [vmem:[#allocation6 + $0x114] sm:$0xf0] }
 0x191   :  { %2442 = vmatpush.bf16.msra.mxu0 %v7069_v29  ;;  %v7158_v29 = vld [vmem:[#allocation6 + $0xf8] sm:$0xf0] }
 0x1cc   :  { %v1860_v30 = vpop.f32.mrf.mxu2 }
 0x1cd   :  { %v1861_v33 = vadd.f32 %v1860_v30, %v1841_v32  ;;  %v7269_v30 = vor.u32 %v8762_v24, %v7268_v23  ;;  %v7060_v32 = vld [vmem:[#allocation6 + $0x30] sm:$0xf]  ;;  %v8717_v23 = vld [vmem:[#allocation6 + $0x74] sm:$0xf]  ;;  %v7173_v24 = vor.u32 %v8738_v11, %v7172_v10  ;;  %v7206_v10 = vld [vmem:[#allocation6 + $0x158] sm:$0xf0] }
 0x1ce   :  { %v8761_v11 = vld [vmem:[#allocation6 + $0x1d4] sm:$0xf] }
 0x1cf   :  { %2480 = vmatpush.bf16.msra.mxu3 %v7269_v30 }
 0x1f4   :  { %v1880_v34 = vpop.f32.mrf.mxu3 }
 0x1f5   :  { %v1881_v36 = vadd.f32 %v1880_v34, %v1861_v33  ;;  %v7196_v33 = vld [vmem:[#allocation6 + $0x140] sm:$0xf]  ;;  %v8744_v34 = vld [vmem:[#allocation6 + $0x144] sm:$0xf0] }
 0x1f6   :  { %v7197_v44 = vor.u32 %v8744_v34, %v7196_v33 }
 0x1f7   :  { %v10088_v37 = vmul.f32 0.0078125, %v1881_v36  ;;  %v7133_v36 = vor.u32 %v8728_v22, %v7132_v13  ;;  %v7036_v13 = vld [vmem:[#allocation6] sm:$0xf]  ;;  %v8720_v22 = vld [vmem:[#allocation6 + $0x84] sm:$0xf0] }
 0x1f8   :  { %2468 = vmatpush.bf16.msra.mxu2 %v7197_v44  ;;  %v7037_v33 = vor.u32 %v8704_v15, %v7036_v13  ;;  %v8709_v15 = vld [vmem:[#allocation6 + $0x34] sm:$0xf] }
 0x1f9   :  { %v1884_v38 = vmul.f32 %v10088_v37, %v10088_v37  ;;  %2455 = vmatpush.bf16.msra.mxu1 %v7133_v36 }
 0x1fb   :  { %v1886_v39 = vrot.slane %v1884_v38, 7  ;;  %v8710_v38 = vld [vmem:[#allocation6 + $0x34] sm:$0xf0] }
 0x1fc   :  { %2469 = vmatpush.bf16.msra.mxu2 %v7189_v59  ;;  %v8713_v59 = vld [vmem:[#allocation6 + $0x54] sm:$0xf] }
 0x1fd   :  { %v1888_v40 = vsub.f32 %v10088_v37, %v1886_v39  ;;  %v7260_v39 = vld [vmem:[#allocation6 + $0x1c0] sm:$0xf]  ;;  %2456 = vmatpush.bf16.msra.mxu1 %v7125_v52  ;;  %v8752_v52 = vld [vmem:[#allocation6 + $0x184] sm:$0xf0] }
 0x1fe   :  { %v7229_v54 = vor.u32 %v8752_v52, %v7228_v51  ;;  %v7110_v52 = vld [vmem:[#allocation6 + $0x98] sm:$0xf0] }
 0x1ff   :  { %v1889_v47 = vmax.f32 %v1888_v40, 0.0  ;;  %v8760_v40 = vld [vmem:[#allocation6 + $0x1c4] sm:$0xf0] }
 0x200   :  { %v7261_v49 = vor.u32 %v8760_v40, %v7260_v39  ;;  %2470 = vmatpush.bf16.msra.mxu2 %v7181_v8  ;;  %v7073_v8 = vor.u32 %v8711_v5, %v7070_v6  ;;  %v8735_v5 = vld [vmem:[#allocation6 + $0x104] sm:$0xf]  ;;  %v7166_v6 = vld [vmem:[#allocation6 + $0x108] sm:$0xf0] }
 0x201   :  { %v10093_v48 = vadd.f32 1e-05, %v1889_v47  ;;  %v7061_v47 = vor.u32 %v8710_v38, %v7060_v32  ;;  %2457 = vmatpush.bf16.msra.mxu1 %v7117_v3  ;;  %v7236_v32 = vld [vmem:[#allocation6 + $0x190] sm:$0xf]  ;;  %v7097_v38 = vor.u32 %v8717_v23, %v7094_v27  ;;  %v7217_v3 = vor.u32 %v8747_v0, %v7214_v1  ;;  %v7126_v23 = vld [vmem:[#allocation6 + $0xb8] sm:$0xf0] }
 0x202   :  { %2481 = vmatpush.bf16.msra.mxu3 %v7261_v49  ;;  %v7153_v49 = vor.u32 %v8731_v43, %v7150_v45  ;;  %v8743_v27 = vld [vmem:[#allocation6 + $0x144] sm:$0xf]  ;;  %v8757_v43 = vld [vmem:[#allocation6 + $0x1b4] sm:$0xf]  ;;  %v7254_v45 = vld [vmem:[#allocation6 + $0x1b8] sm:$0xf0] }
 0x203   :  { %9661 = vrsqrt.f32 %v10093_v48  ;;  %vm1897_vm3 = vweird.f32 %v10093_v48  ;;  %2443 = vmatpush.bf16.msra.mxu0 %v7061_v47  ;;  %v8736_v47 = vld [vmem:[#allocation6 + $0x104] sm:$0xf0]  ;;  %v8737_v0 = vld [vmem:[#allocation6 + $0x114] sm:$0xf]  ;;  %v7174_v1 = vld [vmem:[#allocation6 + $0x118] sm:$0xf0] }
 0x204   :  { %2471 = vmatpush.bf16.msra.mxu2 %v7173_v24 }
 0x205   :  { %2458 = vmatpush.bf16.msra.mxu1 %v7109_v35  ;;  %v7270_v35 = vld [vmem:[#allocation6 + $0x1d8] sm:$0xf0] }
 0x206   :  { %2482 = vmatpush.bf16.msra.mxu3 %v7253_v62  ;;  %v7142_v62 = vld [vmem:[#allocation6 + $0xd8] sm:$0xf0]  ;;  %v7273_v13 = vor.u32 %v8761_v11, %v7270_v35 }
 0x207   :  { %2444 = vmatpush.bf16.msra.mxu0 %v7053_v61  ;;  %v7081_v61 = vor.u32 %v8713_v59, %v7078_v60  ;;  %v7038_v60 = vld [vmem:[#allocation6 + $0x8] sm:$0xf0] }
 0x209   :  { %v9662_v12 = vpop.eup %9661 }
 0x20a   :  { %v1892_v20 = vmul.f32 %v9662_v12, %v10093_v48  ;;  %vm1898_vm2 = vweird.f32 %v9662_v12  ;;  %v7244_v48 = vld [vmem:[#allocation6 + $0x1a0] sm:$0xf] }
 0x20b   :  { %vm1899_vm4 = vmor %vm1897_vm3, %vm1898_vm2  ;;  %v7245_v9 = vor.u32 %v8756_v4, %v7244_v48  ;;  %2445 = vmatpush.bf16.msra.mxu0 %v7045_v31  ;;  %v7278_v48 = vld [vmem:[#allocation6 + $0x1e8] sm:$0xf0] }
 0x20c   :  { %v1893_v28 = vmul.f32 %v9662_v12, %v1892_v20  ;;  %v7100_v20 = vld [vmem:[#allocation6 + $0x80] sm:$0xf] }
 0x20d   :  { %2483 = vmatpush.bf16.msra.mxu3 %v7245_v9  ;;  %v7101_v34 = vor.u32 %v8720_v22, %v7100_v20  ;;  %v8745_v9 = vld [vmem:[#allocation6 + $0x154] sm:$0xf] }
 0x20e   :  { %v1894_v41 = vmul.f32 0.5, %v1893_v28  ;;  %v8733_v28 = vld [vmem:[#allocation6 + $0xf4] sm:$0xf] }
 0x20f   :  { %v7161_v39 = vor.u32 %v8733_v28, %v7158_v29  ;;  %2446 = vmatpush.bf16.msra.mxu0 %v7037_v33  ;;  %2459 = vmatpush.bf16.msra.mxu1 %v7101_v34  ;;  %v8725_v20 = vld [vmem:[#allocation6 + $0xb4] sm:$0xf]  ;;  %v7198_v28 = vld [vmem:[#allocation6 + $0x148] sm:$0xf0]  ;;  %v8759_v29 = vld [vmem:[#allocation6 + $0x1c4] sm:$0xf] }
 0x210   :  { %v1895_v46 = vsub.f32 1.5, %v1894_v41  ;;  %v8715_v41 = vld [vmem:[#allocation6 + $0x64] sm:$0xf]  ;;  %v7129_v24 = vor.u32 %v8725_v20, %v7126_v23  ;;  %v7054_v34 = vld [vmem:[#allocation6 + $0x28] sm:$0xf0] }
 0x211   :  { %v7089_v44 = vor.u32 %v8715_v41, %v7086_v42  ;;  %v8707_v33 = vld [vmem:[#allocation6 + $0x24] sm:$0xf]  ;;  %v8741_v41 = vld [vmem:[#allocation6 + $0x134] sm:$0xf]  ;;  %v7190_v42 = vld [vmem:[#allocation6 + $0x138] sm:$0xf0] }
 0x212   :  { %v1896_v56 = vmul.f32 %v9662_v12, %v1895_v46  ;;  %v7164_v46 = vld [vmem:[#allocation6 + $0x100] sm:$0xf] }
 0x213   :  { %v7165_v50 = vor.u32 %v8736_v47, %v7164_v46  ;;  %v7257_v46 = vor.u32 %v8757_v43, %v7254_v45  ;;  %v8705_v47 = vld [vmem:[#allocation6 + $0x14] sm:$0xf] }
 0x214   :  { %v1900_v18 = vsel %vm1899_vm4, %v9662_v12, %v1896_v56  ;;  %v8765_v56 = vld [vmem:[#allocation6 + $0x1f4] sm:$0xf] }
 0x215   :  { %v1902_v2 = vrot.slane %v1900_v18, 1  ;;  %2472 = vmatpush.bf16.msra.mxu2 %v7165_v50  ;;  %v8729_v18 = vld [vmem:[#allocation6 + $0xd4] sm:$0xf] }
 0x216   :  { %v7145_v63 = vor.u32 %v8729_v18, %v7142_v62  ;;  %v8721_v50 = vld [vmem:[#allocation6 + $0x94] sm:$0xf]  ;;  %v8719_v18 = vld [vmem:[#allocation6 + $0x84] sm:$0xf] }
 0x217   :  { %v1904_v7 = vmul.f32 %v1902_v2, %v372_v17  ;;  %v7289_v17 = vor.u32 %v8765_v56, %v7286_v57  ;;  %v8763_v2 = vld [vmem:[#allocation6 + $0x1e4] sm:$0xf]  ;;  %v7113_v55 = vor.u32 %v8721_v50, %v7110_v52 }
 0x218   :  { %v7281_v4 = vor.u32 %v8763_v2, %v7278_v48  ;;  %v8755_v57 = vld [vmem:[#allocation6 + $0x1a4] sm:$0xf]  ;;  %v8753_v2 = vld [vmem:[#allocation6 + $0x194] sm:$0xf]  ;;  %v7177_v48 = vor.u32 %v8737_v0, %v7174_v1  ;;  %v9565_v0 = vld [vmem:[%s10610_s7 + $0x108] sm:$0xff]  }
 0x219   :  { %v1905_v12 = vmul.f32 %v1904_v7, %v10088_v37  ;;  %v8754_v37 = vld [vmem:[#allocation6 + $0x194] sm:$0xf0] }
 0x21a   :  { %v7237_v40 = vor.u32 %v8754_v37, %v7236_v32  ;;  %v7262_v32 = vld [vmem:[#allocation6 + $0x1c8] sm:$0xf0]  ;;  %v9577_v1 = vld [vmem:[%s10610_s7 + $0x168] sm:$0xff]  }
 0x21b   :  { %v1906_v19 = vsub.f32 %v373_v26, %v1905_v12  ;;  %v7134_v26 = vld [vmem:[#allocation6 + $0xc8] sm:$0xf0]  ;;  %v7209_v12 = vor.u32 %v8745_v9, %v7206_v10  ;;  %v7265_v37 = vor.u32 %v8759_v29, %v7262_v32 }
 0x21c   :  { %2484 = vmatpush.bf16.msra.mxu3 %v7237_v40 }
 0x21d   :  { %v1908_v30 = vrot.slane %v1906_v19, 7  ;;  %v7062_v19 = vld [vmem:[#allocation6 + $0x38] sm:$0xf0] }
 0x21e   :  { %v7065_v22 = vor.u32 %v8709_v15, %v7062_v19 }
 0x21f   :  { %v1910_v36 = vsel %vm1798_vm1, %v1904_v7, %v1908_v30  ;;  %v8727_v7 = vld [vmem:[#allocation6 + $0xc4] sm:$0xf]  ;;  %v7201_v30 = vor.u32 %v8743_v27, %v7198_v28 }
 0x220   :  { %7030 = vmatmul.msk.f32.vlgmr.msrb.gmra.mxu0 %vm1911_vm5, %v1910_v36  ;;  %7031 = vmatmul.msk.f32.vlgmr.msrb.gmra.mxu1 %vm1911_vm5, %v1910_v36  ;;  %v7137_v31 = vor.u32 %v8727_v7, %v7134_v26  ;;  %v8751_v7 = vld [vmem:[#allocation6 + $0x184] sm:$0xf]  ;;  %v7230_v26 = vld [vmem:[#allocation6 + $0x188] sm:$0xf0] }
 0x221   :  { %7032 = vmatmul.msk.f32.vlgmr.msrb.gmra.mxu2 %vm1911_vm5, %v1910_v36  ;;  %7033 = vmatmul.msk.f32.vlgmr.msrb.gmra.mxu3 %vm1911_vm5, %v1910_v36  ;;  %v8723_v36 = vld [vmem:[#allocation6 + $0xa4] sm:$0xf] }
 0x222   :  { %2491 = vmatpush.bf16.msrb.mxu0 %v7097_v38  ;;  %2504 = vmatpush.bf16.msrb.mxu1 %v7161_v39  ;;  %v7057_v38 = vor.u32 %v8707_v33, %v7054_v34  ;;  %v7118_v39 = vld [vmem:[#allocation6 + $0xa8] sm:$0xf0] }
 0x223   :  { %2485 = vmatpush.bf16.msra.mxu3 %v7229_v54  ;;  %2517 = vmatpush.bf16.msrb.mxu2 %v7225_v58  ;;  %v7121_v40 = vor.u32 %v8723_v36, %v7118_v39  ;;  %v7182_v54 = vld [vmem:[#allocation6 + $0x128] sm:$0xf0] }
 0x224   :  { %v7185_v56 = vor.u32 %v8739_v53, %v7182_v54  ;;  %v7246_v58 = vld [vmem:[#allocation6 + $0x1a8] sm:$0xf0] }
 0x225   :  { %v7249_v59 = vor.u32 %v8755_v57, %v7246_v58  ;;  %v9567_v54 = vld [vmem:[%s10610_s7 + $0x118] sm:$0xff]  }
 0x226   :  { %2492 = vmatpush.bf16.msrb.mxu0 %v7089_v44  ;;  %2505 = vmatpush.bf16.msrb.mxu1 %v7153_v49  ;;  %v7193_v44 = vor.u32 %v8741_v41, %v7190_v42  ;;  %v7046_v49 = vld [vmem:[#allocation6 + $0x18] sm:$0xf0]  ;;  %v9211_v58 = vunpack.c.l.bf16 %v9567_v54 }
 0x227   :  { %2530 = vmatpush.bf16.msrb.mxu3 %v7289_v17  ;;  %2518 = vmatpush.bf16.msrb.mxu2 %v7217_v3  ;;  %v7049_v51 = vor.u32 %v8705_v47, %v7046_v49  ;;  %v8703_v17 = vld [vmem:[#allocation6 + $0x4] sm:$0xf]  ;;  %v7238_v3 = vld [vmem:[#allocation6 + $0x198] sm:$0xf0] }
 0x228   :  { %v7041_v62 = vor.u32 %v8703_v17, %v7038_v60  ;;  %v9569_v47 = vld [vmem:[%s10610_s7 + $0x128] sm:$0xff]   ;;  %v9578_v60 = vld [vmem:[%s10610_s7 + $0x170] sm:$0xff]  }
 0x229   :  { %v9220_v49 = vunpack.c.h.bf16 %v9569_v47  ;;  %v9219_v50 = vunpack.c.l.bf16 %v9569_v47 }
 0x22a   :  { %2493 = vmatpush.bf16.msrb.mxu0 %v7081_v61  ;;  %2506 = vmatpush.bf16.msrb.mxu1 %v7145_v63  ;;  %v7102_v61 = vld [vmem:[#allocation6 + $0x88] sm:$0xf0] }
 0x22b   :  { %2531 = vmatpush.bf16.msrb.mxu3 %v7281_v4  ;;  %2519 = vmatpush.bf16.msrb.mxu2 %v7209_v12  ;;  %v7105_v63 = vor.u32 %v8719_v18, %v7102_v61  ;;  %v7241_v4 = vor.u32 %v8753_v2, %v7238_v3  ;;  %v9256_v61 = vunpack.c.h.bf16 %v9578_v60  ;;  %v9204_v2 = vunpack.c.h.bf16 %v9565_v0 }
 0x22c   :  { %v9252_v3 = vunpack.c.h.bf16 %v9577_v1 }
 0x22e   :  { %2494 = vmatpush.bf16.msrb.mxu0 %v7073_v8  ;;  %2507 = vmatpush.bf16.msrb.mxu1 %v7137_v31  ;;  %v7169_v8 = vor.u32 %v8735_v5, %v7166_v6  ;;  %v7233_v31 = vor.u32 %v8751_v7, %v7230_v26  ;;  %v9564_v5 = vld [vmem:[%s10610_s7 + $0x100] sm:$0xff]  }
 0x22f   :  { %2532 = vmatpush.bf16.msrb.mxu3 %v7273_v13  ;;  %2520 = vmatpush.bf16.msrb.mxu2 %v7201_v30  ;;  %v9576_v6 = vld [vmem:[%s10610_s7 + $0x160] sm:$0xff]   ;;  %v9200_v7 = vunpack.c.h.bf16 %v9564_v5  ;;  %v9199_v26 = vunpack.c.l.bf16 %v9564_v5 }
 0x232   :  { %2495 = vmatpush.bf16.msrb.mxu0 %v7065_v22  ;;  %2508 = vmatpush.bf16.msrb.mxu1 %v7129_v24 }
 0x233   :  { %2533 = vmatpush.bf16.msrb.mxu3 %v7265_v37  ;;  %2521 = vmatpush.bf16.msrb.mxu2 %v7193_v44  ;;  %v9570_v44 = vld [vmem:[%s10610_s7 + $0x130] sm:$0xff]  }
 0x234   :  { %v9224_v45 = vunpack.c.h.bf16 %v9570_v44 }
 0x236   :  { %2496 = vmatpush.bf16.msrb.mxu0 %v7057_v38  ;;  %2509 = vmatpush.bf16.msrb.mxu1 %v7121_v40 }
 0x237   :  { %2534 = vmatpush.bf16.msrb.mxu3 %v7257_v46  ;;  %2522 = vmatpush.bf16.msrb.mxu2 %v7185_v56  ;;  %v9223_v46 = vunpack.c.l.bf16 %v9570_v44  ;;  %v9212_v56 = vunpack.c.h.bf16 %v9567_v54 }
 0x23a   :  { %2497 = vmatpush.bf16.msrb.mxu0 %v7049_v51  ;;  %2510 = vmatpush.bf16.msrb.mxu1 %v7113_v55  ;;  %v9568_v51 = vld [vmem:[%s10610_s7 + $0x120] sm:$0xff]   ;;  %v9579_v55 = vld [vmem:[%s10610_s7 + $0x178] sm:$0xff]  }
 0x23b   :  { %2535 = vmatpush.bf16.msrb.mxu3 %v7249_v59  ;;  %2523 = vmatpush.bf16.msrb.mxu2 %v7177_v48  ;;  %v9216_v52 = vunpack.c.h.bf16 %v9568_v51  ;;  %v9215_v53 = vunpack.c.l.bf16 %v9568_v51  ;;  %v9260_v57 = vunpack.c.h.bf16 %v9579_v55  ;;  %v9259_v17 = vunpack.c.l.bf16 %v9579_v55  ;;  %v9566_v59 = vld [vmem:[%s10610_s7 + $0x110] sm:$0xff]  }
 0x23c   :  { %v9208_v18 = vunpack.c.h.bf16 %v9566_v59  ;;  %v9203_v48 = vunpack.c.l.bf16 %v9565_v0 }
 0x23e   :  { %2498 = vmatpush.bf16.msrb.mxu0 %v7041_v62  ;;  %2511 = vmatpush.bf16.msrb.mxu1 %v7105_v63  ;;  %v9207_v62 = vunpack.c.l.bf16 %v9566_v59  ;;  %v9255_v63 = vunpack.c.l.bf16 %v9578_v60 }
 0x23f   :  { %2536 = vmatpush.bf16.msrb.mxu3 %v7241_v4  ;;  %2524 = vmatpush.bf16.msrb.mxu2 %v7169_v8  ;;  %v9251_v4 = vunpack.c.l.bf16 %v9577_v1  ;;  %v9248_v8 = vunpack.c.h.bf16 %v9576_v6 }
 0x243   :  { %2537 = vmatpush.bf16.msrb.mxu3 %v7233_v31  ;;  %v9247_v31 = vunpack.c.l.bf16 %v9576_v6 }
 0x29d   :  { %v1932_v9 = vpop.f32.mrf.mxu0  ;;  %v1952_v10 = vpop.f32.mrf.mxu1 }
 0x29e   :  { %v1995_v11 = vperm.slane %v1932_v9, 0  ;;  %v1996_v12 = vperm.slane %v1952_v10, 0  ;;  %v2003_v13 = vperm.slane %v1932_v9, 1  ;;  %v2004_v19 = vperm.slane %v1952_v10, 1 }
 0x2a0   :  { %v1999_v35 = vmul.f32 %v1995_v11, %v9978_v14  ;;  %v2000_v15 = vmul.f32 %v1996_v12, %v10025_v21  ;;  %v9575_v11 = vld [vmem:[%s10610_s7 + $0x158] sm:$0xff]  }
 0x2a1   :  { %v9244_v12 = vunpack.c.h.bf16 %v9575_v11 }
 0x2a2   :  { %v2007_v20 = vadd.f32 %v2003_v13, %v1999_v35  ;;  %v2008_v22 = vadd.f32 %v2004_v19, %v2000_v15  ;;  %v9243_v35 = vunpack.c.l.bf16 %v9575_v11  ;;  %v9574_v13 = vld [vmem:[%s10610_s7 + $0x150] sm:$0xff]  }
 0x2a3   :  { %v9240_v15 = vunpack.c.h.bf16 %v9574_v13  ;;  %v9239_v19 = vunpack.c.l.bf16 %v9574_v13 }
 0x2a4   :  { %v2011_v23 = vmax.f32 %v2007_v20, 0.0  ;;  %v2012_v24 = vmax.f32 %v2008_v22, 0.0  ;;  %v1972_v27 = vpop.f32.mrf.mxu2  ;;  %v1992_v28 = vpop.f32.mrf.mxu3 }
 0x2a5   :  { %v1997_v29 = vperm.slane %v1972_v27, 0  ;;  %v1998_v30 = vperm.slane %v1992_v28, 0  ;;  %v2005_v34 = vperm.slane %v1972_v27, 1  ;;  %v2006_v14 = vperm.slane %v1992_v28, 1  ;;  %v9572_v28 = vld [vmem:[%s10610_s7 + $0x140] sm:$0xff]  }
 0x2a6   :  { %v2115_v32 = vpack.c.bf16 %v2011_v23, %v2011_v23  ;;  %v2116_v37 = vpack.c.bf16 %v2012_v24, %v2012_v24  ;;  %v9573_v23 = vld [vmem:[%s10610_s7 + $0x148] sm:$0xff]  }
 0x2a7   :  { %v2001_v33 = vmul.f32 %v1997_v29, %v10057_v16  ;;  %v2002_v36 = vmul.f32 %v1998_v30, %v10080_v25  ;;  %v9571_v16 = vld [vmem:[%s10610_s7 + $0x138] sm:$0xff]   ;;  %v9236_v24 = vunpack.c.h.bf16 %v9573_v23  ;;  %v9235_v27 = vunpack.c.l.bf16 %v9573_v23 }
 0x2a8   :  { %2447 = vmatmul.bf16.vlgmr.msra.gmra.mxu0 %v2115_v32  ;;  %2460 = vmatmul.bf16.vlgmr.msra.gmra.mxu1 %v2116_v37  ;;  %v9228_v25 = vunpack.c.h.bf16 %v9571_v16  ;;  %v9227_v43 = vunpack.c.l.bf16 %v9571_v16  ;;  %v9232_v29 = vunpack.c.h.bf16 %v9572_v28 }
 0x2a9   :  { %v2009_v21 = vadd.f32 %v2005_v34, %v2001_v33  ;;  %v2010_v38 = vadd.f32 %v2006_v14, %v2002_v36  ;;  %2631 = vmatpush.msra.mxu1 %v9260_v57  ;;  %v9231_v33 = vunpack.c.l.bf16 %v9572_v28 }
 0x2aa   :  { %2611 = vmatpush.msra.mxu0 %v9228_v25 }
 0x2ab   :  { %v2013_v39 = vmax.f32 %v2009_v21, 0.0  ;;  %v2014_v40 = vmax.f32 %v2010_v38, 0.0  ;;  %2632 = vmatpush.msra.mxu1 %v9259_v17 }
 0x2ac   :  { %2612 = vmatpush.msra.mxu0 %v9227_v43 }
 0x2ad   :  { %v2117_v41 = vpack.c.bf16 %v2013_v39, %v2013_v39  ;;  %v2118_v42 = vpack.c.bf16 %v2014_v40, %v2014_v40  ;;  %2633 = vmatpush.msra.mxu1 %v9256_v61 }
 0x2ae   :  { %2613 = vmatpush.msra.mxu0 %v9224_v45 }
 0x2af   :  { %2473 = vmatmul.bf16.vlgmr.msra.gmra.mxu2 %v2117_v41  ;;  %2486 = vmatmul.bf16.vlgmr.msra.gmra.mxu3 %v2118_v42 }
 0x2b0   :  { %2614 = vmatpush.msra.mxu0 %v9223_v46  ;;  %2634 = vmatpush.msra.mxu1 %v9255_v63 }
 0x2b2   :  { %2615 = vmatpush.msra.mxu0 %v9220_v49  ;;  %2635 = vmatpush.msra.mxu1 %v9252_v3 }
 0x2b4   :  { %2616 = vmatpush.msra.mxu0 %v9219_v50  ;;  %2636 = vmatpush.msra.mxu1 %v9251_v4 }
 0x2b6   :  { %2617 = vmatpush.msra.mxu0 %v9216_v52  ;;  %2637 = vmatpush.msra.mxu1 %v9248_v8 }
 0x2b8   :  { %2499 = vmatmul.bf16.vlgmr.msrb.gmra.mxu0 %v2115_v32  ;;  %2512 = vmatmul.bf16.vlgmr.msrb.gmra.mxu1 %v2116_v37 }
 0x2b9   :  { %2618 = vmatpush.msra.mxu0 %v9215_v53  ;;  %2638 = vmatpush.msra.mxu1 %v9247_v31 }
 0x2bb   :  { %2619 = vmatpush.msra.mxu0 %v9212_v56  ;;  %2639 = vmatpush.msra.mxu1 %v9244_v12 }
 0x2bd   :  { %2620 = vmatpush.msra.mxu0 %v9211_v58  ;;  %2640 = vmatpush.msra.mxu1 %v9243_v35 }
 0x2bf   :  { %2525 = vmatmul.bf16.vlgmr.msrb.gmra.mxu2 %v2117_v41  ;;  %2538 = vmatmul.bf16.vlgmr.msrb.gmra.mxu3 %v2118_v42 }
 0x2c0   :  { %2621 = vmatpush.msra.mxu0 %v9208_v18  ;;  %2641 = vmatpush.msra.mxu1 %v9240_v15 }
 0x2c2   :  { %2622 = vmatpush.msra.mxu0 %v9207_v62  ;;  %2642 = vmatpush.msra.mxu1 %v9239_v19  ;;  %v2080_v19 = vld [vmem:[#allocation6 + $0x288] sm:$0xff] }
 0x2c3   :  { %v2546_v23 = vunpack.c.h.bf16 %v2080_v19 }
 0x2c4   :  { %2623 = vmatpush.msra.mxu0 %v9204_v2  ;;  %2643 = vmatpush.msra.mxu1 %v9236_v24  ;;  %v2079_v24 = vld [vmem:[#allocation6 + $0x280] sm:$0xff] }
 0x2c5   :  { %2717 = vmatpush.msra.mxu3 %v2546_v23  ;;  %v2543_v28 = vunpack.c.l.bf16 %v2079_v24 }
 0x2c6   :  { %2624 = vmatpush.msra.mxu0 %v9203_v48  ;;  %2644 = vmatpush.msra.mxu1 %v9235_v27 }
 0x2c8   :  { %2625 = vmatpush.msra.mxu0 %v9200_v7  ;;  %2645 = vmatpush.msra.mxu1 %v9232_v29  ;;  %v2544_v29 = vunpack.c.h.bf16 %v2079_v24 }
 0x2ca   :  { %2626 = vmatpush.msra.mxu0 %v9199_v26  ;;  %2646 = vmatpush.msra.mxu1 %v9231_v33 }
 0x2cb   :  { %2718 = vmatpush.msra.mxu3 %v2544_v29 }
 0x325   :  { %v2448_v9 = vpop.f32.mrf.mxu0  ;;  %v2461_v10 = vpop.f32.mrf.mxu1 }
 0x326   :  { %v2462_v30 = vadd.f32 %v2461_v10, %v2448_v9 }
 0x32d   :  { %v2450_v20 = vpop.f32.mrf.mxu0  ;;  %v2463_v22 = vpop.f32.mrf.mxu1 }
 0x32e   :  { %v2545_v22 = vunpack.c.l.bf16 %v2080_v19 }
 0x330   :  { %2697 = vmatpush.msra.mxu2 %v2545_v22  ;;  %v9586_v22 = vld [vmem:[%s10610_s7 + $0x1a0] sm:$0xff]  }
 0x331   :  { %v9288_v23 = vunpack.c.h.bf16 %v9586_v22  ;;  %v9287_v24 = vunpack.c.l.bf16 %v9586_v22  ;;  %v2786_v22 = vld [vmem:[#allocation9 + $0x5] sm:$0x1] }
 0x332   :  { %v2474_v32 = vpop.f32.mrf.mxu2  ;;  %v2487_v37 = vpop.f32.mrf.mxu3  ;;  %2698 = vmatpush.msra.mxu2 %v2543_v28  ;;  %v9584_v28 = vld [vmem:[%s10610_s7 + $0x190] sm:$0xff]  }
 0x333   :  { %v2475_v34 = vadd.f32 %v2474_v32, %v2462_v30  ;;  %v8774_v32 = vld [vmem:[#allocation8 + $0x38] sm:$0xff]  ;;  %v9280_v29 = vunpack.c.h.bf16 %v9584_v28 }
 0x334   :  { %2885 = vmatpush.bf16.msrb.mxu2 %v8774_v32  ;;  %v9583_v32 = vld [vmem:[%s10610_s7 + $0x188] sm:$0xff]  }
 0x335   :  { %v10157_v36 = vadd.f32 %v2487_v37, %v2475_v34  ;;  %v2500_v14 = vpop.f32.mrf.mxu0  ;;  %v2513_v21 = vpop.f32.mrf.mxu1  ;;  %v8782_v37 = vld [vmem:[#allocation8 + $0x78] sm:$0xff]  ;;  %v8773_v34 = vld [vmem:[#allocation8 + $0x30] sm:$0xff] }
 0x336   :  { %v2514_v53 = vadd.f32 %v2513_v21, %v2500_v14  ;;  %2898 = vmatpush.bf16.msrb.mxu3 %v8782_v37  ;;  %v8781_v14 = vld [vmem:[#allocation8 + $0x70] sm:$0xff]  ;;  %v8772_v21 = vld [vmem:[#allocation8 + $0x28] sm:$0xff]  ;;  %v9276_v37 = vunpack.c.h.bf16 %v9583_v32 }
 0x337   :  { %v2579_v38 = vsel %vm1737_vm0, %v10157_v36, 0.0  ;;  %v2593_v39 = vmul.f32 %v10157_v36, %v10157_v36 }
 0x338   :  { %v2580_v40 = vrot.slane %v2579_v38, 4  ;;  %2886 = vmatpush.bf16.msrb.mxu2 %v8773_v34  ;;  %v9582_v34 = vld [vmem:[%s10610_s7 + $0x180] sm:$0xff]  }
 0x339   :  { %v2595_v41 = vsel %vm1737_vm0, %v2593_v39, 0.0 }
 0x33a   :  { %v2581_v42 = vadd.f32 %v2580_v40, %v2579_v38  ;;  %v2596_v16 = vrot.slane %v2595_v41, 4  ;;  %v2476_v25 = vpop.f32.mrf.mxu2  ;;  %v2489_v43 = vpop.f32.mrf.mxu3  ;;  %2899 = vmatpush.bf16.msrb.mxu3 %v8781_v14  ;;  %v8780_v38 = vld [vmem:[#allocation8 + $0x68] sm:$0xff]  ;;  %v9272_v14 = vunpack.c.h.bf16 %v9582_v34 }
 0x33b   :  { %v8770_v43 = vld [vmem:[#allocation8 + $0x18] sm:$0xff] }
 0x33c   :  { %v2582_v44 = vrot.slane %v2581_v42, 2  ;;  %v2597_v45 = vadd.f32 %v2596_v16, %v2595_v41  ;;  %2887 = vmatpush.bf16.msrb.mxu2 %v8772_v21  ;;  %v8771_v41 = vld [vmem:[#allocation8 + $0x20] sm:$0xff]  ;;  %v9271_v21 = vunpack.c.l.bf16 %v9582_v34 }
 0x33d   :  { %v2502_v46 = vpop.f32.mrf.mxu0  ;;  %v2515_v47 = vpop.f32.mrf.mxu1 }
 0x33e   :  { %v2583_v49 = vadd.f32 %v2582_v44, %v2581_v42  ;;  %v2598_v50 = vrot.slane %v2597_v45, 2  ;;  %2900 = vmatpush.bf16.msrb.mxu3 %v8780_v38  ;;  %v8779_v42 = vld [vmem:[#allocation8 + $0x60] sm:$0xff]  ;;  %v8778_v44 = vld [vmem:[#allocation8 + $0x58] sm:$0xff] }
 0x33f   :  { %v2113_v47 = vld [vmem:[#allocation9 + $0x2] sm:$0x1] }
 0x340   :  { %v2584_v51 = vrot.slane %v2583_v49, 1  ;;  %v2599_v52 = vadd.f32 %v2598_v50, %v2597_v45  ;;  %2888 = vmatpush.bf16.msrb.mxu2 %v8771_v41 }
 0x342   :  { %v2526_v54 = vpop.f32.mrf.mxu2  ;;  %v2539_v55 = vpop.f32.mrf.mxu3  ;;  %v2600_v56 = vrot.slane %v2599_v52, 1  ;;  %v2585_v58 = vadd.f32 %v2584_v51, %v2583_v49  ;;  %2901 = vmatpush.bf16.msrb.mxu3 %v8779_v42 }
 0x343   :  { %v2527_v57 = vadd.f32 %v2526_v54, %v2514_v53 }
 0x344   :  { %v2601_v17 = vadd.f32 %v2600_v56, %v2599_v52  ;;  %2889 = vmatpush.bf16.msrb.mxu2 %v8770_v43  ;;  %v2114_v52 = vld [vmem:[#allocation9 + $0x3] sm:$0x1] }
 0x345   :  { %v10164_v59 = vadd.f32 %v2539_v55, %v2527_v57  ;;  %v8769_v57 = vld [vmem:[#allocation8 + $0x10] sm:$0xff] }
 0x346   :  { %v2609_v60 = vsel %vm1798_vm1, %v2585_v58, %v2601_v17  ;;  %2902 = vmatpush.bf16.msrb.mxu3 %v8778_v44  ;;  %v8777_v58 = vld [vmem:[#allocation8 + $0x50] sm:$0xff]  ;;  %v8768_v17 = vld [vmem:[#allocation8 + $0x8] sm:$0xff] }
 0x347   :  { %v2586_v18 = vsel %vm1737_vm0, %v10164_v59, 0.0  ;;  %v2594_v61 = vmul.f32 %v10164_v59, %v10164_v59  ;;  %2627 = vmatmul.f32.vlgmr.msra.gmra.mxu0 %v2609_v60  ;;  %v8776_v60 = vld [vmem:[#allocation8 + $0x48] sm:$0xff] }
 0x348   :  { %v2587_v62 = vrot.slane %v2586_v18, 4  ;;  %2890 = vmatpush.bf16.msrb.mxu2 %v8769_v57 }
 0x349   :  { %v2602_v63 = vsel %vm1737_vm0, %v2594_v61, 0.0  ;;  %v8775_v61 = vld [vmem:[#allocation8 + $0x40] sm:$0xff] }
 0x34a   :  { %v2588_v0 = vadd.f32 %v2587_v62, %v2586_v18  ;;  %v2603_v1 = vrot.slane %v2602_v63, 4  ;;  %v2528_v2 = vpop.f32.mrf.mxu2  ;;  %v2541_v3 = vpop.f32.mrf.mxu3  ;;  %2903 = vmatpush.bf16.msrb.mxu3 %v8777_v58  ;;  %v8767_v18 = vld [vmem:[#allocation8] sm:$0xff]  ;;  %v9589_v62 = vld [vmem:[%s10610_s7 + $0x1b8] sm:$0xff]  }
 0x34b   :  { %v9587_v3 = vld [vmem:[%s10610_s7 + $0x1a8] sm:$0xff]  }
 0x34c   :  { %v2589_v48 = vrot.slane %v2588_v0, 2  ;;  %v2604_v4 = vadd.f32 %v2603_v1, %v2602_v63  ;;  %2891 = vmatpush.bf16.msrb.mxu2 %v8768_v17  ;;  %v9588_v63 = vld [vmem:[%s10610_s7 + $0x1b0] sm:$0xff]   ;;  %v9299_v1 = vunpack.c.l.bf16 %v9589_v62  ;;  %v10210_v17 = vld [vmem:[#allocation8 + $0x98] sm:$0xff]  }
 0x34d   :  { %v9296_v2 = vunpack.c.h.bf16 %v9588_v63 }
 0x34e   :  { %v2590_v5 = vadd.f32 %v2589_v48, %v2588_v0  ;;  %v2605_v6 = vrot.slane %v2604_v4, 2  ;;  %2904 = vmatpush.bf16.msrb.mxu3 %v8776_v60  ;;  %v9300_v0 = vunpack.c.h.bf16 %v9589_v62  ;;  %v9295_v48 = vunpack.c.l.bf16 %v9588_v63  ;;  %v10216_v63 = vld [vmem:[#allocation8 + $0x90] sm:$0xff]  }
 0x34f   :  { %v9267_v62 = vunpack.c.l.bf16 %v10210_v17 }
 0x350   :  { %v2591_v7 = vrot.slane %v2590_v5, 1  ;;  %v2606_v8 = vadd.f32 %v2605_v6, %v2604_v4  ;;  %2892 = vmatpush.bf16.msrb.mxu2 %v8767_v18  ;;  %2947 = vmatpush.msrb.mxu0 %v9300_v0  ;;  %v9292_v4 = vunpack.c.h.bf16 %v9587_v3  ;;  %v9268_v18 = vunpack.c.h.bf16 %v10210_v17 }
 0x352   :  { %v2607_v26 = vrot.slane %v2606_v8, 1  ;;  %v2592_v31 = vadd.f32 %v2591_v7, %v2590_v5  ;;  %2905 = vmatpush.bf16.msrb.mxu3 %v8775_v61  ;;  %2948 = vmatpush.msrb.mxu0 %v9299_v1  ;;  %v9291_v5 = vunpack.c.l.bf16 %v9587_v3  ;;  %v9263_v3 = vunpack.c.l.bf16 %v10216_v63 }
 0x353   :  { %3011 = vmatpush.msrb.mxu1 %v9268_v18 }
 0x354   :  { %v2608_v9 = vadd.f32 %v2607_v26, %v2606_v8  ;;  %2949 = vmatpush.msrb.mxu0 %v9296_v2 }
 0x355   :  { %3012 = vmatpush.msrb.mxu1 %v9267_v62 }
 0x356   :  { %v2610_v10 = vsel %vm1798_vm1, %v2592_v31, %v2608_v9  ;;  %2950 = vmatpush.msrb.mxu0 %v9295_v48 }
 0x357   :  { %2647 = vmatmul.f32.vlgmr.msra.gmra.mxu1 %v2610_v10 }
 0x358   :  { %2951 = vmatpush.msrb.mxu0 %v9292_v4 }
 0x35a   :  { %2952 = vmatpush.msrb.mxu0 %v9291_v5 }
 0x35c   :  { %2953 = vmatpush.msrb.mxu0 %v9288_v23 }
 0x35e   :  { %2954 = vmatpush.msrb.mxu0 %v9287_v24 }
 0x3c4   :  { %v2628_v11 = vpop.f32.mrf.mxu0 }
 0x3d4   :  { %v2648_v12 = vpop.f32.mrf.mxu1 }
 0x3d5   :  { %v2649_v35 = vadd.f32 %v2648_v12, %v2628_v11 }
 0x3d7   :  { %v2651_v13 = vmul.f32 0.03125, %v2649_v35 }
 0x3d9   :  { %v2652_v15 = vmul.f32 %v2651_v13, %v2651_v13 }
 0x3db   :  { %v2654_v20 = vrot.slane %v2652_v15, 7 }
 0x3dd   :  { %v2656_v27 = vsub.f32 %v2651_v13, %v2654_v20 }
 0x3df   :  { %v2657_v30 = vmax.f32 %v2656_v27, 0.0 }
 0x3e1   :  { %v2658_v33 = vadd.f32 1e-05, %v2657_v30  ;;  %v9279_v30 = vunpack.c.l.bf16 %v9584_v28  ;;  %v8784_v28 = vld [vmem:[%s10608_s5 + $0x8] sm:$0xff] }
 0x3e3   :  { %9663 = vrsqrt.f32 %v2658_v33  ;;  %vm2665_vm7 = vweird.f32 %v2658_v33 }
 0x3e9   :  { %v9664_v39 = vpop.eup %9663 }
 0x3ea   :  { %v2660_v40 = vmul.f32 %v9664_v39, %v2658_v33  ;;  %vm2666_vm6 = vweird.f32 %v9664_v39  ;;  %v9275_v33 = vunpack.c.l.bf16 %v9583_v32 }
 0x3eb   :  { %vm2667_vm8 = vmor %vm2665_vm7, %vm2666_vm6  ;;  %vm3180_vm6 = vcmask 523264  }
 0x3ec   :  { %v2661_v16 = vmul.f32 %v9664_v39, %v2660_v40 }
 0x3ee   :  { %v2662_v25 = vmul.f32 0.5, %v2661_v16 }
 0x3f0   :  { %v2663_v45 = vsub.f32 1.5, %v2662_v25 }
 0x3f2   :  { %v2664_v46 = vmul.f32 %v9664_v39, %v2663_v45 }
 0x3f4   :  { %v2668_v49 = vsel %vm2667_vm8, %v9664_v39, %v2664_v46  ;;  %vm3204_vm8 = vcmask 254976  }
 0x3f5   :  { %v2670_v50 = vrot.slane %v2668_v49, 1 }
 0x3f7   :  { %v2672_v51 = vmul.f32 %v2670_v50, %v2113_v47 }
 0x3f9   :  { %v2673_v53 = vmul.f32 %v2672_v51, %v2651_v13 }
 0x3fb   :  { %v2674_v54 = vsub.f32 %v2114_v52, %v2673_v53 }
 0x3fd   :  { %v2676_v55 = vrot.slane %v2674_v54, 7 }
 0x3ff   :  { %v2678_v56 = vsel %vm1798_vm1, %v2672_v51, %v2676_v55 }
 0x400   :  { %7290 = vmatmul.msk.f32.vlgmr.msra.gmra.mxu2 %vm2679_vm9, %v2678_v56  ;;  %7291 = vmatmul.msk.f32.vlgmr.msra.gmra.mxu3 %vm2679_vm9, %v2678_v56 }
 0x483   :  { %v2700_v6 = vpop.f32.mrf.mxu2  ;;  %v2720_v7 = vpop.f32.mrf.mxu3 }
 0x484   :  { %v2723_v8 = vperm.slane %v2700_v6, 0  ;;  %v2724_v26 = vperm.slane %v2720_v7, 0  ;;  %v2727_v9 = vperm.slane %v2700_v6, 1  ;;  %v2728_v11 = vperm.slane %v2720_v7, 1  ;;  %v8789_v6 = vld [vmem:[%s10608_s5 + $0x30] sm:$0xff]  ;;  %v8788_v7 = vld [vmem:[%s10608_s5 + $0x28] sm:$0xff] }
 0x486   :  { %v2725_v31 = vmul.f32 %v2723_v8, %v10157_v36  ;;  %v2726_v10 = vmul.f32 %v2724_v26, %v10164_v59  ;;  %v9585_v36 = vld [vmem:[%s10610_s7 + $0x198] sm:$0xff]  }
 0x487   :  { %v9284_v59 = vunpack.c.h.bf16 %v9585_v36  ;;  %v9283_v27 = vunpack.c.l.bf16 %v9585_v36 }
 0x488   :  { %v2729_v12 = vadd.f32 %v2727_v9, %v2725_v31  ;;  %v2730_v35 = vadd.f32 %v2728_v11, %v2726_v10  ;;  %v8787_v31 = vld [vmem:[%s10608_s5 + $0x20] sm:$0xff]  ;;  %v8786_v11 = vld [vmem:[%s10608_s5 + $0x18] sm:$0xff] }
 0x489   :  { %2955 = vmatpush.msrb.mxu0 %v9284_v59 }
 0x48a   :  { %v2731_v13 = vmax.f32 %v2729_v12, 0.0  ;;  %v2732_v15 = vmax.f32 %v2730_v35, 0.0 }
 0x48b   :  { %2956 = vmatpush.msrb.mxu0 %v9283_v27 }
 0x48c   :  { %v2787_v19 = vpack.c.bf16 %v2731_v13, %v2731_v13  ;;  %v2788_v20 = vpack.c.bf16 %v2732_v15, %v2732_v15  ;;  %v2785_v13 = vld [vmem:[#allocation9 + $0x4] sm:$0x1] }
 0x48d   :  { %2957 = vmatpush.msrb.mxu0 %v9280_v29 }
 0x48e   :  { %2893 = vmatmul.bf16.vlgmr.msrb.gmra.mxu2 %v2787_v19  ;;  %2906 = vmatmul.bf16.vlgmr.msrb.gmra.mxu3 %v2788_v20 }
 0x48f   :  { %2958 = vmatpush.msrb.mxu0 %v9279_v30 }
 0x491   :  { %2959 = vmatpush.msrb.mxu0 %v9276_v37 }
 0x493   :  { %2960 = vmatpush.msrb.mxu0 %v9275_v33 }
 0x495   :  { %2961 = vmatpush.msrb.mxu0 %v9272_v14 }
 0x497   :  { %2962 = vmatpush.msrb.mxu0 %v9271_v21 }
 0x499   :  { %3299 = vmatpush.msra.mxu0 %v9300_v0 }
 0x49b   :  { %3300 = vmatpush.msra.mxu0 %v9299_v1  ;;  %v9264_v1 = vunpack.c.h.bf16 %v10216_v63  ;;  %v8796_v63 = vld [vmem:[#allocation8 + $0x88] sm:$0xff] }
 0x49c   :  { %3256 = vmatpush.bf16.msra.mxu3 %v8796_v63 }
 0x49d   :  { %3301 = vmatpush.msra.mxu0 %v9296_v2  ;;  %3013 = vmatpush.msrb.mxu1 %v9264_v1 }
 0x49f   :  { %3302 = vmatpush.msra.mxu0 %v9295_v48  ;;  %3014 = vmatpush.msrb.mxu1 %v9263_v3 }
 0x4a1   :  { %3303 = vmatpush.msra.mxu0 %v9292_v4  ;;  %v8790_v4 = vld [vmem:[%s10608_s5 + $0x38] sm:$0xff] }
 0x4a2   :  { %3089 = vmatpush.bf16.msra.mxu1 %v8790_v4  ;;  %v8791_v4 = vld [vmem:[%s10609_s6] sm:$0xff] }
 0x4a3   :  { %3304 = vmatpush.msra.mxu0 %v9291_v5 }
 0x4a5   :  { %3305 = vmatpush.msra.mxu0 %v9288_v23 }
 0x4a6   :  { %3090 = vmatpush.bf16.msra.mxu1 %v8789_v6 }
 0x4a7   :  { %3306 = vmatpush.msra.mxu0 %v9287_v24 }
 0x4a9   :  { %3307 = vmatpush.msra.mxu0 %v9284_v59 }
 0x4aa   :  { %3091 = vmatpush.bf16.msra.mxu1 %v8788_v7 }
 0x4ab   :  { %3308 = vmatpush.msra.mxu0 %v9283_v27  ;;  %v8785_v27 = vld [vmem:[%s10608_s5 + $0x10] sm:$0xff] }
 0x4ad   :  { %3309 = vmatpush.msra.mxu0 %v9280_v29  ;;  %v8783_v29 = vld [vmem:[%s10608_s5] sm:$0xff] }
 0x4ae   :  { %3092 = vmatpush.bf16.msra.mxu1 %v8787_v31 }
 0x4af   :  { %3310 = vmatpush.msra.mxu0 %v9279_v30 }
 0x4b1   :  { %3311 = vmatpush.msra.mxu0 %v9276_v37 }
 0x4b2   :  { %3093 = vmatpush.bf16.msra.mxu1 %v8786_v11 }
 0x4b3   :  { %3312 = vmatpush.msra.mxu0 %v9275_v33 }
 0x4b5   :  { %3313 = vmatpush.msra.mxu0 %v9272_v14 }
 0x4b6   :  { %3094 = vmatpush.bf16.msra.mxu1 %v8785_v27 }
 0x4b7   :  { %3314 = vmatpush.msra.mxu0 %v9271_v21 }
 0x4ba   :  { %3095 = vmatpush.bf16.msra.mxu1 %v8784_v28  ;;  %v3206_v28 = vld [vmem:[%s10604_s1] sm:$0x3] }
 0x4be   :  { %3096 = vmatpush.bf16.msra.mxu1 %v8783_v29 }
 0x511   :  { %v2894_v38 = vpop.f32.mrf.mxu2  ;;  %v2907_v39 = vpop.f32.mrf.mxu3 }
 0x512   :  { %v10202_v40 = vadd.f32 %v2907_v39, %v2894_v38  ;;  %v9841_v38 = vmov 2.0  }
 0x514   :  { %v2931_v41 = vsel %vm1737_vm0, %v10202_v40, 0.0  ;;  %v2938_v42 = vmul.f32 %v10202_v40, %v10202_v40 }
 0x515   :  { %v2932_v16 = vrot.slane %v2931_v41, 4 }
 0x516   :  { %v2939_v25 = vsel %vm1737_vm0, %v2938_v42, 0.0 }
 0x517   :  { %v2933_v43 = vadd.f32 %v2932_v16, %v2931_v41  ;;  %v2940_v44 = vrot.slane %v2939_v25, 4 }
 0x519   :  { %v2934_v45 = vrot.slane %v2933_v43, 2  ;;  %v2941_v46 = vadd.f32 %v2940_v44, %v2939_v25  ;;  %v2896_v47 = vpop.f32.mrf.mxu2  ;;  %v2909_v49 = vpop.f32.mrf.mxu3 }
 0x51b   :  { %v2935_v50 = vadd.f32 %v2934_v45, %v2933_v43  ;;  %v2942_v51 = vrot.slane %v2941_v46, 2 }
 0x51d   :  { %v2936_v52 = vrot.slane %v2935_v50, 1  ;;  %v2943_v53 = vadd.f32 %v2942_v51, %v2941_v46 }
 0x51f   :  { %v2944_v54 = vrot.slane %v2943_v53, 1  ;;  %v2937_v55 = vadd.f32 %v2936_v52, %v2935_v50 }
 0x521   :  { %v2945_v56 = vadd.f32 %v2944_v54, %v2943_v53 }
 0x523   :  { %v2946_v57 = vsel %vm1798_vm1, %v2937_v55, %v2945_v56  ;;  %v8794_v55 = vld [vmem:[%s10609_s6 + $0x18] sm:$0xff] }
 0x524   :  { %2963 = vmatmul.f32.vlgmr.msrb.gmra.mxu0 %v2946_v57  ;;  %3188 = vmatpush.bf16.msra.mxu2 %v8794_v55 }
 0x5a1   :  { %v2964_v58 = vpop.f32.mrf.mxu0 }
 0x5a2   :  { %v2967_v60 = vmul.f32 0.125, %v2964_v58  ;;  %v8793_v58 = vld [vmem:[%s10609_s6 + $0x10] sm:$0xff] }
 0x5a3   :  { %3189 = vmatpush.bf16.msra.mxu2 %v8793_v58  ;;  %v8811_v58 = vld [vmem:[#allocation6 + $0x274] sm:$0xf] }
 0x5a4   :  { %v2968_v61 = vmul.f32 %v2967_v60, %v2967_v60 }
 0x5a6   :  { %v2970_v0 = vrot.slane %v2968_v61, 7 }
 0x5a8   :  { %v2972_v2 = vsub.f32 %v2967_v60, %v2970_v0  ;;  %v8792_v0 = vld [vmem:[%s10609_s6 + $0x8] sm:$0xff] }
 0x5a9   :  { %3190 = vmatpush.bf16.msra.mxu2 %v8792_v0  ;;  %v7476_v0 = vld [vmem:[#allocation6 + $0x278] sm:$0xf0] }
 0x5aa   :  { %v2973_v48 = vmax.f32 %v2972_v2, 0.0 }
 0x5ac   :  { %v2974_v5 = vadd.f32 1e-05, %v2973_v48 }
 0x5ad   :  { %3191 = vmatpush.bf16.msra.mxu2 %v8791_v4  ;;  %v8810_v4 = vld [vmem:[#allocation6 + $0x264] sm:$0xf0] }
 0x5ae   :  { %9665 = vrsqrt.f32 %v2974_v5  ;;  %vm2981_vm11 = vweird.f32 %v2974_v5 }
 0x5af   :  { %9667 = vrcp.f32 %v9841_v38 }
 0x5b1   :  { %3362 = vmatpush.msrb.mxu2 %v9268_v18  ;;  %v9659_v18 = vld [vmem:[#allocation9 + $0x6] ss:$0 sm:$0xff] }
 0x5b3   :  { %3363 = vmatpush.msrb.mxu2 %v9267_v62 }
 0x5b4   :  { %v9666_v8 = vpop.eup %9665 }
 0x5b5   :  { %v2976_v26 = vmul.f32 %v9666_v8, %v2974_v5  ;;  %vm2982_vm10 = vweird.f32 %v9666_v8  ;;  %v9668_v39 = vpop.eup %9667  ;;  %3364 = vmatpush.msrb.mxu2 %v9264_v1 }
 0x5b6   :  { %vm2983_vm12 = vmor %vm2981_vm11, %vm2982_vm10  ;;  %v3111_v41 = vmul.f32 2.0, %v9668_v39  ;;  %vm3115_vm15 = vweird.f32 %v9668_v39 }
 0x5b7   :  { %v2977_v9 = vmul.f32 %v9666_v8, %v2976_v26  ;;  %3365 = vmatpush.msrb.mxu2 %v9263_v3  ;;  %v8795_v3 = vld [vmem:[#allocation8 + $0x80] sm:$0xff] }
 0x5b8   :  { %v3112_v42 = vsub.f32 1.0, %v3111_v41  ;;  %3257 = vmatpush.bf16.msra.mxu3 %v8795_v3  ;;  %v7442_v3 = vld [vmem:[#allocation6 + $0x230] sm:$0xf] }
 0x5b9   :  { %v2978_v10 = vmul.f32 0.5, %v2977_v9 }
 0x5ba   :  { %v3113_v44 = vmul.f32 %v9668_v39, %v3112_v42 }
 0x5bb   :  { %v2979_v12 = vsub.f32 1.5, %v2978_v10 }
 0x5bc   :  { %v3114_v47 = vadd.f32 %v9668_v39, %v3113_v44 }
 0x5bd   :  { %v2980_v35 = vmul.f32 %v9666_v8, %v2979_v12 }
 0x5be   :  { %v3116_v51 = vsel %vm3115_vm15, %v9668_v39, %v3114_v47 }
 0x5bf   :  { %v2984_v15 = vsel %vm2983_vm12, %v9666_v8, %v2980_v35  ;;  %v9660_v35 = vld [vmem:[#allocation9 + $0x7] ss:$0 sm:$0xff] }
 0x5c0   :  { %v2986_v19 = vrot.slane %v2984_v15, 1 }
 0x5c2   :  { %v2988_v20 = vmul.f32 %v2986_v19, %v2785_v13 }
 0x5c4   :  { %v2989_v23 = vmul.f32 %v2988_v20, %v2967_v60 }
 0x5c6   :  { %v2990_v24 = vsub.f32 %v2786_v22, %v2989_v23  ;;  %v3197_v22 = vlaneseq }
 0x5c8   :  { %v2992_v36 = vrot.slane %v2990_v24, 7  ;;  %v3198_v24 = vand.u32 127, %v3197_v22  ;;  %v8803_v22 = vld [vmem:[#allocation6 + $0x234] sm:$0xf] }
 0x5ca   :  { %v2994_v59 = vsel %vm1798_vm1, %v2988_v20, %v2992_v36  ;;  %vm3199_vm7 = vcmp.lt.s32.totalorder %v3198_v24, 16 }
 0x5cb   :  { %7356 = vmatmul.msk.f32.vlgmr.msrb.gmra.mxu1 %vm2995_vm13, %v2994_v59 }
 0x648   :  { %v3016_v30 = vpop.f32.mrf.mxu1 }
 0x649   :  { %v3019_v32 = vperm.slane %v3016_v30, 0  ;;  %v3021_v33 = vperm.slane %v3016_v30, 1 }
 0x64b   :  { %v3020_v37 = vmul.f32 %v3019_v32, %v10202_v40 }
 0x64d   :  { %v3022_v34 = vadd.f32 %v3021_v33, %v3020_v37 }
 0x64f   :  { %v3023_v14 = vmax.f32 %v3022_v34, 0.0 }
 0x651   :  { %v3024_v21 = vpack.c.bf16 %v3023_v14, %v3023_v14 }
 0x653   :  { %3097 = vmatmul.bf16.vlgmr.msra.gmra.mxu1 %v3024_v21 }
 0x6d0   :  { %v3098_v16 = vpop.f32.mrf.mxu1 }
 0x6d1   :  { %v3103_v25 = vsel %vm3102_vm14, %v3098_v16, 0.0 }
 0x6d2   :  { %v3104_v43 = vrot.slane %v3103_v25, 4 }
 0x6d4   :  { %v3105_v45 = vadd.f32 %v3104_v43, %v3103_v25 }
 0x6d6   :  { %v3106_v46 = vrot.slane %v3105_v45, 2 }
 0x6d8   :  { %v3107_v40 = vadd.f32 %v3106_v46, %v3105_v45  ;;  %v3100_v49 = vpop.f32.mrf.mxu1 }
 0x6da   :  { %v3108_v50 = vrot.slane %v3107_v40, 1 }
 0x6dc   :  { %v3109_v52 = vadd.f32 %v3108_v50, %v3107_v40 }
 0x6de   :  { %v3117_v53 = vmul.f32 %v3116_v51, %v3109_v52 }
 0x6e0   :  { %v3118_v54 = vsub.f32 %v3098_v16, %v3117_v53 }
 0x6e2   :  { %v3119_v56 = vmul.f32 %v3118_v54, %v3118_v54 }
 0x6e4   :  { %v3120_v57 = vsel %vm3102_vm14, %v3119_v56, 0.0  ;;  %v7474_v56 = vld [vmem:[#allocation6 + $0x270] sm:$0xf] }
 0x6e5   :  { %v3121_v60 = vrot.slane %v3120_v57, 4 }
 0x6e7   :  { %v3122_v61 = vadd.f32 %v3121_v60, %v3120_v57  ;;  %v8812_v57 = vld [vmem:[#allocation6 + $0x274] sm:$0xf0] }
 0x6e9   :  { %v3123_v2 = vrot.slane %v3122_v61, 2 }
 0x6eb   :  { %v3124_v48 = vadd.f32 %v3123_v2, %v3122_v61  ;;  %v7475_v61 = vor.u32 %v8812_v57, %v7474_v56  ;;  %v7466_v2 = vld [vmem:[#allocation6 + $0x260] sm:$0xf]  ;;  %v9615_v57 = vld [vmem:[%s10610_s7 + $0x178] sm:$0xff]  }
 0x6ed   :  { %v3125_v5 = vrot.slane %v3124_v48, 1  ;;  %3508 = vmatpush.bf16.msrb.mxu3 %v7475_v61  ;;  %v9404_v61 = vunpack.c.h.bf16 %v9615_v57 }
 0x6ef   :  { %v3126_v6 = vadd.f32 %v3125_v5, %v3124_v48  ;;  %v7479_v48 = vor.u32 %v8811_v58, %v7476_v0  ;;  %v8809_v5 = vld [vmem:[#allocation6 + $0x264] sm:$0xf]  ;;  %v9403_v0 = vunpack.c.l.bf16 %v9615_v57  ;;  %3622 = vmatpush.msrb.mxu0 %v9404_v61 }
 0x6f0   :  { %v9614_v58 = vld [vmem:[%s10610_s7 + $0x170] sm:$0xff]  }
 0x6f1   :  { %v3127_v7 = vmul.f32 %v3126_v6, %v3116_v51  ;;  %v7468_v6 = vld [vmem:[#allocation6 + $0x268] sm:$0xf0]  ;;  %3521 = vmatpush.bf16.msrb.mxu1 %v7479_v48  ;;  %v9606_v48 = vld [vmem:[%s10610_s7 + $0x130] sm:$0xff]   ;;  %3623 = vmatpush.msrb.mxu0 %v9403_v0 }
 0x6f3   :  { %v3128_v8 = vadd.f32 1e-05, %v3127_v7  ;;  %v7467_v7 = vor.u32 %v8810_v4, %v7466_v2 }
 0x6f5   :  { %9669 = vrsqrt.f32 %v3128_v8  ;;  %vm3135_vm3 = vweird.f32 %v3128_v8  ;;  %3509 = vmatpush.bf16.msrb.mxu3 %v7467_v7  ;;  %v9613_v7 = vld [vmem:[%s10610_s7 + $0x168] sm:$0xff]  }
 0x6fb   :  { %v9670_v26 = vpop.eup %9669 }
 0x6fc   :  { %v3130_v31 = vmul.f32 %v9670_v26, %v3128_v8  ;;  %vm3136_vm2 = vweird.f32 %v9670_v26  ;;  %v7471_v8 = vor.u32 %v8809_v5, %v7468_v6  ;;  %v9400_v5 = vunpack.c.h.bf16 %v9614_v58 }
 0x6fd   :  { %vm3137_vm4 = vmor %vm3135_vm3, %vm3136_vm2  ;;  %v9368_v6 = vunpack.c.h.bf16 %v9606_v48 }
 0x6fe   :  { %v3131_v9 = vmul.f32 %v9670_v26, %v3130_v31  ;;  %v8808_v31 = vld [vmem:[#allocation6 + $0x254] sm:$0xf0]  ;;  %3522 = vmatpush.bf16.msrb.mxu1 %v7471_v8  ;;  %v9399_v8 = vunpack.c.l.bf16 %v9614_v58  ;;  %3624 = vmatpush.msrb.mxu0 %v9400_v5 }
 0x700   :  { %v3132_v10 = vmul.f32 0.5, %v3131_v9  ;;  %v8807_v9 = vld [vmem:[#allocation6 + $0x254] sm:$0xf]  ;;  %3625 = vmatpush.msrb.mxu0 %v9399_v8 }
 0x702   :  { %v3133_v11 = vsub.f32 1.5, %v3132_v10  ;;  %v7460_v10 = vld [vmem:[#allocation6 + $0x258] sm:$0xf0] }
 0x704   :  { %v3134_v12 = vmul.f32 %v9670_v26, %v3133_v11 }
 0x706   :  { %v3138_v17 = vsel %vm3137_vm4, %v9670_v26, %v3134_v12  ;;  %v7458_v26 = vld [vmem:[#allocation6 + $0x250] sm:$0xf]  ;;  %v7463_v12 = vor.u32 %v8807_v9, %v7460_v10  ;;  %v9395_v10 = vunpack.c.l.bf16 %v9613_v7 }
 0x707   :  { %v3139_v62 = vmul.f32 %v3138_v17, %v3118_v54  ;;  %v7459_v11 = vor.u32 %v8808_v31, %v7458_v26  ;;  %v8806_v17 = vld [vmem:[#allocation6 + $0x244] sm:$0xf0]  ;;  %v9367_v26 = vunpack.c.l.bf16 %v9606_v48  ;;  %v9396_v31 = vunpack.c.h.bf16 %v9613_v7  ;;  %v9612_v9 = vld [vmem:[%s10610_s7 + $0x160] sm:$0xff]  }
 0x708   :  { %3523 = vmatpush.bf16.msrb.mxu1 %v7463_v12 }
 0x709   :  { %v3142_v13 = vmul.f32 %v9659_v18, %v3139_v62  ;;  %v7450_v18 = vld [vmem:[#allocation6 + $0x240] sm:$0xf]  ;;  %3510 = vmatpush.bf16.msrb.mxu3 %v7459_v11  ;;  %3626 = vmatpush.msrb.mxu0 %v9396_v31  ;;  %v9392_v11 = vunpack.c.h.bf16 %v9612_v9 }
 0x70b   :  { %v3145_v15 = vadd.f32 %v9660_v35, %v3142_v13  ;;  %v8805_v35 = vld [vmem:[#allocation6 + $0x244] sm:$0xf]  ;;  %v7452_v13 = vld [vmem:[#allocation6 + $0x248] sm:$0xf0]  ;;  %3627 = vmatpush.msrb.mxu0 %v9395_v10 }
 0x70c   :  { %v7455_v63 = vor.u32 %v8805_v35, %v7452_v13 }
 0x70d   :  { %v3146_v1 = vmax.f32 %v3145_v15, 0.0  ;;  %3628 = vmatpush.msrb.mxu0 %v9392_v11 }
 0x70e   :  { %3524 = vmatpush.bf16.msrb.mxu1 %v7455_v63  ;;  %v9391_v63 = vunpack.c.l.bf16 %v9612_v9 }
 0x70f   :  { %v3147_v19 = vpack.c.bf16 %v3146_v1, %v3146_v1  ;;  %v7451_v1 = vor.u32 %v8806_v17, %v7450_v18 }
 0x710   :  { %3629 = vmatpush.msrb.mxu0 %v9391_v63 }
 0x711   :  { %7405 = vmatmul.msk.bf16.vlgmr.msra.gmra.mxu2 %vm3180_vm6, %v3147_v19  ;;  %3511 = vmatpush.bf16.msrb.mxu3 %v7451_v1  ;;  %v9605_v1 = vld [vmem:[%s10610_s7 + $0x128] sm:$0xff]  }
 0x794   :  { %v3193_v20 = vpop.f32.mrf.mxu2 }
 0x795   :  { %v3200_v23 = vmul.f32 1.442695, %v3193_v20 }
 0x797   :  { %9671 = vpow2.f32 %v3200_v23  ;;  %v7444_v23 = vld [vmem:[#allocation6 + $0x238] sm:$0xf0] }
 0x79c   :  { %v3195_v36 = vpop.f32.mrf.mxu2 }
 0x79d   :  { %v9672_v59 = vpop.eup %9671 }
 0x79e   :  { %v3202_v27 = vadd.f32 1.0, %v9672_v59 }
 0x7a0   :  { %v3203_v29 = vsel %vm3199_vm7, %v3193_v20, %v3202_v27  ;;  %v8804_v20 = vld [vmem:[#allocation6 + $0x234] sm:$0xf0]  ;;  %v7447_v27 = vor.u32 %v8803_v22, %v7444_v23  ;;  %v9604_v22 = vld [vmem:[%s10610_s7 + $0x120] sm:$0xff]  }
 0x7a1   :  { %3205 = vst.msk [vmem:[%s10613_s10] sm:$0x3] %vm3204_vm8, %v3203_v29  ;;  %v3207_v30 = vmul.f32 %v3206_v28, %v3203_v29  ;;  %v7443_v36 = vor.u32 %v8804_v20, %v7442_v3  ;;  %v3232_v29 = vld [vmem:[#allocation9 + $0x8] sm:$0x1]  ;;  %v9611_v3 = vld [vmem:[%s10610_s7 + $0x158] sm:$0xff]   ;;  %v9363_v20 = vunpack.c.l.bf16 %v9605_v1  ;;  %v9360_v23 = vunpack.c.h.bf16 %v9604_v22 }
 0x7a2   :  { %3525 = vmatpush.bf16.msrb.mxu1 %v7447_v27 }
 0x7a3   :  { %v3234_v32 = vpack.c.bf16 %v3207_v30, %v3207_v30  ;;  %3512 = vmatpush.bf16.msrb.mxu3 %v7443_v36  ;;  %v9610_v36 = vld [vmem:[%s10610_s7 + $0x150] sm:$0xff]  }
 0x7a4   :  { %v9384_v27 = vunpack.c.h.bf16 %v9610_v36 }
 0x7a5   :  { %7414 = vmatmul.msk.bf16.vlgmr.msra.gmra.mxu3 %vm2995_vm13, %v3234_v32 }
 0x828   :  { %v10282_v37 = vpop.f32.mrf.mxu3 }
 0x829   :  { %v3283_v33 = vsel %vm1737_vm0, %v10282_v37, 0.0  ;;  %v3290_v34 = vmul.f32 %v10282_v37, %v10282_v37 }
 0x82a   :  { %v3284_v14 = vrot.slane %v3283_v33, 4 }
 0x82b   :  { %v3291_v21 = vsel %vm1737_vm0, %v3290_v34, 0.0  ;;  %v3233_v34 = vld [vmem:[#allocation9 + $0x9] sm:$0x1] }
 0x82c   :  { %v3285_v38 = vadd.f32 %v3284_v14, %v3283_v33  ;;  %v3292_v39 = vrot.slane %v3291_v21, 4 }
 0x82e   :  { %v3286_v41 = vrot.slane %v3285_v38, 2  ;;  %v3293_v42 = vadd.f32 %v3292_v39, %v3291_v21 }
 0x830   :  { %v3287_v16 = vadd.f32 %v3286_v41, %v3285_v38  ;;  %v3294_v25 = vrot.slane %v3293_v42, 2  ;;  %v3261_v43 = vpop.f32.mrf.mxu3  ;;  %v7434_v41 = vld [vmem:[#allocation6 + $0x220] sm:$0xf] }
 0x831   :  { %v7436_v43 = vld [vmem:[#allocation6 + $0x228] sm:$0xf0] }
 0x832   :  { %v3288_v44 = vrot.slane %v3287_v16, 1  ;;  %v3295_v45 = vadd.f32 %v3294_v25, %v3293_v42  ;;  %v8802_v42 = vld [vmem:[#allocation6 + $0x224] sm:$0xf0] }
 0x833   :  { %v7435_v25 = vor.u32 %v8802_v42, %v7434_v41 }
 0x834   :  { %v3296_v46 = vrot.slane %v3295_v45, 1  ;;  %v3289_v47 = vadd.f32 %v3288_v44, %v3287_v16  ;;  %v8801_v16 = vld [vmem:[#allocation6 + $0x224] sm:$0xf] }
 0x835   :  { %v7439_v44 = vor.u32 %v8801_v16, %v7436_v43  ;;  %3513 = vmatpush.bf16.msrb.mxu3 %v7435_v25  ;;  %v9601_v16 = vld [vmem:[%s10610_s7 + $0x108] sm:$0xff]  }
 0x836   :  { %v3297_v40 = vadd.f32 %v3296_v46, %v3295_v45  ;;  %v7426_v45 = vld [vmem:[#allocation6 + $0x210] sm:$0xf]  ;;  %v8800_v46 = vld [vmem:[#allocation6 + $0x214] sm:$0xf0]  ;;  %v9348_v25 = vunpack.c.h.bf16 %v9601_v16 }
 0x837   :  { %3526 = vmatpush.bf16.msrb.mxu1 %v7439_v44  ;;  %v9347_v44 = vunpack.c.l.bf16 %v9601_v16 }
 0x838   :  { %v3298_v49 = vsel %vm1798_vm1, %v3289_v47, %v3297_v40  ;;  %v8799_v47 = vld [vmem:[#allocation6 + $0x214] sm:$0xf]  ;;  %v7427_v40 = vor.u32 %v8800_v46, %v7426_v45 }
 0x839   :  { %3315 = vmatmul.f32.vlgmr.msra.gmra.mxu0 %v3298_v49  ;;  %v7428_v49 = vld [vmem:[#allocation6 + $0x218] sm:$0xf0]  ;;  %v9600_v45 = vld [vmem:[%s10610_s7 + $0x100] sm:$0xff]  }
 0x83a   :  { %3514 = vmatpush.bf16.msrb.mxu3 %v7427_v40  ;;  %v9344_v46 = vunpack.c.h.bf16 %v9600_v45 }
 0x8b6   :  { %v3316_v50 = vpop.f32.mrf.mxu0 }
 0x8b7   :  { %v3319_v51 = vmul.f32 0.125, %v3316_v50  ;;  %v7431_v50 = vor.u32 %v8799_v47, %v7428_v49  ;;  %v9343_v47 = vunpack.c.l.bf16 %v9600_v45 }
 0x8b9   :  { %v3320_v52 = vmul.f32 %v3319_v51, %v3319_v51  ;;  %3527 = vmatpush.bf16.msrb.mxu1 %v7431_v50 }
 0x8bb   :  { %v3322_v53 = vrot.slane %v3320_v52, 7  ;;  %v8798_v52 = vld [vmem:[#allocation6 + $0x204] sm:$0xf0] }
 0x8bd   :  { %v3324_v54 = vsub.f32 %v3319_v51, %v3322_v53  ;;  %v8797_v53 = vld [vmem:[#allocation6 + $0x204] sm:$0xf] }
 0x8bf   :  { %v3325_v55 = vmax.f32 %v3324_v54, 0.0 }
 0x8c1   :  { %v3326_v60 = vadd.f32 1e-05, %v3325_v55  ;;  %v7420_v55 = vld [vmem:[#allocation6 + $0x208] sm:$0xf0] }
 0x8c2   :  { %v7423_v56 = vor.u32 %v8797_v53, %v7420_v55 }
 0x8c3   :  { %9673 = vrsqrt.f32 %v3326_v60  ;;  %vm3333_vm11 = vweird.f32 %v3326_v60 }
 0x8c4   :  { %3528 = vmatpush.bf16.msrb.mxu1 %v7423_v56 }
 0x8c9   :  { %v9674_v62 = vpop.eup %9673 }
 0x8ca   :  { %v3328_v15 = vmul.f32 %v9674_v62, %v3326_v60  ;;  %vm3334_vm10 = vweird.f32 %v9674_v62  ;;  %v9607_v60 = vld [vmem:[%s10610_s7 + $0x138] sm:$0xff]  }
 0x8cb   :  { %vm3335_vm12 = vmor %vm3333_vm11, %vm3334_vm10  ;;  %v9372_v2 = vunpack.c.h.bf16 %v9607_v60  ;;  %v9371_v4 = vunpack.c.l.bf16 %v9607_v60 }
 0x8cc   :  { %v3329_v19 = vmul.f32 %v9674_v62, %v3328_v15 }
 0x8cd   :  { %3602 = vmatpush.msra.mxu2 %v9372_v2 }
 0x8ce   :  { %v3330_v24 = vmul.f32 0.5, %v3329_v19  ;;  %v9364_v19 = vunpack.c.h.bf16 %v9605_v1 }
 0x8cf   :  { %3603 = vmatpush.msra.mxu2 %v9371_v4 }
 0x8d0   :  { %v3331_v59 = vsub.f32 1.5, %v3330_v24  ;;  %v9387_v24 = vunpack.c.l.bf16 %v9611_v3 }
 0x8d1   :  { %3604 = vmatpush.msra.mxu2 %v9368_v6 }
 0x8d2   :  { %v3332_v28 = vmul.f32 %v9674_v62, %v3331_v59  ;;  %v9359_v59 = vunpack.c.l.bf16 %v9604_v22 }
 0x8d3   :  { %3605 = vmatpush.msra.mxu2 %v9367_v26 }
 0x8d4   :  { %v3336_v30 = vsel %vm3335_vm12, %v9674_v62, %v3332_v28  ;;  %v9603_v28 = vld [vmem:[%s10610_s7 + $0x118] sm:$0xff]  }
 0x8d5   :  { %v3338_v32 = vrot.slane %v3336_v30, 1  ;;  %3606 = vmatpush.msra.mxu2 %v9364_v19  ;;  %v9383_v30 = vunpack.c.l.bf16 %v9610_v36 }
 0x8d7   :  { %v3340_v33 = vmul.f32 %v3338_v32, %v3232_v29  ;;  %3607 = vmatpush.msra.mxu2 %v9363_v20  ;;  %v9356_v29 = vunpack.c.h.bf16 %v9603_v28  ;;  %v9609_v32 = vld [vmem:[%s10610_s7 + $0x148] sm:$0xff]  }
 0x8d9   :  { %v3341_v14 = vmul.f32 %v3340_v33, %v3319_v51  ;;  %v7418_v51 = vld [vmem:[#allocation6 + $0x200] sm:$0xf]  ;;  %3608 = vmatpush.msra.mxu2 %v9360_v23 }
 0x8da   :  { %v7419_v54 = vor.u32 %v8798_v52, %v7418_v51 }
 0x8db   :  { %v3342_v21 = vsub.f32 %v3233_v34, %v3341_v14  ;;  %3609 = vmatpush.msra.mxu2 %v9359_v59  ;;  %v9380_v34 = vunpack.c.h.bf16 %v9609_v32  ;;  %v9602_v14 = vld [vmem:[%s10610_s7 + $0x110] sm:$0xff]  }
 0x8dc   :  { %3515 = vmatpush.bf16.msrb.mxu3 %v7419_v54  ;;  %v9351_v41 = vunpack.c.l.bf16 %v9602_v14 }
 0x8dd   :  { %v3344_v38 = vrot.slane %v3342_v21, 7  ;;  %3610 = vmatpush.msra.mxu2 %v9356_v29  ;;  %v9352_v21 = vunpack.c.h.bf16 %v9602_v14  ;;  %v8875_v14 = vld [vmem:[#allocation4 + $0x7ec] sm:$0xf0] }
 0x8df   :  { %v3346_v39 = vsel %vm1798_vm1, %v3340_v33, %v3344_v38  ;;  %v9355_v33 = vunpack.c.l.bf16 %v9603_v28  ;;  %v9379_v38 = vunpack.c.l.bf16 %v9609_v32  ;;  %v3391_v28 = vld [vmem:[#allocation6 + $0x280] sm:$0xff] }
 0x8e0   :  { %7415 = vmatmul.msk.f32.vlgmr.msrb.gmra.mxu2 %vm2995_vm13, %v3346_v39  ;;  %v9608_v39 = vld [vmem:[%s10610_s7 + $0x140] sm:$0xff]   ;;  %v3535_v32 = vunpack.c.h.bf16 %v3391_v28 }
 0x8e1   :  { %3611 = vmatpush.msra.mxu2 %v9355_v33  ;;  %v9376_v42 = vunpack.c.h.bf16 %v9608_v39  ;;  %v9375_v43 = vunpack.c.l.bf16 %v9608_v39 }
 0x8e3   :  { %3612 = vmatpush.msra.mxu2 %v9352_v21  ;;  %v8873_v21 = vld [vmem:[#allocation4 + $0x7e4] sm:$0xf] }
 0x8e5   :  { %3613 = vmatpush.msra.mxu2 %v9351_v41  ;;  %v7726_v41 = vld [vmem:[#allocation4 + $0x7f0] sm:$0xf0] }
 0x8e6   :  { %v7729_v16 = vor.u32 %v8873_v21, %v7726_v41  ;;  %v7534_v41 = vld [vmem:[#allocation4 + $0x670] sm:$0xf0] }
 0x8e7   :  { %3614 = vmatpush.msra.mxu2 %v9348_v25  ;;  %v8871_v25 = vld [vmem:[#allocation4 + $0x7cc] sm:$0xf0] }
 0x8e9   :  { %3615 = vmatpush.msra.mxu2 %v9347_v44  ;;  %v7710_v44 = vld [vmem:[#allocation4 + $0x7d0] sm:$0xf0] }
 0x8eb   :  { %3616 = vmatpush.msra.mxu2 %v9344_v46  ;;  %v7596_v46 = vld [vmem:[#allocation4 + $0x6e0] sm:$0xf] }
 0x8ed   :  { %3617 = vmatpush.msra.mxu2 %v9343_v47  ;;  %v8843_v47 = vld [vmem:[#allocation4 + $0x6ec] sm:$0xf0] }
 0x963   :  { %v3367_v12 = vpop.f32.mrf.mxu2 }
 0x964   :  { %v3370_v18 = vperm.slane %v3367_v12, 0  ;;  %v3372_v62 = vperm.slane %v3367_v12, 1 }
 0x966   :  { %v3371_v17 = vmul.f32 %v3370_v18, %v10282_v37  ;;  %v9388_v37 = vunpack.c.h.bf16 %v9611_v3 }
 0x968   :  { %v3373_v35 = vadd.f32 %v3372_v62, %v3371_v17  ;;  %3630 = vmatpush.msrb.mxu0 %v9388_v37 }
 0x96a   :  { %v3374_v13 = vmax.f32 %v3373_v35, 0.0  ;;  %3631 = vmatpush.msrb.mxu0 %v9387_v24  ;;  %v3392_v24 = vld [vmem:[#allocation6 + $0x288] sm:$0xff] }
 0x96b   :  { %v3536_v59 = vunpack.c.l.bf16 %v3392_v24 }
 0x96c   :  { %v3427_v15 = vpack.c.bf16 %v3374_v13, %v3374_v13  ;;  %3632 = vmatpush.msrb.mxu0 %v9384_v27  ;;  %v3537_v27 = vunpack.c.h.bf16 %v3392_v24  ;;  %v8857_v24 = vld [vmem:[#allocation4 + $0x764] sm:$0xf] }
 0x96d   :  { %3687 = vmatpush.msra.mxu3 %v3536_v59 }
 0x96e   :  { %3516 = vmatmul.bf16.vlgmr.msrb.gmra.mxu3 %v3427_v15  ;;  %3529 = vmatmul.bf16.vlgmr.msrb.gmra.mxu1 %v3427_v15 }
 0x96f   :  { %3633 = vmatpush.msrb.mxu0 %v9383_v30  ;;  %3707 = vmatpush.msra.mxu1 %v3537_v27  ;;  %v3534_v30 = vunpack.c.l.bf16 %v3391_v28  ;;  %v7644_v28 = vld [vmem:[#allocation4 + $0x740] sm:$0xf] }
 0x971   :  { %3634 = vmatpush.msrb.mxu0 %v9380_v34  ;;  %3688 = vmatpush.msra.mxu3 %v3534_v30  ;;  %v7724_v34 = vld [vmem:[#allocation4 + $0x7e0] sm:$0xf] }
 0x972   :  { %3708 = vmatpush.msra.mxu1 %v3535_v32  ;;  %v7725_v39 = vor.u32 %v8875_v14, %v7724_v34  ;;  %v8855_v32 = vld [vmem:[#allocation4 + $0x74c] sm:$0xf0] }
 0x973   :  { %3635 = vmatpush.msrb.mxu0 %v9379_v38  ;;  %v8827_v34 = vld [vmem:[#allocation4 + $0x66c] sm:$0xf0] }
 0x974   :  { %4190 = vmatpush.bf16.msrb.mxu3 %v7725_v39  ;;  %v8825_v39 = vld [vmem:[#allocation4 + $0x664] sm:$0xf] }
 0x975   :  { %3636 = vmatpush.msrb.mxu0 %v9376_v42  ;;  %v7708_v42 = vld [vmem:[#allocation4 + $0x7c0] sm:$0xf] }
 0x976   :  { %v7709_v45 = vor.u32 %v8871_v25, %v7708_v42  ;;  %v8853_v42 = vld [vmem:[#allocation4 + $0x744] sm:$0xf]  ;;  %v3425_v25 = vld [vmem:[#allocation9 + $0xa] sm:$0x1] }
 0x977   :  { %3637 = vmatpush.msrb.mxu0 %v9375_v43  ;;  %v8869_v43 = vld [vmem:[#allocation4 + $0x7c4] sm:$0xf] }
 0x978   :  { %4191 = vmatpush.bf16.msrb.mxu3 %v7709_v45 }
 0x979   :  { %4216 = vmatpush.bf16.msra.mxu0 %v7729_v16  ;;  %v7646_v16 = vld [vmem:[#allocation4 + $0x750] sm:$0xf0] }
 0x9eb   :  { %v10341_v40 = vpop.f32.mrf.mxu1 }
 0x9ec   :  { %v3577_v49 = vsel %vm1737_vm0, %v10341_v40, 0.0  ;;  %v3585_v50 = vmul.f32 %v10341_v40, %v10341_v40 }
 0x9ed   :  { %v3578_v51 = vrot.slane %v3577_v49, 4 }
 0x9ee   :  { %v3593_v52 = vsel %vm1737_vm0, %v3585_v50, 0.0  ;;  %v7713_v50 = vor.u32 %v8869_v43, %v7710_v44  ;;  %v8868_v44 = vld [vmem:[#allocation4 + $0x7b4] sm:$0xf0] }
 0x9ef   :  { %v3579_v53 = vadd.f32 %v3578_v51, %v3577_v49  ;;  %v3594_v54 = vrot.slane %v3593_v52, 4  ;;  %v8841_v49 = vld [vmem:[#allocation4 + $0x6e4] sm:$0xf]  ;;  %v7597_v51 = vor.u32 %v8843_v47, %v7596_v46  ;;  %v7645_v46 = vor.u32 %v8855_v32, %v7644_v28  ;;  %v7484_v28 = vld [vmem:[#allocation4 + $0x600] sm:$0xf] }
 0x9f0   :  { %4217 = vmatpush.bf16.msra.mxu0 %v7713_v50  ;;  %v7537_v47 = vor.u32 %v8825_v39, %v7534_v41  ;;  %v7516_v50 = vld [vmem:[#allocation4 + $0x640] sm:$0xf]  ;;  %v8844_v39 = vld [vmem:[#allocation4 + $0x6f4] sm:$0xf0]  ;;  %v8842_v41 = vld [vmem:[#allocation4 + $0x6ec] sm:$0xf] }
 0x9f1   :  { %v3580_v55 = vrot.slane %v3579_v53, 2  ;;  %v3595_v56 = vadd.f32 %v3594_v54, %v3593_v52  ;;  %v10348_v57 = vpop.f32.mrf.mxu3  ;;  %v7598_v52 = vld [vmem:[#allocation4 + $0x6f0] sm:$0xf0]  ;;  %v8867_v54 = vld [vmem:[#allocation4 + $0x7ac] sm:$0xf0]  ;;  %4177 = vmatpush.bf16.msrb.mxu2 %v7597_v51 }
 0x9f2   :  { %v3570_v58 = vsel %vm1737_vm0, %v10348_v57, 0.0  ;;  %v3584_v60 = vmul.f32 %v10348_v57, %v10348_v57  ;;  %v8823_v51 = vld [vmem:[#allocation4 + $0x64c] sm:$0xf0] }
 0x9f3   :  { %v3581_v61 = vadd.f32 %v3580_v55, %v3579_v53  ;;  %v3596_v0 = vrot.slane %v3595_v56, 2  ;;  %v3571_v2 = vrot.slane %v3570_v58, 4  ;;  %v3532_v48 = vpop.f32.mrf.mxu1  ;;  %v7692_v53 = vld [vmem:[#allocation4 + $0x7a0] sm:$0xf]  ;;  %v7601_v55 = vor.u32 %v8841_v49, %v7598_v52 }
 0x9f4   :  { %v3586_v4 = vsel %vm1737_vm0, %v3584_v60, 0.0  ;;  %v7580_v60 = vld [vmem:[#allocation4 + $0x6c0] sm:$0xf]  ;;  %v7693_v48 = vor.u32 %v8867_v54, %v7692_v53  ;;  %v7649_v52 = vor.u32 %v8853_v42, %v7646_v16  ;;  %v8851_v53 = vld [vmem:[#allocation4 + $0x72c] sm:$0xf0] }
 0x9f5   :  { %v3582_v5 = vrot.slane %v3581_v61, 1  ;;  %v3597_v6 = vadd.f32 %v3596_v0, %v3595_v56  ;;  %v3572_v7 = vadd.f32 %v3571_v2, %v3570_v58  ;;  %v3587_v8 = vrot.slane %v3586_v4, 4  ;;  %v8865_v56 = vld [vmem:[#allocation4 + $0x7a4] sm:$0xf]  ;;  %v7694_v58 = vld [vmem:[#allocation4 + $0x7b0] sm:$0xf0]  ;;  %4203 = vmatpush.bf16.msrb.mxu1 %v7601_v55 }
 0x9f6   :  { %v8837_v0 = vld [vmem:[#allocation4 + $0x6c4] sm:$0xf]  ;;  %v7582_v2 = vld [vmem:[#allocation4 + $0x6d0] sm:$0xf0]  ;;  %4192 = vmatpush.bf16.msrb.mxu3 %v7693_v48  ;;  %v7628_v49 = vld [vmem:[#allocation4 + $0x720] sm:$0xf] }
 0x9f7   :  { %v3573_v26 = vrot.slane %v3572_v7, 2  ;;  %v3588_v31 = vadd.f32 %v3587_v8, %v3586_v4  ;;  %v3598_v9 = vrot.slane %v3597_v6, 1  ;;  %v3583_v18 = vadd.f32 %v3582_v5, %v3581_v61  ;;  %v8839_v61 = vld [vmem:[#allocation4 + $0x6cc] sm:$0xf0]  ;;  %v8821_v54 = vld [vmem:[#allocation4 + $0x644] sm:$0xf] }
 0x9f8   :  { %v7581_v4 = vor.u32 %v8839_v61, %v7580_v60  ;;  %v7585_v5 = vor.u32 %v8837_v0, %v7582_v2  ;;  %v7697_v8 = vor.u32 %v8865_v56, %v7694_v58  ;;  %v7518_v55 = vld [vmem:[#allocation4 + $0x650] sm:$0xf0]  ;;  %v8849_v58 = vld [vmem:[#allocation4 + $0x724] sm:$0xf]  ;;  %v3426_v61 = vld [vmem:[#allocation9 + $0xb] sm:$0x1]  ;;  %v7517_v0 = vor.u32 %v8823_v51, %v7516_v50 }
 0x9f9   :  { %v3574_v10 = vadd.f32 %v3573_v26, %v3572_v7  ;;  %v3589_v11 = vrot.slane %v3588_v31, 2  ;;  %v3519_v12 = vpop.f32.mrf.mxu3  ;;  %v3599_v17 = vadd.f32 %v3598_v9, %v3597_v6  ;;  %v7676_v6 = vld [vmem:[#allocation4 + $0x780] sm:$0xf]  ;;  %v8863_v7 = vld [vmem:[#allocation4 + $0x78c] sm:$0xf0]  ;;  %v7629_v48 = vor.u32 %v8851_v53, %v7628_v49 }
 0x9fa   :  { %v8861_v26 = vld [vmem:[#allocation4 + $0x784] sm:$0xf]  ;;  %v8835_v9 = vld [vmem:[#allocation4 + $0x6ac] sm:$0xf0]  ;;  %4178 = vmatpush.bf16.msrb.mxu2 %v7581_v4  ;;  %4204 = vmatpush.bf16.msrb.mxu1 %v7585_v5  ;;  %v7630_v60 = vld [vmem:[#allocation4 + $0x730] sm:$0xf0]  ;;  %v7521_v4 = vor.u32 %v8821_v54, %v7518_v55 }
 0x9fb   :  { %v3575_v62 = vrot.slane %v3574_v10, 1  ;;  %v3590_v35 = vadd.f32 %v3589_v11, %v3588_v31  ;;  %v3601_v13 = vsel %vm1798_vm1, %v3583_v18, %v3599_v17  ;;  %v7564_v31 = vld [vmem:[#allocation4 + $0x6a0] sm:$0xf]  ;;  %v7678_v11 = vld [vmem:[#allocation4 + $0x790] sm:$0xf0]  ;;  %4218 = vmatpush.bf16.msra.mxu0 %v7697_v8  ;;  %v7633_v8 = vor.u32 %v8849_v58, %v7630_v60 }
 0x9fc   :  { %3638 = vmatmul.f32.vlgmr.msrb.gmra.mxu0 %v3601_v13  ;;  %v8833_v12 = vld [vmem:[#allocation4 + $0x6a4] sm:$0xf]  ;;  %v7566_v18 = vld [vmem:[#allocation4 + $0x6b0] sm:$0xf0]  ;;  %v7612_v5 = vld [vmem:[#allocation4 + $0x700] sm:$0xf] }
 0x9fd   :  { %v3591_v15 = vrot.slane %v3590_v35, 1  ;;  %v3576_v1 = vadd.f32 %v3575_v62, %v3574_v10  ;;  %v7565_v62 = vor.u32 %v8835_v9, %v7564_v31  ;;  %v7569_v13 = vor.u32 %v8833_v12, %v7566_v18  ;;  %v8817_v31 = vld [vmem:[#allocation4 + $0x624] sm:$0xf]  ;;  %v7502_v9 = vld [vmem:[#allocation4 + $0x630] sm:$0xf0] }
 0x9fe   :  { %v7614_v12 = vld [vmem:[#allocation4 + $0x710] sm:$0xf0]  ;;  %v7732_v18 = vld [vmem:[#allocation4 + $0x7e8] sm:$0xf]  ;;  %v7606_v42 = vld [vmem:[#allocation4 + $0x6f8] sm:$0xf0] }
 0x9ff   :  { %v3592_v19 = vadd.f32 %v3591_v15, %v3590_v35  ;;  %v7677_v35 = vor.u32 %v8863_v7, %v7676_v6  ;;  %v7660_v15 = vld [vmem:[#allocation4 + $0x760] sm:$0xf]  ;;  %4179 = vmatpush.bf16.msrb.mxu2 %v7565_v62  ;;  %4205 = vmatpush.bf16.msrb.mxu1 %v7569_v13  ;;  %v8819_v7 = vld [vmem:[#allocation4 + $0x62c] sm:$0xf0]  ;;  %v7588_v50 = vld [vmem:[#allocation4 + $0x6c8] sm:$0xf] }
 0xa00   :  { %v7500_v6 = vld [vmem:[#allocation4 + $0x620] sm:$0xf]  ;;  %v8840_v51 = vld [vmem:[#allocation4 + $0x6d4] sm:$0xf0]  ;;  %v7590_v53 = vld [vmem:[#allocation4 + $0x6d8] sm:$0xf0] }
 0xa01   :  { %v3600_v63 = vsel %vm1798_vm1, %v3576_v1, %v3592_v19  ;;  %v7548_v1 = vld [vmem:[#allocation4 + $0x680] sm:$0xf]  ;;  %v8831_v19 = vld [vmem:[#allocation4 + $0x68c] sm:$0xf0]  ;;  %4193 = vmatpush.bf16.msrb.mxu3 %v7677_v35  ;;  %v7501_v62 = vor.u32 %v8819_v7, %v7500_v6  ;;  %v7684_v55 = vld [vmem:[#allocation4 + $0x788] sm:$0xf] }
 0xa02   :  { %3618 = vmatmul.f32.vlgmr.msra.gmra.mxu2 %v3600_v63  ;;  %v7549_v27 = vor.u32 %v8831_v19, %v7548_v1  ;;  %v7734_v1 = vld [vmem:[#allocation4 + $0x7f8] sm:$0xf0]  ;;  %v7505_v19 = vor.u32 %v8817_v31, %v7502_v9  ;;  %v8862_v58 = vld [vmem:[#allocation4 + $0x78c] sm:$0xf] }
 0xa03   :  { %v7574_v6 = vld [vmem:[#allocation4 + $0x6b8] sm:$0xf0]  ;;  %v8858_v31 = vld [vmem:[#allocation4 + $0x76c] sm:$0xf] }
 0xa04   :  { %4180 = vmatpush.bf16.msrb.mxu2 %v7549_v27  ;;  %v7718_v27 = vld [vmem:[#allocation4 + $0x7d8] sm:$0xf0] }
 0xa79   :  { %v3639_v3 = vpop.f32.mrf.mxu0 }
 0xa85   :  { %v3619_v20 = vpop.f32.mrf.mxu2 }
 0xa86   :  { %v3640_v37 = vadd.f32 %v3639_v3, %v3619_v20  ;;  %v7681_v3 = vor.u32 %v8861_v26, %v7678_v11  ;;  %v8859_v20 = vld [vmem:[#allocation4 + $0x76c] sm:$0xf0]  ;;  %v8845_v11 = vld [vmem:[#allocation4 + $0x704] sm:$0xf] }
 0xa87   :  { %v8847_v26 = vld [vmem:[#allocation4 + $0x70c] sm:$0xf0] }
 0xa88   :  { %v10357_v22 = vmul.f32 0.03125, %v3640_v37  ;;  %v8829_v37 = vld [vmem:[#allocation4 + $0x684] sm:$0xf]  ;;  %4219 = vmatpush.bf16.msra.mxu0 %v7681_v3  ;;  %v7613_v13 = vor.u32 %v8847_v26, %v7612_v5  ;;  %v7617_v3 = vor.u32 %v8845_v11, %v7614_v12  ;;  %v8860_v26 = vld [vmem:[#allocation4 + $0x774] sm:$0xf0] }
 0xa89   :  { %v7556_v12 = vld [vmem:[#allocation4 + $0x688] sm:$0xf] }
 0xa8a   :  { %v3643_v23 = vmul.f32 %v10357_v22, %v10357_v22 }
 0xa8c   :  { %v3645_v36 = vrot.slane %v3643_v23, 7  ;;  %v7550_v23 = vld [vmem:[#allocation4 + $0x690] sm:$0xf0] }
 0xa8d   :  { %v7553_v30 = vor.u32 %v8829_v37, %v7550_v23  ;;  %v7716_v23 = vld [vmem:[#allocation4 + $0x7c8] sm:$0xf] }
 0xa8e   :  { %v3647_v29 = vsub.f32 %v10357_v22, %v3645_v36  ;;  %v7662_v36 = vld [vmem:[#allocation4 + $0x770] sm:$0xf0] }
 0xa8f   :  { %v7665_v21 = vor.u32 %v8857_v24, %v7662_v36  ;;  %4206 = vmatpush.bf16.msrb.mxu1 %v7553_v30  ;;  %v8872_v24 = vld [vmem:[#allocation4 + $0x7d4] sm:$0xf0]  ;;  %v8870_v36 = vld [vmem:[#allocation4 + $0x7cc] sm:$0xf] }
 0xa90   :  { %v3648_v33 = vmax.f32 %v3647_v29, 0.0  ;;  %v7661_v29 = vor.u32 %v8859_v20, %v7660_v15  ;;  %v8874_v15 = vld [vmem:[#allocation4 + $0x7ec] sm:$0xf]  ;;  %v7721_v30 = vor.u32 %v8870_v36, %v7718_v27  ;;  %v7542_v36 = vld [vmem:[#allocation4 + $0x678] sm:$0xf0] }
 0xa91   :  { %4220 = vmatpush.bf16.msra.mxu0 %v7665_v21  ;;  %v7737_v37 = vor.u32 %v8874_v15, %v7734_v1  ;;  %v7652_v15 = vld [vmem:[#allocation4 + $0x748] sm:$0xf]  ;;  %v8856_v1 = vld [vmem:[#allocation4 + $0x754] sm:$0xf0] }
 0xa92   :  { %v10362_v38 = vadd.f32 1e-05, %v3648_v33  ;;  %v7532_v33 = vld [vmem:[#allocation4 + $0x660] sm:$0xf]  ;;  %4194 = vmatpush.bf16.msrb.mxu3 %v7661_v29  ;;  %v8815_v29 = vld [vmem:[#allocation4 + $0x60c] sm:$0xf0] }
 0xa93   :  { %v7533_v45 = vor.u32 %v8827_v34, %v7532_v33  ;;  %4207 = vmatpush.bf16.msrb.mxu1 %v7537_v47  ;;  %v7485_v32 = vor.u32 %v8815_v29, %v7484_v28  ;;  %v8813_v33 = vld [vmem:[#allocation4 + $0x604] sm:$0xf]  ;;  %v7486_v34 = vld [vmem:[#allocation4 + $0x610] sm:$0xf0]  ;;  %v7702_v47 = vld [vmem:[#allocation4 + $0x7b8] sm:$0xf0] }
 0xa94   :  { %9675 = vrsqrt.f32 %v10362_v38  ;;  %vm3656_vm14 = vweird.f32 %v10362_v38  ;;  %v7489_v21 = vor.u32 %v8813_v33, %v7486_v34  ;;  %v7636_v27 = vld [vmem:[#allocation4 + $0x728] sm:$0xf]  ;;  %v8852_v28 = vld [vmem:[#allocation4 + $0x734] sm:$0xf0]  ;;  %v8850_v29 = vld [vmem:[#allocation4 + $0x72c] sm:$0xf] }
 0xa95   :  { %4181 = vmatpush.bf16.msrb.mxu2 %v7533_v45  ;;  %4221 = vmatpush.bf16.msra.mxu0 %v7649_v52  ;;  %v8866_v45 = vld [vmem:[#allocation4 + $0x7ac] sm:$0xf]  ;;  %v7589_v52 = vor.u32 %v8840_v51, %v7588_v50  ;;  %v7524_v33 = vld [vmem:[#allocation4 + $0x648] sm:$0xf]  ;;  %v8824_v34 = vld [vmem:[#allocation4 + $0x654] sm:$0xf0] }
 0xa96   :  { %4195 = vmatpush.bf16.msrb.mxu3 %v7645_v46  ;;  %v7705_v49 = vor.u32 %v8866_v45, %v7702_v47  ;;  %v7508_v47 = vld [vmem:[#allocation4 + $0x628] sm:$0xf]  ;;  %v8818_v50 = vld [vmem:[#allocation4 + $0x62c] sm:$0xf]  ;;  %v7510_v51 = vld [vmem:[#allocation4 + $0x638] sm:$0xf0] }
 0xa97   :  { %4208 = vmatpush.bf16.msrb.mxu1 %v7521_v4  ;;  %v8834_v4 = vld [vmem:[#allocation4 + $0x6ac] sm:$0xf] }
 0xa98   :  { %v7577_v7 = vor.u32 %v8834_v4, %v7574_v6 }
 0xa99   :  { %4182 = vmatpush.bf16.msrb.mxu2 %v7517_v0  ;;  %4222 = vmatpush.bf16.msra.mxu0 %v7633_v8  ;;  %v7668_v8 = vld [vmem:[#allocation4 + $0x768] sm:$0xf] }
 0xa9a   :  { %v9676_v10 = vpop.eup %9675  ;;  %4196 = vmatpush.bf16.msrb.mxu3 %v7629_v48  ;;  %v8836_v48 = vld [vmem:[#allocation4 + $0x6b4] sm:$0xf0]  ;;  %v7669_v9 = vor.u32 %v8860_v26, %v7668_v8 }
 0xa9b   :  { %v3651_v17 = vmul.f32 %v9676_v10, %v10362_v38  ;;  %vm3657_vm13 = vweird.f32 %v9676_v10  ;;  %4209 = vmatpush.bf16.msrb.mxu1 %v7505_v19  ;;  %v8854_v19 = vld [vmem:[#allocation4 + $0x74c] sm:$0xf] }
 0xa9c   :  { %vm10368_vm15 = vmor %vm3656_vm14, %vm3657_vm13 }
 0xa9d   :  { %v3652_v63 = vmul.f32 %v9676_v10, %v3651_v17  ;;  %v8876_v17 = vld [vmem:[#allocation4 + $0x7f4] sm:$0xf0]  ;;  %4183 = vmatpush.bf16.msrb.mxu2 %v7501_v62  ;;  %4223 = vmatpush.bf16.msra.mxu0 %v7617_v3  ;;  %v7654_v3 = vld [vmem:[#allocation4 + $0x758] sm:$0xf0] }
 0xa9e   :  { %v7733_v20 = vor.u32 %v8876_v17, %v7732_v18  ;;  %4197 = vmatpush.bf16.msrb.mxu3 %v7613_v13  ;;  %v8832_v18 = vld [vmem:[#allocation4 + $0x694] sm:$0xf0]  ;;  %v8830_v17 = vld [vmem:[#allocation4 + $0x68c] sm:$0xf] }
 0xa9f   :  { %v3653_v59 = vmul.f32 0.5, %v3652_v63  ;;  %4210 = vmatpush.bf16.msrb.mxu1 %v7489_v21  ;;  %v7557_v62 = vor.u32 %v8832_v18, %v7556_v12  ;;  %v7525_v21 = vor.u32 %v8824_v34, %v7524_v33  ;;  %v9619_v33 = vld [vmem:[%s10610_s7 + $0x20] sm:$0xff]  }
 0xaa0   :  { %v9424_v34 = vunpack.c.h.bf16 %v9619_v33 }
 0xaa1   :  { %v3654_v14 = vsub.f32 1.5, %v3653_v59  ;;  %4268 = vmatpush.bf16.msrb.mxu0 %v7737_v37  ;;  %v7717_v59 = vor.u32 %v8872_v24, %v7716_v23  ;;  %4184 = vmatpush.bf16.msrb.mxu2 %v7485_v32  ;;  %v7540_v37 = vld [vmem:[#allocation4 + $0x668] sm:$0xf]  ;;  %v8826_v23 = vld [vmem:[#allocation4 + $0x66c] sm:$0xf] }
 0xaa2   :  { %v7638_v32 = vld [vmem:[#allocation4 + $0x738] sm:$0xf0] }
 0xaa3   :  { %v3655_v43 = vmul.f32 %v9676_v10, %v3654_v14  ;;  %v7604_v14 = vld [vmem:[#allocation4 + $0x6e8] sm:$0xf] }
 0xaa4   :  { %v7605_v16 = vor.u32 %v8844_v39, %v7604_v14  ;;  %v7641_v14 = vor.u32 %v8850_v29, %v7638_v32  ;;  %v8822_v39 = vld [vmem:[#allocation4 + $0x64c] sm:$0xf] }
 0xaa5   :  { %v3659_v38 = vsel %vm10368_vm15, %v9676_v10, %v3655_v43  ;;  %4269 = vmatpush.bf16.msrb.mxu0 %v7721_v30  ;;  %v7700_v43 = vld [vmem:[#allocation4 + $0x7a8] sm:$0xf]  ;;  %v7637_v30 = vor.u32 %v8852_v28, %v7636_v27  ;;  %v9626_v27 = vld [vmem:[%s10610_s7 + $0x58] sm:$0xff]  }
 0xaa6   :  { %v3661_v56 = vrot.slane %v3659_v38, 1  ;;  %v7701_v46 = vor.u32 %v8868_v44, %v7700_v43  ;;  %4229 = vmatpush.bf16.msra.mxu2 %v7605_v16  ;;  %v8838_v38 = vld [vmem:[#allocation4 + $0x6cc] sm:$0xf]  ;;  %v7622_v44 = vld [vmem:[#allocation4 + $0x718] sm:$0xf0] }
 0xaa7   :  { %v7593_v54 = vor.u32 %v8838_v38, %v7590_v53  ;;  %v8846_v43 = vld [vmem:[#allocation4 + $0x70c] sm:$0xf]  ;;  %v7492_v53 = vld [vmem:[#allocation4 + $0x608] sm:$0xf]  ;;  %v9646_v28 = vld [vmem:[%s10610_s7 + $0xf8] sm:$0xff]  }
 0xaa8   :  { %v3663_v2 = vmul.f32 %v3661_v56, %v3425_v25  ;;  %v7609_v25 = vor.u32 %v8842_v41, %v7606_v42  ;;  %v8864_v56 = vld [vmem:[#allocation4 + $0x794] sm:$0xf0]  ;;  %v7526_v41 = vld [vmem:[#allocation4 + $0x658] sm:$0xf0]  ;;  %v7620_v42 = vld [vmem:[#allocation4 + $0x708] sm:$0xf]  ;;  %v9532_v32 = vunpack.c.h.bf16 %v9646_v28 }
 0xaa9   :  { %4270 = vmatpush.bf16.msrb.mxu0 %v7705_v49  ;;  %v7685_v60 = vor.u32 %v8864_v56, %v7684_v55  ;;  %v7529_v16 = vor.u32 %v8822_v39, %v7526_v41  ;;  %v8820_v49 = vld [vmem:[#allocation4 + $0x634] sm:$0xf0]  ;;  %v8814_v55 = vld [vmem:[#allocation4 + $0x60c] sm:$0xf]  ;;  %v9625_v39 = vld [vmem:[%s10610_s7 + $0x50] sm:$0xff]  }
 0xaaa   :  { %v3664_v10 = vmul.f32 %v3663_v2, %v10357_v22  ;;  %4230 = vmatpush.bf16.msra.mxu2 %v7589_v52  ;;  %v7509_v38 = vor.u32 %v8820_v49, %v7508_v47  ;;  %v7513_v52 = vor.u32 %v8818_v50, %v7510_v51  ;;  %v9645_v41 = vld [vmem:[%s10610_s7 + $0xf0] sm:$0xff]   ;;  %v9624_v50 = vld [vmem:[%s10610_s7 + $0x48] sm:$0xff]  }
 0xaab   :  { %v9527_v49 = vunpack.c.l.bf16 %v9645_v41  ;;  %v9644_v51 = vld [vmem:[%s10610_s7 + $0xe8] sm:$0xff]  }
 0xaac   :  { %v3665_v35 = vsub.f32 %v3426_v61, %v3664_v10  ;;  %v7686_v61 = vld [vmem:[#allocation4 + $0x798] sm:$0xf0] }
 0xaad   :  { %v7689_v0 = vor.u32 %v8862_v58, %v7686_v61  ;;  %v7670_v10 = vld [vmem:[#allocation4 + $0x778] sm:$0xf0] }
 0xaae   :  { %v3667_v63 = vrot.slane %v3665_v35, 7  ;;  %v7673_v11 = vor.u32 %v8858_v31, %v7670_v10  ;;  %v7558_v35 = vld [vmem:[#allocation4 + $0x698] sm:$0xf0] }
 0xaaf   :  { %4271 = vmatpush.bf16.msrb.mxu0 %v7689_v0  ;;  %v7561_v13 = vor.u32 %v8830_v17, %v7558_v35  ;;  %v7494_v58 = vld [vmem:[#allocation4 + $0x618] sm:$0xf0] }
 0xab0   :  { %v3669_v22 = vsel %vm1798_vm1, %v3663_v2, %v3667_v63  ;;  %v7572_v2 = vld [vmem:[#allocation4 + $0x6a8] sm:$0xf]  ;;  %v7653_v63 = vor.u32 %v8856_v1, %v7652_v15 }
 0xab1   :  { %7480 = vmatmul.msk.f32.vlgmr.msra.gmra.mxu3 %vm2679_vm9, %v3669_v22  ;;  %7481 = vmatmul.msk.f32.vlgmr.msra.gmra.mxu1 %vm2679_vm9, %v3669_v22  ;;  %v7573_v5 = vor.u32 %v8836_v48, %v7572_v2  ;;  %v8828_v22 = vld [vmem:[#allocation4 + $0x674] sm:$0xf0]  ;;  %v9628_v15 = vld [vmem:[%s10610_s7 + $0x68] sm:$0xff]  }
 0xab2   :  { %4242 = vmatpush.bf16.msra.mxu3 %v7733_v20  ;;  %4255 = vmatpush.bf16.msra.mxu1 %v7609_v25  ;;  %v7657_v20 = vor.u32 %v8854_v19, %v7654_v3  ;;  %v7541_v24 = vor.u32 %v8828_v22, %v7540_v37  ;;  %v8848_v25 = vld [vmem:[#allocation4 + $0x714] sm:$0xf0]  ;;  %v9460_v19 = vunpack.c.h.bf16 %v9628_v15  ;;  %v9459_v3 = vunpack.c.l.bf16 %v9628_v15  ;;  %v9627_v37 = vld [vmem:[%s10610_s7 + $0x60] sm:$0xff]  }
 0xab3   :  { %4231 = vmatpush.bf16.msra.mxu2 %v7573_v5  ;;  %4272 = vmatpush.bf16.msrb.mxu0 %v7673_v11  ;;  %v7621_v45 = vor.u32 %v8848_v25, %v7620_v42  ;;  %v9630_v5 = vld [vmem:[%s10610_s7 + $0x78] sm:$0xff]   ;;  %v9629_v11 = vld [vmem:[%s10610_s7 + $0x70] sm:$0xff]   ;;  %v9423_v42 = vunpack.c.l.bf16 %v9619_v33  ;;  %v9528_v25 = vunpack.c.h.bf16 %v9645_v41 }
 0xab4   :  { %v9468_v26 = vunpack.c.h.bf16 %v9630_v5  ;;  %v9467_v12 = vunpack.c.l.bf16 %v9630_v5  ;;  %v9464_v18 = vunpack.c.h.bf16 %v9629_v11 }
 0xab6   :  { %4243 = vmatpush.bf16.msra.mxu3 %v7717_v59  ;;  %4256 = vmatpush.bf16.msra.mxu1 %v7593_v54  ;;  %v7545_v59 = vor.u32 %v8826_v23, %v7542_v36  ;;  %v8816_v54 = vld [vmem:[#allocation4 + $0x614] sm:$0xf0]  ;;  %v9456_v23 = vunpack.c.h.bf16 %v9627_v37 }
 0xab7   :  { %4232 = vmatpush.bf16.msra.mxu2 %v7557_v62  ;;  %4273 = vmatpush.bf16.msrb.mxu0 %v7657_v20  ;;  %v7493_v56 = vor.u32 %v8816_v54, %v7492_v53  ;;  %v9524_v54 = vunpack.c.h.bf16 %v9644_v51 }
 0xaba   :  { %4244 = vmatpush.bf16.msra.mxu3 %v7701_v46  ;;  %4257 = vmatpush.bf16.msra.mxu1 %v7577_v7  ;;  %v7625_v46 = vor.u32 %v8846_v43, %v7622_v44  ;;  %v9618_v43 = vld [vmem:[%s10610_s7 + $0x18] sm:$0xff]  }
 0xabb   :  { %4233 = vmatpush.bf16.msra.mxu2 %v7541_v24  ;;  %4274 = vmatpush.bf16.msrb.mxu0 %v7641_v14  ;;  %v9620_v24 = vld [vmem:[%s10610_s7 + $0x28] sm:$0xff]   ;;  %v9451_v14 = vunpack.c.l.bf16 %v9626_v27  ;;  %v9638_v44 = vld [vmem:[%s10610_s7 + $0xb8] sm:$0xff]  }
 0xabc   :  { %v9428_v36 = vunpack.c.h.bf16 %v9620_v24  ;;  %v9427_v29 = vunpack.c.l.bf16 %v9620_v24  ;;  %v9500_v47 = vunpack.c.h.bf16 %v9638_v44  ;;  %v9499_v53 = vunpack.c.l.bf16 %v9638_v44 }
 0xabe   :  { %4245 = vmatpush.bf16.msra.mxu3 %v7685_v60  ;;  %4258 = vmatpush.bf16.msra.mxu1 %v7561_v13  ;;  %v7497_v60 = vor.u32 %v8814_v55, %v7494_v58  ;;  %v9463_v13 = vunpack.c.l.bf16 %v9629_v11  ;;  %v9617_v55 = vld [vmem:[%s10610_s7 + $0x10] sm:$0xff]  }
 0xabf   :  { %4234 = vmatpush.bf16.msra.mxu2 %v7525_v21  ;;  %4275 = vmatpush.bf16.msrb.mxu0 %v7625_v46  ;;  %v9531_v21 = vunpack.c.l.bf16 %v9646_v28  ;;  %v9447_v46 = vunpack.c.l.bf16 %v9625_v39  ;;  %v9416_v58 = vunpack.c.h.bf16 %v9617_v55 }
 0xac2   :  { %4246 = vmatpush.bf16.msra.mxu3 %v7669_v9  ;;  %4259 = vmatpush.bf16.msra.mxu1 %v7545_v59  ;;  %v9455_v59 = vunpack.c.l.bf16 %v9627_v37 }
 0xac3   :  { %4235 = vmatpush.bf16.msra.mxu2 %v7509_v38  ;;  %v9419_v38 = vunpack.c.l.bf16 %v9618_v43 }
 0xac6   :  { %4247 = vmatpush.bf16.msra.mxu3 %v7653_v63  ;;  %4260 = vmatpush.bf16.msra.mxu1 %v7529_v16  ;;  %v9621_v63 = vld [vmem:[%s10610_s7 + $0x30] sm:$0xff]   ;;  %v9448_v16 = vunpack.c.h.bf16 %v9625_v39 }
 0xac7   :  { %4236 = vmatpush.bf16.msra.mxu2 %v7493_v56  ;;  %v9432_v20 = vunpack.c.h.bf16 %v9621_v63  ;;  %v9431_v22 = vunpack.c.l.bf16 %v9621_v63  ;;  %v9637_v56 = vld [vmem:[%s10610_s7 + $0xb0] sm:$0xff]  }
 0xaca   :  { %4248 = vmatpush.bf16.msra.mxu3 %v7637_v30  ;;  %4261 = vmatpush.bf16.msra.mxu1 %v7513_v52  ;;  %v9452_v30 = vunpack.c.h.bf16 %v9626_v27  ;;  %v9444_v52 = vunpack.c.h.bf16 %v9624_v50  ;;  %v9633_v27 = vld [vmem:[%s10610_s7 + $0x90] sm:$0xff]  }
 0xacb   :  { %v9480_v28 = vunpack.c.h.bf16 %v9633_v27 }
 0xace   :  { %4249 = vmatpush.bf16.msra.mxu3 %v7621_v45  ;;  %4262 = vmatpush.bf16.msra.mxu1 %v7497_v60  ;;  %v9420_v45 = vunpack.c.h.bf16 %v9618_v43  ;;  %v9443_v60 = vunpack.c.l.bf16 %v9624_v50 }
 0xb2e   :  { %v3710_v61 = vpop.f32.mrf.mxu1 }
 0xb2f   :  { %v3714_v0 = vperm.slane %v3710_v61, 0  ;;  %v3718_v48 = vperm.slane %v3710_v61, 1  ;;  %v9496_v61 = vunpack.c.h.bf16 %v9637_v56 }
 0xb31   :  { %v3716_v2 = vmul.f32 %v3714_v0, %v10341_v40  ;;  %v9523_v0 = vunpack.c.l.bf16 %v9644_v51 }
 0xb33   :  { %v3720_v4 = vadd.f32 %v3718_v48, %v3716_v2  ;;  %v9623_v2 = vld [vmem:[%s10610_s7 + $0x40] sm:$0xff]  }
 0xb34   :  { %v3690_v6 = vpop.f32.mrf.mxu3  ;;  %v9643_v48 = vld [vmem:[%s10610_s7 + $0xe0] sm:$0xff]   ;;  %v9440_v5 = vunpack.c.h.bf16 %v9623_v2 }
 0xb35   :  { %v3722_v7 = vmax.f32 %v3720_v4, 0.0  ;;  %v3713_v8 = vperm.slane %v3690_v6, 0  ;;  %v3717_v10 = vperm.slane %v3690_v6, 1  ;;  %v9415_v4 = vunpack.c.l.bf16 %v9617_v55 }
 0xb36   :  { %v9495_v6 = vunpack.c.l.bf16 %v9637_v56  ;;  %v9519_v11 = vunpack.c.l.bf16 %v9643_v48 }
 0xb37   :  { %v3856_v31 = vpack.c.bf16 %v3722_v7, %v3722_v7  ;;  %v3715_v9 = vmul.f32 %v3713_v8, %v10348_v57  ;;  %v9622_v57 = vld [vmem:[%s10610_s7 + $0x38] sm:$0xff]   ;;  %v9520_v7 = vunpack.c.h.bf16 %v9643_v48  ;;  %v9616_v8 = vld [vmem:[%s10610_s7 + $0x8] sm:$0xff]  }
 0xb38   :  { %v9436_v35 = vunpack.c.h.bf16 %v9622_v57  ;;  %v9435_v1 = vunpack.c.l.bf16 %v9622_v57  ;;  %v9635_v57 = vld [vmem:[%s10610_s7 + $0xa0] sm:$0xff]  }
 0xb39   :  { %v3719_v40 = vadd.f32 %v3717_v10, %v3715_v9  ;;  %4198 = vmatmul.bf16.vlgmr.msrb.gmra.mxu3 %v3856_v31  ;;  %4224 = vmatmul.bf16.vlgmr.msra.gmra.mxu0 %v3856_v31  ;;  %v9439_v9 = vunpack.c.l.bf16 %v9623_v2  ;;  %v9487_v63 = vunpack.c.l.bf16 %v9635_v57 }
 0xb3a   :  { %4433 = vmatpush.msrb.mxu3 %v9468_v26  ;;  %4473 = vmatpush.msra.mxu0 %v9532_v32  ;;  %v9636_v26 = vld [vmem:[%s10610_s7 + $0xa8] sm:$0xff]   ;;  %v9479_v32 = vunpack.c.l.bf16 %v9633_v27 }
 0xb3b   :  { %v3721_v17 = vmax.f32 %v3719_v40, 0.0  ;;  %v9492_v10 = vunpack.c.h.bf16 %v9636_v26  ;;  %v9411_v40 = vunpack.c.l.bf16 %v9616_v8 }
 0xb3c   :  { %4434 = vmatpush.msrb.mxu3 %v9467_v12  ;;  %4474 = vmatpush.msra.mxu0 %v9531_v21  ;;  %v9642_v12 = vld [vmem:[%s10610_s7 + $0xd8] sm:$0xff]  }
 0xb3d   :  { %v3855_v62 = vpack.c.bf16 %v3721_v17, %v3721_v17  ;;  %v9516_v17 = vunpack.c.h.bf16 %v9642_v12  ;;  %v9515_v15 = vunpack.c.l.bf16 %v9642_v12 }
 0xb3e   :  { %4435 = vmatpush.msrb.mxu3 %v9464_v18  ;;  %4475 = vmatpush.msra.mxu0 %v9528_v25  ;;  %v9491_v18 = vunpack.c.l.bf16 %v9636_v26 }
 0xb3f   :  { %4185 = vmatmul.bf16.vlgmr.msrb.gmra.mxu2 %v3855_v62  ;;  %4211 = vmatmul.bf16.vlgmr.msrb.gmra.mxu1 %v3855_v62 }
 0xb40   :  { %4413 = vmatpush.msrb.mxu2 %v9436_v35  ;;  %4436 = vmatpush.msrb.mxu3 %v9463_v13  ;;  %v9488_v13 = vunpack.c.h.bf16 %v9635_v57 }
 0xb41   :  { %4453 = vmatpush.msrb.mxu1 %v9500_v47  ;;  %4476 = vmatpush.msra.mxu0 %v9527_v49 }
 0xb42   :  { %4414 = vmatpush.msrb.mxu2 %v9435_v1  ;;  %4437 = vmatpush.msrb.mxu3 %v9460_v19  ;;  %v9641_v1 = vld [vmem:[%s10610_s7 + $0xd0] sm:$0xff]  }
 0xb43   :  { %4454 = vmatpush.msrb.mxu1 %v9499_v53  ;;  %4477 = vmatpush.msra.mxu0 %v9524_v54 }
 0xb44   :  { %4415 = vmatpush.msrb.mxu2 %v9432_v20  ;;  %4438 = vmatpush.msrb.mxu3 %v9459_v3  ;;  %v9512_v3 = vunpack.c.h.bf16 %v9641_v1  ;;  %v9634_v20 = vld [vmem:[%s10610_s7 + $0x98] sm:$0xff]  }
 0xb45   :  { %4455 = vmatpush.msrb.mxu1 %v9496_v61  ;;  %4478 = vmatpush.msra.mxu0 %v9523_v0  ;;  %v9484_v37 = vunpack.c.h.bf16 %v9634_v20 }
 0xb46   :  { %4416 = vmatpush.msrb.mxu2 %v9431_v22  ;;  %4439 = vmatpush.msrb.mxu3 %v9456_v23  ;;  %v9511_v22 = vunpack.c.l.bf16 %v9641_v1  ;;  %v9640_v23 = vld [vmem:[%s10610_s7 + $0xc8] sm:$0xff]  }
 0xb47   :  { %4456 = vmatpush.msrb.mxu1 %v9495_v6  ;;  %4479 = vmatpush.msra.mxu0 %v9520_v7 }
 0xb48   :  { %4417 = vmatpush.msrb.mxu2 %v9428_v36  ;;  %4440 = vmatpush.msrb.mxu3 %v9455_v59  ;;  %v9483_v36 = vunpack.c.l.bf16 %v9634_v20  ;;  %v9508_v59 = vunpack.c.h.bf16 %v9640_v23 }
 0xb49   :  { %4250 = vmatmul.bf16.vlgmr.msra.gmra.mxu3 %v3856_v31  ;;  %4276 = vmatmul.bf16.vlgmr.msrb.gmra.mxu0 %v3856_v31  ;;  %v9412_v31 = vunpack.c.h.bf16 %v9616_v8 }
 0xb4a   :  { %4418 = vmatpush.msrb.mxu2 %v9427_v29  ;;  %4441 = vmatpush.msrb.mxu3 %v9452_v30  ;;  %v9507_v29 = vunpack.c.l.bf16 %v9640_v23  ;;  %v9639_v30 = vld [vmem:[%s10610_s7 + $0xc0] sm:$0xff]  }
 0xb4b   :  { %4457 = vmatpush.msrb.mxu1 %v9492_v10  ;;  %4480 = vmatpush.msra.mxu0 %v9519_v11  ;;  %v9504_v33 = vunpack.c.h.bf16 %v9639_v30  ;;  %v9503_v41 = vunpack.c.l.bf16 %v9639_v30 }
 0xb4c   :  { %4419 = vmatpush.msrb.mxu2 %v9424_v34  ;;  %4442 = vmatpush.msrb.mxu3 %v9451_v14  ;;  %v9632_v34 = vld [vmem:[%s10610_s7 + $0x88] sm:$0xff]  }
 0xb4d   :  { %4458 = vmatpush.msrb.mxu1 %v9491_v18  ;;  %4481 = vmatpush.msra.mxu0 %v9516_v17  ;;  %v9476_v39 = vunpack.c.h.bf16 %v9632_v34  ;;  %v9475_v25 = vunpack.c.l.bf16 %v9632_v34 }
 0xb4e   :  { %4420 = vmatpush.msrb.mxu2 %v9423_v42  ;;  %4443 = vmatpush.msrb.mxu3 %v9448_v16 }
 0xb4f   :  { %4237 = vmatmul.bf16.vlgmr.msra.gmra.mxu2 %v3855_v62  ;;  %4263 = vmatmul.bf16.vlgmr.msra.gmra.mxu1 %v3855_v62  ;;  %v9406_v62 = vld [vmem:[%s10610_s7] sm:$0xff]  }
 0xb50   :  { %4421 = vmatpush.msrb.mxu2 %v9420_v45  ;;  %4444 = vmatpush.msrb.mxu3 %v9447_v46  ;;  %v9408_v35 = vunpack.c.h.bf16 %v9406_v62  ;;  %v9407_v19 = vunpack.c.l.bf16 %v9406_v62  ;;  %v9631_v45 = vld [vmem:[%s10610_s7 + $0x80] sm:$0xff]  }
 0xb51   :  { %4459 = vmatpush.msrb.mxu1 %v9488_v13  ;;  %4482 = vmatpush.msra.mxu0 %v9515_v15  ;;  %v9472_v47 = vunpack.c.h.bf16 %v9631_v45  ;;  %v9471_v50 = vunpack.c.l.bf16 %v9631_v45 }
 0xb52   :  { %4422 = vmatpush.msrb.mxu2 %v9419_v38  ;;  %4445 = vmatpush.msrb.mxu3 %v9444_v52 }
 0xb53   :  { %4460 = vmatpush.msrb.mxu1 %v9487_v63  ;;  %4483 = vmatpush.msra.mxu0 %v9512_v3 }
 0xb54   :  { %4423 = vmatpush.msrb.mxu2 %v9416_v58  ;;  %4446 = vmatpush.msrb.mxu3 %v9443_v60 }
 0xb55   :  { %4461 = vmatpush.msrb.mxu1 %v9484_v37  ;;  %4484 = vmatpush.msra.mxu0 %v9511_v22 }
 0xb56   :  { %4424 = vmatpush.msrb.mxu2 %v9415_v4  ;;  %4447 = vmatpush.msrb.mxu3 %v9440_v5 }
 0xb57   :  { %4462 = vmatpush.msrb.mxu1 %v9483_v36  ;;  %4485 = vmatpush.msra.mxu0 %v9508_v59 }
 0xb58   :  { %4425 = vmatpush.msrb.mxu2 %v9412_v31  ;;  %4448 = vmatpush.msrb.mxu3 %v9439_v9 }
 0xb59   :  { %4463 = vmatpush.msrb.mxu1 %v9480_v28  ;;  %4486 = vmatpush.msra.mxu0 %v9507_v29 }
 0xb5a   :  { %4426 = vmatpush.msrb.mxu2 %v9411_v40 }
 0xb5b   :  { %4464 = vmatpush.msrb.mxu1 %v9479_v32  ;;  %4487 = vmatpush.msra.mxu0 %v9504_v33 }
 0xb5c   :  { %4427 = vmatpush.msrb.mxu2 %v9408_v35 }
 0xb5d   :  { %4465 = vmatpush.msrb.mxu1 %v9476_v39  ;;  %4488 = vmatpush.msra.mxu0 %v9503_v41 }
 0xb5e   :  { %4428 = vmatpush.msrb.mxu2 %v9407_v19 }
 0xb5f   :  { %4466 = vmatpush.msrb.mxu1 %v9475_v25 }
 0xb61   :  { %4467 = vmatpush.msrb.mxu1 %v9472_v47 }
 0xb63   :  { %4468 = vmatpush.msrb.mxu1 %v9471_v50 }
 0xbb6   :  { %v4225_v24 = vpop.f32.mrf.mxu0 }
 0xbbc   :  { %v4199_v14 = vpop.f32.mrf.mxu3  ;;  %v4212_v21 = vpop.f32.mrf.mxu1 }
 0xbbd   :  { %v10473_v42 = vadd.f32 %v4225_v24, %v4212_v21 }
 0xbbe   :  { %v4227_v16 = vpop.f32.mrf.mxu0 }
 0xbbf   :  { %v4356_v43 = vsel %vm1737_vm0, %v10473_v42, 0.0  ;;  %v4378_v44 = vmul.f32 %v10473_v42, %v10473_v42 }
 0xbc0   :  { %v4357_v46 = vrot.slane %v4356_v43, 4 }
 0xbc1   :  { %v4388_v49 = vsel %vm1737_vm0, %v4378_v44, 0.0 }
 0xbc2   :  { %v4358_v51 = vadd.f32 %v4357_v46, %v4356_v43  ;;  %v4389_v38 = vrot.slane %v4388_v49, 4  ;;  %v4186_v52 = vpop.f32.mrf.mxu2 }
 0xbc3   :  { %v10483_v53 = vadd.f32 %v4199_v14, %v4186_v52 }
 0xbc4   :  { %v4359_v54 = vrot.slane %v4358_v51, 2  ;;  %v4390_v55 = vadd.f32 %v4389_v38, %v4388_v49  ;;  %v4201_v56 = vpop.f32.mrf.mxu3  ;;  %v4214_v58 = vpop.f32.mrf.mxu1 }
 0xbc5   :  { %v4349_v60 = vsel %vm1737_vm0, %v10483_v53, 0.0  ;;  %v4377_v61 = vmul.f32 %v10483_v53, %v10483_v53 }
 0xbc6   :  { %v4360_v0 = vadd.f32 %v4359_v54, %v4358_v51  ;;  %v4391_v2 = vrot.slane %v4390_v55, 2  ;;  %v4350_v48 = vrot.slane %v4349_v60, 4  ;;  %v4277_v4 = vpop.f32.mrf.mxu0 }
 0xbc7   :  { %v4381_v5 = vsel %vm1737_vm0, %v4377_v61, 0.0 }
 0xbc8   :  { %v4361_v6 = vrot.slane %v4360_v0, 1  ;;  %v4392_v7 = vadd.f32 %v4391_v2, %v4390_v55  ;;  %v4351_v8 = vadd.f32 %v4350_v48, %v4349_v60  ;;  %v4382_v26 = vrot.slane %v4381_v5, 4 }
 0xbca   :  { %v4393_v31 = vrot.slane %v4392_v7, 1  ;;  %v4352_v9 = vrot.slane %v4351_v8, 2  ;;  %v4383_v10 = vadd.f32 %v4382_v26, %v4381_v5  ;;  %v4188_v11 = vpop.f32.mrf.mxu2  ;;  %v4362_v12 = vadd.f32 %v4361_v6, %v4360_v0 }
 0xbcc   :  { %v4353_v40 = vadd.f32 %v4352_v9, %v4351_v8  ;;  %v4384_v18 = vrot.slane %v4383_v10, 2  ;;  %v4251_v17 = vpop.f32.mrf.mxu3  ;;  %v4264_v62 = vpop.f32.mrf.mxu1  ;;  %v4394_v57 = vadd.f32 %v4393_v31, %v4392_v7 }
 0xbcd   :  { %v10490_v35 = vadd.f32 %v4277_v4, %v4264_v62 }
 0xbce   :  { %v4354_v13 = vrot.slane %v4353_v40, 1  ;;  %v4385_v15 = vadd.f32 %v4384_v18, %v4383_v10  ;;  %v4279_v1 = vpop.f32.mrf.mxu0  ;;  %v4410_v19 = vsel %vm1798_vm1, %v4362_v12, %v4394_v57  ;;  %v3787_v12 = vld [vmem:[#allocation4 + $0x800] sm:$0xff] }
 0xbcf   :  { %v4370_v63 = vsel %vm1737_vm0, %v10490_v35, 0.0  ;;  %v4380_v3 = vmul.f32 %v10490_v35, %v10490_v35  ;;  %4449 = vmatmul.f32.vlgmr.msrb.gmra.mxu3 %v4410_v19  ;;  %v4282_v62 = vunpack.c.h.bf16 %v3787_v12 }
 0xbd0   :  { %v4386_v20 = vrot.slane %v4385_v15, 1  ;;  %v4371_v37 = vrot.slane %v4370_v63, 4  ;;  %v4355_v23 = vadd.f32 %v4354_v13, %v4353_v40  ;;  %v3788_v40 = vld [vmem:[#allocation4 + $0x808] sm:$0xff] }
 0xbd1   :  { %v4402_v22 = vsel %vm1737_vm0, %v4380_v3, 0.0  ;;  %v4283_v57 = vunpack.c.l.bf16 %v3788_v40  ;;  %4559 = vmatpush.msra.mxu3 %v4282_v62  ;;  %v4284_v1 = vunpack.c.h.bf16 %v3788_v40 }
 0xbd2   :  { %v4372_v24 = vadd.f32 %v4371_v37, %v4370_v63  ;;  %v4403_v36 = vrot.slane %v4402_v22, 4  ;;  %v4238_v59 = vpop.f32.mrf.mxu2  ;;  %v4387_v27 = vadd.f32 %v4386_v20, %v4385_v15 }
 0xbd3   :  { %v10498_v28 = vadd.f32 %v4251_v17, %v4238_v59  ;;  %v4281_v17 = vunpack.c.l.bf16 %v3787_v12  ;;  %4579 = vmatpush.msra.mxu1 %v4283_v57 }
 0xbd4   :  { %v4373_v29 = vrot.slane %v4372_v24, 2  ;;  %v4404_v30 = vadd.f32 %v4403_v36, %v4402_v22  ;;  %v4253_v32 = vpop.f32.mrf.mxu3  ;;  %v4266_v33 = vpop.f32.mrf.mxu1  ;;  %v4409_v34 = vsel %vm1798_vm1, %v4355_v23, %v4387_v27  ;;  %v3853_v23 = vld [vmem:[#allocation9 + $0xc] sm:$0x1]  ;;  %v3854_v27 = vld [vmem:[#allocation9 + $0xd] sm:$0x1] }
 0xbd5   :  { %v4363_v14 = vsel %vm1737_vm0, %v10498_v28, 0.0  ;;  %v4379_v21 = vmul.f32 %v10498_v28, %v10498_v28  ;;  %4429 = vmatmul.f32.vlgmr.msrb.gmra.mxu2 %v4409_v34 }
 0xbd6   :  { %v4374_v39 = vadd.f32 %v4373_v29, %v4372_v24  ;;  %v4405_v41 = vrot.slane %v4404_v30, 2  ;;  %v4364_v16 = vrot.slane %v4363_v14, 4  ;;  %4539 = vmatpush.msra.mxu2 %v4281_v17 }
 0xbd7   :  { %v4395_v25 = vsel %vm1737_vm0, %v4379_v21, 0.0 }
 0xbd8   :  { %v4375_v43 = vrot.slane %v4374_v39, 1  ;;  %v4406_v44 = vadd.f32 %v4405_v41, %v4404_v30  ;;  %v4365_v45 = vadd.f32 %v4364_v16, %v4363_v14  ;;  %v4396_v46 = vrot.slane %v4395_v25, 4  ;;  %4599 = vmatpush.msrb.mxu2 %v4284_v1 }
 0xbda   :  { %v4407_v47 = vrot.slane %v4406_v44, 1  ;;  %v4366_v49 = vrot.slane %v4365_v45, 2  ;;  %v4397_v50 = vadd.f32 %v4396_v46, %v4395_v25  ;;  %v4240_v51 = vpop.f32.mrf.mxu2  ;;  %v4376_v38 = vadd.f32 %v4375_v43, %v4374_v39 }
 0xbdc   :  { %v4367_v52 = vadd.f32 %v4366_v49, %v4365_v45  ;;  %v4398_v54 = vrot.slane %v4397_v50, 2  ;;  %v4408_v55 = vadd.f32 %v4407_v47, %v4406_v44 }
 0xbde   :  { %v4368_v56 = vrot.slane %v4367_v52, 1  ;;  %v4399_v58 = vadd.f32 %v4398_v54, %v4397_v50  ;;  %v4412_v60 = vsel %vm1798_vm1, %v4376_v38, %v4408_v55 }
 0xbdf   :  { %4489 = vmatmul.f32.vlgmr.msra.gmra.mxu0 %v4412_v60 }
 0xbe0   :  { %v4400_v61 = vrot.slane %v4399_v58, 1  ;;  %v4369_v0 = vadd.f32 %v4368_v56, %v4367_v52 }
 0xbe2   :  { %v4401_v2 = vadd.f32 %v4400_v61, %v4399_v58 }
 0xbe4   :  { %v4411_v48 = vsel %vm1798_vm1, %v4369_v0, %v4401_v2 }
 0xbe5   :  { %4469 = vmatmul.f32.vlgmr.msrb.gmra.mxu1 %v4411_v48 }
 0xc52   :  { %v4450_v5 = vpop.f32.mrf.mxu3 }
 0xc58   :  { %v4430_v4 = vpop.f32.mrf.mxu2 }
 0xc59   :  { %v4451_v6 = vadd.f32 %v4450_v5, %v4430_v4 }
 0xc5c   :  { %v4490_v26 = vpop.f32.mrf.mxu0 }
 0xc62   :  { %v4470_v7 = vpop.f32.mrf.mxu1 }
 0xc63   :  { %v4471_v8 = vadd.f32 %v4470_v7, %v4451_v6 }
 0xc65   :  { %v4491_v31 = vadd.f32 %v4490_v26, %v4471_v8 }
 0xc67   :  { %v4493_v9 = vmul.f32 0.0078125, %v4491_v31 }
 0xc69   :  { %v4494_v10 = vmul.f32 %v4493_v9, %v4493_v9 }
 0xc6b   :  { %v4496_v11 = vrot.slane %v4494_v10, 7 }
 0xc6d   :  { %v4498_v18 = vsub.f32 %v4493_v9, %v4496_v11 }
 0xc6f   :  { %v4499_v13 = vmax.f32 %v4498_v18, 0.0 }
 0xc71   :  { %v4500_v15 = vadd.f32 1e-05, %v4499_v13 }
 0xc73   :  { %9677 = vrsqrt.f32 %v4500_v15  ;;  %vm4507_vm2 = vweird.f32 %v4500_v15 }
 0xc79   :  { %v9678_v19 = vpop.eup %9677 }
 0xc7a   :  { %v4502_v63 = vmul.f32 %v9678_v19, %v4500_v15  ;;  %vm4508_vm9 = vweird.f32 %v9678_v19 }
 0xc7b   :  { %vm4509_vm3 = vmor %vm4507_vm2, %vm4508_vm9 }
 0xc7c   :  { %v4503_v3 = vmul.f32 %v9678_v19, %v4502_v63 }
 0xc7e   :  { %v4504_v20 = vmul.f32 0.5, %v4503_v3 }
 0xc80   :  { %v4505_v37 = vsub.f32 1.5, %v4504_v20 }
 0xc82   :  { %v4506_v22 = vmul.f32 %v9678_v19, %v4505_v37 }
 0xc84   :  { %v4510_v24 = vsel %vm4509_vm3, %v9678_v19, %v4506_v22 }
 0xc85   :  { %v4512_v36 = vrot.slane %v4510_v24, 1 }
 0xc87   :  { %v4514_v59 = vmul.f32 %v4512_v36, %v3853_v23 }
 0xc89   :  { %v4515_v29 = vmul.f32 %v4514_v59, %v4493_v9 }
 0xc8b   :  { %v4516_v30 = vsub.f32 %v3854_v27, %v4515_v29 }
 0xc8d   :  { %v4518_v32 = vrot.slane %v4516_v30, 7 }
 0xc8f   :  { %v4520_v33 = vsel %vm1798_vm1, %v4514_v59, %v4518_v32 }
 0xc90   :  { %7738 = vmatmul.msk.f32.vlgmr.msra.gmra.mxu2 %vm1911_vm5, %v4520_v33  ;;  %7739 = vmatmul.msk.f32.vlgmr.msra.gmra.mxu3 %vm1911_vm5, %v4520_v33 }
 0xc91   :  { %7740 = vmatmul.msk.f32.vlgmr.msra.gmra.mxu1 %vm1911_vm5, %v4520_v33 }
 0xc98   :  { %7741 = vmatmul.msk.f32.vlgmr.msrb.gmra.mxu2 %vm1911_vm5, %v4520_v33 }
 0xd0e   :  { %v4581_v34 = vpop.f32.mrf.mxu1 }
 0xd0f   :  { %v4606_v14 = vperm.slane %v4581_v34, 0  ;;  %v4614_v39 = vperm.slane %v4581_v34, 1 }
 0xd11   :  { %v4610_v21 = vmul.f32 %v4606_v14, %v10498_v28 }
 0xd13   :  { %v10517_v41 = vadd.f32 %v4614_v39, %v4610_v21  ;;  %v4541_v16 = vpop.f32.mrf.mxu2  ;;  %v4561_v25 = vpop.f32.mrf.mxu3 }
 0xd14   :  { %v4604_v43 = vperm.slane %v4541_v16, 0  ;;  %v4605_v44 = vperm.slane %v4561_v25, 0  ;;  %v4612_v47 = vperm.slane %v4541_v16, 1  ;;  %v4613_v50 = vperm.slane %v4561_v25, 1 }
 0xd15   :  { %v4622_v45 = vmax.f32 %v10517_v41, 0.0 }
 0xd16   :  { %v4608_v46 = vmul.f32 %v4604_v43, %v10483_v53  ;;  %v4609_v49 = vmul.f32 %v4605_v44, %v10473_v42 }
 0xd18   :  { %v10522_v51 = vadd.f32 %v4612_v47, %v4608_v46  ;;  %v10524_v38 = vadd.f32 %v4613_v50, %v4609_v49 }
 0xd1a   :  { %v4620_v28 = vmax.f32 %v10522_v51, 0.0  ;;  %v4621_v52 = vmax.f32 %v10524_v38, 0.0 }
 0xd1b   :  { %v4601_v54 = vpop.f32.mrf.mxu2 }
 0xd1c   :  { %v4607_v55 = vperm.slane %v4601_v54, 0  ;;  %v4615_v58 = vperm.slane %v4601_v54, 1 }
 0xd1e   :  { %v4611_v56 = vmul.f32 %v4607_v55, %v10490_v35 }
 0xd20   :  { %v10529_v60 = vadd.f32 %v4615_v58, %v4611_v56 }
 0xd22   :  { %v4623_v53 = vmax.f32 %v10529_v60, 0.0 }
 0xd23   :  { %9829 = dma.done.wait [#allocation3], 24960 }
 0xd24   :  { %9830 = vsyncadd [#allocation3], 4294942336  ;;  %v7912_v42 = vld [vmem:[#allocation2 + $0x150] sm:$0xf]  ;;  %v8922_v61 = vld [vmem:[#allocation2 + $0x164] sm:$0xf0]  ;;  %v10550_v60 = vpack.c.bf16 %v4622_v45, %v4622_v45 }
 0xd25   :  { %v8104_v0 = vld [vmem:[#allocation2 + $0x2d0] sm:$0xf]  ;;  %v7913_v2 = vor.u32 %v8922_v61, %v7912_v42  ;;  %v8970_v48 = vld [vmem:[#allocation2 + $0x2e4] sm:$0xf0]  ;;  %v7888_v31 = vld [vmem:[#allocation2 + $0x120] sm:$0xf] }
 0xd26   :  { %v8488_v4 = vld [vmem:[#allocation2 + $0x5d0] sm:$0xf]  ;;  %v9066_v5 = vld [vmem:[#allocation2 + $0x5e4] sm:$0xf0]  ;;  %v8105_v6 = vor.u32 %v8970_v48, %v8104_v0  ;;  %v8916_v9 = vld [vmem:[#allocation2 + $0x134] sm:$0xf0] }
 0xd27   :  { %v8489_v7 = vor.u32 %v9066_v5, %v8488_v4  ;;  %v8296_v8 = vld [vmem:[#allocation2 + $0x450] sm:$0xf]  ;;  %v9018_v26 = vld [vmem:[#allocation2 + $0x464] sm:$0xf0]  ;;  %5799 = vmatpush.bf16.msrb.mxu3 %v7913_v2  ;;  %v8080_v10 = vld [vmem:[#allocation2 + $0x2a0] sm:$0xf]  ;;  %v7889_v12 = vor.u32 %v8916_v9, %v7888_v31 }
 0xd28   :  { %v8297_v35 = vor.u32 %v9018_v26, %v8296_v8  ;;  %v8964_v11 = vld [vmem:[#allocation2 + $0x2b4] sm:$0xf0]  ;;  %5812 = vmatpush.bf16.msrb.mxu0 %v8105_v6  ;;  %v8464_v18 = vld [vmem:[#allocation2 + $0x5a0] sm:$0xf]  ;;  %v7864_v15 = vld [vmem:[#allocation2 + $0xf0] sm:$0xf] }
 0xd29   :  { %5838 = vmatpush.bf16.msra.mxu2 %v8489_v7  ;;  %v8081_v40 = vor.u32 %v8964_v11, %v8080_v10  ;;  %v9060_v17 = vld [vmem:[#allocation2 + $0x5b4] sm:$0xf0]  ;;  %v8272_v62 = vld [vmem:[#allocation2 + $0x420] sm:$0xf]  ;;  %v8910_v1 = vld [vmem:[#allocation2 + $0x104] sm:$0xf0] }
 0xd2a   :  { %5825 = vmatpush.bf16.msrb.mxu1 %v8297_v35  ;;  %v8465_v57 = vor.u32 %v9060_v17, %v8464_v18  ;;  %v9012_v13 = vld [vmem:[#allocation2 + $0x434] sm:$0xf0]  ;;  %v8056_v63 = vld [vmem:[#allocation2 + $0x270] sm:$0xf]  ;;  %v8958_v3 = vld [vmem:[#allocation2 + $0x284] sm:$0xf0]  ;;  %v7865_v37 = vor.u32 %v8910_v1, %v7864_v15 }
 0xd2b   :  { %v8273_v19 = vor.u32 %v9012_v13, %v8272_v62  ;;  %v8440_v20 = vld [vmem:[#allocation2 + $0x570] sm:$0xf]  ;;  %5800 = vmatpush.bf16.msrb.mxu3 %v7889_v12  ;;  %v9054_v22 = vld [vmem:[#allocation2 + $0x584] sm:$0xf0]  ;;  %v8057_v36 = vor.u32 %v8958_v3, %v8056_v63  ;;  %v7840_v27 = vld [vmem:[#allocation2 + $0xc0] sm:$0xf] }
 0xd2c   :  { %v8248_v23 = vld [vmem:[#allocation2 + $0x3f0] sm:$0xf]  ;;  %v9006_v24 = vld [vmem:[#allocation2 + $0x404] sm:$0xf0]  ;;  %5813 = vmatpush.bf16.msrb.mxu0 %v8081_v40  ;;  %v8441_v59 = vor.u32 %v9054_v22, %v8440_v20  ;;  %v8904_v29 = vld [vmem:[#allocation2 + $0xd4] sm:$0xf0] }
 0xd2d   :  { %5839 = vmatpush.bf16.msra.mxu2 %v8465_v57  ;;  %v8032_v30 = vld [vmem:[#allocation2 + $0x240] sm:$0xf]  ;;  %v8249_v32 = vor.u32 %v9006_v24, %v8248_v23  ;;  %v8952_v33 = vld [vmem:[#allocation2 + $0x254] sm:$0xf0]  ;;  %v7841_v16 = vor.u32 %v8904_v29, %v7840_v27  ;;  %v7816_v44 = vld [vmem:[#allocation2 + $0x90] sm:$0xf] }
 0xd2e   :  { %5826 = vmatpush.bf16.msrb.mxu1 %v8273_v19  ;;  %v8416_v34 = vld [vmem:[#allocation2 + $0x540] sm:$0xf]  ;;  %v9048_v14 = vld [vmem:[#allocation2 + $0x554] sm:$0xf0]  ;;  %v8033_v25 = vor.u32 %v8952_v33, %v8032_v30  ;;  %v8898_v46 = vld [vmem:[#allocation2 + $0xa4] sm:$0xf0] }
 0xd2f   :  { %v8224_v21 = vld [vmem:[#allocation2 + $0x3c0] sm:$0xf]  ;;  %v9000_v39 = vld [vmem:[#allocation2 + $0x3d4] sm:$0xf0]  ;;  %5801 = vmatpush.bf16.msrb.mxu3 %v7865_v37  ;;  %v8417_v43 = vor.u32 %v9048_v14, %v8416_v34  ;;  %v8008_v47 = vld [vmem:[#allocation2 + $0x210] sm:$0xf]  ;;  %v7817_v42 = vor.u32 %v8898_v46, %v7816_v44 }
 0xd30   :  { %5814 = vmatpush.bf16.msrb.mxu0 %v8057_v36  ;;  %v8225_v49 = vor.u32 %v9000_v39, %v8224_v21  ;;  %v8946_v50 = vld [vmem:[#allocation2 + $0x224] sm:$0xf0]  ;;  %v8392_v54 = vld [vmem:[#allocation2 + $0x510] sm:$0xf]  ;;  %v7792_v2 = vld [vmem:[#allocation2 + $0x60] sm:$0xf] }
 0xd31   :  { %5840 = vmatpush.bf16.msra.mxu2 %v8441_v59  ;;  %v9042_v55 = vld [vmem:[#allocation2 + $0x524] sm:$0xf0]  ;;  %v8200_v56 = vld [vmem:[#allocation2 + $0x390] sm:$0xf]  ;;  %v8009_v61 = vor.u32 %v8946_v50, %v8008_v47  ;;  %v8892_v48 = vld [vmem:[#allocation2 + $0x74] sm:$0xf0] }
 0xd32   :  { %5827 = vmatpush.bf16.msrb.mxu1 %v8249_v32  ;;  %v8994_v58 = vld [vmem:[#allocation2 + $0x3a4] sm:$0xf0]  ;;  %v8393_v0 = vor.u32 %v9042_v55, %v8392_v54  ;;  %v7984_v4 = vld [vmem:[#allocation2 + $0x1e0] sm:$0xf]  ;;  %v8940_v6 = vld [vmem:[#allocation2 + $0x1f4] sm:$0xf0]  ;;  %v7793_v35 = vor.u32 %v8892_v48, %v7792_v2 }
 0xd33   :  { %5802 = vmatpush.bf16.msrb.mxu3 %v7841_v16  ;;  %v8201_v5 = vor.u32 %v8994_v58, %v8200_v56  ;;  %v8368_v7 = vld [vmem:[#allocation2 + $0x4e0] sm:$0xf]  ;;  %v9036_v8 = vld [vmem:[#allocation2 + $0x4f4] sm:$0xf0]  ;;  %v7985_v9 = vor.u32 %v8940_v6, %v7984_v4  ;;  %v7768_v11 = vld [vmem:[#allocation2 + $0x30] sm:$0xf]  ;;  %v10540_v4 = vpack.c.bf16 %v4623_v53, %v4623_v53 }
 0xd34   :  { %5815 = vmatpush.bf16.msrb.mxu0 %v8033_v25  ;;  %v8176_v26 = vld [vmem:[#allocation2 + $0x360] sm:$0xf]  ;;  %v8988_v31 = vld [vmem:[#allocation2 + $0x374] sm:$0xf0]  ;;  %v8369_v10 = vor.u32 %v9036_v8, %v8368_v7  ;;  %v8886_v12 = vld [vmem:[#allocation2 + $0x44] sm:$0xf0] }
 0xd35   :  { %5841 = vmatpush.bf16.msra.mxu2 %v8417_v43  ;;  %v7960_v40 = vld [vmem:[#allocation2 + $0x1b0] sm:$0xf]  ;;  %v8177_v18 = vor.u32 %v8988_v31, %v8176_v26  ;;  %v8934_v17 = vld [vmem:[#allocation2 + $0x1c4] sm:$0xf0]  ;;  %v7769_v1 = vor.u32 %v8886_v12, %v7768_v11  ;;  %v7744_v19 = vld [vmem:[#allocation2] sm:$0xf] }
 0xd36   :  { %5828 = vmatpush.bf16.msrb.mxu1 %v8225_v49  ;;  %v8344_v62 = vld [vmem:[#allocation2 + $0x4b0] sm:$0xf]  ;;  %v9030_v57 = vld [vmem:[#allocation2 + $0x4c4] sm:$0xf0]  ;;  %v8880_v63 = vld [vmem:[#allocation2 + $0x14] sm:$0xf0]  ;;  %v7961_v3 = vor.u32 %v8934_v17, %v7960_v40 }
 0xd37   :  { %5803 = vmatpush.bf16.msrb.mxu3 %v7817_v42  ;;  %v8152_v13 = vld [vmem:[#allocation2 + $0x330] sm:$0xf]  ;;  %v8982_v15 = vld [vmem:[#allocation2 + $0x344] sm:$0xf0]  ;;  %v8345_v20 = vor.u32 %v9030_v57, %v8344_v62  ;;  %v7936_v37 = vld [vmem:[#allocation2 + $0x180] sm:$0xf]  ;;  %v7745_v33 = vor.u32 %v8880_v63, %v7744_v19 }
 0xd38   :  { %5816 = vmatpush.bf16.msrb.mxu0 %v8009_v61  ;;  %v8928_v22 = vld [vmem:[#allocation2 + $0x194] sm:$0xf0]  ;;  %v8320_v23 = vld [vmem:[#allocation2 + $0x480] sm:$0xf]  ;;  %v8153_v24 = vor.u32 %v8982_v15, %v8152_v13  ;;  %v8919_v59 = vld [vmem:[#allocation2 + $0x154] sm:$0xf] }
 0xd39   :  { %5842 = vmatpush.bf16.msra.mxu2 %v8393_v0  ;;  %v9024_v36 = vld [vmem:[#allocation2 + $0x494] sm:$0xf0]  ;;  %v7914_v27 = vld [vmem:[#allocation2 + $0x168] sm:$0xf0]  ;;  %v8967_v29 = vld [vmem:[#allocation2 + $0x2d4] sm:$0xf]  ;;  %v7937_v39 = vor.u32 %v8928_v22, %v7936_v37  ;;  %v10535_v0 = vpack.c.bf16 %v4620_v28, %v4620_v28 }
 0xd3a   :  { %5829 = vmatpush.bf16.msrb.mxu1 %v8201_v5  ;;  %v8106_v30 = vld [vmem:[#allocation2 + $0x2e8] sm:$0xf0]  ;;  %v9063_v32 = vld [vmem:[#allocation2 + $0x5d4] sm:$0xf]  ;;  %v8128_v14 = vld [vmem:[#allocation2 + $0x300] sm:$0xf]  ;;  %v8321_v16 = vor.u32 %v9024_v36, %v8320_v23  ;;  %v7917_v44 = vor.u32 %v8919_v59, %v7914_v27  ;;  %v10545_v5 = vpack.c.bf16 %v4621_v52, %v4621_v52 }
 0xd3b   :  { %5804 = vmatpush.bf16.msrb.mxu3 %v7793_v35  ;;  %v8490_v34 = vld [vmem:[#allocation2 + $0x5e8] sm:$0xf0]  ;;  %v8976_v21 = vld [vmem:[#allocation2 + $0x314] sm:$0xf0]  ;;  %v9015_v25 = vld [vmem:[#allocation2 + $0x454] sm:$0xf]  ;;  %v8109_v46 = vor.u32 %v8967_v29, %v8106_v30 }
 0xd3c   :  { %5817 = vmatpush.bf16.msrb.mxu0 %v7985_v9  ;;  %v8298_v43 = vld [vmem:[#allocation2 + $0x468] sm:$0xf0]  ;;  %v8913_v47 = vld [vmem:[#allocation2 + $0x124] sm:$0xf]  ;;  %v8493_v49 = vor.u32 %v9063_v32, %v8490_v34  ;;  %v8129_v50 = vor.u32 %v8976_v21, %v8128_v14  ;;  %v7890_v54 = vld [vmem:[#allocation2 + $0x138] sm:$0xf0] }
 0xd3d   :  { %5843 = vmatpush.bf16.msra.mxu2 %v8369_v10  ;;  %v8961_v55 = vld [vmem:[#allocation2 + $0x2a4] sm:$0xf]  ;;  %v8082_v56 = vld [vmem:[#allocation2 + $0x2b8] sm:$0xf0]  ;;  %v8301_v58 = vor.u32 %v9015_v25, %v8298_v43  ;;  %v7893_v51 = vor.u32 %v8913_v47, %v7890_v54  ;;  %v8907_v28 = vld [vmem:[#allocation2 + $0xf4] sm:$0xf] }
 0xd3e   :  { %5830 = vmatpush.bf16.msrb.mxu1 %v8177_v18  ;;  %v9057_v42 = vld [vmem:[#allocation2 + $0x5a4] sm:$0xf]  ;;  %v8466_v61 = vld [vmem:[#allocation2 + $0x5b8] sm:$0xf0]  ;;  %v8085_v6 = vor.u32 %v8961_v55, %v8082_v56  ;;  %v7866_v8 = vld [vmem:[#allocation2 + $0x108] sm:$0xf0] }
 0xd3f   :  { %5805 = vmatpush.bf16.msrb.mxu3 %v7769_v1  ;;  %v9009_v2 = vld [vmem:[#allocation2 + $0x424] sm:$0xf]  ;;  %v8274_v48 = vld [vmem:[#allocation2 + $0x438] sm:$0xf0]  ;;  %v8469_v7 = vor.u32 %v9057_v42, %v8466_v61  ;;  %v8955_v26 = vld [vmem:[#allocation2 + $0x274] sm:$0xf]  ;;  %v7869_v10 = vor.u32 %v8907_v28, %v7866_v8 }
 0xd40   :  { %5818 = vmatpush.bf16.msrb.mxu0 %v7961_v3  ;;  %v8058_v31 = vld [vmem:[#allocation2 + $0x288] sm:$0xf0]  ;;  %v8277_v38 = vor.u32 %v9009_v2, %v8274_v48  ;;  %v9051_v52 = vld [vmem:[#allocation2 + $0x574] sm:$0xf]  ;;  %v8901_v41 = vld [vmem:[#allocation2 + $0xc4] sm:$0xf] }
 0xd41   :  { %5844 = vmatpush.bf16.msra.mxu2 %v8345_v20  ;;  %v8442_v53 = vld [vmem:[#allocation2 + $0x588] sm:$0xf0]  ;;  %v9003_v35 = vld [vmem:[#allocation2 + $0x3f4] sm:$0xf]  ;;  %v8061_v11 = vor.u32 %v8955_v26, %v8058_v31  ;;  %v7842_v12 = vld [vmem:[#allocation2 + $0xd8] sm:$0xf0] }
 0xd42   :  { %5831 = vmatpush.bf16.msrb.mxu1 %v8153_v24  ;;  %v8250_v9 = vld [vmem:[#allocation2 + $0x408] sm:$0xf0]  ;;  %v8445_v45 = vor.u32 %v9051_v52, %v8442_v53  ;;  %v8949_v40 = vld [vmem:[#allocation2 + $0x244] sm:$0xf]  ;;  %v8034_v18 = vld [vmem:[#allocation2 + $0x258] sm:$0xf0]  ;;  %v7845_v1 = vor.u32 %v8901_v41, %v7842_v12 }
 0xd43   :  { %5806 = vmatpush.bf16.msrb.mxu3 %v7745_v33  ;;  %v8253_v17 = vor.u32 %v9003_v35, %v8250_v9  ;;  %v9045_v62 = vld [vmem:[#allocation2 + $0x544] sm:$0xf]  ;;  %v8418_v57 = vld [vmem:[#allocation2 + $0x558] sm:$0xf0]  ;;  %v8037_v19 = vor.u32 %v8949_v40, %v8034_v18  ;;  %v8895_v63 = vld [vmem:[#allocation2 + $0x94] sm:$0xf] }
 0xd44   :  { %5819 = vmatpush.bf16.msrb.mxu0 %v7937_v39  ;;  %v8997_v13 = vld [vmem:[#allocation2 + $0x3c4] sm:$0xf]  ;;  %v8226_v15 = vld [vmem:[#allocation2 + $0x3d8] sm:$0xf0]  ;;  %v8421_v3 = vor.u32 %v9045_v62, %v8418_v57  ;;  %v7818_v20 = vld [vmem:[#allocation2 + $0xa8] sm:$0xf0] }
 0xd45   :  { %5845 = vmatpush.bf16.msra.mxu2 %v8321_v16  ;;  %v8943_v37 = vld [vmem:[#allocation2 + $0x214] sm:$0xf]  ;;  %v8010_v22 = vld [vmem:[#allocation2 + $0x228] sm:$0xf0]  ;;  %v8229_v23 = vor.u32 %v8997_v13, %v8226_v15  ;;  %v7821_v29 = vor.u32 %v8895_v63, %v7818_v20  ;;  %v8889_v32 = vld [vmem:[#allocation2 + $0x64] sm:$0xf] }
 0xd46   :  { %5832 = vmatpush.bf16.msrb.mxu1 %v8129_v50  ;;  %5807 = vmatmul.bf16.vlgmr.msrb.gmra.mxu3 %v10535_v0  ;;  %v9039_v24 = vld [vmem:[#allocation2 + $0x514] sm:$0xf]  ;;  %v8394_v36 = vld [vmem:[#allocation2 + $0x528] sm:$0xf0]  ;;  %v8013_v30 = vor.u32 %v8943_v37, %v8010_v22  ;;  %v7794_v34 = vld [vmem:[#allocation2 + $0x78] sm:$0xf0] }
 0xd47   :  { %5851 = vmatpush.bf16.msra.mxu3 %v7917_v44  ;;  %5820 = vmatmul.bf16.vlgmr.msrb.gmra.mxu0 %v10545_v5  ;;  %v8991_v59 = vld [vmem:[#allocation2 + $0x394] sm:$0xf]  ;;  %v8202_v27 = vld [vmem:[#allocation2 + $0x3a8] sm:$0xf0]  ;;  %v8397_v33 = vor.u32 %v9039_v24, %v8394_v36  ;;  %v8937_v14 = vld [vmem:[#allocation2 + $0x1e4] sm:$0xf] }
 0xd48   :  { %5864 = vmatpush.bf16.msra.mxu0 %v8109_v46  ;;  %5846 = vmatmul.bf16.vlgmr.msra.gmra.mxu2 %v10540_v4  ;;  %v7986_v21 = vld [vmem:[#allocation2 + $0x1f8] sm:$0xf0]  ;;  %v8205_v39 = vor.u32 %v8991_v59, %v8202_v27  ;;  %v9033_v16 = vld [vmem:[#allocation2 + $0x4e4] sm:$0xf]  ;;  %v7797_v46 = vor.u32 %v8889_v32, %v7794_v34  ;;  %v7770_v54 = vld [vmem:[#allocation2 + $0x48] sm:$0xf0] }
 0xd49   :  { %5890 = vmatpush.bf16.msrb.mxu2 %v8493_v49  ;;  %5833 = vmatmul.bf16.vlgmr.msrb.gmra.mxu1 %v10550_v60  ;;  %v8370_v25 = vld [vmem:[#allocation2 + $0x4f8] sm:$0xf0]  ;;  %v8985_v43 = vld [vmem:[#allocation2 + $0x364] sm:$0xf]  ;;  %v7989_v47 = vor.u32 %v8937_v14, %v7986_v21  ;;  %v8883_v49 = vld [vmem:[#allocation2 + $0x34] sm:$0xf] }
 0xd4a   :  { %5877 = vmatpush.bf16.msra.mxu1 %v8301_v58  ;;  %v8178_v44 = vld [vmem:[#allocation2 + $0x378] sm:$0xf0]  ;;  %v8373_v50 = vor.u32 %v9033_v16, %v8370_v25  ;;  %v8931_v55 = vld [vmem:[#allocation2 + $0x1b4] sm:$0xf]  ;;  %v7962_v56 = vld [vmem:[#allocation2 + $0x1c8] sm:$0xf0] }
 0xd4b   :  { %5852 = vmatpush.bf16.msra.mxu3 %v7893_v51  ;;  %v8181_v58 = vor.u32 %v8985_v43, %v8178_v44  ;;  %v9027_v42 = vld [vmem:[#allocation2 + $0x4b4] sm:$0xf]  ;;  %v8346_v61 = vld [vmem:[#allocation2 + $0x4c8] sm:$0xf0]  ;;  %v7773_v51 = vor.u32 %v8883_v49, %v7770_v54  ;;  %v8877_v28 = vld [vmem:[#allocation2 + $0x4] sm:$0xf] }
 0xd4c   :  { %5865 = vmatpush.bf16.msra.mxu0 %v8085_v6  ;;  %v8979_v2 = vld [vmem:[#allocation2 + $0x334] sm:$0xf]  ;;  %v8154_v48 = vld [vmem:[#allocation2 + $0x348] sm:$0xf0]  ;;  %v7965_v6 = vor.u32 %v8931_v55, %v7962_v56  ;;  %v8925_v8 = vld [vmem:[#allocation2 + $0x184] sm:$0xf]  ;;  %v8349_v26 = vor.u32 %v9027_v42, %v8346_v61 }
 0xd4d   :  { %5891 = vmatpush.bf16.msrb.mxu2 %v8469_v7  ;;  %v7746_v7 = vld [vmem:[#allocation2 + $0x18] sm:$0xf0]  ;;  %v8157_v53 = vor.u32 %v8979_v2, %v8154_v48  ;;  %v7920_v35 = vld [vmem:[#allocation2 + $0x158] sm:$0xf]  ;;  %v8923_v9 = vld [vmem:[#allocation2 + $0x16c] sm:$0xf0] }
 0xd4e   :  { %5878 = vmatpush.bf16.msra.mxu1 %v8277_v38  ;;  %v7938_v31 = vld [vmem:[#allocation2 + $0x198] sm:$0xf0]  ;;  %v9021_v38 = vld [vmem:[#allocation2 + $0x484] sm:$0xf]  ;;  %v8496_v41 = vld [vmem:[#allocation2 + $0x5d8] sm:$0xf]  ;;  %v7749_v12 = vor.u32 %v8877_v28, %v7746_v7  ;;  %v7921_v57 = vor.u32 %v8923_v9, %v7920_v35 }
 0xd4f   :  { %5853 = vmatpush.bf16.msra.mxu3 %v7869_v10  ;;  %v8322_v52 = vld [vmem:[#allocation2 + $0x498] sm:$0xf0]  ;;  %v8112_v10 = vld [vmem:[#allocation2 + $0x2d8] sm:$0xf]  ;;  %v7941_v40 = vor.u32 %v8925_v8, %v7938_v31  ;;  %v8973_v18 = vld [vmem:[#allocation2 + $0x304] sm:$0xf] }
 0xd50   :  { %5866 = vmatpush.bf16.msra.mxu0 %v8061_v11  ;;  %v8971_v11 = vld [vmem:[#allocation2 + $0x2ec] sm:$0xf0]  ;;  %v8325_v62 = vor.u32 %v9021_v38, %v8322_v52  ;;  %v8304_v13 = vld [vmem:[#allocation2 + $0x458] sm:$0xf]  ;;  %v7896_v63 = vld [vmem:[#allocation2 + $0x128] sm:$0xf] }
 0xd51   :  { %5892 = vmatpush.bf16.msrb.mxu2 %v8445_v45  ;;  %v9067_v45 = vld [vmem:[#allocation2 + $0x5ec] sm:$0xf0]  ;;  %v8088_v20 = vld [vmem:[#allocation2 + $0x2a8] sm:$0xf]  ;;  %v8965_v22 = vld [vmem:[#allocation2 + $0x2bc] sm:$0xf0] }
 0xd52   :  { %5879 = vmatpush.bf16.msra.mxu1 %v8253_v17  ;;  %v8130_v17 = vld [vmem:[#allocation2 + $0x318] sm:$0xf0]  ;;  %v9019_v15 = vld [vmem:[#allocation2 + $0x46c] sm:$0xf0]  ;;  %v9061_v24 = vld [vmem:[#allocation2 + $0x5bc] sm:$0xf0] }
 0xd53   :  { %5854 = vmatpush.bf16.msra.mxu3 %v7845_v1  ;;  %v8113_v1 = vor.u32 %v8971_v11, %v8112_v10  ;;  %v8133_v37 = vor.u32 %v8973_v18, %v8130_v17  ;;  %v8305_v36 = vor.u32 %v9019_v15, %v8304_v13  ;;  %v8280_v27 = vld [vmem:[#allocation2 + $0x428] sm:$0xf]  ;;  %v8911_v34 = vld [vmem:[#allocation2 + $0x10c] sm:$0xf0]  ;;  %v8064_v14 = vld [vmem:[#allocation2 + $0x278] sm:$0xf] }
 0xd54   :  { %5867 = vmatpush.bf16.msra.mxu0 %v8037_v19  ;;  %v8497_v19 = vor.u32 %v9067_v45, %v8496_v41  ;;  %v8959_v21 = vld [vmem:[#allocation2 + $0x28c] sm:$0xf0]  ;;  %v8256_v44 = vld [vmem:[#allocation2 + $0x3f8] sm:$0xf]  ;;  %v8905_v54 = vld [vmem:[#allocation2 + $0xdc] sm:$0xf0] }
 0xd55   :  { %5893 = vmatpush.bf16.msrb.mxu2 %v8421_v3  ;;  %v8917_v3 = vld [vmem:[#allocation2 + $0x13c] sm:$0xf0]  ;;  %v9055_v16 = vld [vmem:[#allocation2 + $0x58c] sm:$0xf0]  ;;  %v8040_v55 = vld [vmem:[#allocation2 + $0x248] sm:$0xf] }
 0xd56   :  { %5880 = vmatpush.bf16.msra.mxu1 %v8229_v23  ;;  %v8472_v23 = vld [vmem:[#allocation2 + $0x5a8] sm:$0xf]  ;;  %v7897_v59 = vor.u32 %v8917_v3, %v7896_v63  ;;  %v8953_v56 = vld [vmem:[#allocation2 + $0x25c] sm:$0xf0]  ;;  %v7824_v7 = vld [vmem:[#allocation2 + $0x98] sm:$0xf] }
 0xd57   :  { %5855 = vmatpush.bf16.msra.mxu3 %v7821_v29  ;;  %v9013_v29 = vld [vmem:[#allocation2 + $0x43c] sm:$0xf0]  ;;  %v8473_v32 = vor.u32 %v9061_v24, %v8472_v23  ;;  %v8232_v48 = vld [vmem:[#allocation2 + $0x3c8] sm:$0xf]  ;;  %v8899_v8 = vld [vmem:[#allocation2 + $0xac] sm:$0xf0] }
 0xd58   :  { %5868 = vmatpush.bf16.msra.mxu0 %v8013_v30  ;;  %v8089_v30 = vor.u32 %v8965_v22, %v8088_v20  ;;  %v8281_v25 = vor.u32 %v9013_v29, %v8280_v27  ;;  %v9049_v42 = vld [vmem:[#allocation2 + $0x55c] sm:$0xf0]  ;;  %v8947_v31 = vld [vmem:[#allocation2 + $0x22c] sm:$0xf0]  ;;  %v8400_v38 = vld [vmem:[#allocation2 + $0x518] sm:$0xf]  ;;  %v7825_v35 = vor.u32 %v8899_v8, %v7824_v7 }
 0xd59   :  { %5894 = vmatpush.bf16.msrb.mxu2 %v8397_v33  ;;  %v7872_v33 = vld [vmem:[#allocation2 + $0xf8] sm:$0xf]  ;;  %v9043_v52 = vld [vmem:[#allocation2 + $0x52c] sm:$0xf0]  ;;  %v7800_v45 = vld [vmem:[#allocation2 + $0x68] sm:$0xf] }
 0xd5a   :  { %5881 = vmatpush.bf16.msra.mxu1 %v8205_v39  ;;  %v8448_v39 = vld [vmem:[#allocation2 + $0x578] sm:$0xf]  ;;  %v7873_v43 = vor.u32 %v8911_v34, %v7872_v33  ;;  %v8995_v10 = vld [vmem:[#allocation2 + $0x3ac] sm:$0xf0]  ;;  %v8401_v41 = vor.u32 %v9043_v52, %v8400_v38  ;;  %v8941_v18 = vld [vmem:[#allocation2 + $0x1fc] sm:$0xf0] }
 0xd5b   :  { %5856 = vmatpush.bf16.msra.mxu3 %v7797_v46  ;;  %v9007_v46 = vld [vmem:[#allocation2 + $0x40c] sm:$0xf0]  ;;  %v8449_v49 = vor.u32 %v9055_v16, %v8448_v39  ;;  %v8208_v9 = vld [vmem:[#allocation2 + $0x398] sm:$0xf]  ;;  %v8376_v17 = vld [vmem:[#allocation2 + $0x4e8] sm:$0xf] }
 0xd5c   :  { %5869 = vmatpush.bf16.msra.mxu0 %v7989_v47  ;;  %v8065_v47 = vor.u32 %v8959_v21, %v8064_v14  ;;  %v8257_v61 = vor.u32 %v9007_v46, %v8256_v44  ;;  %v8184_v15 = vld [vmem:[#allocation2 + $0x368] sm:$0xf]  ;;  %v7776_v3 = vld [vmem:[#allocation2 + $0x38] sm:$0xf]  ;;  %v8887_v20 = vld [vmem:[#allocation2 + $0x4c] sm:$0xf0] }
 0xd5d   :  { %5895 = vmatpush.bf16.msrb.mxu2 %v8373_v50  ;;  %v7848_v50 = vld [vmem:[#allocation2 + $0xc8] sm:$0xf]  ;;  %v8935_v22 = vld [vmem:[#allocation2 + $0x1cc] sm:$0xf0]  ;;  %v8352_v23 = vld [vmem:[#allocation2 + $0x4b8] sm:$0xf]  ;;  %v7777_v27 = vor.u32 %v8887_v20, %v7776_v3 }
 0xd5e   :  { %5882 = vmatpush.bf16.msra.mxu1 %v8181_v58  ;;  %v8424_v58 = vld [vmem:[#allocation2 + $0x548] sm:$0xf]  ;;  %v7849_v2 = vor.u32 %v8905_v54, %v7848_v50  ;;  %v9031_v24 = vld [vmem:[#allocation2 + $0x4cc] sm:$0xf0]  ;;  %v8929_v21 = vld [vmem:[#allocation2 + $0x19c] sm:$0xf0] }
 0xd5f   :  { %5857 = vmatpush.bf16.msra.mxu3 %v7773_v51  ;;  %v9001_v51 = vld [vmem:[#allocation2 + $0x3dc] sm:$0xf0]  ;;  %v8425_v28 = vor.u32 %v9049_v42, %v8424_v58  ;;  %v8983_v29 = vld [vmem:[#allocation2 + $0x34c] sm:$0xf0]  ;;  %v8353_v34 = vor.u32 %v9031_v24, %v8352_v23  ;;  %v7944_v14 = vld [vmem:[#allocation2 + $0x188] sm:$0xf] }
 0xd60   :  { %5870 = vmatpush.bf16.msra.mxu0 %v7965_v6  ;;  %v8041_v6 = vor.u32 %v8953_v56, %v8040_v55  ;;  %v8328_v39 = vld [vmem:[#allocation2 + $0x488] sm:$0xf]  ;;  %v9025_v16 = vld [vmem:[#allocation2 + $0x49c] sm:$0xf0]  ;;  %v8968_v46 = vld [vmem:[#allocation2 + $0x2dc] sm:$0xf]  ;;  %v7945_v58 = vor.u32 %v8929_v21, %v7944_v14 }
 0xd61   :  { %5896 = vmatpush.bf16.msrb.mxu2 %v8349_v26  ;;  %v8016_v26 = vld [vmem:[#allocation2 + $0x218] sm:$0xf]  ;;  %v8498_v54 = vld [vmem:[#allocation2 + $0x5f0] sm:$0xf0]  ;;  %v8136_v55 = vld [vmem:[#allocation2 + $0x308] sm:$0xf]  ;;  %v8329_v42 = vor.u32 %v9025_v16, %v8328_v39 }
 0xd62   :  { %5883 = vmatpush.bf16.msra.mxu1 %v8157_v53  ;;  %v8233_v53 = vor.u32 %v9001_v51, %v8232_v48  ;;  %v8017_v11 = vor.u32 %v8947_v31, %v8016_v26  ;;  %v8977_v56 = vld [vmem:[#allocation2 + $0x31c] sm:$0xf0]  ;;  %v7898_v8 = vld [vmem:[#allocation2 + $0x140] sm:$0xf0]  ;;  %v8962_v26 = vld [vmem:[#allocation2 + $0x2ac] sm:$0xf] }
 0xd63   :  { %5858 = vmatpush.bf16.msra.mxu3 %v7749_v12  ;;  %v8893_v12 = vld [vmem:[#allocation2 + $0x7c] sm:$0xf0]  ;;  %v8137_v7 = vor.u32 %v8977_v56, %v8136_v55  ;;  %v8090_v31 = vld [vmem:[#allocation2 + $0x2c0] sm:$0xf0]  ;;  %v9058_v52 = vld [vmem:[#allocation2 + $0x5ac] sm:$0xf] }
 0xd64   :  { %5871 = vmatpush.bf16.msra.mxu0 %v7941_v40  ;;  %v7992_v40 = vld [vmem:[#allocation2 + $0x1e8] sm:$0xf]  ;;  %v7801_v13 = vor.u32 %v8893_v12, %v7800_v45  ;;  %v7874_v12 = vld [vmem:[#allocation2 + $0x110] sm:$0xf0]  ;;  %v7850_v20 = vld [vmem:[#allocation2 + $0xe0] sm:$0xf0] }
 0xd65   :  { %5897 = vmatpush.bf16.msrb.mxu2 %v8325_v62  ;;  %v9037_v62 = vld [vmem:[#allocation2 + $0x4fc] sm:$0xf0]  ;;  %v9046_v24 = vld [vmem:[#allocation2 + $0x54c] sm:$0xf]  ;;  %v8944_v14 = vld [vmem:[#allocation2 + $0x21c] sm:$0xf] }
 0xd66   :  { %5884 = vmatpush.bf16.msra.mxu1 %v8133_v37  ;;  %5859 = vmatmul.bf16.vlgmr.msra.gmra.mxu3 %v10535_v0  ;;  %v8377_v63 = vor.u32 %v9037_v62, %v8376_v17  ;;  %v7968_v37 = vld [vmem:[#allocation2 + $0x1b8] sm:$0xf]  ;;  %v9052_v62 = vld [vmem:[#allocation2 + $0x57c] sm:$0xf]  ;;  %v8018_v21 = vld [vmem:[#allocation2 + $0x230] sm:$0xf0] }
 0xd67   :  { %5903 = vmatpush.bf16.msrb.mxu3 %v7921_v57  ;;  %5872 = vmatmul.bf16.vlgmr.msra.gmra.mxu0 %v10545_v5  ;;  %v8209_v57 = vor.u32 %v8995_v10, %v8208_v9  ;;  %v7969_v33 = vor.u32 %v8935_v22, %v7968_v37  ;;  %v8282_v9 = vld [vmem:[#allocation2 + $0x440] sm:$0xf0]  ;;  %v8950_v37 = vld [vmem:[#allocation2 + $0x24c] sm:$0xf]  ;;  %v9040_v16 = vld [vmem:[#allocation2 + $0x51c] sm:$0xf] }
 0xd68   :  { %5916 = vmatpush.bf16.msrb.mxu0 %v8113_v1  ;;  %5898 = vmatmul.bf16.vlgmr.msrb.gmra.mxu2 %v10540_v4  ;;  %v8989_v1 = vld [vmem:[#allocation2 + $0x37c] sm:$0xf0]  ;;  %v8042_v22 = vld [vmem:[#allocation2 + $0x260] sm:$0xf0]  ;;  %v8938_v55 = vld [vmem:[#allocation2 + $0x1ec] sm:$0xf] }
 0xd69   :  { %5942 = vmatpush.bf16.msra.mxu2 %v8497_v19  ;;  %5885 = vmatmul.bf16.vlgmr.msra.gmra.mxu1 %v10550_v60  ;;  %v7993_v19 = vor.u32 %v8941_v18, %v7992_v40  ;;  %v8956_v40 = vld [vmem:[#allocation2 + $0x27c] sm:$0xf]  ;;  %v8066_v18 = vld [vmem:[#allocation2 + $0x290] sm:$0xf0]  ;;  %v7994_v56 = vld [vmem:[#allocation2 + $0x200] sm:$0xf0] }
 0xd6a   :  { %5929 = vmatpush.bf16.msrb.mxu1 %v8305_v36  ;;  %v8185_v36 = vor.u32 %v8989_v1, %v8184_v15  ;;  %v8258_v15 = vld [vmem:[#allocation2 + $0x410] sm:$0xf0] }
 0xd6b   :  { %5904 = vmatpush.bf16.msrb.mxu3 %v7897_v59  ;;  %v8160_v59 = vld [vmem:[#allocation2 + $0x338] sm:$0xf] }
 0xd6c   :  { %5917 = vmatpush.bf16.msrb.mxu0 %v8089_v30  ;;  %v7752_v30 = vld [vmem:[#allocation2 + $0x8] sm:$0xf]  ;;  %v8161_v44 = vor.u32 %v8983_v29, %v8160_v59  ;;  %v8998_v59 = vld [vmem:[#allocation2 + $0x3cc] sm:$0xf] }
 0xd6d   :  { %5943 = vmatpush.bf16.msra.mxu2 %v8473_v32  ;;  %v8881_v32 = vld [vmem:[#allocation2 + $0x1c] sm:$0xf0] }
 0xd6e   :  { %5930 = vmatpush.bf16.msrb.mxu1 %v8281_v25  ;;  %v8920_v25 = vld [vmem:[#allocation2 + $0x15c] sm:$0xf]  ;;  %v7753_v50 = vor.u32 %v8881_v32, %v7752_v30  ;;  %v8045_v30 = vor.u32 %v8950_v37, %v8042_v22  ;;  %v8974_v22 = vld [vmem:[#allocation2 + $0x30c] sm:$0xf] }
 0xd6f   :  { %5905 = vmatpush.bf16.msrb.mxu3 %v7873_v43  ;;  %v7922_v43 = vld [vmem:[#allocation2 + $0x170] sm:$0xf0]  ;;  %v8896_v32 = vld [vmem:[#allocation2 + $0x9c] sm:$0xf] }
 0xd70   :  { %5918 = vmatpush.bf16.msrb.mxu0 %v8065_v47  ;;  %v8114_v47 = vld [vmem:[#allocation2 + $0x2f0] sm:$0xf0]  ;;  %v7925_v48 = vor.u32 %v8920_v25, %v7922_v43  ;;  %v8992_v43 = vld [vmem:[#allocation2 + $0x39c] sm:$0xf] }
 0xd71   :  { %5944 = vmatpush.bf16.msra.mxu2 %v8449_v49  ;;  %v9064_v49 = vld [vmem:[#allocation2 + $0x5dc] sm:$0xf]  ;;  %v8117_v51 = vor.u32 %v8968_v46, %v8114_v47  ;;  %v8402_v25 = vld [vmem:[#allocation2 + $0x530] sm:$0xf0]  ;;  %v8021_v47 = vor.u32 %v8944_v14, %v8018_v21  ;;  %v8966_v21 = vld [vmem:[#allocation2 + $0x2c4] sm:$0xf0] }
 0xd72   :  { %5931 = vmatpush.bf16.msrb.mxu1 %v8257_v61  ;;  %v9016_v61 = vld [vmem:[#allocation2 + $0x45c] sm:$0xf] }
 0xd73   :  { %5906 = vmatpush.bf16.msrb.mxu3 %v7849_v2  ;;  %v8306_v2 = vld [vmem:[#allocation2 + $0x470] sm:$0xf0] }
 0xd74   :  { %5919 = vmatpush.bf16.msrb.mxu0 %v8041_v6  ;;  %v8914_v6 = vld [vmem:[#allocation2 + $0x12c] sm:$0xf]  ;;  %v8309_v38 = vor.u32 %v9016_v61, %v8306_v2  ;;  %v8378_v61 = vld [vmem:[#allocation2 + $0x500] sm:$0xf0] }
 0xd75   :  { %5945 = vmatpush.bf16.msra.mxu2 %v8425_v28  ;;  %v8501_v28 = vor.u32 %v9064_v49, %v8498_v54  ;;  %v7901_v10 = vor.u32 %v8914_v6, %v7898_v8  ;;  %v8890_v49 = vld [vmem:[#allocation2 + $0x6c] sm:$0xf]  ;;  %v7802_v54 = vld [vmem:[#allocation2 + $0x80] sm:$0xf0]  ;;  %v7997_v6 = vor.u32 %v8938_v55, %v7994_v56  ;;  %v7778_v8 = vld [vmem:[#allocation2 + $0x50] sm:$0xf0] }
 0xd76   :  { %5932 = vmatpush.bf16.msrb.mxu1 %v8233_v53  ;;  %v8474_v53 = vld [vmem:[#allocation2 + $0x5c0] sm:$0xf0]  ;;  %v8986_v2 = vld [vmem:[#allocation2 + $0x36c] sm:$0xf]  ;;  %v8072_v55 = vld [vmem:[#allocation2 + $0x280] sm:$0xf] }
 0xd77   :  { %5907 = vmatpush.bf16.msrb.mxu3 %v7825_v35  ;;  %v9010_v35 = vld [vmem:[#allocation2 + $0x42c] sm:$0xf]  ;;  %v8477_v45 = vor.u32 %v9058_v52, %v8474_v53  ;;  %v9028_v52 = vld [vmem:[#allocation2 + $0x4bc] sm:$0xf]  ;;  %v8354_v53 = vld [vmem:[#allocation2 + $0x4d0] sm:$0xf0] }
 0xd78   :  { %5920 = vmatpush.bf16.msrb.mxu0 %v8017_v11  ;;  %v8093_v11 = vor.u32 %v8962_v26, %v8090_v31  ;;  %v8285_v17 = vor.u32 %v9010_v35, %v8282_v9  ;;  %v8932_v26 = vld [vmem:[#allocation2 + $0x1bc] sm:$0xf]  ;;  %v7970_v31 = vld [vmem:[#allocation2 + $0x1d0] sm:$0xf0]  ;;  %v8960_v56 = vld [vmem:[#allocation2 + $0x294] sm:$0xf0] }
 0xd79   :  { %5946 = vmatpush.bf16.msra.mxu2 %v8401_v41  ;;  %v8908_v41 = vld [vmem:[#allocation2 + $0xfc] sm:$0xf]  ;;  %v8162_v9 = vld [vmem:[#allocation2 + $0x350] sm:$0xf0] }
 0xd7a   :  { %5933 = vmatpush.bf16.msrb.mxu1 %v8209_v57  ;;  %v8450_v57 = vld [vmem:[#allocation2 + $0x590] sm:$0xf0]  ;;  %v7877_v1 = vor.u32 %v8908_v41, %v7874_v12  ;;  %v8980_v35 = vld [vmem:[#allocation2 + $0x33c] sm:$0xf]  ;;  %v8878_v41 = vld [vmem:[#allocation2 + $0xc] sm:$0xf] }
 0xd7b   :  { %5908 = vmatpush.bf16.msrb.mxu3 %v7801_v13  ;;  %v9004_v13 = vld [vmem:[#allocation2 + $0x3fc] sm:$0xf]  ;;  %v8453_v3 = vor.u32 %v9052_v62, %v8450_v57  ;;  %v8926_v12 = vld [vmem:[#allocation2 + $0x18c] sm:$0xf]  ;;  %v8330_v62 = vld [vmem:[#allocation2 + $0x4a0] sm:$0xf0]  ;;  %v8165_v57 = vor.u32 %v8980_v35, %v8162_v9 }
 0xd7c   :  { %5921 = vmatpush.bf16.msrb.mxu0 %v7993_v19  ;;  %v8069_v19 = vor.u32 %v8956_v40, %v8066_v18  ;;  %v8261_v23 = vor.u32 %v9004_v13, %v8258_v15  ;;  %v8357_v40 = vor.u32 %v9028_v52, %v8354_v53  ;;  %v7946_v18 = vld [vmem:[#allocation2 + $0x1a0] sm:$0xf0]  ;;  %v7928_v13 = vld [vmem:[#allocation2 + $0x160] sm:$0xf]  ;;  %v8924_v15 = vld [vmem:[#allocation2 + $0x174] sm:$0xf0] }
 0xd7d   :  { %5947 = vmatpush.bf16.msra.mxu2 %v8377_v63  ;;  %v8902_v63 = vld [vmem:[#allocation2 + $0xcc] sm:$0xf]  ;;  %v7949_v37 = vor.u32 %v8926_v12, %v7946_v18  ;;  %v9050_v52 = vld [vmem:[#allocation2 + $0x564] sm:$0xf0]  ;;  %v8240_v9 = vld [vmem:[#allocation2 + $0x3d0] sm:$0xf] }
 0xd7e   :  { %5934 = vmatpush.bf16.msrb.mxu1 %v8185_v36  ;;  %v8426_v36 = vld [vmem:[#allocation2 + $0x560] sm:$0xf0]  ;;  %v7853_v29 = vor.u32 %v8902_v63, %v7850_v20  ;;  %v8504_v63 = vld [vmem:[#allocation2 + $0x5e0] sm:$0xf]  ;;  %v8900_v12 = vld [vmem:[#allocation2 + $0xb4] sm:$0xf0] }
 0xd7f   :  { %5909 = vmatpush.bf16.msrb.mxu3 %v7777_v27  ;;  %v8234_v27 = vld [vmem:[#allocation2 + $0x3e0] sm:$0xf0]  ;;  %v8948_v18 = vld [vmem:[#allocation2 + $0x234] sm:$0xf0] }
 0xd80   :  { %5922 = vmatpush.bf16.msrb.mxu0 %v7969_v33  ;;  %v8429_v33 = vor.u32 %v9046_v24, %v8426_v36  ;;  %v8237_v39 = vor.u32 %v8998_v59, %v8234_v27  ;;  %v7929_v36 = vor.u32 %v8924_v15, %v7928_v13  ;;  %v8312_v59 = vld [vmem:[#allocation2 + $0x460] sm:$0xf]  ;;  %v9020_v27 = vld [vmem:[#allocation2 + $0x474] sm:$0xf0] }
 0xd81   :  { %5948 = vmatpush.bf16.msra.mxu2 %v8353_v34  ;;  %v7826_v34 = vld [vmem:[#allocation2 + $0xb0] sm:$0xf0]  ;;  %v8216_v15 = vld [vmem:[#allocation2 + $0x3a0] sm:$0xf] }
 0xd82   :  { %5935 = vmatpush.bf16.msrb.mxu1 %v8161_v44  ;;  %v8210_v44 = vld [vmem:[#allocation2 + $0x3b0] sm:$0xf0]  ;;  %v7829_v46 = vor.u32 %v8896_v32, %v7826_v34  ;;  %v7904_v32 = vld [vmem:[#allocation2 + $0x130] sm:$0xf] }
 0xd83   :  { %5910 = vmatpush.bf16.msrb.mxu3 %v7753_v50  ;;  %v8405_v50 = vor.u32 %v9040_v16, %v8402_v25  ;;  %v8096_v34 = vld [vmem:[#allocation2 + $0x2b0] sm:$0xf]  ;;  %v9062_v16 = vld [vmem:[#allocation2 + $0x5c4] sm:$0xf0]  ;;  %v8313_v25 = vor.u32 %v9020_v27, %v8312_v59 }
 0xd84   :  { %5923 = vmatpush.bf16.msrb.mxu0 %v7945_v58  ;;  %v8213_v58 = vor.u32 %v8992_v43, %v8210_v44  ;;  %v8288_v44 = vld [vmem:[#allocation2 + $0x430] sm:$0xf] }
 0xd85   :  { %5949 = vmatpush.bf16.msra.mxu2 %v8329_v42  ;;  %v9034_v42 = vld [vmem:[#allocation2 + $0x4ec] sm:$0xf]  ;;  %v8192_v27 = vld [vmem:[#allocation2 + $0x370] sm:$0xf] }
 0xd86   :  { %5936 = vmatpush.bf16.msrb.mxu1 %v8137_v7  ;;  %5911 = vmatmul.bf16.vlgmr.msrb.gmra.mxu3 %v10535_v0  ;;  %v8381_v7 = vor.u32 %v9034_v42, %v8378_v61  ;;  %v9056_v42 = vld [vmem:[#allocation2 + $0x594] sm:$0xf0] }
 0xd87   :  { %5955 = vmatpush.bf16.msra.mxu3 %v7925_v48  ;;  %5924 = vmatmul.bf16.vlgmr.msrb.gmra.mxu0 %v10545_v5  ;;  %v8186_v48 = vld [vmem:[#allocation2 + $0x380] sm:$0xf0] }
 0xd88   :  { %5968 = vmatpush.bf16.msra.mxu0 %v8117_v51  ;;  %5950 = vmatmul.bf16.vlgmr.msra.gmra.mxu2 %v10540_v4  ;;  %v7805_v51 = vor.u32 %v8890_v49, %v7802_v54  ;;  %v8912_v54 = vld [vmem:[#allocation2 + $0x114] sm:$0xf0] }
 0xd89   :  { %5994 = vmatpush.bf16.msrb.mxu2 %v8501_v28  ;;  %5937 = vmatmul.bf16.vlgmr.msrb.gmra.mxu1 %v10550_v60  ;;  %v8884_v28 = vld [vmem:[#allocation2 + $0x3c] sm:$0xf] }
 0xd8a   :  { %5981 = vmatpush.bf16.msra.mxu1 %v8309_v38  ;;  %v8189_v38 = vor.u32 %v8986_v2, %v8186_v48  ;;  %v8264_v48 = vld [vmem:[#allocation2 + $0x400] sm:$0xf] }
 0xd8b   :  { %5956 = vmatpush.bf16.msra.mxu3 %v7901_v10  ;;  %v7781_v10 = vor.u32 %v8884_v28, %v7778_v8  ;;  %v8906_v8 = vld [vmem:[#allocation2 + $0xe4] sm:$0xf0] }
 0xd8c   :  { %5969 = vmatpush.bf16.msra.mxu0 %v8093_v11  ;;  %v7973_v11 = vor.u32 %v8932_v26, %v7970_v31  ;;  %v8048_v26 = vld [vmem:[#allocation2 + $0x250] sm:$0xf]  ;;  %v8954_v31 = vld [vmem:[#allocation2 + $0x264] sm:$0xf0] }
 0xd8d   :  { %5995 = vmatpush.bf16.msrb.mxu2 %v8477_v45  ;;  %v7754_v45 = vld [vmem:[#allocation2 + $0x20] sm:$0xf0] }
 0xd8e   :  { %5982 = vmatpush.bf16.msra.mxu1 %v8285_v17  ;;  %v9022_v17 = vld [vmem:[#allocation2 + $0x48c] sm:$0xf]  ;;  %v7757_v20 = vor.u32 %v8878_v41, %v7754_v45  ;;  %v7832_v45 = vld [vmem:[#allocation2 + $0xa0] sm:$0xf] }
 0xd8f   :  { %5957 = vmatpush.bf16.msra.mxu3 %v7877_v1  ;;  %v8120_v1 = vld [vmem:[#allocation2 + $0x2e0] sm:$0xf]  ;;  %v8333_v24 = vor.u32 %v9022_v17, %v8330_v62  ;;  %v9044_v62 = vld [vmem:[#allocation2 + $0x534] sm:$0xf0]  ;;  %v7833_v13 = vor.u32 %v8900_v12, %v7832_v45  ;;  %v7906_v12 = vld [vmem:[#allocation2 + $0x148] sm:$0xf0] }
 0xd90   :  { %5970 = vmatpush.bf16.msra.mxu0 %v8069_v19  ;;  %v8972_v19 = vld [vmem:[#allocation2 + $0x2f4] sm:$0xf0]  ;;  %v8408_v17 = vld [vmem:[#allocation2 + $0x520] sm:$0xf] }
 0xd91   :  { %5996 = vmatpush.bf16.msrb.mxu2 %v8453_v3  ;;  %v9068_v3 = vld [vmem:[#allocation2 + $0x5f4] sm:$0xf0] }
 0xd92   :  { %5983 = vmatpush.bf16.msra.mxu1 %v8261_v23  ;;  %v8138_v23 = vld [vmem:[#allocation2 + $0x320] sm:$0xf0] }
 0xd93   :  { %5958 = vmatpush.bf16.msra.mxu3 %v7853_v29  ;;  %v8121_v29 = vor.u32 %v8972_v19, %v8120_v1  ;;  %v8141_v14 = vor.u32 %v8974_v22, %v8138_v23  ;;  %v8996_v1 = vld [vmem:[#allocation2 + $0x3b4] sm:$0xf0]  ;;  %v8942_v22 = vld [vmem:[#allocation2 + $0x204] sm:$0xf0]  ;;  %v8384_v23 = vld [vmem:[#allocation2 + $0x4f0] sm:$0xf] }
 0xd94   :  { %5971 = vmatpush.bf16.msra.mxu0 %v8045_v30  ;;  %v8505_v30 = vor.u32 %v9068_v3, %v8504_v63  ;;  %v8409_v63 = vor.u32 %v9044_v62, %v8408_v17  ;;  %v7808_v3 = vld [vmem:[#allocation2 + $0x70] sm:$0xf]  ;;  %v9059_v62 = vld [vmem:[#allocation2 + $0x5b4] sm:$0xf] }
 0xd95   :  { %5997 = vmatpush.bf16.msrb.mxu2 %v8429_v33  ;;  %v8918_v33 = vld [vmem:[#allocation2 + $0x144] sm:$0xf0] }
 0xd96   :  { %5984 = vmatpush.bf16.msra.mxu1 %v8237_v39  ;;  %v8480_v39 = vld [vmem:[#allocation2 + $0x5b0] sm:$0xf]  ;;  %v7905_v43 = vor.u32 %v8918_v33, %v7904_v32  ;;  %v7784_v33 = vld [vmem:[#allocation2 + $0x40] sm:$0xf] }
 0xd97   :  { %5959 = vmatpush.bf16.msra.mxu3 %v7829_v46  ;;  %v9014_v46 = vld [vmem:[#allocation2 + $0x444] sm:$0xf0]  ;;  %v8481_v49 = vor.u32 %v9062_v16, %v8480_v39  ;;  %v8360_v39 = vld [vmem:[#allocation2 + $0x4c0] sm:$0xf]  ;;  %v9032_v16 = vld [vmem:[#allocation2 + $0x4d4] sm:$0xf0] }
 0xd98   :  { %5972 = vmatpush.bf16.msra.mxu0 %v8021_v47  ;;  %v8097_v47 = vor.u32 %v8966_v21, %v8096_v34  ;;  %v8289_v61 = vor.u32 %v9014_v46, %v8288_v44  ;;  %v8888_v34 = vld [vmem:[#allocation2 + $0x54] sm:$0xf0] }
 0xd99   :  { %5998 = vmatpush.bf16.msrb.mxu2 %v8405_v50  ;;  %v7880_v50 = vld [vmem:[#allocation2 + $0x100] sm:$0xf]  ;;  %v8936_v21 = vld [vmem:[#allocation2 + $0x1d4] sm:$0xf0]  ;;  %v7785_v44 = vor.u32 %v8888_v34, %v7784_v33  ;;  %v7858_v33 = vld [vmem:[#allocation2 + $0xe8] sm:$0xf0] }
 0xd9a   :  { %5985 = vmatpush.bf16.msra.mxu1 %v8213_v58  ;;  %v8456_v58 = vld [vmem:[#allocation2 + $0x580] sm:$0xf]  ;;  %v7881_v2 = vor.u32 %v8912_v54, %v7880_v50  ;;  %v8984_v46 = vld [vmem:[#allocation2 + $0x354] sm:$0xf0]  ;;  %v8361_v54 = vor.u32 %v9032_v16, %v8360_v39 }
 0xd9b   :  { %5960 = vmatpush.bf16.msra.mxu3 %v7805_v51  ;;  %v9008_v51 = vld [vmem:[#allocation2 + $0x414] sm:$0xf0]  ;;  %v8457_v28 = vor.u32 %v9056_v42, %v8456_v58  ;;  %v8336_v58 = vld [vmem:[#allocation2 + $0x490] sm:$0xf]  ;;  %v9026_v42 = vld [vmem:[#allocation2 + $0x4a4] sm:$0xf0] }
 0xd9c   :  { %5973 = vmatpush.bf16.msra.mxu0 %v7997_v6  ;;  %v8073_v6 = vor.u32 %v8960_v56, %v8072_v55  ;;  %v8265_v53 = vor.u32 %v9008_v51, %v8264_v48  ;;  %v7952_v55 = vld [vmem:[#allocation2 + $0x190] sm:$0xf]  ;;  %v8930_v56 = vld [vmem:[#allocation2 + $0x1a4] sm:$0xf0]  ;;  %v8969_v51 = vld [vmem:[#allocation2 + $0x2e4] sm:$0xf] }
 0xd9d   :  { %5999 = vmatpush.bf16.msrb.mxu2 %v8381_v7  ;;  %v7856_v7 = vld [vmem:[#allocation2 + $0xd0] sm:$0xf]  ;;  %v10572_v39 = vld [vmem:[#allocation2 + $0x600] sm:$0x11] }
 0xd9e   :  { %5986 = vmatpush.bf16.msra.mxu1 %v8189_v38  ;;  %v8432_v38 = vld [vmem:[#allocation2 + $0x550] sm:$0xf]  ;;  %v7857_v35 = vor.u32 %v8906_v8, %v7856_v7  ;;  %v8506_v8 = vld [vmem:[#allocation2 + $0x5f8] sm:$0xf0] }
 0xd9f   :  { %5961 = vmatpush.bf16.msra.mxu3 %v7781_v10  ;;  %v9002_v10 = vld [vmem:[#allocation2 + $0x3e4] sm:$0xf0]  ;;  %v8433_v41 = vor.u32 %v9050_v52, %v8432_v38  ;;  %v7953_v38 = vor.u32 %v8930_v56, %v7952_v55  ;;  %v8337_v52 = vor.u32 %v9026_v42, %v8336_v58  ;;  %v7834_v56 = vld [vmem:[#allocation2 + $0xb8] sm:$0xf0]  ;;  %v8945_v58 = vld [vmem:[#allocation2 + $0x224] sm:$0xf] }
 0xda0   :  { %5974 = vmatpush.bf16.msra.mxu0 %v7973_v11  ;;  %v8049_v11 = vor.u32 %v8954_v31, %v8048_v26  ;;  %v8144_v26 = vld [vmem:[#allocation2 + $0x310] sm:$0xf]  ;;  %v8978_v31 = vld [vmem:[#allocation2 + $0x324] sm:$0xf0]  ;;  %v8026_v42 = vld [vmem:[#allocation2 + $0x238] sm:$0xf0] }
 0xda1   :  { %6000 = vmatpush.bf16.msrb.mxu2 %v8357_v40  ;;  %v8024_v40 = vld [vmem:[#allocation2 + $0x220] sm:$0xf]  ;;  %v8145_v45 = vor.u32 %v8978_v31, %v8144_v26  ;;  %v8891_v26 = vld [vmem:[#allocation2 + $0x74] sm:$0xf] }
 0xda2   :  { %5987 = vmatpush.bf16.msra.mxu1 %v8165_v57  ;;  %v8241_v57 = vor.u32 %v9002_v10, %v8240_v9  ;;  %v8025_v19 = vor.u32 %v8948_v18, %v8024_v40  ;;  %v8963_v40 = vld [vmem:[#allocation2 + $0x2b4] sm:$0xf]  ;;  %v8098_v18 = vld [vmem:[#allocation2 + $0x2c8] sm:$0xf0] }
 0xda3   :  { %5962 = vmatpush.bf16.msra.mxu3 %v7757_v20  ;;  %v8894_v20 = vld [vmem:[#allocation2 + $0x84] sm:$0xf0] }
 0xda4   :  { %5975 = vmatpush.bf16.msra.mxu0 %v7949_v37  ;;  %v8000_v37 = vld [vmem:[#allocation2 + $0x1f0] sm:$0xf]  ;;  %v7809_v59 = vor.u32 %v8894_v20, %v7808_v3  ;;  %v7882_v20 = vld [vmem:[#allocation2 + $0x118] sm:$0xf0] }
 0xda5   :  { %6001 = vmatpush.bf16.msrb.mxu2 %v8333_v24  ;;  %v9038_v24 = vld [vmem:[#allocation2 + $0x504] sm:$0xf0] }
 0xda6   :  { %5988 = vmatpush.bf16.msra.mxu1 %v8141_v14  ;;  %5963 = vmatmul.bf16.vlgmr.msra.gmra.mxu3 %v10535_v0  ;;  %v8385_v32 = vor.u32 %v9038_v24, %v8384_v23  ;;  %v7976_v14 = vld [vmem:[#allocation2 + $0x1c0] sm:$0xf]  ;;  %v9053_v24 = vld [vmem:[#allocation2 + $0x584] sm:$0xf] }
 0xda7   :  { %6007 = vmatpush.bf16.msrb.mxu3 %v7929_v36  ;;  %5976 = vmatmul.bf16.vlgmr.msra.gmra.mxu0 %v10545_v5  ;;  %v8217_v36 = vor.u32 %v8996_v1, %v8216_v15  ;;  %v7977_v50 = vor.u32 %v8936_v21, %v7976_v14  ;;  %v8290_v15 = vld [vmem:[#allocation2 + $0x448] sm:$0xf0]  ;;  %v8951_v14 = vld [vmem:[#allocation2 + $0x254] sm:$0xf] }
 0xda8   :  { %6020 = vmatpush.bf16.msrb.mxu0 %v8121_v29  ;;  %6002 = vmatmul.bf16.vlgmr.msrb.gmra.mxu2 %v10540_v4  ;;  %v8990_v29 = vld [vmem:[#allocation2 + $0x384] sm:$0xf0]  ;;  %v8050_v21 = vld [vmem:[#allocation2 + $0x268] sm:$0xf0] }
 0xda9   :  { %6046 = vmatpush.bf16.msra.mxu2 %v8505_v30  ;;  %5989 = vmatmul.bf16.vlgmr.msra.gmra.mxu1 %v10550_v60  ;;  %v8001_v30 = vor.u32 %v8942_v22, %v8000_v37  ;;  %v8957_v37 = vld [vmem:[#allocation2 + $0x284] sm:$0xf]  ;;  %v8074_v22 = vld [vmem:[#allocation2 + $0x298] sm:$0xf0] }
 0xdaa   :  { %6033 = vmatpush.bf16.msrb.mxu1 %v8313_v25  ;;  %v8193_v25 = vor.u32 %v8990_v29, %v8192_v27  ;;  %v8266_v27 = vld [vmem:[#allocation2 + $0x418] sm:$0xf0] }
 0xdab   :  { %6008 = vmatpush.bf16.msrb.mxu3 %v7905_v43  ;;  %v8168_v43 = vld [vmem:[#allocation2 + $0x340] sm:$0xf] }
 0xdac   :  { %6021 = vmatpush.bf16.msrb.mxu0 %v8097_v47  ;;  %v7760_v47 = vld [vmem:[#allocation2 + $0x10] sm:$0xf]  ;;  %v8169_v48 = vor.u32 %v8984_v46, %v8168_v43  ;;  %v8434_v43 = vld [vmem:[#allocation2 + $0x568] sm:$0xf0] }
 0xdad   :  { %6047 = vmatpush.bf16.msra.mxu2 %v8481_v49  ;;  %v8882_v49 = vld [vmem:[#allocation2 + $0x24] sm:$0xf0]  ;;  %v8242_v46 = vld [vmem:[#allocation2 + $0x3e8] sm:$0xf0] }
 0xdae   :  { %6034 = vmatpush.bf16.msrb.mxu1 %v8289_v61  ;;  %v8921_v61 = vld [vmem:[#allocation2 + $0x164] sm:$0xf]  ;;  %v7761_v7 = vor.u32 %v8882_v49, %v7760_v47  ;;  %v8053_v49 = vor.u32 %v8951_v14, %v8050_v21  ;;  %v8927_v14 = vld [vmem:[#allocation2 + $0x194] sm:$0xf]  ;;  %v7954_v21 = vld [vmem:[#allocation2 + $0x1a8] sm:$0xf0] }
 0xdaf   :  { %6009 = vmatpush.bf16.msrb.mxu3 %v7881_v2  ;;  %v7930_v2 = vld [vmem:[#allocation2 + $0x178] sm:$0xf0] }
 0xdb0   :  { %6022 = vmatpush.bf16.msrb.mxu0 %v8073_v6  ;;  %v8122_v6 = vld [vmem:[#allocation2 + $0x2f8] sm:$0xf0]  ;;  %v7933_v9 = vor.u32 %v8921_v61, %v7930_v2  ;;  %v9041_v2 = vld [vmem:[#allocation2 + $0x524] sm:$0xf] }
 0xdb1   :  { %6048 = vmatpush.bf16.msra.mxu2 %v8457_v28  ;;  %v9065_v28 = vld [vmem:[#allocation2 + $0x5e4] sm:$0xf]  ;;  %v8125_v10 = vor.u32 %v8969_v51, %v8122_v6 }
 0xdb2   :  { %6035 = vmatpush.bf16.msrb.mxu1 %v8265_v53  ;;  %v9017_v53 = vld [vmem:[#allocation2 + $0x464] sm:$0xf] }
 0xdb3   :  { %6010 = vmatpush.bf16.msrb.mxu3 %v7857_v35  ;;  %v8314_v35 = vld [vmem:[#allocation2 + $0x478] sm:$0xf0]  ;;  %v8993_v6 = vld [vmem:[#allocation2 + $0x3a4] sm:$0xf] }
 0xdb4   :  { %6023 = vmatpush.bf16.msrb.mxu0 %v8049_v11  ;;  %v8915_v11 = vld [vmem:[#allocation2 + $0x134] sm:$0xf]  ;;  %v8317_v17 = vor.u32 %v9017_v53, %v8314_v35  ;;  %v7810_v53 = vld [vmem:[#allocation2 + $0x88] sm:$0xf0] }
 0xdb5   :  { %6049 = vmatpush.bf16.msra.mxu2 %v8433_v41  ;;  %v8509_v41 = vor.u32 %v9065_v28, %v8506_v8  ;;  %v7909_v1 = vor.u32 %v8915_v11, %v7906_v12  ;;  %v8218_v28 = vld [vmem:[#allocation2 + $0x3b8] sm:$0xf0]  ;;  %v8029_v8 = vor.u32 %v8945_v58, %v8026_v42  ;;  %v8939_v35 = vld [vmem:[#allocation2 + $0x1f4] sm:$0xf]  ;;  %v8194_v12 = vld [vmem:[#allocation2 + $0x388] sm:$0xf0] }
 0xdb6   :  { %6036 = vmatpush.bf16.msrb.mxu1 %v8241_v57  ;;  %v8482_v57 = vld [vmem:[#allocation2 + $0x5c8] sm:$0xf0]  ;;  %v9035_v11 = vld [vmem:[#allocation2 + $0x4f4] sm:$0xf] }
 0xdb7   :  { %6011 = vmatpush.bf16.msrb.mxu3 %v7833_v13  ;;  %v9011_v13 = vld [vmem:[#allocation2 + $0x434] sm:$0xf]  ;;  %v8485_v3 = vor.u32 %v9059_v62, %v8482_v57  ;;  %v8885_v62 = vld [vmem:[#allocation2 + $0x44] sm:$0xf] }
 0xdb8   :  { %6024 = vmatpush.bf16.msrb.mxu0 %v8025_v19  ;;  %v8101_v19 = vor.u32 %v8963_v40, %v8098_v18  ;;  %v8293_v23 = vor.u32 %v9011_v13, %v8290_v15  ;;  %v7813_v18 = vor.u32 %v8891_v26, %v7810_v53 }
 0xdb9   :  { %6050 = vmatpush.bf16.msra.mxu2 %v8409_v63  ;;  %v8909_v63 = vld [vmem:[#allocation2 + $0x104] sm:$0xf] }
 0xdba   :  { %6037 = vmatpush.bf16.msrb.mxu1 %v8217_v36  ;;  %v8458_v36 = vld [vmem:[#allocation2 + $0x598] sm:$0xf0]  ;;  %v7885_v29 = vor.u32 %v8909_v63, %v7882_v20  ;;  %v9029_v20 = vld [vmem:[#allocation2 + $0x4c4] sm:$0xf] }
 0xdbb   :  { %6012 = vmatpush.bf16.msrb.mxu3 %v7809_v59  ;;  %v9005_v59 = vld [vmem:[#allocation2 + $0x404] sm:$0xf]  ;;  %v8461_v34 = vor.u32 %v9053_v24, %v8458_v36  ;;  %v7978_v63 = vld [vmem:[#allocation2 + $0x1d8] sm:$0xf0] }
 0xdbc   :  { %6025 = vmatpush.bf16.msrb.mxu0 %v8001_v30  ;;  %v8077_v30 = vor.u32 %v8957_v37, %v8074_v22  ;;  %v8269_v16 = vor.u32 %v9005_v59, %v8266_v27  ;;  %v8362_v37 = vld [vmem:[#allocation2 + $0x4d8] sm:$0xf0]  ;;  %v8981_v24 = vld [vmem:[#allocation2 + $0x344] sm:$0xf] }
 0xdbd   :  { %6051 = vmatpush.bf16.msra.mxu2 %v8385_v32  ;;  %v8903_v32 = vld [vmem:[#allocation2 + $0xd4] sm:$0xf]  ;;  %v8170_v36 = vld [vmem:[#allocation2 + $0x358] sm:$0xf0] }
 0xdbe   :  { %6038 = vmatpush.bf16.msrb.mxu1 %v8193_v25  ;;  %v9047_v25 = vld [vmem:[#allocation2 + $0x554] sm:$0xf]  ;;  %v7861_v47 = vor.u32 %v8903_v32, %v7858_v33  ;;  %v8365_v33 = vor.u32 %v9029_v20, %v8362_v37 }
 0xdbf   :  { %6013 = vmatpush.bf16.msrb.mxu3 %v7785_v44  ;;  %v8999_v44 = vld [vmem:[#allocation2 + $0x3d4] sm:$0xf]  ;;  %v8437_v55 = vor.u32 %v9047_v25, %v8434_v43  ;;  %v8338_v43 = vld [vmem:[#allocation2 + $0x4a8] sm:$0xf0] }
 0xdc0   :  { %6026 = vmatpush.bf16.msrb.mxu0 %v7977_v50  ;;  %v8897_v50 = vld [vmem:[#allocation2 + $0xa4] sm:$0xf]  ;;  %v8245_v61 = vor.u32 %v8999_v44, %v8242_v46  ;;  %v9023_v25 = vld [vmem:[#allocation2 + $0x494] sm:$0xf] }
 0xdc1   :  { %6052 = vmatpush.bf16.msra.mxu2 %v8361_v54  ;;  %v4827_v54 = vunpack.c.l.bf16 %v10572_v39  ;;  %v8975_v46 = vld [vmem:[#allocation2 + $0x314] sm:$0xf] }
 0xdc2   :  { %6039 = vmatpush.bf16.msrb.mxu1 %v8169_v48  ;;  %v8410_v48 = vld [vmem:[#allocation2 + $0x538] sm:$0xf0] }
 0xdc3   :  { %6014 = vmatpush.bf16.msrb.mxu3 %v7761_v7  ;;  %v7837_v7 = vor.u32 %v8897_v50, %v7834_v56  ;;  %v4833_v31 = vperm.slane %v4827_v54, 0  ;;  %v7957_v54 = vor.u32 %v8927_v14, %v7954_v21  ;;  %v8341_v56 = vor.u32 %v9023_v25, %v8338_v43 }
 0xdc4   :  { %6027 = vmatpush.bf16.msrb.mxu0 %v7953_v38  ;;  %v5821_v51 = vpop.f32.mrf.mxu0 }
 0xdc5   :  { %6053 = vmatpush.bf16.msra.mxu2 %v8337_v52  ;;  %v8413_v52 = vor.u32 %v9041_v2, %v8410_v48 }
 0xdc6   :  { %6040 = vmatpush.bf16.msrb.mxu1 %v8145_v45  ;;  %6015 = vmatmul.bf16.vlgmr.msrb.gmra.mxu3 %v10535_v0  ;;  %v5834_v38 = vpop.f32.mrf.mxu1  ;;  %v8987_v45 = vld [vmem:[#allocation2 + $0x374] sm:$0xf] }
 0xdc7   :  { %6059 = vmatpush.bf16.msra.mxu3 %v7933_v9  ;;  %6028 = vmatmul.bf16.vlgmr.msrb.gmra.mxu0 %v10545_v5  ;;  %v8002_v9 = vld [vmem:[#allocation2 + $0x208] sm:$0xf0] }
 0xdc8   :  { %6072 = vmatpush.bf16.msra.mxu0 %v8125_v10  ;;  %6054 = vmatmul.bf16.vlgmr.msra.gmra.mxu2 %v10540_v4  ;;  %v8221_v10 = vor.u32 %v8993_v6, %v8218_v28 }
 0xdc9   :  { %6098 = vmatpush.bf16.msrb.mxu2 %v8509_v41  ;;  %6041 = vmatmul.bf16.vlgmr.msrb.gmra.mxu1 %v10550_v60  ;;  %v8386_v41 = vld [vmem:[#allocation2 + $0x508] sm:$0xf0]  ;;  %v5808_v40 = vpop.f32.mrf.mxu3 }
 0xdca   :  { %6085 = vmatpush.bf16.msra.mxu1 %v8317_v17  ;;  %v8005_v17 = vor.u32 %v8939_v35, %v8002_v9  ;;  %v5809_v57 = vadd.f32 %v5808_v40, %v4833_v31  ;;  %v8389_v15 = vor.u32 %v9035_v11, %v8386_v41  ;;  %v4825_v41 = vld [vmem:[#allocation2 + $0x608] sm:$0x11] }
 0xdcb   :  { %6060 = vmatpush.bf16.msra.mxu3 %v7909_v1  ;;  %v5847_v13 = vpop.f32.mrf.mxu2  ;;  %v7786_v1 = vld [vmem:[#allocation2 + $0x58] sm:$0xf0] }
 0xdcc   :  { %6073 = vmatpush.bf16.msra.mxu0 %v8101_v19  ;;  %v8933_v19 = vld [vmem:[#allocation2 + $0x1c4] sm:$0xf]  ;;  %v5822_v22 = vadd.f32 %v5821_v51, %v5809_v57  ;;  %v7789_v59 = vor.u32 %v8885_v62, %v7786_v1 }
 0xdcd   :  { %6099 = vmatpush.bf16.msrb.mxu2 %v8485_v3  ;;  %v8197_v3 = vor.u32 %v8987_v45, %v8194_v12  ;;  %v7981_v27 = vor.u32 %v8933_v19, %v7978_v63  ;;  %v4829_v12 = vunpack.c.l.bf16 %v4825_v41 }
 0xdce   :  { %6086 = vmatpush.bf16.msra.mxu1 %v8293_v23  ;;  %v5823_v23 = vpop.f32.mrf.mxu0  ;;  %v5836_v32 = vpop.f32.mrf.mxu1 }
 0xdcf   :  { %6061 = vmatpush.bf16.msra.mxu3 %v7885_v29  ;;  %v8879_v29 = vld [vmem:[#allocation2 + $0x14] sm:$0xf] }
 0xdd0   :  { %6074 = vmatpush.bf16.msra.mxu0 %v8077_v30  ;;  %v5835_v30 = vadd.f32 %v5834_v38, %v5822_v22 }
 0xdd1   :  { %6100 = vmatpush.bf16.msrb.mxu2 %v8461_v34  ;;  %v7762_v34 = vld [vmem:[#allocation2 + $0x28] sm:$0xf0] }
 0xdd2   :  { %6087 = vmatpush.bf16.msra.mxu1 %v8269_v16  ;;  %v8173_v16 = vor.u32 %v8981_v24, %v8170_v36  ;;  %v5848_v44 = vadd.f32 %v5847_v13, %v5835_v30  ;;  %v7765_v50 = vor.u32 %v8879_v29, %v7762_v34 }
 0xdd3   :  { %6062 = vmatpush.bf16.msra.mxu3 %v7861_v47  ;;  %v8146_v47 = vld [vmem:[#allocation2 + $0x328] sm:$0xf0] }
 0xdd4   :  { %6075 = vmatpush.bf16.msra.mxu0 %v8053_v49  ;;  %v5810_v49 = vpop.f32.mrf.mxu3  ;;  %v8149_v58 = vor.u32 %v8975_v46, %v8146_v47  ;;  %v6111_v42 = vsub.f32 0.0, %v5848_v44 }
 0xdd5   :  { %6101 = vmatpush.bf16.msrb.mxu2 %v8437_v55  ;;  %v5849_v55 = vpop.f32.mrf.mxu2 }
 0xdd6   :  { %6088 = vmatpush.bf16.msra.mxu1 %v8245_v61  ;;  %v4828_v61 = vunpack.c.h.bf16 %v10572_v39  ;;  %v6117_v2 = vmul.f32 1.442695, %v6111_v42 }
 0xdd7   :  { %6063 = vmatpush.bf16.msra.mxu3 %v7837_v7 }
 0xdd8   :  { %6076 = vmatpush.bf16.msra.mxu0 %v8029_v8  ;;  %v4834_v51 = vperm.slane %v4828_v61, 0  ;;  %9679 = vpow2.f32 %v6117_v2 }
 0xdd9   :  { %6102 = vmatpush.bf16.msrb.mxu2 %v8413_v52 }
 0xdda   :  { %6089 = vmatpush.bf16.msra.mxu1 %v8221_v10 }
 0xddb   :  { %6064 = vmatpush.bf16.msra.mxu3 %v7813_v18 }
 0xddc   :  { %6077 = vmatpush.bf16.msra.mxu0 %v8005_v17  ;;  %v4835_v17 = vperm.slane %v4829_v12, 0 }
 0xddd   :  { %6103 = vmatpush.bf16.msrb.mxu2 %v8389_v15 }
 0xdde   :  { %6090 = vmatpush.bf16.msra.mxu1 %v8197_v3 }
 0xddf   :  { %6065 = vmatpush.bf16.msra.mxu3 %v7789_v59 }
 0xde0   :  { %6078 = vmatpush.bf16.msra.mxu0 %v7981_v27 }
 0xde1   :  { %6104 = vmatpush.bf16.msrb.mxu2 %v8365_v33 }
 0xde2   :  { %6091 = vmatpush.bf16.msra.mxu1 %v8173_v16 }
 0xde3   :  { %6066 = vmatpush.bf16.msra.mxu3 %v7765_v50 }
 0xde4   :  { %6079 = vmatpush.bf16.msra.mxu0 %v7957_v54  ;;  %v5873_v48 = vpop.f32.mrf.mxu0 }
 0xde5   :  { %6105 = vmatpush.bf16.msrb.mxu2 %v8341_v56  ;;  %v4830_v56 = vunpack.c.h.bf16 %v4825_v41 }
 0xde6   :  { %6092 = vmatpush.bf16.msra.mxu1 %v8149_v58  ;;  %6067 = vmatmul.bf16.vlgmr.msra.gmra.mxu3 %v10535_v0  ;;  %v5886_v6 = vpop.f32.mrf.mxu1  ;;  %v9680_v0 = vpop.eup %9679 }
 0xde7   :  { %6080 = vmatmul.bf16.vlgmr.msra.gmra.mxu0 %v10545_v5  ;;  %v4836_v42 = vperm.slane %v4830_v56, 0 }
 0xde8   :  { %6106 = vmatmul.bf16.vlgmr.msrb.gmra.mxu2 %v10540_v4  ;;  %v6129_v4 = vadd.f32 1.0, %v9680_v0 }
 0xde9   :  { %6093 = vmatmul.bf16.vlgmr.msra.gmra.mxu1 %v10550_v60  ;;  %v5860_v28 = vpop.f32.mrf.mxu3 }
 0xdea   :  { %v5861_v7 = vadd.f32 %v5860_v28, %v4834_v51  ;;  %9681 = vrcp.f32 %v6129_v4  ;;  %vm6140_vm1 = vweird.f32 %v6129_v4  ;;  %v6146_v22 = vand.u32 2147483648, %v6129_v4 }
 0xdeb   :  { %v5899_v8 = vpop.f32.mrf.mxu2  ;;  %v6144_v36 = vand.u32 2147483647, %v6129_v4 }
 0xdec   :  { %v5874_v26 = vadd.f32 %v5873_v48, %v5861_v7  ;;  %v5875_v31 = vpop.f32.mrf.mxu0  ;;  %v6147_v34 = vor.u32 1.1754944e-38, %v6146_v22 }
 0xded   :  { %vm6145_vm11 = vcmp.eq.f32.partialorder %v6144_v36, 8.507059e+37 }
 0xdee   :  { %v5887_v38 = vadd.f32 %v5886_v6, %v5874_v26  ;;  %v5888_v5 = vpop.f32.mrf.mxu1 }
 0xdf0   :  { %v5900_v52 = vadd.f32 %v5899_v8, %v5887_v38  ;;  %v9682_v39 = vpop.eup %9681 }
 0xdf1   :  { %v5862_v53 = vpop.f32.mrf.mxu3  ;;  %v6136_v45 = vmul.f32 %v9682_v39, %v6129_v4  ;;  %vm6141_vm5 = vweird.f32 %v9682_v39 }
 0xdf2   :  { %v6112_v60 = vsub.f32 0.0, %v5900_v52  ;;  %vm10580_vm7 = vmor %vm6140_vm1, %vm6141_vm5  ;;  %vm6236_vm5 = vcmask 1045508  }
 0xdf3   :  { %v5901_v35 = vpop.f32.mrf.mxu2  ;;  %v6137_v40 = vsub.f32 1.0, %v6136_v45 }
 0xdf4   :  { %v6119_v9 = vmul.f32 1.442695, %v6112_v60 }
 0xdf5   :  { %v6138_v13 = vmul.f32 %v9682_v39, %v6137_v40 }
 0xdf6   :  { %9683 = vpow2.f32 %v6119_v9 }
 0xdf7   :  { %v6139_v23 = vadd.f32 %v9682_v39, %v6138_v13 }
 0xdf9   :  { %v6143_v14 = vsel %vm10580_vm7, %v9682_v39, %v6139_v23 }
 0xdfa   :  { %v6148_v47 = vsel %vm6145_vm11, %v6147_v34, %v6143_v14 }
 0xdfc   :  { %v9684_v10 = vpop.eup %9683 }
 0xdfd   :  { %v6130_v11 = vadd.f32 1.0, %v9684_v10  ;;  %v4826_v10 = vld [vmem:[#allocation2 + $0x610] sm:$0x11] }
 0xdfe   :  { %v4831_v45 = vunpack.c.l.bf16 %v4826_v10 }
 0xdff   :  { %9685 = vrcp.f32 %v6130_v11  ;;  %vm6155_vm4 = vweird.f32 %v6130_v11  ;;  %v6161_v1 = vand.u32 2147483648, %v6130_v11  ;;  %v6159_v3 = vand.u32 2147483647, %v6130_v11 }
 0xe01   :  { %v6162_v29 = vor.u32 1.1754944e-38, %v6161_v1  ;;  %vm6160_vm10 = vcmp.eq.f32.partialorder %v6159_v3, 8.507059e+37  ;;  %v4837_v1 = vperm.slane %v4831_v45, 0 }
 0xe04   :  { %v5925_v18 = vpop.f32.mrf.mxu0 }
 0xe05   :  { %v9686_v57 = vpop.eup %9685 }
 0xe06   :  { %v5938_v62 = vpop.f32.mrf.mxu1  ;;  %v6151_v15 = vmul.f32 %v9686_v57, %v6130_v11  ;;  %vm6156_vm6 = vweird.f32 %v9686_v57 }
 0xe07   :  { %vm6157_vm8 = vmor %vm6155_vm4, %vm6156_vm6  ;;  %vm6238_vm4 = vcmask 1043456  }
 0xe08   :  { %v6152_v63 = vsub.f32 1.0, %v6151_v15 }
 0xe09   :  { %v5912_v19 = vpop.f32.mrf.mxu3 }
 0xe0a   :  { %v5913_v20 = vadd.f32 %v5912_v19, %v4835_v17  ;;  %v6153_v59 = vmul.f32 %v9686_v57, %v6152_v63 }
 0xe0b   :  { %v5951_v37 = vpop.f32.mrf.mxu2 }
 0xe0c   :  { %v5927_v27 = vpop.f32.mrf.mxu0  ;;  %v5926_v30 = vadd.f32 %v5925_v18, %v5913_v20  ;;  %v6154_v32 = vadd.f32 %v9686_v57, %v6153_v59 }
 0xe0e   :  { %v5940_v33 = vpop.f32.mrf.mxu1  ;;  %v6158_v21 = vsel %vm6157_vm8, %v9686_v57, %v6154_v32  ;;  %v5939_v25 = vadd.f32 %v5938_v62, %v5926_v30 }
 0xe0f   :  { %v6163_v16 = vsel %vm6160_vm10, %v6162_v29, %v6158_v21 }
 0xe10   :  { %v6231_v44 = vrot.slane %v6163_v16, 6  ;;  %v5952_v50 = vadd.f32 %v5951_v37, %v5939_v25 }
 0xe11   :  { %v5914_v43 = vpop.f32.mrf.mxu3 }
 0xe12   :  { %v10587_v49 = vsel %vm1737_vm0, %v6148_v47, %v6231_v44  ;;  %v6113_v54 = vsub.f32 0.0, %v5952_v50 }
 0xe13   :  { %v5953_v46 = vpop.f32.mrf.mxu2 }
 0xe14   :  { %v6121_v55 = vmul.f32 1.442695, %v6113_v54  ;;  %v4832_v54 = vunpack.c.h.bf16 %v4826_v10 }
 0xe16   :  { %9687 = vpow2.f32 %v6121_v55 }
 0xe1c   :  { %v9688_v48 = vpop.eup %9687 }
 0xe1d   :  { %v6131_v7 = vadd.f32 1.0, %v9688_v48 }
 0xe1f   :  { %9689 = vrcp.f32 %v6131_v7  ;;  %vm6170_vm12 = vweird.f32 %v6131_v7  ;;  %v6176_v18 = vand.u32 2147483648, %v6131_v7  ;;  %v6174_v62 = vand.u32 2147483647, %v6131_v7 }
 0xe21   :  { %v6177_v37 = vor.u32 1.1754944e-38, %v6176_v18  ;;  %vm6175_vm2 = vcmp.eq.f32.partialorder %v6174_v62, 8.507059e+37 }
 0xe24   :  { %v5977_v58 = vpop.f32.mrf.mxu0 }
 0xe25   :  { %v9690_v53 = vpop.eup %9689 }
 0xe26   :  { %v5990_v61 = vpop.f32.mrf.mxu1  ;;  %v6166_v60 = vmul.f32 %v9690_v53, %v6131_v7  ;;  %vm6171_vm13 = vweird.f32 %v9690_v53 }
 0xe27   :  { %vm10589_vm14 = vmor %vm6170_vm12, %vm6171_vm13 }
 0xe28   :  { %v6167_v39 = vsub.f32 1.0, %v6166_v60 }
 0xe29   :  { %v5964_v2 = vpop.f32.mrf.mxu3 }
 0xe2a   :  { %v5965_v51 = vadd.f32 %v5964_v2, %v4836_v42  ;;  %v6168_v11 = vmul.f32 %v9690_v53, %v6167_v39  ;;  %v4838_v42 = vperm.slane %v4832_v54, 0 }
 0xe2b   :  { %v6003_v6 = vpop.f32.mrf.mxu2 }
 0xe2c   :  { %v5978_v28 = vadd.f32 %v5977_v58, %v5965_v51  ;;  %v5979_v8 = vpop.f32.mrf.mxu0  ;;  %v6169_v17 = vadd.f32 %v9690_v53, %v6168_v11 }
 0xe2e   :  { %v5991_v26 = vadd.f32 %v5990_v61, %v5978_v28  ;;  %v5992_v31 = vpop.f32.mrf.mxu1  ;;  %v6173_v22 = vsel %vm10589_vm14, %v9690_v53, %v6169_v17 }
 0xe2f   :  { %v6178_v30 = vsel %vm6175_vm2, %v6177_v37, %v6173_v22 }
 0xe30   :  { %v6004_v0 = vadd.f32 %v6003_v6, %v5991_v26  ;;  %v6232_v21 = vrot.slane %v6178_v30, 4 }
 0xe31   :  { %v5966_v38 = vpop.f32.mrf.mxu3 }
 0xe32   :  { %v6114_v5 = vsub.f32 0.0, %v6004_v0 }
 0xe33   :  { %v6005_v52 = vpop.f32.mrf.mxu2 }
 0xe34   :  { %v6123_v4 = vmul.f32 1.442695, %v6114_v5 }
 0xe36   :  { %9691 = vpow2.f32 %v6123_v4 }
 0xe3c   :  { %v9692_v35 = vpop.eup %9691 }
 0xe3d   :  { %v6132_v9 = vadd.f32 1.0, %v9692_v35 }
 0xe3f   :  { %9693 = vrcp.f32 %v6132_v9  ;;  %v6191_v15 = vand.u32 2147483648, %v6132_v9  ;;  %vm6185_vm15 = vweird.f32 %v6132_v9  ;;  %v6189_v3 = vand.u32 2147483647, %v6132_v9 }
 0xe41   :  { %v6192_v36 = vor.u32 1.1754944e-38, %v6191_v15  ;;  %vm6190_vm1 = vcmp.eq.f32.partialorder %v6189_v3, 8.507059e+37 }
 0xe44   :  { %v6029_v41 = vpop.f32.mrf.mxu0 }
 0xe45   :  { %v9694_v40 = vpop.eup %9693 }
 0xe46   :  { %v6042_v12 = vpop.f32.mrf.mxu1  ;;  %v6181_v57 = vmul.f32 %v9694_v40, %v6132_v9  ;;  %vm6186_vm9 = vweird.f32 %v9694_v40 }
 0xe47   :  { %vm6187_vm3 = vmor %vm6185_vm15, %vm6186_vm9 }
 0xe48   :  { %v6182_v63 = vsub.f32 1.0, %v6181_v57 }
 0xe49   :  { %v6016_v19 = vpop.f32.mrf.mxu3 }
 0xe4a   :  { %v6183_v23 = vmul.f32 %v9694_v40, %v6182_v63  ;;  %v6017_v59 = vadd.f32 %v6016_v19, %v4837_v1 }
 0xe4b   :  { %v6055_v20 = vpop.f32.mrf.mxu2 }
 0xe4c   :  { %v6031_v24 = vpop.f32.mrf.mxu0  ;;  %v6184_v27 = vadd.f32 %v9694_v40, %v6183_v23  ;;  %v6030_v34 = vadd.f32 %v6029_v41, %v6017_v59 }
 0xe4e   :  { %v6044_v29 = vpop.f32.mrf.mxu1  ;;  %v6188_v32 = vsel %vm6187_vm3, %v9694_v40, %v6184_v27  ;;  %v6043_v46 = vadd.f32 %v6042_v12, %v6030_v34 }
 0xe4f   :  { %v6193_v33 = vsel %vm6190_vm1, %v6192_v36, %v6188_v32 }
 0xe50   :  { %v6233_v16 = vrot.slane %v6193_v33, 2  ;;  %v6056_v47 = vadd.f32 %v6055_v20, %v6043_v46 }
 0xe51   :  { %v6018_v14 = vpop.f32.mrf.mxu3 }
 0xe52   :  { %v6237_v43 = vsel %vm6236_vm5, %v6232_v21, %v6233_v16  ;;  %v6115_v50 = vsub.f32 0.0, %v6056_v47 }
 0xe53   :  { %v6057_v25 = vpop.f32.mrf.mxu2  ;;  %v6239_v44 = vsel %vm6238_vm4, %v10587_v49, %v6237_v43 }
 0xe54   :  { %6243 = vst [vmem:[%s10614_s11] sm:$0xff] %v6239_v44  ;;  %v6125_v56 = vmul.f32 1.442695, %v6115_v50 }
 0xe56   :  { %9695 = vpow2.f32 %v6125_v56 }
 0xe5c   :  { %v9696_v49 = vpop.eup %9695 }
 0xe5d   :  { %v6133_v26 = vadd.f32 1.0, %v9696_v49 }
 0xe5f   :  { %9697 = vrcp.f32 %v6133_v26  ;;  %vm6200_vm6 = vweird.f32 %v6133_v26  ;;  %v6204_v41 = vand.u32 2147483647, %v6133_v26  ;;  %v6206_v45 = vand.u32 2147483648, %v6133_v26 }
 0xe61   :  { %v6207_v57 = vor.u32 1.1754944e-38, %v6206_v45  ;;  %vm6205_vm13 = vcmp.eq.f32.partialorder %v6204_v41, 8.507059e+37 }
 0xe64   :  { %v6081_v55 = vpop.f32.mrf.mxu0 }
 0xe65   :  { %v9698_v52 = vpop.eup %9697 }
 0xe66   :  { %v6094_v58 = vpop.f32.mrf.mxu1  ;;  %v6196_v60 = vmul.f32 %v9698_v52, %v6133_v26  ;;  %vm6201_vm7 = vweird.f32 %v9698_v52 }
 0xe67   :  { %vm6202_vm10 = vmor %vm6200_vm6, %vm6201_vm7 }
 0xe68   :  { %v6197_v35 = vsub.f32 1.0, %v6196_v60 }
 0xe69   :  { %v6068_v61 = vpop.f32.mrf.mxu3 }
 0xe6a   :  { %v6069_v2 = vadd.f32 %v6068_v61, %v4838_v42  ;;  %v6198_v39 = vmul.f32 %v9698_v52, %v6197_v35 }
 0xe6b   :  { %v6107_v48 = vpop.f32.mrf.mxu2 }
 0xe6c   :  { %v6083_v51 = vpop.f32.mrf.mxu0  ;;  %v6082_v6 = vadd.f32 %v6081_v55, %v6069_v2  ;;  %v6199_v40 = vadd.f32 %v9698_v52, %v6198_v39 }
 0xe6e   :  { %v6096_v28 = vpop.f32.mrf.mxu1  ;;  %v6095_v7 = vadd.f32 %v6094_v58, %v6082_v6  ;;  %v6203_v15 = vsel %vm6202_vm10, %v9698_v52, %v6199_v40 }
 0xe6f   :  { %v6208_v3 = vsel %vm6205_vm13, %v6207_v57, %v6203_v15 }
 0xe70   :  { %v6108_v8 = vadd.f32 %v6107_v48, %v6095_v7 }
 0xe71   :  { %v6070_v31 = vpop.f32.mrf.mxu3 }
 0xe72   :  { %v6116_v0 = vsub.f32 0.0, %v6108_v8 }
 0xe73   :  { %v6109_v38 = vpop.f32.mrf.mxu2 }
 0xe74   :  { %v6127_v5 = vmul.f32 1.442695, %v6116_v0 }
 0xe76   :  { %9699 = vpow2.f32 %v6127_v5 }
 0xe7c   :  { %v9700_v4 = vpop.eup %9699 }
 0xe7d   :  { %v6134_v53 = vadd.f32 1.0, %v9700_v4 }
 0xe7f   :  { %9701 = vrcp.f32 %v6134_v53  ;;  %v6221_v12 = vand.u32 2147483648, %v6134_v53  ;;  %v6219_v17 = vand.u32 2147483647, %v6134_v53  ;;  %vm6215_vm11 = vweird.f32 %v6134_v53 }
 0xe81   :  { %v6222_v13 = vor.u32 1.1754944e-38, %v6221_v12  ;;  %vm6220_vm14 = vcmp.eq.f32.partialorder %v6219_v17, 8.507059e+37 }
 0xe85   :  { %v9702_v9 = vpop.eup %9701 }
 0xe86   :  { %v6211_v10 = vmul.f32 %v9702_v9, %v6134_v53  ;;  %vm6216_vm8 = vweird.f32 %v9702_v9 }
 0xe87   :  { %vm6217_vm12 = vmor %vm6215_vm11, %vm6216_vm8 }
 0xe88   :  { %v6212_v11 = vsub.f32 1.0, %v6211_v10 }
 0xe8a   :  { %v6213_v18 = vmul.f32 %v9702_v9, %v6212_v11 }
 0xe8c   :  { %v6214_v62 = vadd.f32 %v9702_v9, %v6213_v18 }
 0xe8e   :  { %v6218_v1 = vsel %vm6217_vm12, %v9702_v9, %v6214_v62 }
 0xe8f   :  { %v6223_v19 = vsel %vm6220_vm14, %v6222_v13, %v6218_v1 }
 0xe90   :  { %v6234_v63 = vrot.slane %v6223_v19, 6 }
 0xe92   :  { %v6240_v20 = vsel %vm1737_vm0, %v6208_v3, %v6234_v63 }
 0xe93   :  { %6244 = vst [vmem:[%s10614_s11 + $0x8] sm:$0xf] %v6240_v20 }
 0xe94   :  { %6253 = vsyncpa [#allocation5], 1 }
 0xe95   :  { %6254 = vsyncpa [#allocation7], 1 }
 0xe96   :  { %6255 = vsyncpa [#allocation10], 1 }
 0xe97   :  { %6256 = vsyncmov [#allocation3] }
 0xe9a   :  { %s6257_s13 = vpop.sfrf %6256 }
 0xe9b   :  { %p8510_p0 = scmp.ne.s32.totalorder %s6257_s13, 0 }
 0xe9d   :  { %6261 = shalt.err (%p8510_p0)  }

</bundles_post_ra>
